<compile_context>
chip_gen: v6e
topology: v6e:2x2x1
jax: 0.10.0
libtpu: 0.0.40
codegen_flags: <defaults>
</compile_context>

<pallas_src>
import functools

import jax
import jax.numpy as jnp
from jax import lax
from jax.experimental import pallas as pl
from jax.experimental.pallas import tpu as pltpu

BN_EPS = 1e-5
# MXU operand dtype.  bfloat16 feeds the v6e/v7x 256x256 MXU at full rate;
# accumulation (preferred_element_type) and the BN epilogue stay float32.
# Set to jnp.float32 for exact parity with the float32 PyTorch forward.
COMPUTE_DTYPE = jnp.bfloat16

_VMEM = pl.BlockSpec(memory_space=pltpu.MemorySpace.VMEM)


def _dot_f32acc(a, b):
    """MXU matmul with COMPUTE_DTYPE operands and float32 accumulation."""
    return jnp.dot(a.astype(COMPUTE_DTYPE), b.astype(COMPUTE_DTYPE),
                   preferred_element_type=jnp.float32)


def _bn_train(y, gamma, beta, inv_m):
    """Train-mode BatchNorm (biased variance, eps=1e-5), single-pass stats, f32."""
    s = jnp.sum(y, axis=0, keepdims=True)
    ss = jnp.sum(y * y, axis=0, keepdims=True)
    mean = s * inv_m
    var = jnp.maximum(ss * inv_m - mean * mean, 0.0)     # biased variance
    return (y - mean) * lax.rsqrt(var + BN_EPS) * gamma + beta


# ----------------------------------------------------------------------------
# Fully fused Bottleneck kernel
# ----------------------------------------------------------------------------
def _bottleneck_kernel(x_ref, w1_ref, g1_ref, b1_ref,
                       w2_ref, g2_ref, b2_ref,
                       w3_ref, g3_ref, b3_ref,
                       *rest, B, H, W, stride, has_shortcut):
    """rest = ([wsc, gsc, bsc[, xs]], o_ref, h1p_scratch)."""
    i = 0
    if has_shortcut:
        wsc_ref, gsc_ref, bsc_ref = rest[0], rest[1], rest[2]
        i = 3
        if stride > 1:
            xs_ref = rest[i]
            i += 1
    o_ref, h1p_ref = rest[i], rest[i + 1]

    planes = w1_ref.shape[1]
    Ho = (H - 1) // stride + 1
    Wo = (W - 1) // stride + 1
    M = B * H * W
    M2 = B * Ho * Wo

    x2d = x_ref[...]                                  # [M, Cin] float32
    x_cd = x2d.astype(COMPUTE_DTYPE)

    # ---- conv1 (1x1) + bn1 + relu ------------------------------------------
    y1 = _dot_f32acc(x_cd, w1_ref[...])                               # [M, planes]
    h1 = jnp.maximum(_bn_train(y1, g1_ref[...], b1_ref[...], 1.0 / M), 0.0)

    # ---- conv2 (3x3, pad=1, stride) + bn2 + relu ----------------------------
    # Zero-padded NHWC copy of h1 in a VMEM scratch, then in-kernel im2col into
    # a single [M2, 9*planes] operand -> one K = 9*planes MXU matmul.
    h1p_ref[...] = jnp.zeros(h1p_ref.shape, h1p_ref.dtype)
    h1p_ref[:, 1:H + 1, 1:W + 1, :] = (
        h1.reshape(B, H, W, planes).astype(h1p_ref.dtype))

    taps = []
    for dy in range(3):
        for dx in range(3):
            if stride == 1:
                p = h1p_ref[:, dy:dy + Ho, dx:dx + Wo, :]
            else:
                p = h1p_ref[:, pl.ds(dy, Ho, stride), pl.ds(dx, Wo, stride), :]
            taps.append(p.reshape(M2, planes))
    col = jnp.concatenate(taps, axis=-1)                              # [M2, 9*planes]
    y2 = _dot_f32acc(col, w2_ref[...])                                # [M2, planes]
    h2 = jnp.maximum(_bn_train(y2, g2_ref[...], b2_ref[...], 1.0 / M2), 0.0)

    # ---- conv3 (1x1) + bn3 --------------------------------------------------
    y3 = _bn_train(_dot_f32acc(h2, w3_ref[...]),
                   g3_ref[...], b3_ref[...], 1.0 / M2)                # [M2, 4*planes]

    # ---- shortcut + residual add + relu ------------------------------------
    if has_shortcut:
        xs = x_cd if stride == 1 else xs_ref[...].astype(COMPUTE_DTYPE)
        sc = _bn_train(_dot_f32acc(xs, wsc_ref[...]),
                       gsc_ref[...], bsc_ref[...], 1.0 / M2)
    else:
        sc = x2d                                                      # identity shortcut

    o_ref[...] = jnp.maximum(y3 + sc, 0.0).astype(o_ref.dtype)        # lane-dense store


# ----------------------------------------------------------------------------
# Wrapper (matches the PyTorch module's train-mode forward, NCHW in / NCHW out)
# ----------------------------------------------------------------------------
def bottleneck_forward(x_nchw, params, *, stride=1):
    B, Cin, H, W = x_nchw.shape
    planes = params["conv1_w"].shape[1]
    cout = params["conv3_w"].shape[1]                 # expansion * planes
    Ho = (H - 1) // stride + 1
    Wo = (W - 1) // stride + 1
    M, M2 = B * H * W, B * Ho * Wo

    x_nhwc = jnp.transpose(x_nchw, (0, 2, 3, 1)).astype(jnp.float32)
    x2d = x_nhwc.reshape(M, Cin)

    cd = COMPUTE_DTYPE

    def bn(prefix, n):
        return (params[prefix + "_g"].reshape(1, n).astype(jnp.float32),
                params[prefix + "_b"].reshape(1, n).astype(jnp.float32))

    g1, b1 = bn("bn1", planes)
    g2, b2 = bn("bn2", planes)
    g3, b3 = bn("bn3", cout)

    args = [x2d,
            params["conv1_w"].astype(cd), g1, b1,
            params["conv2_w"].reshape(9 * planes, planes).astype(cd), g2, b2,
            params["conv3_w"].astype(cd), g3, b3]

    has_shortcut = "sc_w" in params                   # static pytree check
    if has_shortcut:
        gsc, bsc = bn("sc_bn", cout)
        args += [params["sc_w"].astype(cd), gsc, bsc]
        if stride > 1:
            args.append(x_nhwc[:, ::stride, ::stride, :].reshape(M2, Cin))

    kernel = functools.partial(_bottleneck_kernel, B=B, H=H, W=W,
                               stride=stride, has_shortcut=has_shortcut)

    out2d = pl.pallas_call(
        kernel,
        out_shape=jax.ShapeDtypeStruct((M2, cout), jnp.float32),
        in_specs=[_VMEM] * len(args),
        out_specs=_VMEM,
        # padded h1 buffer (f32 for robust unaligned sublane slicing; tiny)
        scratch_shapes=[pltpu.VMEM((B, H + 2, W + 2, planes), jnp.float32)],
    )(*args)

    return out2d.reshape(B, Ho, Wo, cout).transpose(0, 3, 1, 2)       # back to NCHW


# ----------------------------------------------------------------------------
# Deterministic synthetic parameters (shapes match the PyTorch module)
# ----------------------------------------------------------------------------
def init_bottleneck_params(key, in_planes, planes, stride, expansion=4):
    kc1, kc2, kc3, ksc = jax.random.split(key, 4)
    out_planes = expansion * planes

    def conv_w(k, shape, fan_in):
        return jax.random.normal(k, shape, jnp.float32) * (1.0 / fan_in) ** 0.5

    p = {
        "conv1_w": conv_w(kc1, (in_planes, planes), in_planes),       # 1x1: [Cin, Cout]
        "bn1_g": jnp.ones((planes,), jnp.float32),
        "bn1_b": jnp.zeros((planes,), jnp.float32),
        "conv2_w": conv_w(kc2, (3, 3, planes, planes), 9 * planes),   # 3x3: [KH,KW,Cin,Cout]
        "bn2_g": jnp.ones((planes,), jnp.float32),
        "bn2_b": jnp.zeros((planes,), jnp.float32),
        "conv3_w": conv_w(kc3, (planes, out_planes), planes),         # 1x1
        "bn3_g": jnp.ones((out_planes,), jnp.float32),
        "bn3_b": jnp.zeros((out_planes,), jnp.float32),
    }
    if stride != 1 or in_planes != out_planes:                        # use_shortcut
        p["sc_w"] = conv_w(ksc, (in_planes, out_planes), in_planes)   # 1x1, stride
        p["sc_bn_g"] = jnp.ones((out_planes,), jnp.float32)
        p["sc_bn_b"] = jnp.zeros((out_planes,), jnp.float32)
    return p


# ----------------------------------------------------------------------------
if __name__ == "__main__":
    IN_PLANES, PLANES, STRIDE = 64, 32, 1     # 4*PLANES=128 != 64 -> shortcut conv+bn
    B, H, W = 2, 16, 16

    key = jax.random.PRNGKey(0)
    kx, kp = jax.random.split(key)
    x = jax.random.normal(kx, (B, IN_PLANES, H, W), jnp.float32)      # NCHW like torch
    params = init_bottleneck_params(kp, IN_PLANES, PLANES, STRIDE)

    fwd = jax.jit(functools.partial(bottleneck_forward, stride=STRIDE))
    out = fwd(x, params)
    jax.block_until_ready(out)

    Ho, Wo = (H - 1) // STRIDE + 1, (W - 1) // STRIDE + 1
    assert out.shape == (B, 4 * PLANES, Ho, Wo), out.shape
    assert bool(jnp.all(jnp.isfinite(out)))
    print("KERNEL_OK")
</pallas_src>

<mosaic_0001>
module attributes {stable_mosaic.version = 11 : i64} {
  func.func @_bottleneck_kernel(%arg0: memref<512x64xf32, #tpu.memory_space<vmem>>, %arg1: memref<64x32xbf16, #tpu.memory_space<vmem>>, %arg2: memref<1x32xf32, #tpu.memory_space<vmem>>, %arg3: memref<1x32xf32, #tpu.memory_space<vmem>>, %arg4: memref<288x32xbf16, #tpu.memory_space<vmem>>, %arg5: memref<1x32xf32, #tpu.memory_space<vmem>>, %arg6: memref<1x32xf32, #tpu.memory_space<vmem>>, %arg7: memref<32x128xbf16, #tpu.memory_space<vmem>>, %arg8: memref<1x128xf32, #tpu.memory_space<vmem>>, %arg9: memref<1x128xf32, #tpu.memory_space<vmem>>, %arg10: memref<64x128xbf16, #tpu.memory_space<vmem>>, %arg11: memref<1x128xf32, #tpu.memory_space<vmem>>, %arg12: memref<1x128xf32, #tpu.memory_space<vmem>>, %arg13: memref<512x128xf32, #tpu.memory_space<vmem>>, %arg14: memref<2x18x18x32xf32, #tpu.memory_space<vmem>>) attributes {dimension_semantics = [], scalar_prefetch = 0 : i64, scratch_operands = 1 : i64, tpu.core_type = #tpu.core_type<tc>} {
    %c0 = arith.constant 0 : index
    %c0_0 = arith.constant 0 : index
    %0 = vector.load %arg0[%c0, %c0_0] : memref<512x64xf32, #tpu.memory_space<vmem>>, vector<512x64xf32>
    %1 = arith.truncf %0 : vector<512x64xf32> to vector<512x64xbf16>
    %c0_1 = arith.constant 0 : index
    %c0_2 = arith.constant 0 : index
    %2 = vector.load %arg1[%c0_1, %c0_2] : memref<64x32xbf16, #tpu.memory_space<vmem>>, vector<64x32xbf16>
    %cst = arith.constant dense<0.000000e+00> : vector<512x32xf32>
    %3 = tpu.matmul %1, %2, %cst {dimension_numbers = #tpu.dot_dimension_numbers<[1], [0], [0], [1], [0, 0, 1, 1], [], []>} : vector<512x64xbf16>, vector<64x32xbf16>, vector<512x32xf32> -> vector<512x32xf32>
    %c0_3 = arith.constant 0 : index
    %c0_4 = arith.constant 0 : index
    %4 = vector.load %arg2[%c0_3, %c0_4] : memref<1x32xf32, #tpu.memory_space<vmem>>, vector<1x32xf32>
    %c0_5 = arith.constant 0 : index
    %c0_6 = arith.constant 0 : index
    %5 = vector.load %arg3[%c0_5, %c0_6] : memref<1x32xf32, #tpu.memory_space<vmem>>, vector<1x32xf32>
    %cst_7 = arith.constant dense<0.000000e+00> : vector<32xf32>
    %6 = vector.multi_reduction <add>, %3, %cst_7 [0] : vector<512x32xf32> to vector<32xf32>
    %7 = vector.shape_cast %6 : vector<32xf32> to vector<1x32xf32>
    %8 = arith.mulf %3, %3 : vector<512x32xf32>
    %cst_8 = arith.constant dense<0.000000e+00> : vector<32xf32>
    %9 = vector.multi_reduction <add>, %8, %cst_8 [0] : vector<512x32xf32> to vector<32xf32>
    %10 = vector.shape_cast %9 : vector<32xf32> to vector<1x32xf32>
    %cst_9 = arith.constant 0.001953125 : f32
    %11 = vector.broadcast %cst_9 : f32 to vector<1x32xf32>
    %12 = arith.mulf %7, %11 : vector<1x32xf32>
    %cst_10 = arith.constant 0.001953125 : f32
    %13 = vector.broadcast %cst_10 : f32 to vector<1x32xf32>
    %14 = arith.mulf %10, %13 : vector<1x32xf32>
    %15 = arith.mulf %12, %12 : vector<1x32xf32>
    %16 = arith.subf %14, %15 : vector<1x32xf32>
    %cst_11 = arith.constant 0.000000e+00 : f32
    %17 = vector.broadcast %cst_11 : f32 to vector<1x32xf32>
    %18 = arith.maximumf %16, %17 : vector<1x32xf32>
    %19 = vector.broadcast %12 : vector<1x32xf32> to vector<512x32xf32>
    %20 = arith.subf %3, %19 : vector<512x32xf32>
    %cst_12 = arith.constant 9.99999974E-6 : f32
    %21 = vector.broadcast %cst_12 : f32 to vector<1x32xf32>
    %22 = arith.addf %18, %21 : vector<1x32xf32>
    %23 = math.rsqrt %22 : vector<1x32xf32>
    %24 = vector.broadcast %23 : vector<1x32xf32> to vector<512x32xf32>
    %25 = arith.mulf %20, %24 : vector<512x32xf32>
    %26 = vector.broadcast %4 : vector<1x32xf32> to vector<512x32xf32>
    %27 = arith.mulf %25, %26 : vector<512x32xf32>
    %28 = vector.broadcast %5 : vector<1x32xf32> to vector<512x32xf32>
    %29 = arith.addf %27, %28 : vector<512x32xf32>
    %cst_13 = arith.constant 0.000000e+00 : f32
    %30 = vector.broadcast %cst_13 : f32 to vector<512x32xf32>
    %31 = arith.maximumf %29, %30 : vector<512x32xf32>
    %cst_14 = arith.constant 0.000000e+00 : f32
    %32 = vector.broadcast %cst_14 : f32 to vector<2x18x18x32xf32>
    %c0_15 = arith.constant 0 : index
    %c0_16 = arith.constant 0 : index
    %c0_17 = arith.constant 0 : index
    %c0_18 = arith.constant 0 : index
    %33 = vector.load %arg14[%c0_15, %c0_16, %c0_17, %c0_18] : memref<2x18x18x32xf32, #tpu.memory_space<vmem>>, vector<2x18x18x32xf32>
    tpu.vector_store %arg14[%c0_15, %c0_16, %c0_17, %c0_18], %32 {strides = array<i32>} : memref<2x18x18x32xf32, #tpu.memory_space<vmem>>, vector<2x18x18x32xf32>,
    %34 = vector.shape_cast %31 : vector<512x32xf32> to vector<2x16x16x32xf32>
    %c0_19 = arith.constant 0 : index
    %c1 = arith.constant 1 : index
    %c1_20 = arith.constant 1 : index
    %c0_21 = arith.constant 0 : index
    %35 = vector.load %arg14[%c0_19, %c1, %c1_20, %c0_21] : memref<2x18x18x32xf32, #tpu.memory_space<vmem>>, vector<2x16x16x32xf32>
    tpu.vector_store %arg14[%c0_19, %c1, %c1_20, %c0_21], %34 {strides = array<i32>} : memref<2x18x18x32xf32, #tpu.memory_space<vmem>>, vector<2x16x16x32xf32>,
    %c0_22 = arith.constant 0 : index
    %c0_23 = arith.constant 0 : index
    %c0_24 = arith.constant 0 : index
    %c0_25 = arith.constant 0 : index
    %36 = vector.load %arg14[%c0_22, %c0_23, %c0_24, %c0_25] : memref<2x18x18x32xf32, #tpu.memory_space<vmem>>, vector<2x16x16x32xf32>
    %37 = vector.shape_cast %36 : vector<2x16x16x32xf32> to vector<512x32xf32>
    %c0_26 = arith.constant 0 : index
    %c0_27 = arith.constant 0 : index
    %c1_28 = arith.constant 1 : index
    %c0_29 = arith.constant 0 : index
    %38 = vector.load %arg14[%c0_26, %c0_27, %c1_28, %c0_29] : memref<2x18x18x32xf32, #tpu.memory_space<vmem>>, vector<2x16x16x32xf32>
    %39 = vector.shape_cast %38 : vector<2x16x16x32xf32> to vector<512x32xf32>
    %c0_30 = arith.constant 0 : index
    %c0_31 = arith.constant 0 : index
    %c2 = arith.constant 2 : index
    %c0_32 = arith.constant 0 : index
    %40 = vector.load %arg14[%c0_30, %c0_31, %c2, %c0_32] : memref<2x18x18x32xf32, #tpu.memory_space<vmem>>, vector<2x16x16x32xf32>
    %41 = vector.shape_cast %40 : vector<2x16x16x32xf32> to vector<512x32xf32>
    %c0_33 = arith.constant 0 : index
    %c1_34 = arith.constant 1 : index
    %c0_35 = arith.constant 0 : index
    %c0_36 = arith.constant 0 : index
    %42 = vector.load %arg14[%c0_33, %c1_34, %c0_35, %c0_36] : memref<2x18x18x32xf32, #tpu.memory_space<vmem>>, vector<2x16x16x32xf32>
    %43 = vector.shape_cast %42 : vector<2x16x16x32xf32> to vector<512x32xf32>
    %c0_37 = arith.constant 0 : index
    %c1_38 = arith.constant 1 : index
    %c1_39 = arith.constant 1 : index
    %c0_40 = arith.constant 0 : index
    %44 = vector.load %arg14[%c0_37, %c1_38, %c1_39, %c0_40] : memref<2x18x18x32xf32, #tpu.memory_space<vmem>>, vector<2x16x16x32xf32>
    %45 = vector.shape_cast %44 : vector<2x16x16x32xf32> to vector<512x32xf32>
    %c0_41 = arith.constant 0 : index
    %c1_42 = arith.constant 1 : index
    %c2_43 = arith.constant 2 : index
    %c0_44 = arith.constant 0 : index
    %46 = vector.load %arg14[%c0_41, %c1_42, %c2_43, %c0_44] : memref<2x18x18x32xf32, #tpu.memory_space<vmem>>, vector<2x16x16x32xf32>
    %47 = vector.shape_cast %46 : vector<2x16x16x32xf32> to vector<512x32xf32>
    %c0_45 = arith.constant 0 : index
    %c2_46 = arith.constant 2 : index
    %c0_47 = arith.constant 0 : index
    %c0_48 = arith.constant 0 : index
    %48 = vector.load %arg14[%c0_45, %c2_46, %c0_47, %c0_48] : memref<2x18x18x32xf32, #tpu.memory_space<vmem>>, vector<2x16x16x32xf32>
    %49 = vector.shape_cast %48 : vector<2x16x16x32xf32> to vector<512x32xf32>
    %c0_49 = arith.constant 0 : index
    %c2_50 = arith.constant 2 : index
    %c1_51 = arith.constant 1 : index
    %c0_52 = arith.constant 0 : index
    %50 = vector.load %arg14[%c0_49, %c2_50, %c1_51, %c0_52] : memref<2x18x18x32xf32, #tpu.memory_space<vmem>>, vector<2x16x16x32xf32>
    %51 = vector.shape_cast %50 : vector<2x16x16x32xf32> to vector<512x32xf32>
    %c0_53 = arith.constant 0 : index
    %c2_54 = arith.constant 2 : index
    %c2_55 = arith.constant 2 : index
    %c0_56 = arith.constant 0 : index
    %52 = vector.load %arg14[%c0_53, %c2_54, %c2_55, %c0_56] : memref<2x18x18x32xf32, #tpu.memory_space<vmem>>, vector<2x16x16x32xf32>
    %53 = vector.shape_cast %52 : vector<2x16x16x32xf32> to vector<512x32xf32>
    %54 = tpu.concatenate %37, %39, %41, %43, %45, %47, %49, %51, %53 in 1 : vector<512x32xf32>, vector<512x32xf32>, vector<512x32xf32>, vector<512x32xf32>, vector<512x32xf32>, vector<512x32xf32>, vector<512x32xf32>, vector<512x32xf32>, vector<512x32xf32> -> vector<512x288xf32>
    %c0_57 = arith.constant 0 : index
    %c0_58 = arith.constant 0 : index
    %55 = vector.load %arg4[%c0_57, %c0_58] : memref<288x32xbf16, #tpu.memory_space<vmem>>, vector<288x32xbf16>
    %56 = arith.truncf %54 : vector<512x288xf32> to vector<512x288xbf16>
    %cst_59 = arith.constant dense<0.000000e+00> : vector<512x32xf32>
    %57 = tpu.matmul %56, %55, %cst_59 {dimension_numbers = #tpu.dot_dimension_numbers<[1], [0], [0], [1], [0, 0, 1, 1], [], []>} : vector<512x288xbf16>, vector<288x32xbf16>, vector<512x32xf32> -> vector<512x32xf32>
    %c0_60 = arith.constant 0 : index
    %c0_61 = arith.constant 0 : index
    %58 = vector.load %arg5[%c0_60, %c0_61] : memref<1x32xf32, #tpu.memory_space<vmem>>, vector<1x32xf32>
    %c0_62 = arith.constant 0 : index
    %c0_63 = arith.constant 0 : index
    %59 = vector.load %arg6[%c0_62, %c0_63] : memref<1x32xf32, #tpu.memory_space<vmem>>, vector<1x32xf32>
    %cst_64 = arith.constant dense<0.000000e+00> : vector<32xf32>
    %60 = vector.multi_reduction <add>, %57, %cst_64 [0] : vector<512x32xf32> to vector<32xf32>
    %61 = vector.shape_cast %60 : vector<32xf32> to vector<1x32xf32>
    %62 = arith.mulf %57, %57 : vector<512x32xf32>
    %cst_65 = arith.constant dense<0.000000e+00> : vector<32xf32>
    %63 = vector.multi_reduction <add>, %62, %cst_65 [0] : vector<512x32xf32> to vector<32xf32>
    %64 = vector.shape_cast %63 : vector<32xf32> to vector<1x32xf32>
    %cst_66 = arith.constant 0.001953125 : f32
    %65 = vector.broadcast %cst_66 : f32 to vector<1x32xf32>
    %66 = arith.mulf %61, %65 : vector<1x32xf32>
    %cst_67 = arith.constant 0.001953125 : f32
    %67 = vector.broadcast %cst_67 : f32 to vector<1x32xf32>
    %68 = arith.mulf %64, %67 : vector<1x32xf32>
    %69 = arith.mulf %66, %66 : vector<1x32xf32>
    %70 = arith.subf %68, %69 : vector<1x32xf32>
    %cst_68 = arith.constant 0.000000e+00 : f32
    %71 = vector.broadcast %cst_68 : f32 to vector<1x32xf32>
    %72 = arith.maximumf %70, %71 : vector<1x32xf32>
    %73 = vector.broadcast %66 : vector<1x32xf32> to vector<512x32xf32>
    %74 = arith.subf %57, %73 : vector<512x32xf32>
    %cst_69 = arith.constant 9.99999974E-6 : f32
    %75 = vector.broadcast %cst_69 : f32 to vector<1x32xf32>
    %76 = arith.addf %72, %75 : vector<1x32xf32>
    %77 = math.rsqrt %76 : vector<1x32xf32>
    %78 = vector.broadcast %77 : vector<1x32xf32> to vector<512x32xf32>
    %79 = arith.mulf %74, %78 : vector<512x32xf32>
    %80 = vector.broadcast %58 : vector<1x32xf32> to vector<512x32xf32>
    %81 = arith.mulf %79, %80 : vector<512x32xf32>
    %82 = vector.broadcast %59 : vector<1x32xf32> to vector<512x32xf32>
    %83 = arith.addf %81, %82 : vector<512x32xf32>
    %cst_70 = arith.constant 0.000000e+00 : f32
    %84 = vector.broadcast %cst_70 : f32 to vector<512x32xf32>
    %85 = arith.maximumf %83, %84 : vector<512x32xf32>
    %c0_71 = arith.constant 0 : index
    %c0_72 = arith.constant 0 : index
    %86 = vector.load %arg7[%c0_71, %c0_72] : memref<32x128xbf16, #tpu.memory_space<vmem>>, vector<32x128xbf16>
    %87 = arith.truncf %85 : vector<512x32xf32> to vector<512x32xbf16>
    %cst_73 = arith.constant dense<0.000000e+00> : vector<512x128xf32>
    %88 = tpu.matmul %87, %86, %cst_73 {dimension_numbers = #tpu.dot_dimension_numbers<[1], [0], [0], [1], [0, 0, 1, 1], [], []>} : vector<512x32xbf16>, vector<32x128xbf16>, vector<512x128xf32> -> vector<512x128xf32>
    %c0_74 = arith.constant 0 : index
    %c0_75 = arith.constant 0 : index
    %89 = vector.load %arg8[%c0_74, %c0_75] : memref<1x128xf32, #tpu.memory_space<vmem>>, vector<1x128xf32>
    %c0_76 = arith.constant 0 : index
    %c0_77 = arith.constant 0 : index
    %90 = vector.load %arg9[%c0_76, %c0_77] : memref<1x128xf32, #tpu.memory_space<vmem>>, vector<1x128xf32>
    %cst_78 = arith.constant dense<0.000000e+00> : vector<128xf32>
    %91 = vector.multi_reduction <add>, %88, %cst_78 [0] : vector<512x128xf32> to vector<128xf32>
    %92 = vector.shape_cast %91 : vector<128xf32> to vector<1x128xf32>
    %93 = arith.mulf %88, %88 : vector<512x128xf32>
    %cst_79 = arith.constant dense<0.000000e+00> : vector<128xf32>
    %94 = vector.multi_reduction <add>, %93, %cst_79 [0] : vector<512x128xf32> to vector<128xf32>
    %95 = vector.shape_cast %94 : vector<128xf32> to vector<1x128xf32>
    %cst_80 = arith.constant 0.001953125 : f32
    %96 = vector.broadcast %cst_80 : f32 to vector<1x128xf32>
    %97 = arith.mulf %92, %96 : vector<1x128xf32>
    %cst_81 = arith.constant 0.001953125 : f32
    %98 = vector.broadcast %cst_81 : f32 to vector<1x128xf32>
    %99 = arith.mulf %95, %98 : vector<1x128xf32>
    %100 = arith.mulf %97, %97 : vector<1x128xf32>
    %101 = arith.subf %99, %100 : vector<1x128xf32>
    %cst_82 = arith.constant 0.000000e+00 : f32
    %102 = vector.broadcast %cst_82 : f32 to vector<1x128xf32>
    %103 = arith.maximumf %101, %102 : vector<1x128xf32>
    %104 = vector.broadcast %97 : vector<1x128xf32> to vector<512x128xf32>
    %105 = arith.subf %88, %104 : vector<512x128xf32>
    %cst_83 = arith.constant 9.99999974E-6 : f32
    %106 = vector.broadcast %cst_83 : f32 to vector<1x128xf32>
    %107 = arith.addf %103, %106 : vector<1x128xf32>
    %108 = math.rsqrt %107 : vector<1x128xf32>
    %109 = vector.broadcast %108 : vector<1x128xf32> to vector<512x128xf32>
    %110 = arith.mulf %105, %109 : vector<512x128xf32>
    %111 = vector.broadcast %89 : vector<1x128xf32> to vector<512x128xf32>
    %112 = arith.mulf %110, %111 : vector<512x128xf32>
    %113 = vector.broadcast %90 : vector<1x128xf32> to vector<512x128xf32>
    %114 = arith.addf %112, %113 : vector<512x128xf32>
    %c0_84 = arith.constant 0 : index
    %c0_85 = arith.constant 0 : index
    %115 = vector.load %arg10[%c0_84, %c0_85] : memref<64x128xbf16, #tpu.memory_space<vmem>>, vector<64x128xbf16>
    %cst_86 = arith.constant dense<0.000000e+00> : vector<512x128xf32>
    %116 = tpu.matmul %1, %115, %cst_86 {dimension_numbers = #tpu.dot_dimension_numbers<[1], [0], [0], [1], [0, 0, 1, 1], [], []>} : vector<512x64xbf16>, vector<64x128xbf16>, vector<512x128xf32> -> vector<512x128xf32>
    %c0_87 = arith.constant 0 : index
    %c0_88 = arith.constant 0 : index
    %117 = vector.load %arg11[%c0_87, %c0_88] : memref<1x128xf32, #tpu.memory_space<vmem>>, vector<1x128xf32>
    %c0_89 = arith.constant 0 : index
    %c0_90 = arith.constant 0 : index
    %118 = vector.load %arg12[%c0_89, %c0_90] : memref<1x128xf32, #tpu.memory_space<vmem>>, vector<1x128xf32>
    %cst_91 = arith.constant dense<0.000000e+00> : vector<128xf32>
    %119 = vector.multi_reduction <add>, %116, %cst_91 [0] : vector<512x128xf32> to vector<128xf32>
    %120 = vector.shape_cast %119 : vector<128xf32> to vector<1x128xf32>
    %121 = arith.mulf %116, %116 : vector<512x128xf32>
    %cst_92 = arith.constant dense<0.000000e+00> : vector<128xf32>
    %122 = vector.multi_reduction <add>, %121, %cst_92 [0] : vector<512x128xf32> to vector<128xf32>
    %123 = vector.shape_cast %122 : vector<128xf32> to vector<1x128xf32>
    %cst_93 = arith.constant 0.001953125 : f32
    %124 = vector.broadcast %cst_93 : f32 to vector<1x128xf32>
    %125 = arith.mulf %120, %124 : vector<1x128xf32>
    %cst_94 = arith.constant 0.001953125 : f32
    %126 = vector.broadcast %cst_94 : f32 to vector<1x128xf32>
    %127 = arith.mulf %123, %126 : vector<1x128xf32>
    %128 = arith.mulf %125, %125 : vector<1x128xf32>
    %129 = arith.subf %127, %128 : vector<1x128xf32>
    %cst_95 = arith.constant 0.000000e+00 : f32
    %130 = vector.broadcast %cst_95 : f32 to vector<1x128xf32>
    %131 = arith.maximumf %129, %130 : vector<1x128xf32>
    %132 = vector.broadcast %125 : vector<1x128xf32> to vector<512x128xf32>
    %133 = arith.subf %116, %132 : vector<512x128xf32>
    %cst_96 = arith.constant 9.99999974E-6 : f32
    %134 = vector.broadcast %cst_96 : f32 to vector<1x128xf32>
    %135 = arith.addf %131, %134 : vector<1x128xf32>
    %136 = math.rsqrt %135 : vector<1x128xf32>
    %137 = vector.broadcast %136 : vector<1x128xf32> to vector<512x128xf32>
    %138 = arith.mulf %133, %137 : vector<512x128xf32>
    %139 = vector.broadcast %117 : vector<1x128xf32> to vector<512x128xf32>
    %140 = arith.mulf %138, %139 : vector<512x128xf32>
    %141 = vector.broadcast %118 : vector<1x128xf32> to vector<512x128xf32>
    %142 = arith.addf %140, %141 : vector<512x128xf32>
    %143 = arith.addf %114, %142 : vector<512x128xf32>
    %cst_97 = arith.constant 0.000000e+00 : f32
    %144 = vector.broadcast %cst_97 : f32 to vector<512x128xf32>
    %145 = arith.maximumf %143, %144 : vector<512x128xf32>
    %c0_98 = arith.constant 0 : index
    %c0_99 = arith.constant 0 : index
    %146 = vector.load %arg13[%c0_98, %c0_99] : memref<512x128xf32, #tpu.memory_space<vmem>>, vector<512x128xf32>
    tpu.vector_store %arg13[%c0_98, %c0_99], %145 {strides = array<i32>} : memref<512x128xf32, #tpu.memory_space<vmem>>, vector<512x128xf32>,
    return
  }
}

</mosaic_0001>

<bundles_post_ra>
// kernel: bottleneck_forward.1
= control target key start
LH: loop header
LB: loop body
LE: loop exit
PB: predicated region body
PF: predicated region fallthrough
CT: control target
= control target key end

     0   :  { %vm174_vm0 = vcmask 523264   ;;  %s16781_s0 = inlined_call_operand.vmem [shape: f32[512,64], index: 0, kind: input, shape index: {}]   ;;  %s16782_s1 = inlined_call_operand.vmem [shape: bf16[64,32], index: 1, kind: input, shape index: {}]   ;;  %s16783_s2 = inlined_call_operand.vmem [shape: f32[1,32], index: 2, kind: input, shape index: {}]   ;;  %s16784_s3 = inlined_call_operand.vmem [shape: f32[1,32], index: 3, kind: input, shape index: {}]   ;;  %s16785_s4 = inlined_call_operand.vmem [shape: bf16[288,32], index: 4, kind: input, shape index: {}]   ;;  %s16786_s5 = inlined_call_operand.vmem [shape: f32[1,32], index: 5, kind: input, shape index: {}]   ;;  %s16787_s6 = inlined_call_operand.vmem [shape: f32[1,32], index: 6, kind: input, shape index: {}]   ;;  %s16788_s7 = inlined_call_operand.vmem [shape: bf16[32,128], index: 7, kind: input, shape index: {}]   ;;  %s16789_s8 = inlined_call_operand.vmem [shape: f32[1,128], index: 8, kind: input, shape index: {}]   ;;  %s16790_s9 = inlined_call_operand.vmem [shape: f32[1,128], index: 9, kind: input, shape index: {}]   ;;  %s16791_s10 = inlined_call_operand.vmem [shape: bf16[64,128], index: 10, kind: input, shape index: {}]   ;;  %s16792_s11 = inlined_call_operand.vmem [shape: f32[1,128], index: 11, kind: input, shape index: {}]   ;;  %s16793_s12 = inlined_call_operand.vmem [shape: f32[1,128], index: 12, kind: input, shape index: {}]   ;;  %s16794_s13 = inlined_call_operand.hbm [shape: f32[512,128], index: 13, kind: output, shape index: {}]  }
   0x1   :  { %v8993_v0 = vld [vmem:[%s16782_s1 + $0x18] sm:$0xff]   ;;  %v8994_v1 = vld [vmem:[%s16782_s1 + $0x10] sm:$0xff]   ;;  %v8995_v2 = vld [vmem:[%s16782_s1 + $0x8] sm:$0xff]  }
   0x2   :  { %7713 = vmatprep.subr.bf16.mxu0 %v8993_v0  ;;  %v46_v3 = vld [vmem:[%s16781_s0] sm:$0xff]  ;;  %v47_v4 = vld [vmem:[%s16781_s0 + $0x8] sm:$0xff]  ;;  %v48_v7 = vld [vmem:[%s16781_s0 + $0x10] sm:$0xff] }
   0x3   :  { %7714 = vmatpush3.bf16.msra.mxu0 %v8993_v0  ;;  %v9154_v5 = vpack.c.bf16 %v47_v4, %v46_v3  ;;  %v8996_v6 = vld [vmem:[%s16782_s1] sm:$0xff]   ;;  %v49_v8 = vld [vmem:[%s16781_s0 + $0x18] sm:$0xff]  ;;  %v51_v10 = vld [vmem:[%s16781_s0 + $0x28] sm:$0xff] }
   0x4   :  { %7715 = vmatprep.subr.bf16.mxu0 %v8994_v1  ;;  %v50_v9 = vld [vmem:[%s16781_s0 + $0x20] sm:$0xff]  ;;  %v9173_v11 = vpack.c.bf16 %v49_v8, %v48_v7  ;;  %v52_v13 = vld [vmem:[%s16781_s0 + $0x30] sm:$0xff]  ;;  %v53_v14 = vld [vmem:[%s16781_s0 + $0x38] sm:$0xff] }
   0x5   :  { %17062 = vst [vmem:[#allocation6_spill] sm:$0xff] %v9154_v5  ;;  %7721 = vmatprep.mubr.msk.bf16.mxu0 %vm174_vm0, %v9154_v5  ;;  %v9175_v12 = vpack.c.bf16 %v51_v10, %v50_v9  ;;  %v54_v15 = vld [vmem:[%s16781_s0 + $0x40] sm:$0xff]  ;;  %v55_v16 = vld [vmem:[%s16781_s0 + $0x48] sm:$0xff]  ;;  %v9193_v17 = vpack.c.bf16 %v53_v14, %v52_v13  ;;  %v56_v19 = vld [vmem:[%s16781_s0 + $0x50] sm:$0xff] }
   0x6   :  { %17063 = vst [vmem:[#allocation7_spill] sm:$0xff] %v9173_v11  ;;  %v9195_v18 = vpack.c.bf16 %v55_v16, %v54_v15  ;;  %v57_v20 = vld [vmem:[%s16781_s0 + $0x58] sm:$0xff]  ;;  %v58_v21 = vld [vmem:[%s16781_s0 + $0x60] sm:$0xff]  ;;  %v59_v22 = vld [vmem:[%s16781_s0 + $0x68] sm:$0xff] }
   0x7   :  { %7716 = vmatpush3.bf16.msra.mxu0 %v8994_v1  ;;  %17064 = vst [vmem:[#allocation8_spill] sm:$0xff] %v9175_v12  ;;  %17065 = vst [vmem:[#allocation9_spill] sm:$0xff] %v9193_v17  ;;  %v9213_v23 = vpack.c.bf16 %v57_v20, %v56_v19  ;;  %v9215_v24 = vpack.c.bf16 %v59_v22, %v58_v21  ;;  %v60_v25 = vld [vmem:[%s16781_s0 + $0x70] sm:$0xff]  ;;  %v61_v26 = vld [vmem:[%s16781_s0 + $0x78] sm:$0xff] }
   0x8   :  { %7717 = vmatprep.subr.bf16.mxu0 %v8995_v2  ;;  %17066 = vst [vmem:[#allocation10_spill] sm:$0xff] %v9195_v18  ;;  %v62_v27 = vld [vmem:[%s16781_s0 + $0x80] sm:$0xff]  ;;  %v63_v28 = vld [vmem:[%s16781_s0 + $0x88] sm:$0xff]  ;;  %v9233_v29 = vpack.c.bf16 %v61_v26, %v60_v25 }
   0x9   :  { %17067 = vst [vmem:[#allocation11_spill] sm:$0xff] %v9213_v23  ;;  %17068 = vst [vmem:[#allocation12_spill] sm:$0xff] %v9215_v24  ;;  %v9235_v30 = vpack.c.bf16 %v63_v28, %v62_v27 }
   0xa   :  { %17069 = vst [vmem:[#allocation13_spill] sm:$0xff] %v9233_v29 }
   0xb   :  { %7718 = vmatpush3.bf16.msra.mxu0 %v8995_v2  ;;  %17070 = vst [vmem:[#allocation14_spill] sm:$0xff] %v9235_v30 }
   0xc   :  { %7719 = vmatprep.subr.bf16.mxu0 %v8996_v6 }
   0xf   :  { %7720 = vmatpush3.bf16.msra.mxu0 %v8996_v6 }
  0x12   :  { %7722 = vmatmul.mubr.msk.bf16.vlgmr.msra.gmra.mxu0 %vm174_vm0, %v9173_v11 }
  0x13   :  { %7725 = vmatprep.mubr.msk.bf16.mxu0 %vm174_vm0, %v9175_v12 }
  0x1a   :  { %7726 = vmatmul.mubr.msk.bf16.gmra.mxu0 %vm174_vm0, %v9193_v17 }
  0x1b   :  { %7729 = vmatprep.mubr.msk.bf16.mxu0 %vm174_vm0, %v9195_v18 }
  0x22   :  { %7730 = vmatmul.mubr.msk.bf16.gmra.mxu0 %vm174_vm0, %v9213_v23 }
  0x23   :  { %7733 = vmatprep.mubr.msk.bf16.mxu0 %vm174_vm0, %v9215_v24 }
  0x24   :  { %18 = vsyncpa [#allocation4], 0  ;;  %v64_v31 = vld [vmem:[%s16781_s0 + $0x90] sm:$0xff]  ;;  %v65_v32 = vld [vmem:[%s16781_s0 + $0x98] sm:$0xff]  ;;  %vm562_vm1 = vcmask 261120   ;;  %v9061_v2 = vmov 0.0  }
  0x25   :  { %v66_v33 = vld [vmem:[%s16781_s0 + $0xa0] sm:$0xff]  ;;  %v67_v34 = vld [vmem:[%s16781_s0 + $0xa8] sm:$0xff]  ;;  %v9253_v35 = vpack.c.bf16 %v65_v32, %v64_v31  ;;  %v68_v37 = vld [vmem:[%s16781_s0 + $0xb0] sm:$0xff]  ;;  %1239 = vst.msk [vmem:[#allocation2 + $0x30] sm:$0xff] %vm562_vm1, %v9061_v2  ;;  %vm1234_vm2 = vcmask 254976   ;;  %s9063_s18 = smov 64  }
  0x26   :  { %v9255_v36 = vpack.c.bf16 %v67_v34, %v66_v33  ;;  %v69_v38 = vld [vmem:[%s16781_s0 + $0xb8] sm:$0xff]  ;;  %v70_v39 = vld [vmem:[%s16781_s0 + $0xc0] sm:$0xff]  ;;  %v71_v40 = vld [vmem:[%s16781_s0 + $0xc8] sm:$0xff]  ;;  %1240 = vst.msk [vmem:[#allocation2 + $0x38] sm:$0xff] %vm562_vm1, %v9061_v2  ;;  %s9064_s19 = smov 96   ;;  %vm3647_vm3 = vcmask 785408  }
  0x27   :  { %17071 = vst [vmem:[#allocation15_spill] sm:$0xff] %v9253_v35  ;;  %v9273_v41 = vpack.c.bf16 %v69_v38, %v68_v37  ;;  %v9275_v42 = vpack.c.bf16 %v71_v40, %v70_v39  ;;  %v72_v43 = vld [vmem:[%s16781_s0 + $0xd0] sm:$0xff]  ;;  %v73_v44 = vld [vmem:[%s16781_s0 + $0xd8] sm:$0xff]  ;;  %v74_v45 = vld [vmem:[%s16781_s0 + $0xe0] sm:$0xff] }
  0x28   :  { %17072 = vst [vmem:[#allocation16_spill] sm:$0xff] %v9255_v36  ;;  %v75_v46 = vld [vmem:[%s16781_s0 + $0xe8] sm:$0xff]  ;;  %v9293_v47 = vpack.c.bf16 %v73_v44, %v72_v43  ;;  %v76_v49 = vld [vmem:[%s16781_s0 + $0xf0] sm:$0xff]  ;;  %v77_v50 = vld [vmem:[%s16781_s0 + $0xf8] sm:$0xff] }
  0x29   :  { %17073 = vst [vmem:[#allocation17_spill] sm:$0xff] %v9273_v41  ;;  %17074 = vst [vmem:[#allocation18_spill] sm:$0xff] %v9275_v42  ;;  %v9295_v48 = vpack.c.bf16 %v75_v46, %v74_v45  ;;  %v78_v51 = vld [vmem:[%s16781_s0 + $0x100] sm:$0xff]  ;;  %v79_v52 = vld [vmem:[%s16781_s0 + $0x108] sm:$0xff]  ;;  %v9313_v53 = vpack.c.bf16 %v77_v50, %v76_v49 }
  0x2a   :  { %7734 = vmatmul.mubr.msk.bf16.gmra.mxu0 %vm174_vm0, %v9233_v29  ;;  %17075 = vst [vmem:[#allocation19_spill] sm:$0xff] %v9293_v47  ;;  %v9315_v54 = vpack.c.bf16 %v79_v52, %v78_v51  ;;  %v80_v55 = vld [vmem:[%s16781_s0 + $0x110] sm:$0xff]  ;;  %v81_v56 = vld [vmem:[%s16781_s0 + $0x118] sm:$0xff]  ;;  %v82_v57 = vld [vmem:[%s16781_s0 + $0x120] sm:$0xff] }
  0x2b   :  { %7737 = vmatprep.mubr.msk.bf16.mxu0 %vm174_vm0, %v9235_v30  ;;  %17076 = vst [vmem:[#allocation20_spill] sm:$0xff] %v9295_v48  ;;  %17077 = vst [vmem:[#allocation21_spill] sm:$0xff] %v9313_v53  ;;  %v83_v58 = vld [vmem:[%s16781_s0 + $0x128] sm:$0xff]  ;;  %v9333_v59 = vpack.c.bf16 %v81_v56, %v80_v55  ;;  %v84_v61 = vld [vmem:[%s16781_s0 + $0x130] sm:$0xff] }
  0x2c   :  { %17078 = vst [vmem:[#allocation22_spill] sm:$0xff] %v9315_v54  ;;  %v9335_v60 = vpack.c.bf16 %v83_v58, %v82_v57  ;;  %v85_v62 = vld [vmem:[%s16781_s0 + $0x138] sm:$0xff]  ;;  %v9350_v63 = vld [vmem:[%s16781_s0 + $0x140] sm:$0xff]  ;;  %v9355_v0 = vld [vmem:[%s16781_s0 + $0x148] sm:$0xff] }
  0x2d   :  { %17079 = vst [vmem:[#allocation23_spill] sm:$0xff] %v9333_v59  ;;  %v9357_v1 = vpack.c.bf16 %v85_v62, %v84_v61  ;;  %1232 = vst.msk [vmem:[#allocation2] sm:$0xff] %vm562_vm1, %v9061_v2  ;;  %v9505_v3 = vpack.c.bf16 %v9355_v0, %v9350_v63  ;;  %v88_v4 = vld [vmem:[%s16781_s0 + $0x150] sm:$0xff]  ;;  %v89_v6 = vld [vmem:[%s16781_s0 + $0x158] sm:$0xff] }
  0x2e   :  { %17080 = vst [vmem:[#allocation24_spill] sm:$0xff] %v9335_v60  ;;  %1233 = vst.msk [vmem:[#allocation2 + $0x8] sm:$0xff] %vm562_vm1, %v9061_v2  ;;  %v90_v7 = vld [vmem:[%s16781_s0 + $0x160] sm:$0xff]  ;;  %v91_v8 = vld [vmem:[%s16781_s0 + $0x168] sm:$0xff]  ;;  %v9595_v9 = vpack.c.bf16 %v89_v6, %v88_v4 }
  0x2f   :  { %17081 = vst [vmem:[#allocation25_spill] sm:$0xff] %v9357_v1  ;;  %1236 = vst.msk [vmem:[#allocation2 + $0x18] sm:$0xff] %vm562_vm1, %v9061_v2  ;;  %v9597_v10 = vpack.c.bf16 %v91_v8, %v90_v7  ;;  %v92_v13 = vld [vmem:[%s16781_s0 + $0x170] sm:$0xff]  ;;  %v93_v14 = vld [vmem:[%s16781_s0 + $0x178] sm:$0xff] }
  0x30   :  { %1237 = vst.msk [vmem:[#allocation2 + $0x20] sm:$0xff] %vm562_vm1, %v9061_v2  ;;  %1242 = vst.msk [vmem:[#allocation2 + $0x48] sm:$0xff] %vm562_vm1, %v9061_v2  ;;  %v94_v15 = vld [vmem:[%s16781_s0 + $0x180] sm:$0xff]  ;;  %v95_v16 = vld [vmem:[%s16781_s0 + $0x188] sm:$0xff]  ;;  %v9615_v19 = vpack.c.bf16 %v93_v14, %v92_v13 }
  0x31   :  { %1243 = vst.msk [vmem:[#allocation2 + $0x50] sm:$0xff] %vm562_vm1, %v9061_v2  ;;  %1245 = vst.msk [vmem:[#allocation2 + $0x60] sm:$0xff] %vm562_vm1, %v9061_v2  ;;  %v9617_v20 = vpack.c.bf16 %v95_v16, %v94_v15  ;;  %v96_v21 = vld [vmem:[%s16781_s0 + $0x190] sm:$0xff]  ;;  %v97_v22 = vld [vmem:[%s16781_s0 + $0x198] sm:$0xff] }
  0x32   :  { %7738 = vmatmul.mubr.msk.bf16.gmra.mxu0 %vm174_vm0, %v9253_v35  ;;  %1246 = vst.msk [vmem:[#allocation2 + $0x68] sm:$0xff] %vm562_vm1, %v9061_v2  ;;  %1248 = vst.msk [vmem:[#allocation2 + $0x78] sm:$0xff] %vm562_vm1, %v9061_v2  ;;  %v98_v25 = vld [vmem:[%s16781_s0 + $0x1a0] sm:$0xff]  ;;  %v99_v26 = vld [vmem:[%s16781_s0 + $0x1a8] sm:$0xff]  ;;  %v9635_v27 = vpack.c.bf16 %v97_v22, %v96_v21 }
  0x33   :  { %7741 = vmatprep.mubr.msk.bf16.mxu0 %vm174_vm0, %v9255_v36  ;;  %1249 = vst.msk [vmem:[#allocation2 + $0x80] sm:$0xff] %vm562_vm1, %v9061_v2  ;;  %1251 = vst.msk [vmem:[#allocation2 + $0x90] sm:$0xff] %vm562_vm1, %v9061_v2  ;;  %v9637_v28 = vpack.c.bf16 %v99_v26, %v98_v25  ;;  %v100_v31 = vld [vmem:[%s16781_s0 + $0x1b0] sm:$0xff]  ;;  %v101_v32 = vld [vmem:[%s16781_s0 + $0x1b8] sm:$0xff] }
  0x34   :  { %1252 = vst.msk [vmem:[#allocation2 + $0x98] sm:$0xff] %vm562_vm1, %v9061_v2  ;;  %1254 = vst.msk [vmem:[#allocation2 + $0xa8] sm:$0xff] %vm562_vm1, %v9061_v2  ;;  %v102_v33 = vld [vmem:[%s16781_s0 + $0x1c0] sm:$0xff]  ;;  %v103_v34 = vld [vmem:[%s16781_s0 + $0x1c8] sm:$0xff]  ;;  %v9655_v37 = vpack.c.bf16 %v101_v32, %v100_v31 }
  0x35   :  { %1255 = vst.msk [vmem:[#allocation2 + $0xb0] sm:$0xff] %vm562_vm1, %v9061_v2  ;;  %1257 = vst.msk [vmem:[#allocation2 + $0xc0] sm:$0xff] %vm562_vm1, %v9061_v2  ;;  %v9657_v38 = vpack.c.bf16 %v103_v34, %v102_v33  ;;  %v104_v39 = vld [vmem:[%s16781_s0 + $0x1d0] sm:$0xff]  ;;  %v105_v40 = vld [vmem:[%s16781_s0 + $0x1d8] sm:$0xff] }
  0x36   :  { %1258 = vst.msk [vmem:[#allocation2 + $0xc8] sm:$0xff] %vm562_vm1, %v9061_v2  ;;  %1260 = vst.msk [vmem:[#allocation2 + $0xd8] sm:$0xff] %vm562_vm1, %v9061_v2  ;;  %v106_v43 = vld [vmem:[%s16781_s0 + $0x1e0] sm:$0xff]  ;;  %v107_v44 = vld [vmem:[%s16781_s0 + $0x1e8] sm:$0xff]  ;;  %v9675_v45 = vpack.c.bf16 %v105_v40, %v104_v39 }
  0x37   :  { %1261 = vst.msk [vmem:[#allocation2 + $0xe0] sm:$0xff] %vm562_vm1, %v9061_v2  ;;  %1263 = vst.msk [vmem:[#allocation2 + $0xf0] sm:$0xff] %vm562_vm1, %v9061_v2  ;;  %v9677_v46 = vpack.c.bf16 %v107_v44, %v106_v43  ;;  %v108_v49 = vld [vmem:[%s16781_s0 + $0x1f0] sm:$0xff]  ;;  %v109_v50 = vld [vmem:[%s16781_s0 + $0x1f8] sm:$0xff]  ;;  %s9062_s0 = smov 32  }
  0x38   :  { %1264 = vst.msk [vmem:[#allocation2 + $0xf8] sm:$0xff] %vm562_vm1, %v9061_v2  ;;  %1266 = vst.msk [vmem:[#allocation2 + $0x108] sm:$0xff] %vm562_vm1, %v9061_v2  ;;  %v9689_v51 = vpack.c.bf16 %v109_v50, %v108_v49 }
  0x39   :  { %1267 = vst.msk [vmem:[#allocation2 + $0x110] sm:$0xff] %vm562_vm1, %v9061_v2  ;;  %1269 = vst.msk [vmem:[#allocation2 + $0x120] sm:$0xff] %vm562_vm1, %v9061_v2 }
  0x3a   :  { %7742 = vmatmul.mubr.msk.bf16.gmra.mxu0 %vm174_vm0, %v9273_v41  ;;  %1270 = vst.msk [vmem:[#allocation2 + $0x128] sm:$0xff] %vm562_vm1, %v9061_v2  ;;  %1272 = vst.msk [vmem:[#allocation2 + $0x138] sm:$0xff] %vm562_vm1, %v9061_v2 }
  0x3b   :  { %7745 = vmatprep.mubr.msk.bf16.mxu0 %vm174_vm0, %v9275_v42  ;;  %1273 = vst.msk [vmem:[#allocation2 + $0x140] sm:$0xff] %vm562_vm1, %v9061_v2  ;;  %1275 = vst.msk [vmem:[#allocation2 + $0x150] sm:$0xff] %vm562_vm1, %v9061_v2 }
  0x3c   :  { %1276 = vst.msk [vmem:[#allocation2 + $0x158] sm:$0xff] %vm562_vm1, %v9061_v2  ;;  %1278 = vst.msk [vmem:[#allocation2 + $0x168] sm:$0xff] %vm562_vm1, %v9061_v2 }
  0x3d   :  { %1279 = vst.msk [vmem:[#allocation2 + $0x170] sm:$0xff] %vm562_vm1, %v9061_v2  ;;  %1281 = vst.msk [vmem:[#allocation2 + $0x180] sm:$0xff] %vm562_vm1, %v9061_v2 }
  0x3e   :  { %1282 = vst.msk [vmem:[#allocation2 + $0x188] sm:$0xff] %vm562_vm1, %v9061_v2  ;;  %1284 = vst.msk [vmem:[#allocation2 + $0x198] sm:$0xff] %vm562_vm1, %v9061_v2 }
  0x3f   :  { %1285 = vst.msk [vmem:[#allocation2 + $0x1a0] sm:$0xff] %vm562_vm1, %v9061_v2  ;;  %1287 = vst.msk [vmem:[#allocation2 + $0x1b0] sm:$0xff] %vm562_vm1, %v9061_v2 }
  0x40   :  { %1288 = vst.msk [vmem:[#allocation2 + $0x1b8] sm:$0xff] %vm562_vm1, %v9061_v2  ;;  %1290 = vst.msk [vmem:[#allocation2 + $0x1c8] sm:$0xff] %vm562_vm1, %v9061_v2 }
  0x41   :  { %1291 = vst.msk [vmem:[#allocation2 + $0x1d0] sm:$0xff] %vm562_vm1, %v9061_v2  ;;  %1293 = vst.msk [vmem:[#allocation2 + $0x1e0] sm:$0xff] %vm562_vm1, %v9061_v2 }
  0x42   :  { %7746 = vmatmul.mubr.msk.bf16.gmra.mxu0 %vm174_vm0, %v9293_v47  ;;  %1294 = vst.msk [vmem:[#allocation2 + $0x1e8] sm:$0xff] %vm562_vm1, %v9061_v2  ;;  %1296 = vst.msk [vmem:[#allocation2 + $0x1f8] sm:$0xff] %vm562_vm1, %v9061_v2 }
  0x43   :  { %7749 = vmatprep.mubr.msk.bf16.mxu0 %vm174_vm0, %v9295_v48  ;;  %1297 = vst.msk [vmem:[#allocation2 + $0x200] sm:$0xff] %vm562_vm1, %v9061_v2  ;;  %1299 = vst.msk [vmem:[#allocation2 + $0x210] sm:$0xff] %vm562_vm1, %v9061_v2 }
  0x44   :  { %1300 = vst.msk [vmem:[#allocation2 + $0x218] sm:$0xff] %vm562_vm1, %v9061_v2  ;;  %1302 = vst.msk [vmem:[#allocation2 + $0x228] sm:$0xff] %vm562_vm1, %v9061_v2 }
  0x45   :  { %1303 = vst.msk [vmem:[#allocation2 + $0x230] sm:$0xff] %vm562_vm1, %v9061_v2  ;;  %1305 = vst.msk [vmem:[#allocation2 + $0x240] sm:$0xff] %vm562_vm1, %v9061_v2  ;;  %v1821_v42 = vld [vmem:[#allocation2 + $0x198] sm:$0xff] }
  0x46   :  { %1306 = vst.msk [vmem:[#allocation2 + $0x248] sm:$0xff] %vm562_vm1, %v9061_v2  ;;  %1308 = vst.msk [vmem:[#allocation2 + $0x258] sm:$0xff] %vm562_vm1, %v9061_v2  ;;  %v1822_v41 = vld [vmem:[#allocation2 + $0x1a0] sm:$0xff] }
  0x47   :  { %1309 = vst.msk [vmem:[#allocation2 + $0x260] sm:$0xff] %vm562_vm1, %v9061_v2  ;;  %1311 = vst.msk [vmem:[#allocation2 + $0x270] sm:$0xff] %vm562_vm1, %v9061_v2  ;;  %v1502_v18 = vld [vmem:[#allocation2 + $0x1b1] sm:$0xff] }
  0x48   :  { %1312 = vst.msk [vmem:[#allocation2 + $0x278] sm:$0xff] %vm562_vm1, %v9061_v2  ;;  %1314 = vst.msk [vmem:[#allocation2 + $0x288] sm:$0xff] %vm562_vm1, %v9061_v2 }
  0x49   :  { %1315 = vst.msk [vmem:[#allocation2 + $0x290] sm:$0xff] %vm562_vm1, %v9061_v2  ;;  %1317 = vst.msk [vmem:[#allocation2 + $0x2a0] sm:$0xff] %vm562_vm1, %v9061_v2 }
  0x4a   :  { %7750 = vmatmul.mubr.msk.bf16.gmra.mxu0 %vm174_vm0, %v9313_v53  ;;  %1318 = vst.msk [vmem:[#allocation2 + $0x2a8] sm:$0xff] %vm562_vm1, %v9061_v2  ;;  %1320 = vst.msk [vmem:[#allocation2 + $0x2b8] sm:$0xff] %vm562_vm1, %v9061_v2 }
  0x4b   :  { %7753 = vmatprep.mubr.msk.bf16.mxu0 %vm174_vm0, %v9315_v54  ;;  %1321 = vst.msk [vmem:[#allocation2 + $0x2c0] sm:$0xff] %vm562_vm1, %v9061_v2  ;;  %1323 = vst.msk [vmem:[#allocation2 + $0x2d0] sm:$0xff] %vm562_vm1, %v9061_v2 }
  0x4c   :  { %1324 = vst.msk [vmem:[#allocation2 + $0x2d8] sm:$0xff] %vm562_vm1, %v9061_v2  ;;  %1326 = vst.msk [vmem:[#allocation2 + $0x2e8] sm:$0xff] %vm562_vm1, %v9061_v2 }
  0x4d   :  { %1327 = vst.msk [vmem:[#allocation2 + $0x2f0] sm:$0xff] %vm562_vm1, %v9061_v2  ;;  %1329 = vst.msk [vmem:[#allocation2 + $0x300] sm:$0xff] %vm562_vm1, %v9061_v2 }
  0x4e   :  { %1330 = vst.msk [vmem:[#allocation2 + $0x308] sm:$0xff] %vm562_vm1, %v9061_v2  ;;  %1332 = vst.msk [vmem:[#allocation2 + $0x318] sm:$0xff] %vm562_vm1, %v9061_v2 }
  0x4f   :  { %1333 = vst.msk [vmem:[#allocation2 + $0x320] sm:$0xff] %vm562_vm1, %v9061_v2  ;;  %1335 = vst.msk [vmem:[#allocation2 + $0x330] sm:$0xff] %vm562_vm1, %v9061_v2 }
  0x50   :  { %1336 = vst.msk [vmem:[#allocation2 + $0x338] sm:$0xff] %vm562_vm1, %v9061_v2  ;;  %1338 = vst.msk [vmem:[#allocation2 + $0x348] sm:$0xff] %vm562_vm1, %v9061_v2 }
  0x51   :  { %1339 = vst.msk [vmem:[#allocation2 + $0x350] sm:$0xff] %vm562_vm1, %v9061_v2  ;;  %17082 = vst [vmem:[#allocation26_spill] sm:$0xff] %v9505_v3 }
  0x52   :  { %7754 = vmatmul.mubr.msk.bf16.gmra.mxu0 %vm174_vm0, %v9333_v59  ;;  %1241 = vst.msk [vmem:[#allocation2 + $0x40] sm:$0x3] %vm1234_vm2, %v9061_v2  ;;  %1235 = vst.msk [vmem:[#allocation2 + $0x10] sm:$0x3] %vm1234_vm2, %v9061_v2 }
  0x53   :  { %7757 = vmatprep.mubr.msk.bf16.mxu0 %vm174_vm0, %v9335_v60  ;;  %1238 = vst.msk [vmem:[#allocation2 + $0x28] sm:$0x3] %vm1234_vm2, %v9061_v2  ;;  %1244 = vst.msk [vmem:[#allocation2 + $0x58] sm:$0x3] %vm1234_vm2, %v9061_v2 }
  0x54   :  { %1247 = vst.msk [vmem:[#allocation2 + $0x70] sm:$0x3] %vm1234_vm2, %v9061_v2  ;;  %1250 = vst.msk [vmem:[#allocation2 + $0x88] sm:$0x3] %vm1234_vm2, %v9061_v2 }
  0x55   :  { %1253 = vst.msk [vmem:[#allocation2 + $0xa0] sm:$0x3] %vm1234_vm2, %v9061_v2  ;;  %1256 = vst.msk [vmem:[#allocation2 + $0xb8] sm:$0x3] %vm1234_vm2, %v9061_v2 }
  0x56   :  { %1259 = vst.msk [vmem:[#allocation2 + $0xd0] sm:$0x3] %vm1234_vm2, %v9061_v2  ;;  %1262 = vst.msk [vmem:[#allocation2 + $0xe8] sm:$0x3] %vm1234_vm2, %v9061_v2 }
  0x57   :  { %1265 = vst.msk [vmem:[#allocation2 + $0x100] sm:$0x3] %vm1234_vm2, %v9061_v2  ;;  %1268 = vst.msk [vmem:[#allocation2 + $0x118] sm:$0x3] %vm1234_vm2, %v9061_v2 }
  0x58   :  { %1271 = vst.msk [vmem:[#allocation2 + $0x130] sm:$0x3] %vm1234_vm2, %v9061_v2  ;;  %1274 = vst.msk [vmem:[#allocation2 + $0x148] sm:$0x3] %vm1234_vm2, %v9061_v2 }
  0x59   :  { %1277 = vst.msk [vmem:[#allocation2 + $0x160] sm:$0x3] %vm1234_vm2, %v9061_v2  ;;  %1280 = vst.msk [vmem:[#allocation2 + $0x178] sm:$0x3] %vm1234_vm2, %v9061_v2 }
  0x5a   :  { %7758 = vmatmul.mubr.msk.bf16.gmra.mxu0 %vm174_vm0, %v9357_v1  ;;  %1283 = vst.msk [vmem:[#allocation2 + $0x190] sm:$0x3] %vm1234_vm2, %v9061_v2  ;;  %1286 = vst.msk [vmem:[#allocation2 + $0x1a8] sm:$0x3] %vm1234_vm2, %v9061_v2  ;;  %v1535_v1 = vld [vmem:[#allocation2 + $0xa] sm:$0xff] }
  0x5b   :  { %1289 = vst.msk [vmem:[#allocation2 + $0x1c0] sm:$0x3] %vm1234_vm2, %v9061_v2  ;;  %1292 = vst.msk [vmem:[#allocation2 + $0x1d8] sm:$0x3] %vm1234_vm2, %v9061_v2  ;;  %7761 = vmatprep.mubr.msk.bf16.mxu0 %vm174_vm0, %v9505_v3 }
  0x5c   :  { %1295 = vst.msk [vmem:[#allocation2 + $0x1f0] sm:$0x3] %vm1234_vm2, %v9061_v2  ;;  %1298 = vst.msk [vmem:[#allocation2 + $0x208] sm:$0x3] %vm1234_vm2, %v9061_v2 }
  0x5d   :  { %1301 = vst.msk [vmem:[#allocation2 + $0x220] sm:$0x3] %vm1234_vm2, %v9061_v2  ;;  %1304 = vst.msk [vmem:[#allocation2 + $0x238] sm:$0x3] %vm1234_vm2, %v9061_v2 }
  0x5e   :  { %1307 = vst.msk [vmem:[#allocation2 + $0x250] sm:$0x3] %vm1234_vm2, %v9061_v2  ;;  %1310 = vst.msk [vmem:[#allocation2 + $0x268] sm:$0x3] %vm1234_vm2, %v9061_v2 }
  0x5f   :  { %1313 = vst.msk [vmem:[#allocation2 + $0x280] sm:$0x3] %vm1234_vm2, %v9061_v2  ;;  %1316 = vst.msk [vmem:[#allocation2 + $0x298] sm:$0x3] %vm1234_vm2, %v9061_v2 }
  0x60   :  { %1319 = vst.msk [vmem:[#allocation2 + $0x2b0] sm:$0x3] %vm1234_vm2, %v9061_v2  ;;  %1322 = vst.msk [vmem:[#allocation2 + $0x2c8] sm:$0x3] %vm1234_vm2, %v9061_v2 }
  0x61   :  { %1325 = vst.msk [vmem:[#allocation2 + $0x2e0] sm:$0x3] %vm1234_vm2, %v9061_v2  ;;  %1328 = vst.msk [vmem:[#allocation2 + $0x2f8] sm:$0x3] %vm1234_vm2, %v9061_v2 }
  0x62   :  { %1331 = vst.msk [vmem:[#allocation2 + $0x310] sm:$0x3] %vm1234_vm2, %v9061_v2  ;;  %1334 = vst.msk [vmem:[#allocation2 + $0x328] sm:$0x3] %vm1234_vm2, %v9061_v2  ;;  %7762 = vmatmul.mubr.msk.bf16.gmra.mxu0 %vm174_vm0, %v9595_v9  ;;  %v1503_v17 = vld [vmem:[#allocation2 + $0x1b9] sm:$0xff] }
  0x63   :  { %1337 = vst.msk [vmem:[#allocation2 + $0x340] sm:$0x3] %vm1234_vm2, %v9061_v2  ;;  %1340 = vst.msk [vmem:[#allocation2 + $0x358] sm:$0x3] %vm1234_vm2, %v9061_v2  ;;  %7765 = vmatprep.mubr.msk.bf16.mxu0 %vm174_vm0, %v9597_v10 }
  0x64   :  { %17083 = vst [vmem:[#allocation27_spill] sm:$0xff] %v9595_v9  ;;  %17084 = vst [vmem:[#allocation28_spill] sm:$0xff] %v9597_v10 }
  0x65   :  { %17085 = vst [vmem:[#allocation29_spill] sm:$0xff] %v9615_v19  ;;  %17086 = vst [vmem:[#allocation30_spill] sm:$0xff] %v9617_v20 }
  0x66   :  { %17087 = vst [vmem:[#allocation31_spill] sm:$0xff] %v9635_v27  ;;  %17088 = vst [vmem:[#allocation32_spill] sm:$0xff] %v9637_v28 }
  0x67   :  { %17089 = vst [vmem:[#allocation33_spill] sm:$0xff] %v9655_v37  ;;  %17090 = vst [vmem:[#allocation34_spill] sm:$0xff] %v9657_v38 }
  0x68   :  { %17091 = vst [vmem:[#allocation35_spill] sm:$0xff] %v9675_v45  ;;  %17092 = vst [vmem:[#allocation36_spill] sm:$0xff] %v9677_v46 }
  0x69   :  { %17093 = vst [vmem:[#allocation37_spill] sm:$0xff] %v9689_v51 }
  0x6a   :  { %7766 = vmatmul.mubr.msk.bf16.gmra.mxu0 %vm174_vm0, %v9615_v19  ;;  %v1471_v19 = vld [vmem:[#allocation2 + $0x9] sm:$0xff] }
  0x6b   :  { %7769 = vmatprep.mubr.msk.bf16.mxu0 %vm174_vm0, %v9617_v20  ;;  %v1470_v20 = vld [vmem:[#allocation2 + $0x1] sm:$0xff] }
  0x72   :  { %7770 = vmatmul.mubr.msk.bf16.gmra.mxu0 %vm174_vm0, %v9635_v27 }
  0x73   :  { %7773 = vmatprep.mubr.msk.bf16.mxu0 %vm174_vm0, %v9637_v28 }
  0x7a   :  { %7774 = vmatmul.mubr.msk.bf16.gmra.mxu0 %vm174_vm0, %v9655_v37 }
  0x7b   :  { %7777 = vmatprep.mubr.msk.bf16.mxu0 %vm174_vm0, %v9657_v38 }
  0x82   :  { %7778 = vmatmul.mubr.msk.bf16.gmra.mxu0 %vm174_vm0, %v9675_v45 }
  0x83   :  { %7781 = vmatprep.mubr.msk.bf16.mxu0 %vm174_vm0, %v9677_v46 }
  0x8a   :  { %7782 = vmatmul.mubr.msk.bf16.gmra.mxu0 %vm174_vm0, %v9689_v51 }
  0xd2   :  { %v9693_v52 = vpop.f32.mrf.mxu0 }
  0xd3   :  { %v698_v61 = vmul.f32 %v9693_v52, %v9693_v52  ;;  %v566_v6 = vsel %vm562_vm1, %v9693_v52, 0.0 }
  0xd4   :  { %v9695_v55 = vpop.f32.mrf.mxu0 }
  0xd5   :  { %v696_v57 = vmul.f32 %v9695_v55, %v9695_v55  ;;  %v563_v62 = vsel %vm562_vm1, %v9695_v55, 0.0  ;;  %v763_v21 = vsel %vm562_vm1, %v698_v61, 0.0 }
  0xd6   :  { %v9697_v56 = vpop.f32.mrf.mxu0 }
  0xd7   :  { %v760_v7 = vsel %vm562_vm1, %v696_v57, 0.0  ;;  %v699_v8 = vmul.f32 %v9697_v56, %v9697_v56  ;;  %v568_v22 = vsel %vm562_vm1, %v9697_v56, 0.0 }
  0xd8   :  { %v9701_v58 = vpop.f32.mrf.mxu0 }
  0xd9   :  { %v564_v63 = vsel %vm562_vm1, %v9701_v58, 0.0  ;;  %v697_v0 = vmul.f32 %v9701_v58, %v9701_v58  ;;  %v765_v33 = vsel %vm562_vm1, %v699_v8, 0.0 }
  0xda   :  { %v565_v2 = vadd.f32 %v564_v63, %v563_v62  ;;  %v9711_v4 = vpop.f32.mrf.mxu0 }
  0xdb   :  { %v761_v13 = vsel %vm562_vm1, %v697_v0, 0.0  ;;  %v702_v44 = vmul.f32 %v9711_v4, %v9711_v4  ;;  %v574_v0 = vsel %vm562_vm1, %v9711_v4, 0.0 }
  0xdc   :  { %v762_v14 = vadd.f32 %v761_v13, %v760_v7  ;;  %v9719_v15 = vpop.f32.mrf.mxu0  ;;  %v567_v16 = vadd.f32 %v566_v6, %v565_v2 }
  0xdd   :  { %v700_v25 = vmul.f32 %v9719_v15, %v9719_v15  ;;  %v570_v34 = vsel %vm562_vm1, %v9719_v15, 0.0 }
  0xde   :  { %v569_v26 = vadd.f32 %v568_v22, %v567_v16  ;;  %v764_v31 = vadd.f32 %v763_v21, %v762_v14  ;;  %v9726_v32 = vpop.f32.mrf.mxu0  ;;  %v771_v14 = vsel %vm562_vm1, %v702_v44, 0.0 }
  0xdf   :  { %v767_v49 = vsel %vm562_vm1, %v700_v25, 0.0  ;;  %v703_v2 = vmul.f32 %v9726_v32, %v9726_v32  ;;  %v576_v16 = vsel %vm562_vm1, %v9726_v32, 0.0 }
  0xe0   :  { %v571_v39 = vadd.f32 %v570_v34, %v569_v26  ;;  %v766_v40 = vadd.f32 %v765_v33, %v764_v31  ;;  %v9731_v43 = vpop.f32.mrf.mxu0 }
  0xe1   :  { %v572_v50 = vsel %vm562_vm1, %v9731_v43, 0.0  ;;  %v701_v57 = vmul.f32 %v9731_v43, %v9731_v43  ;;  %v773_v31 = vsel %vm562_vm1, %v703_v2, 0.0 }
  0xe2   :  { %v768_v61 = vadd.f32 %v767_v49, %v766_v40  ;;  %v573_v62 = vadd.f32 %v572_v50, %v571_v39  ;;  %v9740_v63 = vpop.f32.mrf.mxu0 }
  0xe3   :  { %v769_v6 = vsel %vm562_vm1, %v701_v57, 0.0  ;;  %v706_v44 = vmul.f32 %v9740_v63, %v9740_v63  ;;  %v582_v2 = vsel %vm562_vm1, %v9740_v63, 0.0 }
  0xe4   :  { %v770_v7 = vadd.f32 %v769_v6, %v768_v61  ;;  %v9747_v8 = vpop.f32.mrf.mxu0  ;;  %v575_v13 = vadd.f32 %v574_v0, %v573_v62 }
  0xe5   :  { %v704_v21 = vmul.f32 %v9747_v8, %v9747_v8  ;;  %v578_v33 = vsel %vm562_vm1, %v9747_v8, 0.0 }
  0xe6   :  { %v577_v22 = vadd.f32 %v576_v16, %v575_v13  ;;  %v772_v25 = vadd.f32 %v771_v14, %v770_v7  ;;  %v9754_v26 = vpop.f32.mrf.mxu0 }
  0xe7   :  { %v775_v49 = vsel %vm562_vm1, %v704_v21, 0.0  ;;  %v707_v6 = vmul.f32 %v9754_v26, %v9754_v26  ;;  %v779_v21 = vsel %vm562_vm1, %v706_v44, 0.0 }
  0xe8   :  { %v579_v34 = vadd.f32 %v578_v33, %v577_v22  ;;  %v774_v39 = vadd.f32 %v773_v31, %v772_v25  ;;  %v9759_v40 = vpop.f32.mrf.mxu0  ;;  %v584_v22 = vsel %vm562_vm1, %v9754_v26, 0.0 }
  0xe9   :  { %v580_v50 = vsel %vm562_vm1, %v9759_v40, 0.0  ;;  %v705_v57 = vmul.f32 %v9759_v40, %v9759_v40 }
  0xea   :  { %v776_v61 = vadd.f32 %v775_v49, %v774_v39  ;;  %v581_v62 = vadd.f32 %v580_v50, %v579_v34  ;;  %v9768_v0 = vpop.f32.mrf.mxu0  ;;  %v781_v39 = vsel %vm562_vm1, %v707_v6, 0.0 }
  0xeb   :  { %v777_v7 = vsel %vm562_vm1, %v705_v57, 0.0  ;;  %v710_v44 = vmul.f32 %v9768_v0, %v9768_v0 }
  0xec   :  { %v778_v13 = vadd.f32 %v777_v7, %v776_v61  ;;  %v9775_v14 = vpop.f32.mrf.mxu0  ;;  %v583_v16 = vadd.f32 %v582_v2, %v581_v62 }
  0xed   :  { %v708_v25 = vmul.f32 %v9775_v14, %v9775_v14  ;;  %v586_v49 = vsel %vm562_vm1, %v9775_v14, 0.0 }
  0xee   :  { %v585_v31 = vadd.f32 %v584_v22, %v583_v16  ;;  %v780_v33 = vadd.f32 %v779_v21, %v778_v13  ;;  %v9782_v34 = vpop.f32.mrf.mxu0  ;;  %v590_v21 = vsel %vm562_vm1, %v9768_v0, 0.0 }
  0xef   :  { %v783_v62 = vsel %vm562_vm1, %v708_v25, 0.0  ;;  %v711_v22 = vmul.f32 %v9782_v34, %v9782_v34 }
  0xf0   :  { %v587_v50 = vadd.f32 %v586_v49, %v585_v31  ;;  %v782_v57 = vadd.f32 %v781_v39, %v780_v33  ;;  %v9787_v61 = vpop.f32.mrf.mxu0  ;;  %v787_v49 = vsel %vm562_vm1, %v710_v44, 0.0 }
  0xf1   :  { %v588_v2 = vsel %vm562_vm1, %v9787_v61, 0.0  ;;  %v709_v7 = vmul.f32 %v9787_v61, %v9787_v61  ;;  %v789_v46 = vsel %vm562_vm1, %v711_v22, 0.0 }
  0xf2   :  { %v784_v13 = vadd.f32 %v783_v62, %v782_v57  ;;  %v589_v6 = vadd.f32 %v588_v2, %v587_v50  ;;  %v9796_v16 = vpop.f32.mrf.mxu0  ;;  %v592_v57 = vsel %vm562_vm1, %v9782_v34, 0.0 }
  0xf3   :  { %v785_v31 = vsel %vm562_vm1, %v709_v7, 0.0  ;;  %v714_v44 = vmul.f32 %v9796_v16, %v9796_v16 }
  0xf4   :  { %v786_v33 = vadd.f32 %v785_v31, %v784_v13  ;;  %v9803_v25 = vpop.f32.mrf.mxu0  ;;  %v591_v39 = vadd.f32 %v590_v21, %v589_v6 }
  0xf5   :  { %v712_v50 = vmul.f32 %v9803_v25, %v9803_v25  ;;  %v594_v7 = vsel %vm562_vm1, %v9803_v25, 0.0  ;;  %v795_v38 = vsel %vm562_vm1, %v714_v44, 0.0 }
  0xf6   :  { %v593_v62 = vadd.f32 %v592_v57, %v591_v39  ;;  %v788_v2 = vadd.f32 %v787_v49, %v786_v33  ;;  %v9810_v51 = vpop.f32.mrf.mxu0 }
  0xf7   :  { %v791_v21 = vsel %vm562_vm1, %v712_v50, 0.0 }
  0xf8   :  { %v595_v13 = vadd.f32 %v594_v7, %v593_v62  ;;  %v790_v31 = vadd.f32 %v789_v46, %v788_v2  ;;  %v9815_v6 = vpop.f32.mrf.mxu0  ;;  %v598_v46 = vsel %vm562_vm1, %v9796_v16, 0.0  ;;  %v715_v62 = vmul.f32 %v9810_v51, %v9810_v51 }
  0xf9   :  { %v596_v39 = vsel %vm562_vm1, %v9815_v6, 0.0  ;;  %v713_v33 = vmul.f32 %v9815_v6, %v9815_v6 }
  0xfa   :  { %v792_v49 = vadd.f32 %v791_v21, %v790_v31  ;;  %v597_v22 = vadd.f32 %v596_v39, %v595_v13  ;;  %v9824_v57 = vpop.f32.mrf.mxu0  ;;  %v600_v31 = vsel %vm562_vm1, %v9810_v51, 0.0  ;;  %v797_v28 = vsel %vm562_vm1, %v715_v62, 0.0 }
  0xfb   :  { %v793_v2 = vsel %vm562_vm1, %v713_v33, 0.0  ;;  %v718_v44 = vmul.f32 %v9824_v57, %v9824_v57 }
  0xfc   :  { %v794_v7 = vadd.f32 %v793_v2, %v792_v49  ;;  %v9831_v50 = vpop.f32.mrf.mxu0  ;;  %v599_v45 = vadd.f32 %v598_v46, %v597_v22 }
  0xfd   :  { %v716_v13 = vmul.f32 %v9831_v50, %v9831_v50  ;;  %v602_v33 = vsel %vm562_vm1, %v9831_v50, 0.0  ;;  %v803_v10 = vsel %vm562_vm1, %v718_v44, 0.0 }
  0xfe   :  { %v601_v21 = vadd.f32 %v600_v31, %v599_v45  ;;  %v796_v39 = vadd.f32 %v795_v38, %v794_v7  ;;  %v9838_v37 = vpop.f32.mrf.mxu0 }
  0xff   :  { %v799_v46 = vsel %vm562_vm1, %v716_v13, 0.0 }
 0x100   :  { %v603_v49 = vadd.f32 %v602_v33, %v601_v21  ;;  %v798_v2 = vadd.f32 %v797_v28, %v796_v39  ;;  %v9843_v22 = vpop.f32.mrf.mxu0  ;;  %v606_v28 = vsel %vm562_vm1, %v9824_v57, 0.0  ;;  %v719_v21 = vmul.f32 %v9838_v37, %v9838_v37 }
 0x101   :  { %v604_v45 = vsel %vm562_vm1, %v9843_v22, 0.0  ;;  %v717_v38 = vmul.f32 %v9843_v22, %v9843_v22 }
 0x102   :  { %v800_v7 = vadd.f32 %v799_v46, %v798_v2  ;;  %v605_v62 = vadd.f32 %v604_v45, %v603_v49  ;;  %v9852_v31 = vpop.f32.mrf.mxu0  ;;  %v608_v49 = vsel %vm562_vm1, %v9838_v37, 0.0  ;;  %v8033_v46 = vpack.i.bf16 %v1471_v19, %v1470_v20 }
 0x103   :  { %v801_v39 = vsel %vm562_vm1, %v717_v38, 0.0  ;;  %v805_v38 = vsel %vm562_vm1, %v719_v21, 0.0 }
 0x104   :  { %v802_v33 = vadd.f32 %v801_v39, %v800_v7  ;;  %v9859_v13 = vpop.f32.mrf.mxu0  ;;  %v607_v27 = vadd.f32 %v606_v28, %v605_v62  ;;  %8034 = vrot.lane.b32.xlu0 %v8033_v46, %s9062_s0  ;;  %v722_v39 = vmul.f32 %v9852_v31, %v9852_v31 }
 0x105   :  { %v720_v2 = vmul.f32 %v9859_v13, %v9859_v13  ;;  %v610_v7 = vsel %vm562_vm1, %v9859_v13, 0.0 }
 0x106   :  { %v609_v45 = vadd.f32 %v608_v49, %v607_v27  ;;  %v804_v9 = vadd.f32 %v803_v10, %v802_v33  ;;  %v9866_v3 = vpop.f32.mrf.mxu0  ;;  %v811_v60 = vsel %vm562_vm1, %v722_v39, 0.0 }
 0x107   :  { %v807_v19 = vsel %vm562_vm1, %v720_v2, 0.0  ;;  %v723_v49 = vmul.f32 %v9866_v3, %v9866_v3 }
 0x108   :  { %v611_v44 = vadd.f32 %v610_v7, %v609_v45  ;;  %v806_v62 = vadd.f32 %v805_v38, %v804_v9  ;;  %v9872_v28 = vpop.f32.mrf.mxu0  ;;  %v614_v9 = vsel %vm562_vm1, %v9852_v31, 0.0  ;;  %v1534_v7 = vld [vmem:[#allocation2 + $0x2] sm:$0xff] }
 0x109   :  { %v612_v10 = vsel %vm562_vm1, %v9872_v28, 0.0  ;;  %v721_v20 = vmul.f32 %v9872_v28, %v9872_v28 }
 0x10a   :  { %v808_v27 = vadd.f32 %v807_v19, %v806_v62  ;;  %v613_v21 = vadd.f32 %v612_v10, %v611_v44  ;;  %v9881_v33 = vpop.f32.mrf.mxu0  ;;  %v616_v44 = vsel %vm562_vm1, %v9866_v3, 0.0  ;;  %v8038_v19 = vpack.i.bf16 %v1535_v1, %v1534_v7 }
 0x10b   :  { %v809_v46 = vsel %vm562_vm1, %v721_v20, 0.0  ;;  %v813_v20 = vsel %vm562_vm1, %v723_v49, 0.0 }
 0x10c   :  { %v810_v45 = vadd.f32 %v809_v46, %v808_v27  ;;  %v9888_v2 = vpop.f32.mrf.mxu0  ;;  %v615_v38 = vadd.f32 %v614_v9, %v613_v21  ;;  %8039 = vrot.lane.b32.xlu1 %v8038_v19, %s9063_s18  ;;  %v726_v46 = vmul.f32 %v9881_v33, %v9881_v33 }
 0x10d   :  { %v724_v62 = vmul.f32 %v9888_v2, %v9888_v2  ;;  %v618_v27 = vsel %vm562_vm1, %v9888_v2, 0.0 }
 0x10e   :  { %v617_v10 = vadd.f32 %v616_v44, %v615_v38  ;;  %v812_v59 = vadd.f32 %v811_v60, %v810_v45  ;;  %v9895_v54 = vpop.f32.mrf.mxu0 }
 0x10f   :  { %v815_v1 = vsel %vm562_vm1, %v724_v62, 0.0  ;;  %v727_v44 = vmul.f32 %v9895_v54, %v9895_v54 }
 0x110   :  { %v619_v39 = vadd.f32 %v618_v27, %v617_v10  ;;  %v814_v21 = vadd.f32 %v813_v20, %v812_v59  ;;  %v9901_v9 = vpop.f32.mrf.mxu0  ;;  %v622_v59 = vsel %vm562_vm1, %v9881_v33, 0.0  ;;  %v819_v27 = vsel %vm562_vm1, %v726_v46, 0.0 }
 0x111   :  { %v620_v60 = vsel %vm562_vm1, %v9901_v9, 0.0  ;;  %v725_v49 = vmul.f32 %v9901_v9, %v9901_v9  ;;  %v821_v48 = vsel %vm562_vm1, %v727_v44, 0.0 }
 0x112   :  { %v816_v45 = vadd.f32 %v815_v1, %v814_v21  ;;  %v621_v38 = vadd.f32 %v620_v60, %v619_v39  ;;  %v9910_v7 = vpop.f32.mrf.mxu0  ;;  %v624_v21 = vsel %vm562_vm1, %v9895_v54, 0.0 }
 0x113   :  { %17094 = vst [vmem:[#allocation38_spill] sm:$0xff] %v9910_v7  ;;  %v817_v19 = vsel %vm562_vm1, %v725_v49, 0.0  ;;  %v730_v46 = vmul.f32 %v9910_v7, %v9910_v7 }
 0x114   :  { %v818_v10 = vadd.f32 %v817_v19, %v816_v45  ;;  %v9917_v62 = vpop.f32.mrf.mxu0  ;;  %v623_v20 = vadd.f32 %v622_v59, %v621_v38 }
 0x115   :  { %v728_v39 = vmul.f32 %v9917_v62, %v9917_v62  ;;  %v626_v49 = vsel %vm562_vm1, %v9917_v62, 0.0  ;;  %v827_v36 = vsel %vm562_vm1, %v730_v46, 0.0 }
 0x116   :  { %v625_v1 = vadd.f32 %v624_v21, %v623_v20  ;;  %v820_v60 = vadd.f32 %v819_v27, %v818_v10  ;;  %v9924_v53 = vpop.f32.mrf.mxu0 }
 0x117   :  { %17095 = vst [vmem:[#allocation39_spill] sm:$0xff] %v9924_v53  ;;  %v823_v59 = vsel %vm562_vm1, %v728_v39, 0.0 }
 0x118   :  { %v627_v45 = vadd.f32 %v626_v49, %v625_v1  ;;  %v822_v19 = vadd.f32 %v821_v48, %v820_v60  ;;  %v9929_v38 = vpop.f32.mrf.mxu0  ;;  %v630_v48 = vsel %vm562_vm1, %v9910_v7, 0.0  ;;  %v731_v1 = vmul.f32 %v9924_v53, %v9924_v53 }
 0x119   :  { %v628_v20 = vsel %vm562_vm1, %v9929_v38, 0.0  ;;  %v729_v10 = vmul.f32 %v9929_v38, %v9929_v38 }
 0x11a   :  { %v824_v27 = vadd.f32 %v823_v59, %v822_v19  ;;  %v629_v44 = vadd.f32 %v628_v20, %v627_v45  ;;  %v9938_v21 = vpop.f32.mrf.mxu0  ;;  %v632_v45 = vsel %vm562_vm1, %v9924_v53, 0.0  ;;  %v8043_v59 = vpack.i.bf16 %v1822_v41, %v1821_v42 }
 0x11b   :  { %17096 = vst [vmem:[#allocation40_spill] sm:$0xff] %v9938_v21  ;;  %v825_v60 = vsel %vm562_vm1, %v729_v10, 0.0  ;;  %v829_v10 = vsel %vm562_vm1, %v731_v1, 0.0 }
 0x11c   :  { %v826_v49 = vadd.f32 %v825_v60, %v824_v27  ;;  %v9945_v39 = vpop.f32.mrf.mxu0  ;;  %v631_v47 = vadd.f32 %v630_v48, %v629_v44  ;;  %8044 = vrot.lane.b32.xlu0 %v8043_v59, %s9063_s18  ;;  %v734_v60 = vmul.f32 %v9938_v21, %v9938_v21 }
 0x11d   :  { %17097 = vst [vmem:[#allocation41_spill] sm:$0xff] %v9945_v39  ;;  %v732_v19 = vmul.f32 %v9945_v39, %v9945_v39  ;;  %v634_v27 = vsel %vm562_vm1, %v9945_v39, 0.0 }
 0x11e   :  { %v633_v20 = vadd.f32 %v632_v45, %v631_v47  ;;  %v828_v35 = vadd.f32 %v827_v36, %v826_v49  ;;  %v9952_v30 = vpop.f32.mrf.mxu0 }
 0x11f   :  { %17098 = vst [vmem:[#allocation42_spill] sm:$0xff] %v9952_v30  ;;  %v831_v41 = vsel %vm562_vm1, %v732_v19, 0.0  ;;  %v735_v45 = vmul.f32 %v9952_v30, %v9952_v30 }
 0x120   :  { %v635_v44 = vadd.f32 %v634_v27, %v633_v20  ;;  %v830_v46 = vadd.f32 %v829_v10, %v828_v35  ;;  %v9958_v48 = vpop.f32.mrf.mxu0  ;;  %v638_v35 = vsel %vm562_vm1, %v9938_v21, 0.0  ;;  %v835_v27 = vsel %vm562_vm1, %v734_v60, 0.0 }
 0x121   :  { %17099 = vst [vmem:[#allocation43_spill] sm:$0xff] %v9958_v48  ;;  %v636_v36 = vsel %vm562_vm1, %v9958_v48, 0.0  ;;  %v733_v42 = vmul.f32 %v9958_v48, %v9958_v48  ;;  %v837_v24 = vsel %vm562_vm1, %v735_v45, 0.0 }
 0x122   :  { %v832_v47 = vadd.f32 %v831_v41, %v830_v46  ;;  %v637_v1 = vadd.f32 %v636_v36, %v635_v44  ;;  %v9967_v49 = vpop.f32.mrf.mxu0  ;;  %v640_v46 = vsel %vm562_vm1, %v9952_v30, 0.0 }
 0x123   :  { %17100 = vst [vmem:[#allocation44_spill] sm:$0xff] %v9967_v49  ;;  %v833_v59 = vsel %vm562_vm1, %v733_v42, 0.0  ;;  %v738_v60 = vmul.f32 %v9967_v49, %v9967_v49 }
 0x124   :  { %v834_v20 = vadd.f32 %v833_v59, %v832_v47  ;;  %v9974_v19 = vpop.f32.mrf.mxu0  ;;  %v639_v10 = vadd.f32 %v638_v35, %v637_v1 }
 0x125   :  { %17101 = vst [vmem:[#allocation45_spill] sm:$0xff] %v9974_v19  ;;  %v736_v44 = vmul.f32 %v9974_v19, %v9974_v19  ;;  %v642_v42 = vsel %vm562_vm1, %v9974_v19, 0.0  ;;  %v843_v12 = vsel %vm562_vm1, %v738_v60, 0.0 }
 0x126   :  { %v641_v41 = vadd.f32 %v640_v46, %v639_v10  ;;  %v836_v36 = vadd.f32 %v835_v27, %v834_v20  ;;  %v9981_v29 = vpop.f32.mrf.mxu0 }
 0x127   :  { %17102 = vst [vmem:[#allocation46_spill] sm:$0xff] %v9981_v29  ;;  %v839_v35 = vsel %vm562_vm1, %v736_v44, 0.0 }
 0x128   :  { %v643_v47 = vadd.f32 %v642_v42, %v641_v41  ;;  %v838_v59 = vadd.f32 %v837_v24, %v836_v36  ;;  %v9986_v1 = vpop.f32.mrf.mxu0  ;;  %v646_v24 = vsel %vm562_vm1, %v9967_v49, 0.0  ;;  %v739_v41 = vmul.f32 %v9981_v29, %v9981_v29 }
 0x129   :  { %17103 = vst [vmem:[#allocation47_spill] sm:$0xff] %v9986_v1  ;;  %v644_v10 = vsel %vm562_vm1, %v9986_v1, 0.0  ;;  %v737_v20 = vmul.f32 %v9986_v1, %v9986_v1 }
 0x12a   :  { %v840_v27 = vadd.f32 %v839_v35, %v838_v59  ;;  %v645_v45 = vadd.f32 %v644_v10, %v643_v47  ;;  %v9995_v46 = vpop.f32.mrf.mxu0  ;;  %v648_v47 = vsel %vm562_vm1, %v9981_v29, 0.0  ;;  %v8053_v35 = vpack.i.bf16 %v1503_v17, %v1502_v18 }
 0x12b   :  { %17104 = vst [vmem:[#allocation48_spill] sm:$0xff] %v9995_v46  ;;  %v841_v36 = vsel %vm562_vm1, %v737_v20, 0.0  ;;  %v845_v20 = vsel %vm562_vm1, %v739_v41, 0.0 }
 0x12c   :  { %v842_v42 = vadd.f32 %v841_v36, %v840_v27  ;;  %v10002_v44 = vpop.f32.mrf.mxu0  ;;  %v647_v23 = vadd.f32 %v646_v24, %v645_v45  ;;  %8054 = vrot.lane.b32.xlu1 %v8053_v35, %s9062_s0  ;;  %v742_v36 = vmul.f32 %v9995_v46, %v9995_v46 }
 0x12d   :  { %17105 = vst [vmem:[#allocation49_spill] sm:$0xff] %v10002_v44  ;;  %v740_v59 = vmul.f32 %v10002_v44, %v10002_v44  ;;  %v650_v27 = vsel %vm562_vm1, %v10002_v44, 0.0 }
 0x12e   :  { %v649_v10 = vadd.f32 %v648_v47, %v647_v23  ;;  %v844_v11 = vadd.f32 %v843_v12, %v842_v42  ;;  %v10009_v5 = vpop.f32.mrf.mxu0 }
 0x12f   :  { %17106 = vst [vmem:[#allocation50_spill] sm:$0xff] %v10009_v5  ;;  %v847_v17 = vsel %vm562_vm1, %v740_v59, 0.0  ;;  %v743_v47 = vmul.f32 %v10009_v5, %v10009_v5 }
 0x130   :  { %v651_v45 = vadd.f32 %v650_v27, %v649_v10  ;;  %v846_v60 = vadd.f32 %v845_v20, %v844_v11  ;;  %v10015_v24 = vpop.f32.mrf.mxu0  ;;  %v654_v11 = vsel %vm562_vm1, %v9995_v46, 0.0  ;;  %v851_v27 = vsel %vm562_vm1, %v742_v36, 0.0 }
 0x131   :  { %17107 = vst [vmem:[#allocation51_spill] sm:$0xff] %v10015_v24  ;;  %v652_v12 = vsel %vm562_vm1, %v10015_v24, 0.0  ;;  %v741_v18 = vmul.f32 %v10015_v24, %v10015_v24  ;;  %v853_v24 = vsel %vm562_vm1, %v743_v47, 0.0 }
 0x132   :  { %v848_v23 = vadd.f32 %v847_v17, %v846_v60  ;;  %v653_v41 = vadd.f32 %v652_v12, %v651_v45  ;;  %v10024_v42 = vpop.f32.mrf.mxu0  ;;  %v656_v60 = vsel %vm562_vm1, %v10009_v5, 0.0 }
 0x133   :  { %17108 = vst [vmem:[#allocation52_spill] sm:$0xff] %v10024_v42  ;;  %v849_v35 = vsel %vm562_vm1, %v741_v18, 0.0  ;;  %v746_v36 = vmul.f32 %v10024_v42, %v10024_v42 }
 0x134   :  { %v850_v10 = vadd.f32 %v849_v35, %v848_v23  ;;  %v10031_v59 = vpop.f32.mrf.mxu0  ;;  %v655_v20 = vadd.f32 %v654_v11, %v653_v41 }
 0x135   :  { %17109 = vst [vmem:[#allocation53_spill] sm:$0xff] %v10031_v59  ;;  %v744_v45 = vmul.f32 %v10031_v59, %v10031_v59  ;;  %v658_v18 = vsel %vm562_vm1, %v10031_v59, 0.0 }
 0x136   :  { %v657_v17 = vadd.f32 %v656_v60, %v655_v20  ;;  %v852_v12 = vadd.f32 %v851_v27, %v850_v10  ;;  %v10038_v46 = vpop.f32.mrf.mxu0 }
 0x137   :  { %17110 = vst [vmem:[#allocation54_spill] sm:$0xff] %v10038_v46  ;;  %v855_v11 = vsel %vm562_vm1, %v744_v45, 0.0  ;;  %v1886_v45 = vld [vmem:[#allocation2 + $0x1a1] sm:$0xff] }
 0x138   :  { %v659_v23 = vadd.f32 %v658_v18, %v657_v17  ;;  %v854_v35 = vadd.f32 %v853_v24, %v852_v12  ;;  %v10043_v41 = vpop.f32.mrf.mxu0  ;;  %v662_v24 = vsel %vm562_vm1, %v10024_v42, 0.0  ;;  %v747_v17 = vmul.f32 %v10038_v46, %v10038_v46  ;;  %v1885_v18 = vld [vmem:[#allocation2 + $0x199] sm:$0xff] }
 0x139   :  { %17111 = vst [vmem:[#allocation55_spill] sm:$0xff] %v10043_v41  ;;  %v660_v20 = vsel %vm562_vm1, %v10043_v41, 0.0  ;;  %v745_v10 = vmul.f32 %v10043_v41, %v10043_v41  ;;  %v8048_v49 = vpack.i.bf16 %v1886_v45, %v1885_v18  ;;  %v1567_v42 = vld [vmem:[#allocation2 + $0x1ba] sm:$0xff]  ;;  %v1853_v41 = vld [vmem:[#allocation2 + $0x348] sm:$0xff] }
 0x13a   :  { %v856_v27 = vadd.f32 %v855_v11, %v854_v35  ;;  %v661_v47 = vadd.f32 %v660_v20, %v659_v23  ;;  %v10052_v60 = vpop.f32.mrf.mxu0  ;;  %v859_v35 = vsel %vm562_vm1, %v746_v36, 0.0  ;;  %v664_v23 = vsel %vm562_vm1, %v10038_v46, 0.0  ;;  %v1566_v20 = vld [vmem:[#allocation2 + $0x1b2] sm:$0xff] }
 0x13b   :  { %17112 = vst [vmem:[#allocation56_spill] sm:$0xff] %v10052_v60  ;;  %v857_v12 = vsel %vm562_vm1, %v745_v10, 0.0  ;;  %8049 = vrot.lane.b32.xlu0 %v8048_v49, %s9064_s19  ;;  %v861_v36 = vsel %vm562_vm1, %v747_v17, 0.0 }
 0x13c   :  { %v858_v5 = vadd.f32 %v857_v12, %v856_v27  ;;  %v10059_v44 = vpop.f32.mrf.mxu0  ;;  %v663_v29 = vadd.f32 %v662_v24, %v661_v47  ;;  %v8058_v27 = vpack.i.bf16 %v1567_v42, %v1566_v20  ;;  %v1854_v47 = vld [vmem:[#allocation2 + $0x350] sm:$0xff] }
 0x13d   :  { %17113 = vst [vmem:[#allocation57_spill] sm:$0xff] %v10059_v44  ;;  %v748_v11 = vmul.f32 %v10059_v44, %v10059_v44  ;;  %v666_v24 = vsel %vm562_vm1, %v10059_v44, 0.0  ;;  %v8063_v12 = vpack.i.bf16 %v1854_v47, %v1853_v41 }
 0x13e   :  { %v665_v1 = vadd.f32 %v664_v23, %v663_v29  ;;  %v860_v10 = vadd.f32 %v859_v35, %v858_v5  ;;  %v10066_v19 = vpop.f32.mrf.mxu0  ;;  %8059 = vrot.lane.b32.xlu1 %v8058_v27, %s9063_s18  ;;  %v750_v5 = vmul.f32 %v10052_v60, %v10052_v60 }
 0x13f   :  { %17114 = vst [vmem:[#allocation58_spill] sm:$0xff] %v10066_v19  ;;  %v863_v29 = vsel %vm562_vm1, %v748_v11, 0.0  ;;  %8064 = vrot.lane.b32.xlu0 %v8063_v12, %s9063_s18  ;;  %v751_v23 = vmul.f32 %v10066_v19, %v10066_v19 }
 0x140   :  { %v667_v18 = vadd.f32 %v666_v24, %v665_v1  ;;  %v862_v45 = vadd.f32 %v861_v36, %v860_v10  ;;  %v10072_v30 = vpop.f32.mrf.mxu0  ;;  %v670_v1 = vsel %vm562_vm1, %v10052_v60, 0.0  ;;  %v867_v47 = vsel %vm562_vm1, %v750_v5, 0.0 }
 0x141   :  { %17115 = vst [vmem:[#allocation59_spill] sm:$0xff] %v10072_v30  ;;  %v668_v49 = vsel %vm562_vm1, %v10072_v30, 0.0  ;;  %v749_v42 = vmul.f32 %v10072_v30, %v10072_v30  ;;  %v672_v36 = vsel %vm562_vm1, %v10066_v19, 0.0 }
 0x142   :  { %v864_v17 = vadd.f32 %v863_v29, %v862_v45  ;;  %v669_v35 = vadd.f32 %v668_v49, %v667_v18  ;;  %v10082_v41 = vpop.f32.mrf.mxu0  ;;  %v869_v29 = vsel %vm562_vm1, %v751_v23, 0.0 }
 0x143   :  { %17116 = vst [vmem:[#allocation60_spill] sm:$0xff] %v10082_v41  ;;  %v865_v11 = vsel %vm562_vm1, %v749_v42, 0.0  ;;  %v754_v5 = vmul.f32 %v10082_v41, %v10082_v41 }
 0x144   :  { %v866_v20 = vadd.f32 %v865_v11, %v864_v17  ;;  %v10090_v10 = vpop.f32.mrf.mxu0  ;;  %v671_v27 = vadd.f32 %v670_v1, %v669_v35 }
 0x145   :  { %17117 = vst [vmem:[#allocation61_spill] sm:$0xff] %v10090_v10  ;;  %v752_v24 = vmul.f32 %v10090_v10, %v10090_v10  ;;  %v674_v49 = vsel %vm562_vm1, %v10090_v10, 0.0  ;;  %v875_v30 = vsel %vm562_vm1, %v754_v5, 0.0 }
 0x146   :  { %v673_v12 = vadd.f32 %v672_v36, %v671_v27  ;;  %v868_v18 = vadd.f32 %v867_v47, %v866_v20  ;;  %v10097_v45 = vpop.f32.mrf.mxu0  ;;  %v678_v36 = vsel %vm562_vm1, %v10082_v41, 0.0 }
 0x147   :  { %17118 = vst [vmem:[#allocation62_spill] sm:$0xff] %v10097_v45  ;;  %v871_v1 = vsel %vm562_vm1, %v752_v24, 0.0 }
 0x148   :  { %v675_v42 = vadd.f32 %v674_v49, %v673_v12  ;;  %v870_v17 = vadd.f32 %v869_v29, %v868_v18  ;;  %v10102_v35 = vpop.f32.mrf.mxu0  ;;  %v755_v12 = vmul.f32 %v10097_v45, %v10097_v45 }
 0x149   :  { %17119 = vst [vmem:[#allocation63_spill] sm:$0xff] %v10102_v35  ;;  %v676_v11 = vsel %vm562_vm1, %v10102_v35, 0.0  ;;  %v753_v20 = vmul.f32 %v10102_v35, %v10102_v35 }
 0x14a   :  { %v872_v27 = vadd.f32 %v871_v1, %v870_v17  ;;  %v677_v23 = vadd.f32 %v676_v11, %v675_v42  ;;  %v10111_v47 = vpop.f32.mrf.mxu0  ;;  %v680_v17 = vsel %vm562_vm1, %v10097_v45, 0.0  ;;  %v877_v21 = vsel %vm562_vm1, %v755_v12, 0.0 }
 0x14b   :  { %17120 = vst [vmem:[#allocation64_spill] sm:$0xff] %v10111_v47  ;;  %v873_v18 = vsel %vm562_vm1, %v753_v20, 0.0  ;;  %v758_v5 = vmul.f32 %v10111_v47, %v10111_v47 }
 0x14c   :  { %v874_v29 = vadd.f32 %v873_v18, %v872_v27  ;;  %v10118_v24 = vpop.f32.mrf.mxu0  ;;  %v679_v49 = vadd.f32 %v678_v36, %v677_v23 }
 0x14d   :  { %17121 = vst [vmem:[#allocation65_spill] sm:$0xff] %v10118_v24  ;;  %v756_v42 = vmul.f32 %v10118_v24, %v10118_v24  ;;  %v682_v20 = vsel %vm562_vm1, %v10118_v24, 0.0 }
 0x14e   :  { %v681_v1 = vadd.f32 %v680_v17, %v679_v49  ;;  %v876_v11 = vadd.f32 %v875_v30, %v874_v29  ;;  %v10125_v35 = vpop.f32.mrf.mxu0  ;;  %v686_v17 = vsel %vm562_vm1, %v10111_v47, 0.0 }
 0x14f   :  { %17122 = vst [vmem:[#allocation66_spill] sm:$0xff] %v10125_v35  ;;  %v879_v36 = vsel %vm562_vm1, %v756_v42, 0.0  ;;  %v883_v42 = vsel %vm562_vm1, %v758_v5, 0.0  ;;  %v688_v48 = vsel %vm562_vm1, %v10125_v35, 0.0 }
 0x150   :  { %v683_v27 = vadd.f32 %v682_v20, %v681_v1  ;;  %v878_v18 = vadd.f32 %v877_v21, %v876_v11  ;;  %v10130_v23 = vpop.f32.mrf.mxu0  ;;  %v759_v21 = vmul.f32 %v10125_v35, %v10125_v35 }
 0x151   :  { %v684_v49 = vsel %vm562_vm1, %v10130_v23, 0.0  ;;  %v757_v30 = vmul.f32 %v10130_v23, %v10130_v23 }
 0x152   :  { %v880_v29 = vadd.f32 %v879_v36, %v878_v18  ;;  %v685_v12 = vadd.f32 %v684_v49, %v683_v27  ;;  %v885_v18 = vsel %vm562_vm1, %v759_v21, 0.0 }
 0x153   :  { %v881_v1 = vsel %vm562_vm1, %v757_v30, 0.0 }
 0x154   :  { %v687_v11 = vadd.f32 %v686_v17, %v685_v12  ;;  %v882_v20 = vadd.f32 %v881_v1, %v880_v29 }
 0x156   :  { %v689_v39 = vadd.f32 %v688_v48, %v687_v11  ;;  %v884_v53 = vadd.f32 %v883_v42, %v882_v20  ;;  %v17136_v42 = vld [vmem:[#allocation44_spill] sm:$0xff] }
 0x158   :  { %v690_v27 = vrot.slane %v689_v39, 4  ;;  %v886_v36 = vadd.f32 %v885_v18, %v884_v53  ;;  %v17135_v18 = vld [vmem:[#allocation47_spill] sm:$0xff] }
 0x15a   :  { %v691_v49 = vadd.f32 %v690_v27, %v689_v39  ;;  %v887_v47 = vrot.slane %v886_v36, 4 }
 0x15c   :  { %v692_v7 = vrot.slane %v691_v49, 2  ;;  %v888_v24 = vadd.f32 %v887_v47, %v886_v36 }
 0x15e   :  { %v693_v45 = vadd.f32 %v692_v7, %v691_v49  ;;  %v889_v41 = vrot.slane %v888_v24, 2  ;;  %v17132_v49 = vld [vmem:[#allocation40_spill] sm:$0xff] }
 0x160   :  { %v694_v30 = vrot.slane %v693_v45, 1  ;;  %v890_v12 = vadd.f32 %v889_v41, %v888_v24 }
 0x162   :  { %v695_v29 = vadd.f32 %v694_v30, %v693_v45  ;;  %v891_v17 = vrot.slane %v890_v12, 1  ;;  %v17131_v30 = vld [vmem:[#allocation43_spill] sm:$0xff] }
 0x164   :  { %v892_v5 = vadd.f32 %v891_v17, %v890_v12  ;;  %v10148_v1 = vmul.f32 0.001953125, %v695_v29  ;;  %v17126_v17 = vld [vmem:[#allocation38_spill] sm:$0xff]  ;;  %v17130_v12 = vld [vmem:[#allocation41_spill] sm:$0xff] }
 0x166   :  { %v894_v35 = vmul.f32 0.001953125, %v892_v5  ;;  %v895_v48 = vmul.f32 %v10148_v1, %v10148_v1  ;;  %v932_v36 = vsub.f32 %v17126_v17, %v10148_v1  ;;  %v17127_v5 = vld [vmem:[#allocation39_spill] sm:$0xff]  ;;  %v934_v20 = vsub.f32 %v17130_v12, %v10148_v1  ;;  %v17133_v17 = vld [vmem:[#allocation42_spill] sm:$0xff] }
 0x167   :  { %v933_v27 = vsub.f32 %v17127_v5, %v10148_v1  ;;  %v935_v24 = vsub.f32 %v17131_v30, %v10148_v1  ;;  %v937_v47 = vsub.f32 %v17133_v17, %v10148_v1  ;;  %v17134_v5 = vld [vmem:[#allocation45_spill] sm:$0xff]  ;;  %v939_v41 = vsub.f32 %v17135_v18, %v10148_v1  ;;  %v17137_v12 = vld [vmem:[#allocation46_spill] sm:$0xff]  ;;  %v17140_v17 = vld [vmem:[#allocation48_spill] sm:$0xff] }
 0x168   :  { %v896_v21 = vsub.f32 %v894_v35, %v895_v48  ;;  %v936_v35 = vsub.f32 %v17132_v49, %v10148_v1  ;;  %v938_v45 = vsub.f32 %v17134_v5, %v10148_v1  ;;  %v940_v7 = vsub.f32 %v17136_v42, %v10148_v1  ;;  %v17138_v30 = vld [vmem:[#allocation49_spill] sm:$0xff]  ;;  %v17139_v49 = vld [vmem:[#allocation51_spill] sm:$0xff]  ;;  %v17141_v5 = vld [vmem:[#allocation50_spill] sm:$0xff] }
 0x169   :  { %v941_v53 = vsub.f32 %v17137_v12, %v10148_v1  ;;  %v943_v48 = vsub.f32 %v17139_v49, %v10148_v1  ;;  %v944_v29 = vsub.f32 %v17140_v17, %v10148_v1  ;;  %v10277_v42 = vld [vmem:[%s16783_s2] ss:$0 sm:$0xff]  ;;  %v17142_v18 = vld [vmem:[#allocation55_spill] sm:$0xff]  ;;  %v17147_v46 = vsub.f32 %v9695_v55, %v10148_v1 }
 0x16a   :  { %v897_v11 = vmax.f32 %v896_v21, 0.0  ;;  %v942_v21 = vsub.f32 %v17138_v30, %v10148_v1  ;;  %v947_v12 = vsub.f32 %v17142_v18, %v10148_v1  ;;  %v17143_v30 = vld [vmem:[#allocation52_spill] sm:$0xff]  ;;  %v17144_v49 = vld [vmem:[#allocation59_spill] sm:$0xff]  ;;  %v17148_v18 = vsub.f32 %v9701_v58, %v10148_v1 }
 0x16b   :  { %v948_v10 = vsub.f32 %v17143_v30, %v10148_v1  ;;  %v951_v19 = vsub.f32 %v17144_v49, %v10148_v1  ;;  %v17145_v17 = vld [vmem:[#allocation63_spill] sm:$0xff]  ;;  %v17149_v49 = vsub.f32 %v9693_v52, %v10148_v1  ;;  %v17151_v55 = vsub.f32 %v9697_v56, %v10148_v1 }
 0x16c   :  { %v962_v39 = vadd.f32 1e-05, %v897_v11  ;;  %v17152_v58 = vsub.f32 %v9719_v15, %v10148_v1  ;;  %v17153_v52 = vsub.f32 %v9731_v43, %v10148_v1  ;;  %v17155_v15 = vsub.f32 %v9726_v32, %v10148_v1 }
 0x16d   :  { %v17156_v43 = vsub.f32 %v9747_v8, %v10148_v1 }
 0x16e   :  { %9021 = vrsqrt.f32 %v962_v39  ;;  %v945_v39 = vsub.f32 %v17141_v5, %v10148_v1  ;;  %v17146_v5 = vsub.f32 %v10130_v23, %v10148_v1  ;;  %v10312_v23 = vld [vmem:[%s16784_s3] ss:$0 sm:$0xff] }
 0x16f   :  { %17150 = vst [vmem:[#allocation38_spill] sm:$0xff] %v10312_v23 }
 0x17b   :  { %v10272_v11 = vpop.eup %9021 }
 0x17c   :  { %v1025_v44 = vmul.f32 %v10272_v11, %v17146_v5  ;;  %v10295_v59 = vmul.f32 %v10272_v11, %v17147_v46  ;;  %v10301_v30 = vmul.f32 %v10272_v11, %v17148_v18  ;;  %v10307_v60 = vmul.f32 %v10272_v11, %v17149_v49 }
 0x17d   :  { %v10318_v46 = vmul.f32 %v10272_v11, %v17151_v55  ;;  %v10324_v5 = vmul.f32 %v10272_v11, %v17152_v58  ;;  %v10330_v18 = vmul.f32 %v10272_v11, %v17153_v52  ;;  %v17154_v49 = vsub.f32 %v9711_v4, %v10148_v1 }
 0x17e   :  { %v1095_v55 = vmul.f32 %v10277_v42, %v1025_v44  ;;  %v10343_v58 = vmul.f32 %v10272_v11, %v17155_v15  ;;  %v10349_v52 = vmul.f32 %v10272_v11, %v17156_v43  ;;  %v17157_v4 = vsub.f32 %v9759_v40, %v10148_v1 }
 0x17f   :  { %v10336_v56 = vmul.f32 %v10272_v11, %v17154_v49  ;;  %v17158_v44 = vsub.f32 %v9740_v63, %v10148_v1  ;;  %v17159_v15 = vsub.f32 %v9754_v26, %v10148_v1  ;;  %v17160_v43 = vsub.f32 %v9775_v14, %v10148_v1 }
 0x180   :  { %v10355_v49 = vmul.f32 %v10272_v11, %v17157_v4  ;;  %v17161_v4 = vsub.f32 %v9787_v61, %v10148_v1  ;;  %v17162_v26 = vsub.f32 %v9768_v0, %v10148_v1  ;;  %v17163_v14 = vsub.f32 %v9782_v34, %v10148_v1 }
 0x181   :  { %v10361_v32 = vmul.f32 %v10272_v11, %v17158_v44  ;;  %v10367_v8 = vmul.f32 %v10272_v11, %v17159_v15  ;;  %v10373_v40 = vmul.f32 %v10272_v11, %v17160_v43  ;;  %v1165_v44 = vadd.f32 %v10312_v23, %v1095_v55 }
 0x182   :  { %v10379_v63 = vmul.f32 %v10272_v11, %v17161_v4  ;;  %v10386_v15 = vmul.f32 %v10272_v11, %v17162_v26  ;;  %v10392_v43 = vmul.f32 %v10272_v11, %v17163_v14  ;;  %v17164_v61 = vsub.f32 %v9803_v25, %v10148_v1 }
 0x183   :  { %v17165_v55 = vsub.f32 %v9815_v6, %v10148_v1  ;;  %v17166_v26 = vsub.f32 %v9796_v16, %v10148_v1  ;;  %v17167_v14 = vsub.f32 %v9810_v51, %v10148_v1  ;;  %v17169_v23 = vsub.f32 %v9843_v22, %v10148_v1 }
 0x184   :  { %v10398_v4 = vmul.f32 %v10272_v11, %v17164_v61  ;;  %v17168_v61 = vsub.f32 %v9831_v50, %v10148_v1 }
 0x185   :  { %v10404_v0 = vmul.f32 %v10272_v11, %v17165_v55  ;;  %v10410_v34 = vmul.f32 %v10272_v11, %v17166_v26  ;;  %v10416_v25 = vmul.f32 %v10272_v11, %v17167_v14  ;;  %v1229_v55 = vmax.f32 %v1165_v44, 0.0 }
 0x186   :  { %v10422_v6 = vmul.f32 %v10272_v11, %v17168_v61  ;;  %v10428_v16 = vmul.f32 %v10272_v11, %v17169_v23  ;;  %v17170_v26 = vsub.f32 %v9824_v57, %v10148_v1  ;;  %v17171_v14 = vsub.f32 %v9838_v37, %v10148_v1 }
 0x187   :  { %v17172_v44 = vsub.f32 %v9859_v13, %v10148_v1  ;;  %v17173_v23 = vsub.f32 %v9872_v28, %v10148_v1  ;;  %v17174_v61 = vsub.f32 %v9852_v31, %v10148_v1  ;;  %1403 = vst.msk [vmem:[#allocation2 + $0x321] sm:$0xff] %vm562_vm1, %v1229_v55  ;;  %v17176_v28 = vsub.f32 %v9888_v2, %v10148_v1 }
 0x188   :  { %v10434_v51 = vmul.f32 %v10272_v11, %v17170_v26  ;;  %v10440_v50 = vmul.f32 %v10272_v11, %v17171_v14  ;;  %v17175_v26 = vsub.f32 %v9866_v3, %v10148_v1  ;;  %v17177_v31 = vsub.f32 %v9901_v9, %v10148_v1 }
 0x189   :  { %v10446_v22 = vmul.f32 %v10272_v11, %v17172_v44  ;;  %v10452_v57 = vmul.f32 %v10272_v11, %v17173_v23  ;;  %v10458_v37 = vmul.f32 %v10272_v11, %v17174_v61  ;;  %v10471_v14 = vmul.f32 %v10272_v11, %v17176_v28 }
 0x18a   :  { %v10464_v13 = vmul.f32 %v10272_v11, %v17175_v26  ;;  %v10477_v44 = vmul.f32 %v10272_v11, %v17177_v31  ;;  %v17178_v3 = vsub.f32 %v9881_v33, %v10148_v1  ;;  %v17179_v55 = vsub.f32 %v9895_v54, %v10148_v1 }
 0x18b   :  { %v17180_v61 = vsub.f32 %v9917_v62, %v10148_v1  ;;  %v17181_v26 = vsub.f32 %v9929_v38, %v10148_v1  ;;  %v10504_v28 = vmul.f32 %v10272_v11, %v932_v36  ;;  %v10507_v54 = vmul.f32 %v10272_v11, %v933_v27 }
 0x18c   :  { %v10483_v23 = vmul.f32 %v10272_v11, %v17178_v3  ;;  %v10489_v2 = vmul.f32 %v10272_v11, %v17179_v55  ;;  %v10510_v31 = vmul.f32 %v10272_v11, %v934_v20  ;;  %v10513_v62 = vmul.f32 %v10272_v11, %v935_v24 }
 0x18d   :  { %v10495_v9 = vmul.f32 %v10272_v11, %v17180_v61  ;;  %v10501_v33 = vmul.f32 %v10272_v11, %v17181_v26  ;;  %v10516_v3 = vmul.f32 %v10272_v11, %v936_v35  ;;  %v10519_v38 = vmul.f32 %v10272_v11, %v937_v47 }
 0x18e   :  { %v10522_v55 = vmul.f32 %v10272_v11, %v938_v45  ;;  %v10525_v36 = vmul.f32 %v10272_v11, %v939_v41  ;;  %v10528_v27 = vmul.f32 %v10272_v11, %v940_v7  ;;  %v10531_v20 = vmul.f32 %v10272_v11, %v941_v53  ;;  %v17183_v41 = vld [vmem:[#allocation53_spill] sm:$0xff] }
 0x18f   :  { %v10534_v24 = vmul.f32 %v10272_v11, %v942_v21  ;;  %v10537_v35 = vmul.f32 %v10272_v11, %v943_v48  ;;  %v10540_v47 = vmul.f32 %v10272_v11, %v944_v29  ;;  %v10543_v45 = vmul.f32 %v10272_v11, %v945_v39  ;;  %v17187_v48 = vld [vmem:[#allocation54_spill] sm:$0xff]  ;;  %v17190_v39 = vld [vmem:[#allocation57_spill] sm:$0xff] }
 0x190   :  { %v17184_v61 = vsub.f32 %v17183_v41, %v10148_v1  ;;  %v10552_v53 = vmul.f32 %v10272_v11, %v947_v12  ;;  %v10555_v21 = vmul.f32 %v10272_v11, %v948_v10  ;;  %v17188_v26 = vsub.f32 %v17187_v48, %v10148_v1  ;;  %v17192_v12 = vld [vmem:[#allocation56_spill] sm:$0xff] }
 0x191   :  { %17182 = vst [vmem:[#allocation39_spill] sm:$0xff] %v10543_v45  ;;  %v17191_v45 = vsub.f32 %v17190_v39, %v10148_v1 }
 0x192   :  { %v10549_v7 = vmul.f32 %v10272_v11, %v17184_v61  ;;  %17185 = vst [vmem:[#allocation41_spill] sm:$0xff] %v10552_v53  ;;  %17186 = vst [vmem:[#allocation43_spill] sm:$0xff] %v10555_v21  ;;  %v10561_v29 = vmul.f32 %v10272_v11, %v17188_v26  ;;  %v10570_v61 = vmul.f32 %v10272_v11, %v951_v19  ;;  %v17195_v21 = vld [vmem:[#allocation58_spill] sm:$0xff] }
 0x193   :  { %v10567_v41 = vmul.f32 %v10272_v11, %v17191_v45  ;;  %v17193_v53 = vsub.f32 %v17192_v12, %v10148_v1  ;;  %v17196_v48 = vsub.f32 %v17195_v21, %v10148_v1  ;;  %v17201_v19 = vsub.f32 %v17145_v17, %v10148_v1 }
 0x194   :  { %17189 = vst [vmem:[#allocation40_spill] sm:$0xff] %v10561_v29  ;;  %v17198_v29 = vld [vmem:[#allocation61_spill] sm:$0xff] }
 0x195   :  { %v10576_v10 = vmul.f32 %v10272_v11, %v17193_v53  ;;  %v10582_v26 = vmul.f32 %v10272_v11, %v17196_v48  ;;  %v17199_v39 = vsub.f32 %v17198_v29, %v10148_v1  ;;  %v10594_v12 = vmul.f32 %v10272_v11, %v17201_v19  ;;  %v17203_v53 = vld [vmem:[#allocation60_spill] sm:$0xff]  ;;  %v17206_v48 = vld [vmem:[#allocation62_spill] sm:$0xff] }
 0x196   :  { %v17210_v19 = vld [vmem:[#allocation64_spill] sm:$0xff] }
 0x197   :  { %17194 = vst [vmem:[#allocation42_spill] sm:$0xff] %v10576_v10  ;;  %17197 = vst [vmem:[#allocation45_spill] sm:$0xff] %v10582_v26  ;;  %v10588_v45 = vmul.f32 %v10272_v11, %v17199_v39  ;;  %v17204_v10 = vsub.f32 %v17203_v53, %v10148_v1  ;;  %v17207_v26 = vsub.f32 %v17206_v48, %v10148_v1  ;;  %v17208_v39 = vld [vmem:[#allocation65_spill] sm:$0xff] }
 0x198   :  { %17202 = vst [vmem:[#allocation44_spill] sm:$0xff] %v10594_v12  ;;  %v17211_v12 = vsub.f32 %v17210_v19, %v10148_v1 }
 0x199   :  { %17200 = vst [vmem:[#allocation47_spill] sm:$0xff] %v10588_v45  ;;  %v10600_v21 = vmul.f32 %v10272_v11, %v17204_v10  ;;  %v10606_v29 = vmul.f32 %v10272_v11, %v17207_v26  ;;  %v17209_v45 = vsub.f32 %v17208_v39, %v10148_v1  ;;  %v17212_v10 = vld [vmem:[#allocation66_spill] sm:$0xff]  ;;  %v10628_v26 = vmul.f32 %v10277_v42, %v10295_v59  ;;  %v17218_v19 = vld [vmem:[#allocation43_spill] sm:$0xff] }
 0x19a   :  { %v10618_v53 = vmul.f32 %v10272_v11, %v17211_v12  ;;  %v10636_v39 = vmul.f32 %v10277_v42, %v10307_v60  ;;  %v10640_v12 = vmul.f32 %v10277_v42, %v10318_v46  ;;  %v10648_v59 = vmul.f32 %v10277_v42, %v10330_v18 }
 0x19b   :  { %17205 = vst [vmem:[#allocation46_spill] sm:$0xff] %v10600_v21  ;;  %v10612_v17 = vmul.f32 %v10272_v11, %v17209_v45  ;;  %v17213_v21 = vsub.f32 %v17212_v10, %v10148_v1  ;;  %v10632_v45 = vmul.f32 %v10277_v42, %v10301_v30  ;;  %v10644_v1 = vmul.f32 %v10277_v42, %v10324_v5  ;;  %v17220_v10 = vld [vmem:[#allocation40_spill] sm:$0xff] }
 0x19c   :  { %v10656_v60 = vmul.f32 %v10277_v42, %v10343_v58  ;;  %v10660_v30 = vmul.f32 %v10277_v42, %v10349_v52  ;;  %v10664_v46 = vmul.f32 %v10277_v42, %v10355_v49  ;;  %v10668_v5 = vmul.f32 %v10277_v42, %v10361_v32 }
 0x19d   :  { %v10624_v48 = vmul.f32 %v10272_v11, %v17213_v21  ;;  %v10652_v11 = vmul.f32 %v10277_v42, %v10336_v56  ;;  %v10672_v18 = vmul.f32 %v10277_v42, %v10367_v8  ;;  %v10676_v56 = vmul.f32 %v10277_v42, %v10373_v40  ;;  %v17216_v21 = vld [vmem:[#allocation41_spill] sm:$0xff] }
 0x19e   :  { %v10680_v58 = vmul.f32 %v10277_v42, %v10379_v63  ;;  %v10684_v52 = vmul.f32 %v10277_v42, %v10386_v15  ;;  %v10688_v49 = vmul.f32 %v10277_v42, %v10392_v43  ;;  %v10692_v32 = vmul.f32 %v10277_v42, %v10398_v4 }
 0x19f   :  { %v10696_v8 = vmul.f32 %v10277_v42, %v10404_v0  ;;  %v10700_v40 = vmul.f32 %v10277_v42, %v10410_v34  ;;  %v10704_v63 = vmul.f32 %v10277_v42, %v10416_v25  ;;  %v10708_v15 = vmul.f32 %v10277_v42, %v10422_v6 }
 0x1a0   :  { %v10712_v43 = vmul.f32 %v10277_v42, %v10428_v16  ;;  %v10716_v4 = vmul.f32 %v10277_v42, %v10434_v51  ;;  %v10720_v0 = vmul.f32 %v10277_v42, %v10440_v50  ;;  %v10724_v34 = vmul.f32 %v10277_v42, %v10446_v22 }
 0x1a1   :  { %v10728_v25 = vmul.f32 %v10277_v42, %v10452_v57  ;;  %v10732_v6 = vmul.f32 %v10277_v42, %v10458_v37  ;;  %v10736_v16 = vmul.f32 %v10277_v42, %v10464_v13  ;;  %v10740_v51 = vmul.f32 %v10277_v42, %v10471_v14 }
 0x1a2   :  { %v10744_v50 = vmul.f32 %v10277_v42, %v10477_v44  ;;  %v10748_v22 = vmul.f32 %v10277_v42, %v10483_v23  ;;  %v10752_v57 = vmul.f32 %v10277_v42, %v10489_v2  ;;  %v10756_v37 = vmul.f32 %v10277_v42, %v10495_v9 }
 0x1a3   :  { %v10760_v13 = vmul.f32 %v10277_v42, %v10501_v33  ;;  %v10764_v14 = vmul.f32 %v10277_v42, %v10504_v28  ;;  %v10768_v44 = vmul.f32 %v10277_v42, %v10507_v54  ;;  %v10772_v23 = vmul.f32 %v10277_v42, %v10510_v31 }
 0x1a4   :  { %v10776_v2 = vmul.f32 %v10277_v42, %v10513_v62  ;;  %v10780_v9 = vmul.f32 %v10277_v42, %v10516_v3  ;;  %v10784_v33 = vmul.f32 %v10277_v42, %v10519_v38  ;;  %v10788_v28 = vmul.f32 %v10277_v42, %v10522_v55 }
 0x1a5   :  { %v10792_v54 = vmul.f32 %v10277_v42, %v10525_v36  ;;  %v10796_v31 = vmul.f32 %v10277_v42, %v10528_v27  ;;  %v10800_v62 = vmul.f32 %v10277_v42, %v10531_v20  ;;  %v10804_v3 = vmul.f32 %v10277_v42, %v10534_v24  ;;  %v17214_v36 = vld [vmem:[#allocation39_spill] sm:$0xff] }
 0x1a6   :  { %v10808_v38 = vmul.f32 %v10277_v42, %v10537_v35  ;;  %v10812_v55 = vmul.f32 %v10277_v42, %v10540_v47  ;;  %v10816_v27 = vmul.f32 %v10277_v42, %v17214_v36  ;;  %v10820_v20 = vmul.f32 %v10277_v42, %v10549_v7 }
 0x1a7   :  { %v10824_v24 = vmul.f32 %v10277_v42, %v17216_v21  ;;  %v10828_v35 = vmul.f32 %v10277_v42, %v17218_v19  ;;  %v10832_v47 = vmul.f32 %v10277_v42, %v17220_v10  ;;  %v10836_v36 = vmul.f32 %v10277_v42, %v10567_v41 }
 0x1a8   :  { %17215 = vst [vmem:[#allocation49_spill] sm:$0xff] %v10820_v20  ;;  %v10840_v7 = vmul.f32 %v10277_v42, %v10570_v61  ;;  %v17223_v20 = vld [vmem:[#allocation42_spill] sm:$0xff] }
 0x1a9   :  { %17217 = vst [vmem:[#allocation51_spill] sm:$0xff] %v10824_v24  ;;  %17219 = vst [vmem:[#allocation48_spill] sm:$0xff] %v10828_v35  ;;  %v10844_v21 = vmul.f32 %v10277_v42, %v17223_v20  ;;  %v17224_v24 = vld [vmem:[#allocation45_spill] sm:$0xff]  ;;  %v17225_v35 = vld [vmem:[#allocation47_spill] sm:$0xff]  ;;  %v10864_v20 = vmul.f32 %v10277_v42, %v10606_v29 }
 0x1aa   :  { %17221 = vst [vmem:[#allocation50_spill] sm:$0xff] %v10832_v47  ;;  %17222 = vst [vmem:[#allocation55_spill] sm:$0xff] %v10836_v36  ;;  %v10848_v19 = vmul.f32 %v10277_v42, %v17224_v24  ;;  %v10852_v10 = vmul.f32 %v10277_v42, %v17225_v35  ;;  %v17226_v47 = vld [vmem:[#allocation44_spill] sm:$0xff]  ;;  %v17228_v36 = vld [vmem:[#allocation46_spill] sm:$0xff]  ;;  %v10868_v24 = vmul.f32 %v10277_v42, %v10612_v17 }
 0x1ab   :  { %v10856_v41 = vmul.f32 %v10277_v42, %v17226_v47  ;;  %v10860_v61 = vmul.f32 %v10277_v42, %v17228_v36  ;;  %v10872_v35 = vmul.f32 %v10277_v42, %v10618_v53  ;;  %v10876_v47 = vmul.f32 %v10277_v42, %v10624_v48 }
 0x1ad   :  { %17227 = vst [vmem:[#allocation52_spill] sm:$0xff] %v10856_v41  ;;  %v17229_v41 = vld [vmem:[#allocation38_spill] sm:$0xff] }
 0x1ae   :  { %v10880_v36 = vadd.f32 %v17229_v41, %v10628_v26  ;;  %v10884_v29 = vadd.f32 %v17229_v41, %v10632_v45  ;;  %v10888_v17 = vadd.f32 %v17229_v41, %v10636_v39  ;;  %v10892_v53 = vadd.f32 %v17229_v41, %v10640_v12 }
 0x1af   :  { %v10896_v42 = vadd.f32 %v17229_v41, %v10644_v1  ;;  %v10900_v48 = vadd.f32 %v17229_v41, %v10648_v59  ;;  %v10904_v26 = vadd.f32 %v17229_v41, %v10652_v11  ;;  %v10908_v45 = vadd.f32 %v17229_v41, %v10656_v60 }
 0x1b0   :  { %v10912_v39 = vadd.f32 %v17229_v41, %v10660_v30  ;;  %v10916_v12 = vadd.f32 %v17229_v41, %v10664_v46  ;;  %v10920_v1 = vadd.f32 %v17229_v41, %v10668_v5  ;;  %v10924_v59 = vadd.f32 %v17229_v41, %v10672_v18 }
 0x1b1   :  { %v10928_v11 = vadd.f32 %v17229_v41, %v10676_v56  ;;  %v10932_v60 = vadd.f32 %v17229_v41, %v10680_v58  ;;  %v10936_v30 = vadd.f32 %v17229_v41, %v10684_v52  ;;  %v10940_v46 = vadd.f32 %v17229_v41, %v10688_v49 }
 0x1b2   :  { %v10944_v5 = vadd.f32 %v17229_v41, %v10692_v32  ;;  %v10948_v18 = vadd.f32 %v17229_v41, %v10696_v8  ;;  %v10952_v56 = vadd.f32 %v17229_v41, %v10700_v40  ;;  %v10956_v58 = vadd.f32 %v17229_v41, %v10704_v63 }
 0x1b3   :  { %v10960_v52 = vadd.f32 %v17229_v41, %v10708_v15  ;;  %v10964_v49 = vadd.f32 %v17229_v41, %v10712_v43  ;;  %v10968_v32 = vadd.f32 %v17229_v41, %v10716_v4  ;;  %v10972_v8 = vadd.f32 %v17229_v41, %v10720_v0 }
 0x1b4   :  { %v10976_v40 = vadd.f32 %v17229_v41, %v10724_v34  ;;  %v10980_v63 = vadd.f32 %v17229_v41, %v10728_v25  ;;  %v10984_v15 = vadd.f32 %v17229_v41, %v10732_v6  ;;  %v10988_v43 = vadd.f32 %v17229_v41, %v10736_v16 }
 0x1b5   :  { %v10992_v4 = vadd.f32 %v17229_v41, %v10740_v51  ;;  %v10996_v0 = vadd.f32 %v17229_v41, %v10744_v50  ;;  %v11000_v34 = vadd.f32 %v17229_v41, %v10748_v22  ;;  %v11004_v25 = vadd.f32 %v17229_v41, %v10752_v57 }
 0x1b6   :  { %v11008_v6 = vadd.f32 %v17229_v41, %v10756_v37  ;;  %v11012_v16 = vadd.f32 %v17229_v41, %v10760_v13  ;;  %v11016_v51 = vadd.f32 %v17229_v41, %v10764_v14  ;;  %v11020_v50 = vadd.f32 %v17229_v41, %v10768_v44 }
 0x1b7   :  { %v11024_v22 = vadd.f32 %v17229_v41, %v10772_v23  ;;  %v11028_v57 = vadd.f32 %v17229_v41, %v10776_v2  ;;  %v11032_v37 = vadd.f32 %v17229_v41, %v10780_v9  ;;  %v11036_v13 = vadd.f32 %v17229_v41, %v10784_v33 }
 0x1b8   :  { %v11040_v14 = vadd.f32 %v17229_v41, %v10788_v28  ;;  %v11044_v44 = vadd.f32 %v17229_v41, %v10792_v54  ;;  %v11048_v23 = vadd.f32 %v17229_v41, %v10796_v31  ;;  %v11052_v2 = vadd.f32 %v17229_v41, %v10800_v62  ;;  %v17234_v31 = vld [vmem:[#allocation49_spill] sm:$0xff] }
 0x1b9   :  { %v11056_v9 = vadd.f32 %v17229_v41, %v10804_v3  ;;  %v11060_v33 = vadd.f32 %v17229_v41, %v10808_v38  ;;  %v11064_v28 = vadd.f32 %v17229_v41, %v10812_v55  ;;  %v11068_v54 = vadd.f32 %v17229_v41, %v10816_v27 }
 0x1ba   :  { %17230 = vst [vmem:[#allocation59_spill] sm:$0xff] %v11052_v2  ;;  %v11072_v62 = vadd.f32 %v17229_v41, %v17234_v31  ;;  %v17235_v2 = vld [vmem:[#allocation51_spill] sm:$0xff]  ;;  %v11092_v31 = vadd.f32 %v17229_v41, %v10840_v7  ;;  %v11112_v7 = vadd.f32 %v17229_v41, %v10860_v61  ;;  %v1169_v61 = vmax.f32 %v10884_v29, 0.0 }
 0x1bb   :  { %17231 = vst [vmem:[#allocation63_spill] sm:$0xff] %v11056_v9  ;;  %17232 = vst [vmem:[#allocation53_spill] sm:$0xff] %v11060_v33  ;;  %v11076_v3 = vadd.f32 %v17229_v41, %v17235_v2  ;;  %v17236_v9 = vld [vmem:[#allocation48_spill] sm:$0xff]  ;;  %v17237_v33 = vld [vmem:[#allocation50_spill] sm:$0xff]  ;;  %v11096_v2 = vadd.f32 %v17229_v41, %v10844_v21  ;;  %v11116_v21 = vadd.f32 %v17229_v41, %v10864_v20  ;;  %v1171_v20 = vmax.f32 %v10892_v53, 0.0 }
 0x1bc   :  { %17233 = vst [vmem:[#allocation54_spill] sm:$0xff] %v11064_v28  ;;  %v11080_v38 = vadd.f32 %v17229_v41, %v17236_v9  ;;  %v11084_v55 = vadd.f32 %v17229_v41, %v17237_v33  ;;  %v17239_v28 = vld [vmem:[#allocation55_spill] sm:$0xff]  ;;  %v11100_v9 = vadd.f32 %v17229_v41, %v10848_v19  ;;  %v11104_v33 = vadd.f32 %v17229_v41, %v10852_v10 }
 0x1bd   :  { %v11088_v27 = vadd.f32 %v17229_v41, %v17239_v28  ;;  %17242 = vst [vmem:[#allocation58_spill] sm:$0xff] %v11112_v7  ;;  %17243 = vst [vmem:[#allocation61_spill] sm:$0xff] %v11116_v21  ;;  %v11120_v19 = vadd.f32 %v17229_v41, %v10868_v24  ;;  %v11124_v10 = vadd.f32 %v17229_v41, %v10872_v35  ;;  %v1170_v7 = vmax.f32 %v10888_v17, 0.0 }
 0x1be   :  { %17238 = vst [vmem:[#allocation57_spill] sm:$0xff] %v11084_v55  ;;  %v17240_v55 = vld [vmem:[#allocation52_spill] sm:$0xff]  ;;  %v1172_v21 = vmax.f32 %v10896_v42, 0.0  ;;  %v1173_v24 = vmax.f32 %v10900_v48, 0.0  ;;  %v1175_v35 = vmax.f32 %v10908_v45, 0.0  ;;  %1343 = vst.msk [vmem:[#allocation2 + $0x21] sm:$0xff] %vm562_vm1, %v1169_v61 }
 0x1bf   :  { %v11108_v28 = vadd.f32 %v17229_v41, %v17240_v55  ;;  %17244 = vst [vmem:[#allocation60_spill] sm:$0xff] %v11120_v19  ;;  %17245 = vst [vmem:[#allocation62_spill] sm:$0xff] %v11124_v10  ;;  %v11128_v55 = vadd.f32 %v17229_v41, %v10876_v47  ;;  %v1174_v19 = vmax.f32 %v10904_v26, 0.0  ;;  %v1176_v10 = vmax.f32 %v10912_v39, 0.0 }
 0x1c0   :  { %v1177_v41 = vmax.f32 %v10916_v12, 0.0  ;;  %v1178_v47 = vmax.f32 %v10920_v1, 0.0  ;;  %1344 = vst.msk [vmem:[#allocation2 + $0x31] sm:$0xff] %vm562_vm1, %v1170_v7  ;;  %v1180_v29 = vmax.f32 %v10928_v11, 0.0  ;;  %v1181_v17 = vmax.f32 %v10932_v60, 0.0  ;;  %1345 = vst.msk [vmem:[#allocation2 + $0x39] sm:$0xff] %vm562_vm1, %v1171_v20 }
 0x1c1   :  { %17241 = vst [vmem:[#allocation56_spill] sm:$0xff] %v11108_v28  ;;  %v1168_v28 = vmax.f32 %v10880_v36, 0.0  ;;  %v1179_v36 = vmax.f32 %v10924_v59, 0.0  ;;  %v1182_v53 = vmax.f32 %v10936_v30, 0.0  ;;  %1346 = vst.msk [vmem:[#allocation2 + $0x49] sm:$0xff] %vm562_vm1, %v1172_v21  ;;  %v1183_v42 = vmax.f32 %v10940_v46, 0.0 }
 0x1c2   :  { %1347 = vst.msk [vmem:[#allocation2 + $0x51] sm:$0xff] %vm562_vm1, %v1173_v24  ;;  %1348 = vst.msk [vmem:[#allocation2 + $0x61] sm:$0xff] %vm562_vm1, %v1174_v19  ;;  %v1184_v48 = vmax.f32 %v10944_v5, 0.0  ;;  %v1185_v26 = vmax.f32 %v10948_v18, 0.0  ;;  %v1186_v45 = vmax.f32 %v10952_v56, 0.0  ;;  %v1187_v39 = vmax.f32 %v10956_v58, 0.0 }
 0x1c3   :  { %1342 = vst.msk [vmem:[#allocation2 + $0x19] sm:$0xff] %vm562_vm1, %v1168_v28  ;;  %1349 = vst.msk [vmem:[#allocation2 + $0x69] sm:$0xff] %vm562_vm1, %v1175_v35  ;;  %v1188_v12 = vmax.f32 %v10960_v52, 0.0  ;;  %v1189_v1 = vmax.f32 %v10964_v49, 0.0  ;;  %v1190_v59 = vmax.f32 %v10968_v32, 0.0  ;;  %v1191_v11 = vmax.f32 %v10972_v8, 0.0 }
 0x1c4   :  { %1350 = vst.msk [vmem:[#allocation2 + $0x79] sm:$0xff] %vm562_vm1, %v1176_v10  ;;  %1351 = vst.msk [vmem:[#allocation2 + $0x81] sm:$0xff] %vm562_vm1, %v1177_v41  ;;  %v1192_v60 = vmax.f32 %v10976_v40, 0.0  ;;  %v1193_v30 = vmax.f32 %v10980_v63, 0.0  ;;  %v1194_v46 = vmax.f32 %v10984_v15, 0.0  ;;  %v1195_v5 = vmax.f32 %v10988_v43, 0.0 }
 0x1c5   :  { %1352 = vst.msk [vmem:[#allocation2 + $0x91] sm:$0xff] %vm562_vm1, %v1178_v47  ;;  %1353 = vst.msk [vmem:[#allocation2 + $0x99] sm:$0xff] %vm562_vm1, %v1179_v36  ;;  %v1196_v18 = vmax.f32 %v10992_v4, 0.0  ;;  %v1197_v56 = vmax.f32 %v10996_v0, 0.0  ;;  %v1198_v58 = vmax.f32 %v11000_v34, 0.0  ;;  %v1199_v52 = vmax.f32 %v11004_v25, 0.0 }
 0x1c6   :  { %1354 = vst.msk [vmem:[#allocation2 + $0xa9] sm:$0xff] %vm562_vm1, %v1180_v29  ;;  %1355 = vst.msk [vmem:[#allocation2 + $0xb1] sm:$0xff] %vm562_vm1, %v1181_v17  ;;  %v1200_v49 = vmax.f32 %v11008_v6, 0.0  ;;  %v1201_v32 = vmax.f32 %v11012_v16, 0.0  ;;  %v1202_v8 = vmax.f32 %v11016_v51, 0.0  ;;  %v1203_v40 = vmax.f32 %v11020_v50, 0.0 }
 0x1c7   :  { %1356 = vst.msk [vmem:[#allocation2 + $0xc1] sm:$0xff] %vm562_vm1, %v1182_v53  ;;  %1357 = vst.msk [vmem:[#allocation2 + $0xc9] sm:$0xff] %vm562_vm1, %v1183_v42  ;;  %v1204_v63 = vmax.f32 %v11024_v22, 0.0  ;;  %v1205_v15 = vmax.f32 %v11028_v57, 0.0  ;;  %v1206_v43 = vmax.f32 %v11032_v37, 0.0  ;;  %v1207_v4 = vmax.f32 %v11036_v13, 0.0 }
 0x1c8   :  { %1358 = vst.msk [vmem:[#allocation2 + $0xd9] sm:$0xff] %vm562_vm1, %v1184_v48  ;;  %1359 = vst.msk [vmem:[#allocation2 + $0xe1] sm:$0xff] %vm562_vm1, %v1185_v26  ;;  %v1208_v0 = vmax.f32 %v11040_v14, 0.0  ;;  %v1209_v34 = vmax.f32 %v11044_v44, 0.0  ;;  %v1210_v25 = vmax.f32 %v11048_v23, 0.0  ;;  %v17246_v6 = vld [vmem:[#allocation59_spill] sm:$0xff] }
 0x1c9   :  { %1360 = vst.msk [vmem:[#allocation2 + $0xf1] sm:$0xff] %vm562_vm1, %v1186_v45  ;;  %1361 = vst.msk [vmem:[#allocation2 + $0xf9] sm:$0xff] %vm562_vm1, %v1187_v39  ;;  %v1211_v16 = vmax.f32 %v17246_v6, 0.0  ;;  %v17247_v51 = vld [vmem:[#allocation63_spill] sm:$0xff]  ;;  %v17248_v22 = vld [vmem:[#allocation53_spill] sm:$0xff]  ;;  %v1215_v14 = vmax.f32 %v11068_v54, 0.0 }
 0x1ca   :  { %1362 = vst.msk [vmem:[#allocation2 + $0x109] sm:$0xff] %vm562_vm1, %v1188_v12  ;;  %1363 = vst.msk [vmem:[#allocation2 + $0x111] sm:$0xff] %vm562_vm1, %v1189_v1  ;;  %v1212_v50 = vmax.f32 %v17247_v51, 0.0  ;;  %v1213_v57 = vmax.f32 %v17248_v22, 0.0  ;;  %v17249_v37 = vld [vmem:[#allocation54_spill] sm:$0xff]  ;;  %v1216_v44 = vmax.f32 %v11072_v62, 0.0 }
 0x1cb   :  { %1364 = vst.msk [vmem:[#allocation2 + $0x121] sm:$0xff] %vm562_vm1, %v1190_v59  ;;  %1365 = vst.msk [vmem:[#allocation2 + $0x129] sm:$0xff] %vm562_vm1, %v1191_v11  ;;  %v1214_v13 = vmax.f32 %v17249_v37, 0.0  ;;  %v1217_v23 = vmax.f32 %v11076_v3, 0.0  ;;  %v1218_v28 = vmax.f32 %v11080_v38, 0.0  ;;  %v11224_v7 = vld [vmem:[#allocation2 + $0x78] sm:$0xff] }
 0x1cc   :  { %1366 = vst.msk [vmem:[#allocation2 + $0x139] sm:$0xff] %vm562_vm1, %v1192_v60  ;;  %1367 = vst.msk [vmem:[#allocation2 + $0x141] sm:$0xff] %vm562_vm1, %v1193_v30  ;;  %v11226_v21 = vld [vmem:[#allocation2 + $0x80] sm:$0xff]  ;;  %v17250_v19 = vld [vmem:[#allocation57_spill] sm:$0xff]  ;;  %v1220_v62 = vmax.f32 %v11088_v27, 0.0  ;;  %v1221_v3 = vmax.f32 %v11092_v31, 0.0 }
 0x1cd   :  { %1368 = vst.msk [vmem:[#allocation2 + $0x151] sm:$0xff] %vm562_vm1, %v1194_v46  ;;  %1369 = vst.msk [vmem:[#allocation2 + $0x159] sm:$0xff] %vm562_vm1, %v1195_v5  ;;  %v1219_v54 = vmax.f32 %v17250_v19, 0.0  ;;  %v1222_v38 = vmax.f32 %v11096_v2, 0.0  ;;  %v1732_v10 = vld [vmem:[#allocation2 + $0x62] sm:$0xff]  ;;  %v1733_v61 = vld [vmem:[#allocation2 + $0x6a] sm:$0xff]  ;;  %v11258_v53 = vpack.i.bf16 %v11226_v21, %v11224_v7 }
 0x1ce   :  { %1370 = vst.msk [vmem:[#allocation2 + $0x169] sm:$0xff] %vm562_vm1, %v1196_v18  ;;  %1371 = vst.msk [vmem:[#allocation2 + $0x171] sm:$0xff] %vm562_vm1, %v1197_v56  ;;  %v1223_v20 = vmax.f32 %v11100_v9, 0.0  ;;  %v1224_v24 = vmax.f32 %v11104_v33, 0.0  ;;  %v17251_v35 = vld [vmem:[#allocation56_spill] sm:$0xff]  ;;  %v17252_v41 = vld [vmem:[#allocation58_spill] sm:$0xff] }
 0x1cf   :  { %1372 = vst.msk [vmem:[#allocation2 + $0x181] sm:$0xff] %vm562_vm1, %v1198_v58  ;;  %1373 = vst.msk [vmem:[#allocation2 + $0x189] sm:$0xff] %vm562_vm1, %v1199_v52  ;;  %v1225_v27 = vmax.f32 %v17251_v35, 0.0  ;;  %v1226_v31 = vmax.f32 %v17252_v41, 0.0  ;;  %v17253_v2 = vld [vmem:[#allocation61_spill] sm:$0xff]  ;;  %v17254_v36 = vld [vmem:[#allocation60_spill] sm:$0xff]  ;;  %8079 = vrot.lane.b32.xlu1 %v11258_v53, %s9063_s18 }
 0x1d0   :  { %1374 = vst.msk [vmem:[#allocation2 + $0x1c9] sm:$0xff] %vm562_vm1, %v1200_v49  ;;  %1375 = vst.msk [vmem:[#allocation2 + $0x1d1] sm:$0xff] %vm562_vm1, %v1201_v32  ;;  %v1227_v47 = vmax.f32 %v17253_v2, 0.0  ;;  %v1228_v29 = vmax.f32 %v17254_v36, 0.0  ;;  %v17255_v17 = vld [vmem:[#allocation62_spill] sm:$0xff]  ;;  %v1231_v33 = vmax.f32 %v11128_v55, 0.0  ;;  %v8068_v55 = vpack.i.bf16 %v1733_v61, %v1732_v10 }
 0x1d1   :  { %1376 = vst.msk [vmem:[#allocation2 + $0x1e1] sm:$0xff] %vm562_vm1, %v1202_v8  ;;  %1377 = vst.msk [vmem:[#allocation2 + $0x1e9] sm:$0xff] %vm562_vm1, %v1203_v40  ;;  %v1230_v9 = vmax.f32 %v17255_v17, 0.0  ;;  %v1540_v42 = vld [vmem:[#allocation2 + $0x4a] sm:$0xff]  ;;  %v8997_v48 = vld [vmem:[%s16785_s4 + $0x38] sm:$0xff]   ;;  %v9065_v12 = vmov 0  }
 0x1d2   :  { %1378 = vst.msk [vmem:[#allocation2 + $0x1f9] sm:$0xff] %vm562_vm1, %v1204_v63  ;;  %1379 = vst.msk [vmem:[#allocation2 + $0x201] sm:$0xff] %vm562_vm1, %v1205_v15  ;;  %v1541_v26 = vld [vmem:[#allocation2 + $0x52] sm:$0xff]  ;;  %v1476_v45 = vld [vmem:[#allocation2 + $0x49] sm:$0xff]  ;;  %8069 = vrot.lane.b32.xlu0 %v8068_v55, %s9062_s0  ;;  %7993 = vmatprep.subr.bf16.mxu1 %v9065_v12 }
 0x1d3   :  { %1380 = vst.msk [vmem:[#allocation2 + $0x211] sm:$0xff] %vm562_vm1, %v1206_v43  ;;  %1381 = vst.msk [vmem:[#allocation2 + $0x219] sm:$0xff] %vm562_vm1, %v1207_v4  ;;  %v1477_v39 = vld [vmem:[#allocation2 + $0x51] sm:$0xff]  ;;  %4240 = vmatprep.subr.bf16.mxu0 %v9065_v12  ;;  %v8083_v1 = vpack.i.bf16 %v1541_v26, %v1540_v42  ;;  %v11274_v11 = vld [vmem:[#allocation2 + $0x60] sm:$0xff]  ;;  %8009 = vmatpush1.bf16.msra.mxu1 %v8997_v48 }
 0x1d4   :  { %1382 = vst.msk [vmem:[#allocation2 + $0x229] sm:$0xff] %vm562_vm1, %v1208_v0  ;;  %1383 = vst.msk [vmem:[#allocation2 + $0x231] sm:$0xff] %vm562_vm1, %v1209_v34  ;;  %v11272_v59 = vpack.i.bf16 %v1477_v39, %v1476_v45  ;;  %v8998_v60 = vld [vmem:[%s16785_s4 + $0x30] sm:$0xff]   ;;  %v11279_v30 = vld [vmem:[#allocation2 + $0x68] sm:$0xff]  ;;  %7994 = vmatprep.subr.bf16.mxu1 %v9065_v12  ;;  %4241 = vmatpush1.bf16.msra.mxu0 %v8997_v48 }
 0x1d5   :  { %1384 = vst.msk [vmem:[#allocation2 + $0x241] sm:$0xff] %vm562_vm1, %v1210_v25  ;;  %1385 = vst.msk [vmem:[#allocation2 + $0x249] sm:$0xff] %vm562_vm1, %v1211_v16  ;;  %v11281_v46 = vld [vmem:[#allocation2 + $0x79] sm:$0xff]  ;;  %v11283_v5 = vld [vmem:[#allocation2 + $0x81] sm:$0xff]  ;;  %8084 = vrot.lane.b32.xlu1 %v8083_v1, %s9063_s18  ;;  %4242 = vmatprep.subr.bf16.mxu0 %v9065_v12  ;;  %v8093_v18 = vpack.i.bf16 %v11279_v30, %v11274_v11 }
 0x1d6   :  { %1386 = vst.msk [vmem:[#allocation2 + $0x259] sm:$0xff] %vm562_vm1, %v1212_v50  ;;  %1387 = vst.msk [vmem:[#allocation2 + $0x261] sm:$0xff] %vm562_vm1, %v1213_v57  ;;  %8074 = vrot.lane.b32.xlu0 %v11272_v59, %s9062_s0  ;;  %v8088_v56 = vpack.i.bf16 %v11283_v5, %v11281_v46  ;;  %v11294_v58 = vld [vmem:[#allocation2 + $0x61] sm:$0xff]  ;;  %v11299_v49 = vld [vmem:[#allocation2 + $0x69] sm:$0xff] }
 0x1d7   :  { %1388 = vst.msk [vmem:[#allocation2 + $0x271] sm:$0xff] %vm562_vm1, %v1214_v13  ;;  %1389 = vst.msk [vmem:[#allocation2 + $0x279] sm:$0xff] %vm562_vm1, %v1215_v14  ;;  %8010 = vmatpush1.bf16.msra.mxu1 %v8998_v60  ;;  %v8999_v52 = vld [vmem:[%s16785_s4 + $0x28] sm:$0xff]   ;;  %v1734_v32 = vld [vmem:[#allocation2 + $0x7a] sm:$0xff]  ;;  %v8103_v40 = vpack.i.bf16 %v11299_v49, %v11294_v58 }
 0x1d8   :  { %1390 = vst.msk [vmem:[#allocation2 + $0x289] sm:$0xff] %vm562_vm1, %v1216_v44  ;;  %1391 = vst.msk [vmem:[#allocation2 + $0x291] sm:$0xff] %vm562_vm1, %v1217_v23  ;;  %v1735_v8 = vld [vmem:[#allocation2 + $0x82] sm:$0xff]  ;;  %7995 = vmatprep.subr.bf16.mxu1 %v9065_v12  ;;  %4243 = vmatpush1.bf16.msra.mxu0 %v8998_v60  ;;  %v11310_v43 = vld [vmem:[#allocation2 + $0x90] sm:$0xff] }
 0x1d9   :  { %1392 = vst.msk [vmem:[#allocation2 + $0x2a1] sm:$0xff] %vm562_vm1, %v1218_v28  ;;  %1393 = vst.msk [vmem:[#allocation2 + $0x2a9] sm:$0xff] %vm562_vm1, %v1219_v54  ;;  %8094 = vrot.lane.b32.xlu1 %v8093_v18, %s9064_s19  ;;  %4244 = vmatprep.subr.bf16.mxu0 %v9065_v12  ;;  %v8098_v63 = vpack.i.bf16 %v1735_v8, %v1734_v32  ;;  %v9000_v15 = vld [vmem:[%s16785_s4 + $0x20] sm:$0xff]   ;;  %v11312_v4 = vld [vmem:[#allocation2 + $0x98] sm:$0xff] }
 0x1da   :  { %1394 = vst.msk [vmem:[#allocation2 + $0x2b9] sm:$0xff] %vm562_vm1, %v1220_v62  ;;  %1395 = vst.msk [vmem:[#allocation2 + $0x2c1] sm:$0xff] %vm562_vm1, %v1221_v3  ;;  %8089 = vrot.lane.b32.xlu0 %v8088_v56, %s9064_s19  ;;  %v8108_v0 = vpack.i.bf16 %v11312_v4, %v11310_v43  ;;  %v9001_v34 = vld [vmem:[%s16785_s4 + $0x18] sm:$0xff]   ;;  %v9002_v51 = vld [vmem:[%s16785_s4 + $0x10] sm:$0xff]  }
 0x1db   :  { %1396 = vst.msk [vmem:[#allocation2 + $0x2d1] sm:$0xff] %vm562_vm1, %v1222_v38  ;;  %1397 = vst.msk [vmem:[#allocation2 + $0x2d9] sm:$0xff] %vm562_vm1, %v1223_v20  ;;  %8011 = vmatpush1.bf16.msra.mxu1 %v8999_v52  ;;  %v11323_v25 = vld [vmem:[#allocation2 + $0x91] sm:$0xff]  ;;  %v11325_v6 = vld [vmem:[#allocation2 + $0x99] sm:$0xff] }
 0x1dc   :  { %1398 = vst.msk [vmem:[#allocation2 + $0x2e9] sm:$0xff] %vm562_vm1, %v1224_v24  ;;  %1399 = vst.msk [vmem:[#allocation2 + $0x2f1] sm:$0xff] %vm562_vm1, %v1225_v27  ;;  %7996 = vmatprep.subr.bf16.mxu1 %v9065_v12  ;;  %4245 = vmatpush1.bf16.msra.mxu0 %v8999_v52  ;;  %v8118_v16 = vpack.i.bf16 %v11325_v6, %v11323_v25  ;;  %v1736_v50 = vld [vmem:[#allocation2 + $0x92] sm:$0xff]  ;;  %v1737_v22 = vld [vmem:[#allocation2 + $0x9a] sm:$0xff] }
 0x1dd   :  { %1400 = vst.msk [vmem:[#allocation2 + $0x301] sm:$0xff] %vm562_vm1, %v1226_v31  ;;  %1401 = vst.msk [vmem:[#allocation2 + $0x309] sm:$0xff] %vm562_vm1, %v1227_v47  ;;  %8104 = vrot.lane.b32.xlu1 %v8103_v40, %s9062_s0  ;;  %4246 = vmatprep.subr.bf16.mxu0 %v9065_v12  ;;  %v8128_v57 = vpack.i.bf16 %v1737_v22, %v1736_v50  ;;  %v9003_v37 = vld [vmem:[%s16785_s4 + $0x8] sm:$0xff]   ;;  %v1802_v14 = vld [vmem:[#allocation2 + $0xb0] sm:$0xff] }
 0x1de   :  { %1402 = vst.msk [vmem:[#allocation2 + $0x319] sm:$0xff] %vm562_vm1, %v1228_v29  ;;  %1404 = vst.msk [vmem:[#allocation2 + $0x331] sm:$0xff] %vm562_vm1, %v1230_v9  ;;  %8099 = vrot.lane.b32.xlu0 %v8098_v63, %s9062_s0  ;;  %v1801_v13 = vld [vmem:[#allocation2 + $0xa8] sm:$0xff]  ;;  %v9004_v23 = vld [vmem:[%s16785_s4] sm:$0xff]  }
 0x1df   :  { %1405 = vst.msk [vmem:[#allocation2 + $0x339] sm:$0xff] %vm562_vm1, %v1231_v33  ;;  %8012 = vmatpush1.bf16.msra.mxu1 %v9000_v15  ;;  %v8138_v44 = vpack.i.bf16 %v1802_v14, %v1801_v13  ;;  %v11351_v28 = vld [vmem:[#allocation2 + $0xa9] sm:$0xff]  ;;  %v11353_v19 = vld [vmem:[#allocation2 + $0xb1] sm:$0xff]  ;;  %v1803_v20 = vld [vmem:[#allocation2 + $0xc0] sm:$0xff] }
 0x1e0   :  { %7997 = vmatprep.subr.bf16.mxu1 %v9065_v12  ;;  %4247 = vmatpush1.bf16.msra.mxu0 %v9000_v15  ;;  %v8148_v54 = vpack.i.bf16 %v11353_v19, %v11351_v28  ;;  %v9005_v62 = vld [vmem:[%s16785_s4 + $0x78] sm:$0xff]   ;;  %v1738_v3 = vld [vmem:[#allocation2 + $0xaa] sm:$0xff]  ;;  %v11378_v41 = vld [vmem:[#allocation2 + $0xc1] sm:$0xff] }
 0x1e1   :  { %8114 = vrot.lane.b32.xlu1 %v8068_v55, %s9063_s18  ;;  %4248 = vmatprep.subr.bf16.mxu0 %v9065_v12  ;;  %v1739_v38 = vld [vmem:[#allocation2 + $0xb2] sm:$0xff]  ;;  %v1804_v24 = vld [vmem:[#allocation2 + $0xc8] sm:$0xff]  ;;  %v9008_v47 = vld [vmem:[%s16785_s4 + $0x60] sm:$0xff]  }
 0x1e2   :  { %8109 = vrot.lane.b32.xlu0 %v8108_v0, %s9063_s18  ;;  %v8158_v10 = vpack.i.bf16 %v1739_v38, %v1738_v3  ;;  %v9006_v61 = vld [vmem:[%s16785_s4 + $0x70] sm:$0xff]   ;;  %v8168_v35 = vpack.i.bf16 %v1804_v24, %v1803_v20  ;;  %v9007_v27 = vld [vmem:[%s16785_s4 + $0x68] sm:$0xff]   ;;  %v9009_v9 = vld [vmem:[%s16785_s4 + $0x58] sm:$0xff]  }
 0x1e3   :  { %8013 = vmatpush1.bf16.msra.mxu1 %v9001_v34  ;;  %v11380_v31 = vld [vmem:[#allocation2 + $0xc9] sm:$0xff]  ;;  %v1805_v33 = vld [vmem:[#allocation2 + $0xd8] sm:$0xff]  ;;  %v1870_v26 = vld [vmem:[#allocation2 + $0xe1] sm:$0xff] }
 0x1e4   :  { %7998 = vmatprep.subr.bf16.mxu1 %v9065_v12  ;;  %4249 = vmatpush1.bf16.msra.mxu0 %v9001_v34  ;;  %v8178_v2 = vpack.i.bf16 %v11380_v31, %v11378_v41  ;;  %v1740_v36 = vld [vmem:[#allocation2 + $0xc2] sm:$0xff]  ;;  %v1741_v29 = vld [vmem:[#allocation2 + $0xca] sm:$0xff]  ;;  %v1869_v48 = vld [vmem:[#allocation2 + $0xd9] sm:$0xff] }
 0x1e5   :  { %8124 = vrot.lane.b32.xlu1 %v11258_v53, %s9064_s19  ;;  %4250 = vmatprep.subr.bf16.mxu0 %v9065_v12  ;;  %v8188_v17 = vpack.i.bf16 %v1741_v29, %v1740_v36  ;;  %v1806_v53 = vld [vmem:[#allocation2 + $0xe0] sm:$0xff]  ;;  %v9010_v42 = vld [vmem:[%s16785_s4 + $0x50] sm:$0xff]   ;;  %v8208_v45 = vpack.i.bf16 %v1870_v26, %v1869_v48  ;;  %v9011_v39 = vld [vmem:[%s16785_s4 + $0x48] sm:$0xff]  }
 0x1e6   :  { %8119 = vrot.lane.b32.xlu0 %v8118_v16, %s9064_s19  ;;  %v8198_v55 = vpack.i.bf16 %v1806_v53, %v1805_v33  ;;  %v1742_v1 = vld [vmem:[#allocation2 + $0xda] sm:$0xff]  ;;  %v1743_v60 = vld [vmem:[#allocation2 + $0xe2] sm:$0xff]  ;;  %v1807_v52 = vld [vmem:[#allocation2 + $0xf0] sm:$0xff]  ;;  %v11461_v53 = vpop.permute.xlu0 %8034 }
 0x1e7   :  { %8014 = vmatpush1.bf16.msra.mxu1 %v9002_v51  ;;  %v8218_v18 = vpack.i.bf16 %v1743_v60, %v1742_v1  ;;  %v1808_v32 = vld [vmem:[#allocation2 + $0xf8] sm:$0xff]  ;;  %v1810_v50 = vld [vmem:[#allocation2 + $0x110] sm:$0xff]  ;;  %v11469_v1 = vpop.permute.xlu1 %8039 }
 0x1e8   :  { %7999 = vmatprep.subr.bf16.mxu1 %v9065_v12  ;;  %4251 = vmatpush1.bf16.msra.mxu0 %v9002_v51  ;;  %v8228_v8 = vpack.i.bf16 %v1808_v32, %v1807_v52  ;;  %v1871_v40 = vld [vmem:[#allocation2 + $0xf1] sm:$0xff]  ;;  %v1745_v34 = vld [vmem:[#allocation2 + $0xfa] sm:$0xff]  ;;  %v1873_v13 = vld [vmem:[#allocation2 + $0x109] sm:$0xff] }
 0x1e9   :  { %8134 = vrot.lane.b32.xlu1 %v8088_v56, %s9062_s0  ;;  %4252 = vmatprep.subr.bf16.mxu0 %v9065_v12  ;;  %v9012_v56 = vld [vmem:[%s16785_s4 + $0x40] sm:$0xff]   ;;  %v11427_v51 = vld [vmem:[#allocation2 + $0x2d2] sm:$0xff]  ;;  %v1746_v3 = vld [vmem:[#allocation2 + $0x10a] sm:$0xff] }
 0x1ea   :  { %8129 = vrot.lane.b32.xlu0 %v8128_v57, %s9062_s0  ;;  %v11429_v22 = vld [vmem:[#allocation2 + $0x2da] sm:$0xff]  ;;  %v1874_v14 = vld [vmem:[#allocation2 + $0x111] sm:$0xff] }
 0x1eb   :  { %8015 = vmatpush1.bf16.msra.mxu1 %v9003_v37  ;;  %v1747_v38 = vld [vmem:[#allocation2 + $0x112] sm:$0xff] }
 0x1ec   :  { %8000 = vmatprep.subr.bf16.mxu1 %v9065_v12  ;;  %4253 = vmatpush1.bf16.msra.mxu0 %v9003_v37  ;;  %v8278_v20 = vpack.i.bf16 %v1747_v38, %v1746_v3  ;;  %v1813_v26 = vld [vmem:[#allocation2 + $0x138] sm:$0xff] }
 0x1ed   :  { %8144 = vrot.lane.b32.xlu1 %v8098_v63, %s9063_s18  ;;  %4254 = vmatprep.subr.bf16.mxu0 %v9065_v12  ;;  %v1872_v63 = vld [vmem:[#allocation2 + $0xf9] sm:$0xff] }
 0x1ee   :  { %8139 = vrot.lane.b32.xlu0 %v8138_v44, %s9063_s18  ;;  %v8238_v15 = vpack.i.bf16 %v1872_v63, %v1871_v40  ;;  %v1751_v40 = vld [vmem:[#allocation2 + $0x142] sm:$0xff]  ;;  %v11477_v63 = vpop.permute.xlu1 %8054 }
 0x1ef   :  { %8016 = vmatpush1.bf16.msra.mxu1 %v9004_v23 }
 0x1f0   :  { %8001 = vmatprep.subr.bf16.mxu1 %v9065_v12  ;;  %4255 = vmatpush1.bf16.msra.mxu0 %v9004_v23  ;;  %v11437_v23 = vld [vmem:[#allocation2 + $0x2f2] sm:$0xff] }
 0x1f1   :  { %8154 = vrot.lane.b32.xlu1 %v8108_v0, %s9064_s19  ;;  %4256 = vmatprep.subr.bf16.mxu0 %v9065_v12  ;;  %v1744_v0 = vld [vmem:[#allocation2 + $0xf2] sm:$0xff] }
 0x1f2   :  { %8149 = vrot.lane.b32.xlu0 %v8148_v54, %s9064_s19 }
 0x1f3   :  { %8017 = vmatpush2.bf16.msra.mxu1 %v9005_v62 }
 0x1f4   :  { %8002 = vmatprep.subr.bf16.mxu1 %v9065_v12  ;;  %4257 = vmatpush2.bf16.msra.mxu0 %v9005_v62  ;;  %v8268_v62 = vpack.i.bf16 %v1874_v14, %v1873_v13  ;;  %v1879_v13 = vld [vmem:[#allocation2 + $0x151] sm:$0xff]  ;;  %v1880_v14 = vld [vmem:[#allocation2 + $0x159] sm:$0xff] }
 0x1f5   :  { %8164 = vrot.lane.b32.xlu1 %v8118_v16, %s9062_s0  ;;  %4258 = vmatprep.subr.bf16.mxu0 %v9065_v12  ;;  %v8248_v16 = vpack.i.bf16 %v1745_v34, %v1744_v0  ;;  %v1815_v0 = vld [vmem:[#allocation2 + $0x150] sm:$0xff]  ;;  %v1816_v34 = vld [vmem:[#allocation2 + $0x158] sm:$0xff] }
 0x1f6   :  { %8159 = vrot.lane.b32.xlu0 %v8158_v10, %s9062_s0 }
 0x1f7   :  { %8018 = vmatpush2.bf16.msra.mxu1 %v9006_v61 }
 0x1f8   :  { %8003 = vmatprep.subr.bf16.mxu1 %v9065_v12  ;;  %4259 = vmatpush2.bf16.msra.mxu0 %v9006_v61  ;;  %v11447_v61 = vld [vmem:[#allocation2 + $0x30a] sm:$0xff] }
 0x1f9   :  { %8174 = vrot.lane.b32.xlu1 %v8128_v57, %s9063_s18  ;;  %4260 = vmatprep.subr.bf16.mxu0 %v9065_v12  ;;  %v1752_v57 = vld [vmem:[#allocation2 + $0x152] sm:$0xff] }
 0x1fa   :  { %8169 = vrot.lane.b32.xlu0 %v8168_v35, %s9063_s18 }
 0x1fb   :  { %8019 = vmatpush2.bf16.msra.mxu1 %v9007_v27 }
 0x1fc   :  { %8004 = vmatprep.subr.bf16.mxu1 %v9065_v12  ;;  %4261 = vmatpush2.bf16.msra.mxu0 %v9007_v27  ;;  %v1812_v27 = vld [vmem:[#allocation2 + $0x128] sm:$0xff] }
 0x1fd   :  { %8184 = vrot.lane.b32.xlu1 %v8138_v44, %s9064_s19  ;;  %4262 = vmatprep.subr.bf16.mxu0 %v9065_v12  ;;  %v11435_v44 = vld [vmem:[#allocation2 + $0x2ea] sm:$0xff] }
 0x1fe   :  { %8179 = vrot.lane.b32.xlu0 %v8178_v2, %s9064_s19 }
 0x1ff   :  { %8020 = vmatpush2.bf16.msra.mxu1 %v9008_v47 }
 0x200   :  { %8005 = vmatprep.subr.bf16.mxu1 %v9065_v12  ;;  %4263 = vmatpush2.bf16.msra.mxu0 %v9008_v47  ;;  %v11455_v47 = vld [vmem:[#allocation2 + $0x31a] sm:$0xff] }
 0x201   :  { %8194 = vrot.lane.b32.xlu1 %v8148_v54, %s9062_s0  ;;  %4264 = vmatprep.subr.bf16.mxu0 %v9065_v12 }
 0x202   :  { %8189 = vrot.lane.b32.xlu0 %v8188_v17, %s9062_s0 }
 0x203   :  { %8021 = vmatpush2.bf16.msra.mxu1 %v9009_v9 }
 0x204   :  { %8006 = vmatprep.subr.bf16.mxu1 %v9065_v12  ;;  %4265 = vmatpush2.bf16.msra.mxu0 %v9009_v9  ;;  %v1876_v9 = vld [vmem:[#allocation2 + $0x129] sm:$0xff] }
 0x205   :  { %8204 = vrot.lane.b32.xlu1 %v8158_v10, %s9063_s18  ;;  %4266 = vmatprep.subr.bf16.mxu0 %v9065_v12  ;;  %v11445_v10 = vld [vmem:[#allocation2 + $0x302] sm:$0xff] }
 0x206   :  { %8199 = vrot.lane.b32.xlu0 %v8198_v55, %s9063_s18 }
 0x207   :  { %8022 = vmatpush2.bf16.msra.mxu1 %v9010_v42 }
 0x208   :  { %8007 = vmatprep.subr.bf16.mxu1 %v9065_v12  ;;  %4267 = vmatpush2.bf16.msra.mxu0 %v9010_v42  ;;  %v1749_v42 = vld [vmem:[#allocation2 + $0x12a] sm:$0xff] }
 0x209   :  { %8214 = vrot.lane.b32.xlu1 %v8168_v35, %s9064_s19  ;;  %4268 = vmatprep.subr.bf16.mxu0 %v9065_v12  ;;  %v1811_v35 = vld [vmem:[#allocation2 + $0x120] sm:$0xff] }
 0x20a   :  { %8209 = vrot.lane.b32.xlu0 %v8208_v45, %s9064_s19  ;;  %v8288_v36 = vpack.i.bf16 %v1812_v27, %v1811_v35 }
 0x20b   :  { %8023 = vmatpush2.bf16.msra.mxu1 %v9011_v39 }
 0x20c   :  { %8008 = vmatprep.subr.bf16.mxu1 %v9065_v12  ;;  %4269 = vmatpush2.bf16.msra.mxu0 %v9011_v39  ;;  %v11467_v39 = vpop.permute.xlu0 %8044 }
 0x20d   :  { %8224 = vrot.lane.b32.xlu1 %v8178_v2, %s9062_s0  ;;  %4270 = vmatprep.subr.bf16.mxu0 %v9065_v12  ;;  %v1809_v12 = vld [vmem:[#allocation2 + $0x108] sm:$0xff] }
 0x20e   :  { %8219 = vrot.lane.b32.xlu0 %v8218_v18, %s9062_s0  ;;  %v8258_v37 = vpack.i.bf16 %v1810_v50, %v1809_v12  ;;  %v11451_v2 = vld [vmem:[#allocation2 + $0x322] sm:$0xff]  ;;  %v11489_v12 = vpop.permute.xlu1 %8059  ;;  %v11491_v50 = vpack.i.bf16 %v1816_v34, %v1815_v0 }
 0x20f   :  { %8024 = vmatpush2.bf16.msra.mxu1 %v9012_v56 }
 0x210   :  { %4271 = vmatpush2.bf16.msra.mxu0 %v9012_v56  ;;  %v1878_v56 = vld [vmem:[#allocation2 + $0x141] sm:$0xff]  ;;  %v11475_v32 = vpop.permute.xlu0 %8049 }
 0x211   :  { %8234 = vrot.lane.b32.xlu1 %v8188_v17, %s9063_s18  ;;  %v1875_v17 = vld [vmem:[#allocation2 + $0x121] sm:$0xff] }
 0x212   :  { %8229 = vrot.lane.b32.xlu0 %v8228_v8, %s9063_s18  ;;  %v8298_v33 = vpack.i.bf16 %v1876_v9, %v1875_v17  ;;  %v1792_v17 = vld [vmem:[#allocation2 + $0x38] sm:$0xff] }
 0x215   :  { %8244 = vrot.lane.b32.xlu1 %v8198_v55, %s9064_s19  ;;  %v1748_v55 = vld [vmem:[#allocation2 + $0x122] sm:$0xff] }
 0x216   :  { %8239 = vrot.lane.b32.xlu0 %v8238_v15, %s9064_s19  ;;  %v8308_v48 = vpack.i.bf16 %v1749_v42, %v1748_v55 }
 0x219   :  { %8254 = vrot.lane.b32.xlu1 %v8208_v45, %s9062_s0  ;;  %v1814_v45 = vld [vmem:[#allocation2 + $0x140] sm:$0xff] }
 0x21a   :  { %8249 = vrot.lane.b32.xlu0 %v8248_v16, %s9062_s0  ;;  %v8318_v60 = vpack.i.bf16 %v1814_v45, %v1813_v26  ;;  %v1855_v26 = vld [vmem:[#allocation2 + $0x31] sm:$0xff] }
 0x21d   :  { %8264 = vrot.lane.b32.xlu1 %v8218_v18, %s9063_s18  ;;  %v1877_v18 = vld [vmem:[#allocation2 + $0x139] sm:$0xff] }
 0x21e   :  { %8259 = vrot.lane.b32.xlu0 %v8258_v37, %s9063_s18  ;;  %v11473_v52 = vpack.i.bf16 %v1878_v56, %v1877_v18  ;;  %v1856_v56 = vld [vmem:[#allocation2 + $0x39] sm:$0xff] }
 0x221   :  { %8274 = vrot.lane.b32.xlu1 %v8228_v8, %s9064_s19  ;;  %v1750_v8 = vld [vmem:[#allocation2 + $0x13a] sm:$0xff] }
 0x222   :  { %8269 = vrot.lane.b32.xlu0 %v8268_v62, %s9064_s19 }
 0x225   :  { %8284 = vrot.lane.b32.xlu1 %v8238_v15, %s9062_s0  ;;  %v11482_v15 = vpack.i.bf16 %v1751_v40, %v1750_v8  ;;  %v1598_v8 = vld [vmem:[#allocation2 + $0x18] sm:$0xff]  ;;  %v1599_v40 = vld [vmem:[#allocation2 + $0x20] sm:$0xff] }
 0x226   :  { %8279 = vrot.lane.b32.xlu0 %v8278_v20, %s9062_s0 }
 0x229   :  { %8294 = vrot.lane.b32.xlu1 %v8248_v16, %s9063_s18  ;;  %v11487_v16 = vpop.permute.xlu0 %8064 }
 0x22a   :  { %8289 = vrot.lane.b32.xlu0 %v8288_v36, %s9063_s18  ;;  %17256 = vst [vmem:[#allocation65_spill] sm:$0xff] %v11487_v16  ;;  %v1817_v16 = vld [vmem:[#allocation2 + $0x168] sm:$0xff] }
 0x22d   :  { %8304 = vrot.lane.b32.xlu1 %v8258_v37, %s9064_s19  ;;  %v1726_v37 = vld [vmem:[#allocation2 + $0x1a] sm:$0xff] }
 0x22e   :  { %8299 = vrot.lane.b32.xlu0 %v8298_v33, %s9064_s19 }
 0x231   :  { %8314 = vrot.lane.b32.xlu1 %v8268_v62, %s9062_s0  ;;  %v1727_v62 = vld [vmem:[#allocation2 + $0x22] sm:$0xff] }
 0x232   :  { %8309 = vrot.lane.b32.xlu0 %v8308_v48, %s9062_s0  ;;  %v11498_v35 = vpack.i.bf16 %v1727_v62, %v1726_v37  ;;  %v11510_v62 = vld [vmem:[#allocation2 + $0x50] sm:$0xff] }
 0x235   :  { %8324 = vrot.lane.b32.xlu1 %v8278_v20, %s9063_s18  ;;  %v11496_v20 = vpack.i.bf16 %v1880_v14, %v1879_v13  ;;  %v11508_v14 = vld [vmem:[#allocation2 + $0x48] sm:$0xff] }
 0x236   :  { %8319 = vrot.lane.b32.xlu0 %v8318_v60, %s9063_s18 }
 0x239   :  { %8334 = vrot.lane.b32.xlu1 %v8288_v36, %s9064_s19  ;;  %v1791_v36 = vld [vmem:[#allocation2 + $0x30] sm:$0xff] }
 0x23a   :  { %8329 = vrot.lane.b32.xlu0 %v11473_v52, %s9064_s19 }
 0x23d   :  { %8344 = vrot.lane.b32.xlu1 %v8298_v33, %s9062_s0 }
 0x23e   :  { %8339 = vrot.lane.b32.xlu0 %v11482_v15, %s9062_s0 }
 0x241   :  { %8354 = vrot.lane.b32.xlu1 %v8308_v48, %s9063_s18  ;;  %v8080_v3 = vpop.permute.xlu1 %8079  ;;  %v11504_v48 = vpack.i.bf16 %v1792_v17, %v1791_v36  ;;  %v11521_v17 = vpack.i.bf16 %v1856_v56, %v1855_v26 }
 0x242   :  { %8349 = vrot.lane.b32.xlu0 %v11491_v50, %s9063_s18  ;;  %v8081_v33 = vunpack.i.l.bf16 %v8080_v3  ;;  %v8082_v34 = vunpack.i.h.bf16 %v8080_v3 }
 0x244   :  { %v8070_v38 = vpop.permute.xlu0 %8069 }
 0x245   :  { %v8071_v27 = vunpack.i.l.bf16 %v8070_v38  ;;  %8364 = vrot.lane.b32.xlu1 %v11496_v20, %s9064_s19  ;;  %v8072_v9 = vunpack.i.h.bf16 %v8070_v38 }
 0x246   :  { %8359 = vrot.lane.b32.xlu0 %v11498_v35, %s9062_s0 }
 0x247   :  { %v8085_v55 = vpop.permute.xlu1 %8084  ;;  %v3718_v0 = vsel %vm562_vm1, %v11294_v58, %v8071_v27  ;;  %v3719_v58 = vsel %vm562_vm1, %v11299_v49, %v8072_v9 }
 0x248   :  { %v8075_v42 = vpop.permute.xlu0 %8074  ;;  %v8087_v37 = vunpack.i.h.bf16 %v8085_v55  ;;  %v8086_v13 = vunpack.i.l.bf16 %v8085_v55  ;;  %v8383_v55 = vpack.i.bf16 %v1599_v40, %v1598_v8  ;;  %v3783_v49 = vsel %vm174_vm0, %v3719_v58, %v8082_v34  ;;  %v1818_v34 = vld [vmem:[#allocation2 + $0x170] sm:$0xff]  ;;  %v1729_v58 = vld [vmem:[#allocation2 + $0x3a] sm:$0xff] }
 0x249   :  { %v8077_v45 = vunpack.i.h.bf16 %v8075_v42  ;;  %v8076_v18 = vunpack.i.l.bf16 %v8075_v42  ;;  %8369 = vrot.lane.b32.xlu1 %v8318_v60, %s9064_s19  ;;  %v3782_v60 = vsel %vm174_vm0, %v3718_v0, %v8081_v33 }
 0x24a   :  { %8374 = vrot.lane.b32.xlu0 %v11504_v48, %s9063_s18 }
 0x24b   :  { %v3525_v38 = vsel %vm562_vm1, %v11508_v14, %v8076_v18  ;;  %v3526_v36 = vsel %vm562_vm1, %v11510_v62, %v8077_v45  ;;  %v8095_v3 = vpop.permute.xlu1 %8094  ;;  %v1753_v18 = vld [vmem:[#allocation2 + $0x15a] sm:$0xff] }
 0x24c   :  { %v8090_v27 = vpop.permute.xlu0 %8089  ;;  %v8097_v42 = vunpack.i.h.bf16 %v8095_v3  ;;  %v8096_v29 = vunpack.i.l.bf16 %v8095_v3  ;;  %v3589_v9 = vsel %vm174_vm0, %v3525_v38, %v8086_v13  ;;  %v3590_v26 = vsel %vm174_vm0, %v3526_v36, %v8087_v37 }
 0x24d   :  { %v8092_v24 = vunpack.i.h.bf16 %v8090_v27  ;;  %v8091_v54 = vunpack.i.l.bf16 %v8090_v27  ;;  %8384 = vrot.lane.b32.xlu1 %v8383_v55, %s9064_s19  ;;  %v11534_v27 = vpack.i.bf16 %v1753_v18, %v1752_v57 }
 0x24e   :  { %8379 = vrot.lane.b32.xlu0 %v11521_v17, %s9064_s19  ;;  %v3654_v56 = vsel %vm3647_vm3, %v3589_v9, %v8096_v29  ;;  %v3655_v8 = vsel %vm3647_vm3, %v3590_v26, %v8097_v42  ;;  %v1882_v42 = vld [vmem:[#allocation2 + $0x171] sm:$0xff] }
 0x24f   :  { %v3846_v45 = vsel %vm3647_vm3, %v3782_v60, %v8091_v54  ;;  %v3847_v33 = vsel %vm3647_vm3, %v3783_v49, %v8092_v24  ;;  %v8105_v40 = vpop.permute.xlu1 %8104  ;;  %v3949_v55 = vpack.c.bf16 %v3655_v8, %v3654_v56  ;;  %v11540_v54 = vpack.i.bf16 %v1818_v34, %v1817_v16  ;;  %v1728_v24 = vld [vmem:[#allocation2 + $0x32] sm:$0xff]  ;;  %v1881_v60 = vld [vmem:[#allocation2 + $0x169] sm:$0xff] }
 0x250   :  { %v8100_v0 = vpop.permute.xlu0 %8099  ;;  %v3950_v3 = vpack.c.bf16 %v3847_v33, %v3846_v45  ;;  %v8107_v29 = vunpack.i.h.bf16 %v8105_v40  ;;  %v8106_v37 = vunpack.i.l.bf16 %v8105_v40  ;;  %v11548_v16 = vpack.i.bf16 %v1882_v42, %v1881_v60 }
 0x251   :  { %8394 = vrot.lane.b32.xlu1 %v11473_v52, %s9062_s0  ;;  %v8102_v13 = vunpack.i.h.bf16 %v8100_v0  ;;  %v8101_v38 = vunpack.i.l.bf16 %v8100_v0  ;;  %v11546_v52 = vpack.i.bf16 %v1729_v58, %v1728_v24  ;;  %v11558_v24 = vld [vmem:[#allocation2 + $0x19] sm:$0xff] }
 0x252   :  { %4296 = vmatprep.mubr.bf16.mxu1 %v3950_v3  ;;  %8389 = vrot.lane.b32.xlu0 %v11534_v27, %s9062_s0  ;;  %v3528_v45 = vsel %vm562_vm1, %v11279_v30, %v8107_v29  ;;  %v3527_v33 = vsel %vm562_vm1, %v11274_v11, %v8106_v37 }
 0x253   :  { %4297 = vmatmul.mubr.bf16.vlgmr.msra.gmra.mxu1 %v3949_v55  ;;  %v8115_v57 = vpop.permute.xlu1 %8114  ;;  %v3721_v56 = vsel %vm562_vm1, %v11283_v5, %v8102_v13  ;;  %v3720_v8 = vsel %vm562_vm1, %v11281_v46, %v8101_v38 }
 0x254   :  { %v8110_v36 = vpop.permute.xlu0 %8109  ;;  %v8117_v18 = vunpack.i.h.bf16 %v8115_v57  ;;  %v8116_v49 = vunpack.i.l.bf16 %v8115_v57  ;;  %v11560_v57 = vld [vmem:[#allocation2 + $0x21] sm:$0xff] }
 0x255   :  { %v8112_v9 = vunpack.i.h.bf16 %v8110_v36  ;;  %v8111_v26 = vunpack.i.l.bf16 %v8110_v36  ;;  %8404 = vrot.lane.b32.xlu1 %v11482_v15, %s9063_s18  ;;  %v8418_v42 = vpack.i.bf16 %v11560_v57, %v11558_v24 }
 0x256   :  { %8399 = vrot.lane.b32.xlu0 %v11540_v54, %s9063_s18  ;;  %v3591_v5 = vsel %vm174_vm0, %v3527_v33, %v8116_v49  ;;  %v3592_v46 = vsel %vm174_vm0, %v3528_v45, %v8117_v18  ;;  %v11581_v18 = vpack.i.bf16 %v11510_v62, %v11508_v14 }
 0x257   :  { %v8125_v40 = vpop.permute.xlu1 %8124  ;;  %v3784_v11 = vsel %vm174_vm0, %v3720_v8, %v8111_v26  ;;  %v3785_v30 = vsel %vm174_vm0, %v3721_v56, %v8112_v9 }
 0x258   :  { %v8120_v0 = vpop.permute.xlu0 %8119  ;;  %v8127_v3 = vunpack.i.h.bf16 %v8125_v40  ;;  %v8126_v15 = vunpack.i.l.bf16 %v8125_v40 }
 0x259   :  { %v8122_v55 = vunpack.i.h.bf16 %v8120_v0  ;;  %v8121_v34 = vunpack.i.l.bf16 %v8120_v0  ;;  %8414 = vrot.lane.b32.xlu1 %v11548_v16, %s9064_s19 }
 0x25a   :  { %8409 = vrot.lane.b32.xlu0 %v11546_v52, %s9062_s0  ;;  %v3656_v13 = vsel %vm3647_vm3, %v3591_v5, %v8126_v15  ;;  %v3657_v38 = vsel %vm3647_vm3, %v3592_v46, %v8127_v3 }
 0x25b   :  { %v3848_v29 = vsel %vm3647_vm3, %v3784_v11, %v8121_v34  ;;  %v3849_v37 = vsel %vm3647_vm3, %v3785_v30, %v8122_v55  ;;  %v8135_v36 = vpop.permute.xlu1 %8134  ;;  %v3952_v49 = vpack.c.bf16 %v3657_v38, %v3656_v13 }
 0x25c   :  { %v8130_v58 = vpop.permute.xlu0 %8129  ;;  %v3953_v60 = vpack.c.bf16 %v3849_v37, %v3848_v29  ;;  %v8137_v9 = vunpack.i.h.bf16 %v8135_v36  ;;  %v8136_v26 = vunpack.i.l.bf16 %v8135_v36  ;;  %v1754_v37 = vld [vmem:[#allocation2 + $0x16a] sm:$0xff] }
 0x25d   :  { %8424 = vrot.lane.b32.xlu1 %v11491_v50, %s9064_s19  ;;  %v8132_v45 = vunpack.i.h.bf16 %v8130_v58  ;;  %v8131_v33 = vunpack.i.l.bf16 %v8130_v58 }
 0x25e   :  { %4304 = vmatprep.mubr.bf16.mxu1 %v3953_v60  ;;  %8419 = vrot.lane.b32.xlu0 %v8418_v42, %s9062_s0  ;;  %v3530_v50 = vsel %vm562_vm1, %v11226_v21, %v8137_v9  ;;  %v3529_v14 = vsel %vm562_vm1, %v11224_v7, %v8136_v26  ;;  %v1819_v26 = vld [vmem:[#allocation2 + $0x180] sm:$0xff] }
 0x25f   :  { %4305 = vmatmul.mubr.bf16.gmra.mxu1 %v3952_v49  ;;  %v8145_v56 = vpop.permute.xlu1 %8144  ;;  %v3723_v62 = vsel %vm562_vm1, %v11325_v6, %v8132_v45  ;;  %v3722_v55 = vsel %vm562_vm1, %v11323_v25, %v8131_v33  ;;  %v1820_v45 = vld [vmem:[#allocation2 + $0x188] sm:$0xff] }
 0x260   :  { %v8140_v8 = vpop.permute.xlu0 %8139  ;;  %v8147_v40 = vunpack.i.h.bf16 %v8145_v56  ;;  %v8146_v0 = vunpack.i.l.bf16 %v8145_v56  ;;  %v1883_v33 = vld [vmem:[#allocation2 + $0x181] sm:$0xff] }
 0x261   :  { %v8142_v3 = vunpack.i.h.bf16 %v8140_v8  ;;  %v8141_v15 = vunpack.i.l.bf16 %v8140_v8  ;;  %8434 = vrot.lane.b32.xlu1 %v11498_v35, %s9063_s18  ;;  %v1755_v35 = vld [vmem:[#allocation2 + $0x172] sm:$0xff] }
 0x262   :  { %8429 = vrot.lane.b32.xlu0 %v11581_v18, %s9063_s18  ;;  %v3593_v6 = vsel %vm174_vm0, %v3529_v14, %v8146_v0  ;;  %v3594_v13 = vsel %vm174_vm0, %v3530_v50, %v8147_v40  ;;  %v11607_v49 = vpack.i.bf16 %v1755_v35, %v1754_v37  ;;  %v1884_v50 = vld [vmem:[#allocation2 + $0x189] sm:$0xff] }
 0x263   :  { %v8155_v34 = vpop.permute.xlu1 %8154  ;;  %v3786_v21 = vsel %vm174_vm0, %v3722_v55, %v8141_v15  ;;  %v3787_v7 = vsel %vm174_vm0, %v3723_v62, %v8142_v3  ;;  %v1730_v14 = vld [vmem:[#allocation2 + $0x4a] sm:$0xff]  ;;  %v1731_v62 = vld [vmem:[#allocation2 + $0x52] sm:$0xff] }
 0x264   :  { %v8150_v11 = vpop.permute.xlu0 %8149  ;;  %v8157_v30 = vunpack.i.h.bf16 %v8155_v34  ;;  %v8156_v5 = vunpack.i.l.bf16 %v8155_v34 }
 0x265   :  { %v8152_v46 = vunpack.i.h.bf16 %v8150_v11  ;;  %v8151_v29 = vunpack.i.l.bf16 %v8150_v11  ;;  %8444 = vrot.lane.b32.xlu1 %v11504_v48, %s9064_s19  ;;  %v11613_v48 = vpack.i.bf16 %v1820_v45, %v1819_v26  ;;  %v1795_v45 = vld [vmem:[#allocation2 + $0x60] sm:$0xff] }
 0x266   :  { %8439 = vrot.lane.b32.xlu0 %v11272_v59, %s9064_s19  ;;  %v3658_v36 = vsel %vm3647_vm3, %v3593_v6, %v8156_v5  ;;  %v3659_v58 = vsel %vm3647_vm3, %v3594_v13, %v8157_v30  ;;  %v8468_v5 = vpack.i.bf16 %v1731_v62, %v1730_v14  ;;  %v1859_v14 = vld [vmem:[#allocation2 + $0x61] sm:$0xff]  ;;  %v1860_v62 = vld [vmem:[#allocation2 + $0x69] sm:$0xff] }
 0x267   :  { %v3850_v25 = vsel %vm3647_vm3, %v3786_v21, %v8151_v29  ;;  %v3851_v38 = vsel %vm3647_vm3, %v3787_v7, %v8152_v46  ;;  %v8165_v59 = vpop.permute.xlu1 %8164  ;;  %v3955_v9 = vpack.c.bf16 %v3659_v58, %v3658_v36 }
 0x268   :  { %v8160_v60 = vpop.permute.xlu0 %8159  ;;  %v3956_v42 = vpack.c.bf16 %v3851_v38, %v3850_v25  ;;  %v8167_v56 = vunpack.i.h.bf16 %v8165_v59  ;;  %v8166_v8 = vunpack.i.l.bf16 %v8165_v59 }
 0x269   :  { %8454 = vrot.lane.b32.xlu1 %v11496_v20, %s9062_s0  ;;  %v8162_v40 = vunpack.i.h.bf16 %v8160_v60  ;;  %v8161_v0 = vunpack.i.l.bf16 %v8160_v60  ;;  %v8473_v20 = vpack.i.bf16 %v1884_v50, %v1883_v33  ;;  %v1796_v33 = vld [vmem:[#allocation2 + $0x68] sm:$0xff] }
 0x26a   :  { %4312 = vmatprep.mubr.bf16.mxu1 %v3956_v42  ;;  %8449 = vrot.lane.b32.xlu0 %v11607_v49, %s9062_s0  ;;  %v3532_v46 = vsel %vm562_vm1, %v11312_v4, %v8167_v56  ;;  %v3531_v29 = vsel %vm562_vm1, %v11310_v43, %v8166_v8  ;;  %v8488_v56 = vpack.i.bf16 %v1796_v33, %v1795_v45  ;;  %v1758_v45 = vld [vmem:[#allocation2 + $0x1ca] sm:$0xff]  ;;  %v1759_v33 = vld [vmem:[#allocation2 + $0x1d2] sm:$0xff] }
 0x26b   :  { %4313 = vmatmul.mubr.bf16.gmra.mxu1 %v3955_v9  ;;  %v8175_v3 = vpop.permute.xlu1 %8174  ;;  %v3725_v37 = vsel %vm562_vm1, %v11353_v19, %v8162_v40  ;;  %v3724_v35 = vsel %vm562_vm1, %v11351_v28, %v8161_v0 }
 0x26c   :  { %v8170_v15 = vpop.permute.xlu0 %8169  ;;  %v8177_v55 = vunpack.i.h.bf16 %v8175_v3  ;;  %v8176_v34 = vunpack.i.l.bf16 %v8175_v3 }
 0x26d   :  { %v8172_v11 = vunpack.i.h.bf16 %v8170_v15  ;;  %v8171_v30 = vunpack.i.l.bf16 %v8170_v15  ;;  %8464 = vrot.lane.b32.xlu1 %v11534_v27, %s9063_s18 }
 0x26e   :  { %8459 = vrot.lane.b32.xlu0 %v11613_v48, %s9063_s18  ;;  %v3595_v43 = vsel %vm174_vm0, %v3531_v29, %v8176_v34  ;;  %v3596_v36 = vsel %vm174_vm0, %v3532_v46, %v8177_v55  ;;  %v11644_v55 = vld [vmem:[%s16785_s4 + $0x88] sm:$0xff]  }
 0x26f   :  { %v8185_v21 = vpop.permute.xlu1 %8184  ;;  %v3788_v38 = vsel %vm174_vm0, %v3724_v35, %v8171_v30  ;;  %v3789_v4 = vsel %vm174_vm0, %v3725_v37, %v8172_v11  ;;  %7785 = vmatprep.subr.bf16.mxu0 %v11644_v55 }
 0x270   :  { %v8180_v7 = vpop.permute.xlu0 %8179  ;;  %v8187_v6 = vunpack.i.h.bf16 %v8185_v21  ;;  %v8186_v13 = vunpack.i.l.bf16 %v8185_v21 }
 0x271   :  { %v8182_v25 = vunpack.i.h.bf16 %v8180_v7  ;;  %v8181_v27 = vunpack.i.l.bf16 %v8180_v7  ;;  %8474 = vrot.lane.b32.xlu1 %v8473_v20, %s9064_s19  ;;  %v1421_v20 = vld [vmem:[#allocation2 + $0xb0] sm:$0xff] }
 0x272   :  { %8469 = vrot.lane.b32.xlu0 %v8468_v5, %s9062_s0  ;;  %v3660_v58 = vsel %vm3647_vm3, %v3595_v43, %v8186_v13  ;;  %v3661_v59 = vsel %vm3647_vm3, %v3596_v36, %v8187_v6  ;;  %v8498_v5 = vpack.i.bf16 %v1860_v62, %v1859_v14  ;;  %v1824_v14 = vld [vmem:[#allocation2 + $0x1e8] sm:$0xff]  ;;  %v1422_v62 = vld [vmem:[#allocation2 + $0xc0] sm:$0xff] }
 0x273   :  { %v3852_v28 = vsel %vm3647_vm3, %v3788_v38, %v8181_v27  ;;  %v3853_v19 = vsel %vm3647_vm3, %v3789_v4, %v8182_v25  ;;  %v8195_v60 = vpop.permute.xlu1 %8194  ;;  %v3958_v26 = vpack.c.bf16 %v3661_v59, %v3660_v58  ;;  %v1756_v38 = vld [vmem:[#allocation2 + $0x182] sm:$0xff]  ;;  %v1757_v4 = vld [vmem:[#allocation2 + $0x18a] sm:$0xff] }
 0x274   :  { %v8190_v42 = vpop.permute.xlu0 %8189  ;;  %v3959_v9 = vpack.c.bf16 %v3853_v19, %v3852_v28  ;;  %v8197_v8 = vunpack.i.h.bf16 %v8195_v60  ;;  %v8196_v40 = vunpack.i.l.bf16 %v8195_v60 }
 0x275   :  { %8484 = vrot.lane.b32.xlu1 %v11540_v54, %s9064_s19  ;;  %v8192_v0 = vunpack.i.h.bf16 %v8190_v42  ;;  %v8191_v3 = vunpack.i.l.bf16 %v8190_v42  ;;  %v1420_v54 = vld [vmem:[#allocation2 + $0xa8] sm:$0xff] }
 0x276   :  { %4320 = vmatprep.mubr.bf16.mxu1 %v3959_v9  ;;  %8479 = vrot.lane.b32.xlu0 %v11521_v17, %s9062_s0  ;;  %v3534_v46 = vsel %vm562_vm1, %v1421_v20, %v8197_v8  ;;  %v3533_v29 = vsel %vm562_vm1, %v1420_v54, %v8196_v40  ;;  %v8508_v9 = vpack.i.bf16 %v1757_v4, %v1756_v38  ;;  %v1678_v54 = vld [vmem:[#allocation2 + $0xd9] sm:$0xff]  ;;  %v1679_v20 = vld [vmem:[#allocation2 + $0xe1] sm:$0xff]  ;;  %v1888_v4 = vld [vmem:[#allocation2 + $0x1e9] sm:$0xff] }
 0x277   :  { %4321 = vmatmul.mubr.bf16.gmra.mxu1 %v3958_v26  ;;  %v8205_v15 = vpop.permute.xlu1 %8204  ;;  %v3727_v37 = vsel %vm562_vm1, %v11380_v31, %v8192_v0  ;;  %v3726_v35 = vsel %vm562_vm1, %v11378_v41, %v8191_v3  ;;  %v1887_v38 = vld [vmem:[#allocation2 + $0x1e1] sm:$0xff] }
 0x278   :  { %v8200_v50 = vpop.permute.xlu0 %8199  ;;  %v8207_v34 = vunpack.i.h.bf16 %v8205_v15  ;;  %v8206_v17 = vunpack.i.l.bf16 %v8205_v15 }
 0x279   :  { %v8202_v11 = vunpack.i.h.bf16 %v8200_v50  ;;  %v8201_v30 = vunpack.i.l.bf16 %v8200_v50  ;;  %8494 = vrot.lane.b32.xlu1 %v11546_v52, %s9063_s18  ;;  %v1823_v50 = vld [vmem:[#allocation2 + $0x1e0] sm:$0xff] }
 0x27a   :  { %8489 = vrot.lane.b32.xlu0 %v8488_v56, %s9063_s18  ;;  %v3597_v36 = vsel %vm174_vm0, %v3533_v29, %v8206_v17  ;;  %v3598_v31 = vsel %vm174_vm0, %v3534_v46, %v8207_v34 }
 0x27b   :  { %v8215_v21 = vpop.permute.xlu1 %8214  ;;  %v3790_v52 = vsel %vm174_vm0, %v3726_v35, %v8201_v30  ;;  %v3791_v43 = vsel %vm174_vm0, %v3727_v37, %v8202_v11 }
 0x27c   :  { %v8210_v7 = vpop.permute.xlu0 %8209  ;;  %v8217_v6 = vunpack.i.h.bf16 %v8215_v21  ;;  %v8216_v13 = vunpack.i.l.bf16 %v8215_v21 }
 0x27d   :  { %v8212_v25 = vunpack.i.h.bf16 %v8210_v7  ;;  %v8211_v27 = vunpack.i.l.bf16 %v8210_v7  ;;  %8504 = vrot.lane.b32.xlu1 %v11581_v18, %s9064_s19  ;;  %v11670_v18 = vpack.i.bf16 %v1759_v33, %v1758_v45  ;;  %v1760_v33 = vld [vmem:[#allocation2 + $0x1e2] sm:$0xff] }
 0x27e   :  { %8499 = vrot.lane.b32.xlu0 %v8498_v5, %s9064_s19  ;;  %v3662_v19 = vsel %vm3647_vm3, %v3597_v36, %v8216_v13  ;;  %v3663_v58 = vsel %vm3647_vm3, %v3598_v31, %v8217_v6  ;;  %v11676_v5 = vpack.i.bf16 %v1824_v14, %v1823_v50  ;;  %v1631_v36 = vld [vmem:[#allocation2 + $0x1d0] sm:$0xff] }
 0x27f   :  { %v3854_v41 = vsel %vm3647_vm3, %v3790_v52, %v8211_v27  ;;  %v3855_v28 = vsel %vm3647_vm3, %v3791_v43, %v8212_v25  ;;  %v8225_v59 = vpop.permute.xlu1 %8224  ;;  %v3961_v26 = vpack.c.bf16 %v3663_v58, %v3662_v19  ;;  %v1630_v43 = vld [vmem:[#allocation2 + $0x1c8] sm:$0xff] }
 0x280   :  { %v8220_v60 = vpop.permute.xlu0 %8219  ;;  %v3962_v42 = vpack.c.bf16 %v3855_v28, %v3854_v41  ;;  %v8227_v56 = vunpack.i.h.bf16 %v8225_v59  ;;  %v8226_v8 = vunpack.i.l.bf16 %v8225_v59 }
 0x281   :  { %8514 = vrot.lane.b32.xlu1 %v11548_v16, %s9062_s0  ;;  %v8222_v40 = vunpack.i.h.bf16 %v8220_v60  ;;  %v8221_v0 = vunpack.i.l.bf16 %v8220_v60  ;;  %v1423_v16 = vld [vmem:[#allocation2 + $0xc8] sm:$0xff] }
 0x282   :  { %4328 = vmatprep.mubr.bf16.mxu1 %v3962_v42  ;;  %8509 = vrot.lane.b32.xlu0 %v8508_v9, %s9062_s0  ;;  %v3536_v46 = vsel %vm562_vm1, %v1423_v16, %v8227_v56  ;;  %v3535_v29 = vsel %vm562_vm1, %v1422_v62, %v8226_v8  ;;  %v1761_v56 = vld [vmem:[#allocation2 + $0x1ea] sm:$0xff]  ;;  %v8543_v8 = vpack.i.bf16 %v1631_v36, %v1630_v43  ;;  %v1424_v16 = vld [vmem:[#allocation2 + $0xd8] sm:$0xff] }
 0x283   :  { %4329 = vmatmul.mubr.bf16.gmra.mxu1 %v3961_v26  ;;  %v8235_v3 = vpop.permute.xlu1 %8234  ;;  %v3729_v37 = vsel %vm562_vm1, %v1679_v20, %v8222_v40  ;;  %v3728_v35 = vsel %vm562_vm1, %v1678_v54, %v8221_v0  ;;  %v11694_v26 = vpack.i.bf16 %v1888_v4, %v1887_v38  ;;  %v1505_v40 = vld [vmem:[#allocation2 + $0x1d1] sm:$0xff]  ;;  %v11699_v0 = vpack.i.bf16 %v1761_v56, %v1760_v33 }
 0x284   :  { %v8230_v15 = vpop.permute.xlu0 %8229  ;;  %v8237_v34 = vunpack.i.h.bf16 %v8235_v3  ;;  %v8236_v17 = vunpack.i.l.bf16 %v8235_v3 }
 0x285   :  { %v8232_v11 = vunpack.i.h.bf16 %v8230_v15  ;;  %v8231_v30 = vunpack.i.l.bf16 %v8230_v15  ;;  %8519 = vrot.lane.b32.xlu1 %v11607_v49, %s9063_s18 }
 0x286   :  { %8529 = vrot.lane.b32.xlu0 %v11670_v18, %s9062_s0  ;;  %v3599_v31 = vsel %vm174_vm0, %v3535_v29, %v8236_v17  ;;  %v3600_v41 = vsel %vm174_vm0, %v3536_v46, %v8237_v34  ;;  %v1825_v17 = vld [vmem:[#allocation2 + $0x1f8] sm:$0xff] }
 0x287   :  { %v8245_v21 = vpop.permute.xlu1 %8244  ;;  %v3792_v49 = vsel %vm174_vm0, %v3728_v35, %v8231_v30  ;;  %v3793_v52 = vsel %vm174_vm0, %v3729_v37, %v8232_v11  ;;  %v1826_v11 = vld [vmem:[#allocation2 + $0x200] sm:$0xff]  ;;  %v1680_v35 = vld [vmem:[#allocation2 + $0xf1] sm:$0xff] }
 0x288   :  { %v8240_v7 = vpop.permute.xlu0 %8239  ;;  %v8247_v6 = vunpack.i.h.bf16 %v8245_v21  ;;  %v8246_v13 = vunpack.i.l.bf16 %v8245_v21  ;;  %v1425_v37 = vld [vmem:[#allocation2 + $0xe0] sm:$0xff] }
 0x289   :  { %v8242_v25 = vunpack.i.h.bf16 %v8240_v7  ;;  %v8241_v27 = vunpack.i.l.bf16 %v8240_v7  ;;  %8524 = vrot.lane.b32.xlu1 %v11613_v48, %s9064_s19  ;;  %v1504_v48 = vld [vmem:[#allocation2 + $0x1c9] sm:$0xff]  ;;  %v1681_v21 = vld [vmem:[#allocation2 + $0xf9] sm:$0xff]  ;;  %v11704_v7 = vpack.i.bf16 %v1826_v11, %v1825_v17 }
 0x28a   :  { %8534 = vrot.lane.b32.xlu0 %v11676_v5, %s9063_s18  ;;  %v3664_v58 = vsel %vm3647_vm3, %v3599_v31, %v8246_v13  ;;  %v3665_v59 = vsel %vm3647_vm3, %v3600_v41, %v8247_v6  ;;  %v8553_v30 = vpack.i.bf16 %v1505_v40, %v1504_v48  ;;  %v1889_v31 = vld [vmem:[#allocation2 + $0x1f9] sm:$0xff]  ;;  %v1890_v41 = vld [vmem:[#allocation2 + $0x201] sm:$0xff] }
 0x28b   :  { %v3856_v28 = vsel %vm3647_vm3, %v3792_v49, %v8241_v27  ;;  %v3857_v19 = vsel %vm3647_vm3, %v3793_v52, %v8242_v25  ;;  %v8255_v60 = vpop.permute.xlu1 %8254  ;;  %v3964_v45 = vpack.c.bf16 %v3665_v59, %v3664_v58  ;;  %v11722_v48 = vpack.i.bf16 %v1890_v41, %v1889_v31  ;;  %v1891_v41 = vld [vmem:[#allocation2 + $0x211] sm:$0xff] }
 0x28c   :  { %v8250_v42 = vpop.permute.xlu0 %8249  ;;  %v3965_v9 = vpack.c.bf16 %v3857_v19, %v3856_v28  ;;  %v8257_v3 = vunpack.i.h.bf16 %v8255_v60  ;;  %v8256_v15 = vunpack.i.l.bf16 %v8255_v60 }
 0x28d   :  { %8544 = vrot.lane.b32.xlu1 %v8543_v8, %s9064_s19  ;;  %v8252_v50 = vunpack.i.h.bf16 %v8250_v42  ;;  %v8251_v14 = vunpack.i.l.bf16 %v8250_v42 }
 0x28e   :  { %4336 = vmatprep.mubr.bf16.mxu1 %v3965_v9  ;;  %8539 = vrot.lane.b32.xlu0 %v11694_v26, %s9064_s19  ;;  %v3538_v6 = vsel %vm562_vm1, %v1425_v37, %v8257_v3  ;;  %v3537_v13 = vsel %vm562_vm1, %v1424_v16, %v8256_v15  ;;  %v1762_v3 = vld [vmem:[#allocation2 + $0x1fa] sm:$0xff]  ;;  %v1763_v15 = vld [vmem:[#allocation2 + $0x202] sm:$0xff] }
 0x28f   :  { %4337 = vmatmul.mubr.bf16.gmra.mxu1 %v3964_v45  ;;  %v8265_v62 = vpop.permute.xlu1 %8264  ;;  %v3731_v25 = vsel %vm562_vm1, %v1681_v21, %v8252_v50  ;;  %v3730_v27 = vsel %vm562_vm1, %v1680_v35, %v8251_v14  ;;  %v1828_v16 = vld [vmem:[#allocation2 + $0x218] sm:$0xff]  ;;  %v1682_v35 = vld [vmem:[#allocation2 + $0x109] sm:$0xff] }
 0x290   :  { %v8260_v34 = vpop.permute.xlu0 %8259  ;;  %v8267_v54 = vunpack.i.h.bf16 %v8265_v62  ;;  %v8266_v20 = vunpack.i.l.bf16 %v8265_v62  ;;  %v1683_v21 = vld [vmem:[#allocation2 + $0x111] sm:$0xff] }
 0x291   :  { %v8262_v46 = vunpack.i.h.bf16 %v8260_v34  ;;  %v8261_v29 = vunpack.i.l.bf16 %v8260_v34  ;;  %8554 = vrot.lane.b32.xlu1 %v8553_v30, %s9062_s0  ;;  %v1827_v30 = vld [vmem:[#allocation2 + $0x210] sm:$0xff] }
 0x292   :  { %8549 = vrot.lane.b32.xlu0 %v11699_v0, %s9062_s0  ;;  %v3601_v58 = vsel %vm174_vm0, %v3537_v13, %v8266_v20  ;;  %v3602_v59 = vsel %vm174_vm0, %v3538_v6, %v8267_v54  ;;  %v1426_v54 = vld [vmem:[#allocation2 + $0xf0] sm:$0xff]  ;;  %v11734_v6 = vpack.i.bf16 %v1828_v16, %v1827_v30  ;;  %v1829_v16 = vld [vmem:[#allocation2 + $0x228] sm:$0xff] }
 0x293   :  { %v8275_v38 = vpop.permute.xlu1 %8274  ;;  %v3794_v28 = vsel %vm174_vm0, %v3730_v27, %v8261_v29  ;;  %v3795_v19 = vsel %vm174_vm0, %v3731_v25, %v8262_v46 }
 0x294   :  { %v8270_v4 = vpop.permute.xlu0 %8269  ;;  %v8277_v49 = vunpack.i.h.bf16 %v8275_v38  ;;  %v8276_v52 = vunpack.i.l.bf16 %v8275_v38 }
 0x295   :  { %v8272_v43 = vunpack.i.h.bf16 %v8270_v4  ;;  %v8271_v36 = vunpack.i.l.bf16 %v8270_v4  ;;  %8564 = vrot.lane.b32.xlu1 %v11670_v18, %s9063_s18  ;;  %v11728_v18 = vpack.i.bf16 %v1763_v15, %v1762_v3  ;;  %v1764_v15 = vld [vmem:[#allocation2 + $0x212] sm:$0xff] }
 0x296   :  { %8559 = vrot.lane.b32.xlu0 %v11704_v7, %s9063_s18  ;;  %v3666_v9 = vsel %vm3647_vm3, %v3601_v58, %v8276_v52  ;;  %v3667_v45 = vsel %vm3647_vm3, %v3602_v59, %v8277_v49 }
 0x297   :  { %v3858_v60 = vsel %vm3647_vm3, %v3794_v28, %v8271_v36  ;;  %v3859_v42 = vsel %vm3647_vm3, %v3795_v19, %v8272_v43  ;;  %v8285_v33 = vpop.permute.xlu1 %8284  ;;  %v3967_v40 = vpack.c.bf16 %v3667_v45, %v3666_v9  ;;  %v1892_v28 = vld [vmem:[#allocation2 + $0x219] sm:$0xff] }
 0x298   :  { %v8280_v56 = vpop.permute.xlu0 %8279  ;;  %v3968_v8 = vpack.c.bf16 %v3859_v42, %v3858_v60  ;;  %v8287_v50 = vunpack.i.h.bf16 %v8285_v33  ;;  %v8286_v14 = vunpack.i.l.bf16 %v8285_v33 }
 0x299   :  { %8574 = vrot.lane.b32.xlu1 %v11676_v5, %s9064_s19  ;;  %v8282_v62 = vunpack.i.h.bf16 %v8280_v56  ;;  %v8281_v34 = vunpack.i.l.bf16 %v8280_v56  ;;  %v1427_v5 = vld [vmem:[#allocation2 + $0xf8] sm:$0xff] }
 0x29a   :  { %4344 = vmatprep.mubr.bf16.mxu1 %v3968_v8  ;;  %8569 = vrot.lane.b32.xlu0 %v11722_v48, %s9064_s19  ;;  %v3540_v13 = vsel %vm562_vm1, %v1427_v5, %v8287_v50  ;;  %v3539_v25 = vsel %vm562_vm1, %v1426_v54, %v8286_v14  ;;  %v1765_v50 = vld [vmem:[#allocation2 + $0x21a] sm:$0xff]  ;;  %v1830_v54 = vld [vmem:[#allocation2 + $0x230] sm:$0xff] }
 0x29b   :  { %4345 = vmatmul.mubr.bf16.gmra.mxu1 %v3967_v40  ;;  %v8295_v17 = vpop.permute.xlu1 %8294  ;;  %v3733_v27 = vsel %vm562_vm1, %v1683_v21, %v8282_v62  ;;  %v3732_v38 = vsel %vm562_vm1, %v1682_v35, %v8281_v34  ;;  %v11752_v40 = vpack.i.bf16 %v1892_v28, %v1891_v41  ;;  %v1684_v35 = vld [vmem:[#allocation2 + $0x121] sm:$0xff]  ;;  %v1685_v21 = vld [vmem:[#allocation2 + $0x129] sm:$0xff] }
 0x29c   :  { %v8290_v11 = vpop.permute.xlu0 %8289  ;;  %v8297_v20 = vunpack.i.h.bf16 %v8295_v17  ;;  %v8296_v46 = vunpack.i.l.bf16 %v8295_v17  ;;  %v1893_v28 = vld [vmem:[#allocation2 + $0x229] sm:$0xff] }
 0x29d   :  { %v8292_v29 = vunpack.i.h.bf16 %v8290_v11  ;;  %v8291_v37 = vunpack.i.l.bf16 %v8290_v11  ;;  %8584 = vrot.lane.b32.xlu1 %v11694_v26, %s9062_s0 }
 0x29e   :  { %8579 = vrot.lane.b32.xlu0 %v11728_v18, %s9062_s0  ;;  %v3603_v58 = vsel %vm174_vm0, %v3539_v25, %v8296_v46  ;;  %v3604_v59 = vsel %vm174_vm0, %v3540_v13, %v8297_v20  ;;  %v1428_v20 = vld [vmem:[#allocation2 + $0x108] sm:$0xff]  ;;  %v11764_v13 = vpack.i.bf16 %v1830_v54, %v1829_v16 }
 0x29f   :  { %v8305_v4 = vpop.permute.xlu1 %8304  ;;  %v3796_v26 = vsel %vm174_vm0, %v3732_v38, %v8291_v37  ;;  %v3797_v19 = vsel %vm174_vm0, %v3733_v27, %v8292_v29  ;;  %v1832_v16 = vld [vmem:[#allocation2 + $0x248] sm:$0xff] }
 0x2a0   :  { %v8300_v49 = vpop.permute.xlu0 %8299  ;;  %v8307_v52 = vunpack.i.h.bf16 %v8305_v4  ;;  %v8306_v43 = vunpack.i.l.bf16 %v8305_v4 }
 0x2a1   :  { %v8302_v36 = vunpack.i.h.bf16 %v8300_v49  ;;  %v8301_v31 = vunpack.i.l.bf16 %v8300_v49  ;;  %8594 = vrot.lane.b32.xlu1 %v11699_v0, %s9063_s18  ;;  %v11758_v0 = vpack.i.bf16 %v1765_v50, %v1764_v15  ;;  %v1766_v50 = vld [vmem:[#allocation2 + $0x22a] sm:$0xff] }
 0x2a2   :  { %8589 = vrot.lane.b32.xlu0 %v11734_v6, %s9063_s18  ;;  %v3668_v9 = vsel %vm3647_vm3, %v3603_v58, %v8306_v43  ;;  %v3669_v45 = vsel %vm3647_vm3, %v3604_v59, %v8307_v52 }
 0x2a3   :  { %v3860_v60 = vsel %vm3647_vm3, %v3796_v26, %v8301_v31  ;;  %v3861_v42 = vsel %vm3647_vm3, %v3797_v19, %v8302_v36  ;;  %v8315_v33 = vpop.permute.xlu1 %8314  ;;  %v3970_v3 = vpack.c.bf16 %v3669_v45, %v3668_v9  ;;  %v1894_v26 = vld [vmem:[#allocation2 + $0x231] sm:$0xff] }
 0x2a4   :  { %v8310_v56 = vpop.permute.xlu0 %8309  ;;  %v3971_v8 = vpack.c.bf16 %v3861_v42, %v3860_v60  ;;  %v8317_v14 = vunpack.i.h.bf16 %v8315_v33  ;;  %v8316_v62 = vunpack.i.l.bf16 %v8315_v33 }
 0x2a5   :  { %8604 = vrot.lane.b32.xlu1 %v11704_v7, %s9064_s19  ;;  %v8312_v34 = vunpack.i.h.bf16 %v8310_v56  ;;  %v8311_v17 = vunpack.i.l.bf16 %v8310_v56  ;;  %v1429_v7 = vld [vmem:[#allocation2 + $0x110] sm:$0xff] }
 0x2a6   :  { %4352 = vmatprep.mubr.bf16.mxu1 %v3971_v8  ;;  %8599 = vrot.lane.b32.xlu0 %v11752_v40, %s9064_s19  ;;  %v3542_v25 = vsel %vm562_vm1, %v1429_v7, %v8317_v14  ;;  %v3541_v27 = vsel %vm562_vm1, %v1428_v20, %v8316_v62  ;;  %v1767_v14 = vld [vmem:[#allocation2 + $0x232] sm:$0xff] }
 0x2a7   :  { %4353 = vmatmul.mubr.bf16.gmra.mxu1 %v3970_v3  ;;  %v8325_v11 = vpop.permute.xlu1 %8324  ;;  %v3735_v38 = vsel %vm562_vm1, %v1685_v21, %v8312_v34  ;;  %v3734_v4 = vsel %vm562_vm1, %v1684_v35, %v8311_v17  ;;  %v11782_v3 = vpack.i.bf16 %v1894_v26, %v1893_v28  ;;  %v11788_v34 = vpack.i.bf16 %v1767_v14, %v1766_v50  ;;  %v1686_v35 = vld [vmem:[#allocation2 + $0x139] sm:$0xff]  ;;  %v1687_v21 = vld [vmem:[#allocation2 + $0x141] sm:$0xff] }
 0x2a8   :  { %v8320_v30 = vpop.permute.xlu0 %8319  ;;  %v8327_v46 = vunpack.i.h.bf16 %v8325_v11  ;;  %v8326_v29 = vunpack.i.l.bf16 %v8325_v11 }
 0x2a9   :  { %v8322_v37 = vunpack.i.h.bf16 %v8320_v30  ;;  %v8321_v5 = vunpack.i.l.bf16 %v8320_v30  ;;  %8614 = vrot.lane.b32.xlu1 %v11722_v48, %s9062_s0  ;;  %v1831_v30 = vld [vmem:[#allocation2 + $0x240] sm:$0xff] }
 0x2aa   :  { %8609 = vrot.lane.b32.xlu0 %v11758_v0, %s9062_s0  ;;  %v3605_v58 = vsel %vm174_vm0, %v3541_v27, %v8326_v29  ;;  %v3606_v59 = vsel %vm174_vm0, %v3542_v25, %v8327_v46  ;;  %v8037_v46 = vunpack.i.h.bf16 %v11461_v53  ;;  %v8036_v29 = vunpack.i.l.bf16 %v11461_v53 }
 0x2ab   :  { %v8335_v49 = vpop.permute.xlu1 %8334  ;;  %v3798_v48 = vsel %vm174_vm0, %v3734_v4, %v8321_v5  ;;  %v3799_v19 = vsel %vm174_vm0, %v3735_v38, %v8322_v37  ;;  %v8042_v37 = vunpack.i.h.bf16 %v11469_v1  ;;  %v11797_v38 = vpack.i.bf16 %v1832_v16, %v1831_v30 }
 0x2ac   :  { %v8330_v52 = vpop.permute.xlu0 %8329  ;;  %v8337_v43 = vunpack.i.h.bf16 %v8335_v49  ;;  %v8336_v36 = vunpack.i.l.bf16 %v8335_v49 }
 0x2ad   :  { %v8332_v31 = vunpack.i.h.bf16 %v8330_v52  ;;  %v8331_v41 = vunpack.i.l.bf16 %v8330_v52  ;;  %8624 = vrot.lane.b32.xlu1 %v11728_v18, %s9063_s18 }
 0x2ae   :  { %8619 = vrot.lane.b32.xlu0 %v11764_v13, %s9063_s18  ;;  %v3670_v9 = vsel %vm3647_vm3, %v3605_v58, %v8336_v36  ;;  %v3671_v45 = vsel %vm3647_vm3, %v3606_v59, %v8337_v43  ;;  %v1895_v43 = vld [vmem:[#allocation2 + $0x241] sm:$0xff]  ;;  %v1896_v36 = vld [vmem:[#allocation2 + $0x249] sm:$0xff] }
 0x2af   :  { %v3862_v60 = vsel %vm3647_vm3, %v3798_v48, %v8331_v41  ;;  %v3863_v42 = vsel %vm3647_vm3, %v3799_v19, %v8332_v31  ;;  %v8345_v33 = vpop.permute.xlu1 %8344  ;;  %v3973_v15 = vpack.c.bf16 %v3671_v45, %v3670_v9  ;;  %v8041_v48 = vunpack.i.l.bf16 %v11469_v1  ;;  %v1407_v59 = vld [vmem:[#allocation2 + $0x8] sm:$0xff] }
 0x2b0   :  { %v8340_v56 = vpop.permute.xlu0 %8339  ;;  %v3974_v8 = vpack.c.bf16 %v3863_v42, %v3862_v60  ;;  %v8347_v5 = vunpack.i.h.bf16 %v8345_v33  ;;  %v8346_v7 = vunpack.i.l.bf16 %v8345_v33  ;;  %v1430_v60 = vld [vmem:[#allocation2 + $0x120] sm:$0xff]  ;;  %v1431_v42 = vld [vmem:[#allocation2 + $0x128] sm:$0xff] }
 0x2b1   :  { %8634 = vrot.lane.b32.xlu1 %v11734_v6, %s9064_s19  ;;  %v8342_v17 = vunpack.i.h.bf16 %v8340_v56  ;;  %v8341_v11 = vunpack.i.l.bf16 %v8340_v56  ;;  %v1406_v6 = vld [vmem:[#allocation2] sm:$0xff] }
 0x2b2   :  { %4360 = vmatprep.mubr.bf16.mxu1 %v3974_v8  ;;  %8629 = vrot.lane.b32.xlu0 %v11782_v3, %s9064_s19  ;;  %v3519_v26 = vsel %vm562_vm1, %v1406_v6, %v8036_v29  ;;  %v3544_v50 = vsel %vm562_vm1, %v1431_v42, %v8347_v5  ;;  %v3543_v14 = vsel %vm562_vm1, %v1430_v60, %v8346_v7  ;;  %v9014_v60 = vld [vmem:[%s16785_s4 + $0x80] sm:$0xff]  }
 0x2b3   :  { %4361 = vmatmul.mubr.bf16.gmra.mxu1 %v3973_v15  ;;  %v8355_v18 = vpop.permute.xlu1 %8354  ;;  %v3737_v4 = vsel %vm562_vm1, %v1687_v21, %v8342_v17  ;;  %v3736_v49 = vsel %vm562_vm1, %v1686_v35, %v8341_v11  ;;  %v11811_v15 = vpack.i.bf16 %v1896_v36, %v1895_v43  ;;  %v1769_v17 = vld [vmem:[#allocation2 + $0x24a] sm:$0xff]  ;;  %v3583_v29 = vsel %vm174_vm0, %v3519_v26, %v8041_v48  ;;  %v1834_v43 = vld [vmem:[#allocation2 + $0x260] sm:$0xff] }
 0x2b4   :  { %v8350_v62 = vpop.permute.xlu0 %8349  ;;  %v8356_v31 = vunpack.i.l.bf16 %v8355_v18 }
 0x2b5   :  { %v8352_v54 = vunpack.i.h.bf16 %v8350_v62  ;;  %v8351_v20 = vunpack.i.l.bf16 %v8350_v62  ;;  %8644 = vrot.lane.b32.xlu1 %v11752_v40, %s9062_s0  ;;  %v8357_v40 = vunpack.i.h.bf16 %v8355_v18  ;;  %v1768_v62 = vld [vmem:[#allocation2 + $0x242] sm:$0xff] }
 0x2b6   :  { %8639 = vrot.lane.b32.xlu0 %v11788_v34, %s9062_s0  ;;  %v3607_v16 = vsel %vm174_vm0, %v3543_v14, %v8356_v31 }
 0x2b7   :  { %v8365_v25 = vpop.permute.xlu1 %8364  ;;  %v3800_v41 = vsel %vm174_vm0, %v3736_v49, %v8351_v20  ;;  %v3801_v28 = vsel %vm174_vm0, %v3737_v4, %v8352_v54  ;;  %v3608_v54 = vsel %vm174_vm0, %v3544_v50, %v8357_v40  ;;  %v3520_v20 = vsel %vm562_vm1, %v1407_v59, %v8037_v46  ;;  %v1898_v59 = vld [vmem:[#allocation2 + $0x261] sm:$0xff] }
 0x2b8   :  { %v8360_v27 = vpop.permute.xlu0 %8359  ;;  %v8367_v52 = vunpack.i.h.bf16 %v8365_v25  ;;  %v8366_v53 = vunpack.i.l.bf16 %v8365_v25  ;;  %v11829_v4 = vpack.i.bf16 %v1769_v17, %v1768_v62  ;;  %v3584_v36 = vsel %vm174_vm0, %v3520_v20, %v8042_v37 }
 0x2b9   :  { %8654 = vrot.lane.b32.xlu1 %v11758_v0, %s9063_s18  ;;  %v8362_v9 = vunpack.i.h.bf16 %v8360_v27  ;;  %v8361_v45 = vunpack.i.l.bf16 %v8360_v27 }
 0x2ba   :  { %8649 = vrot.lane.b32.xlu0 %v11797_v38, %s9063_s18  ;;  %v3864_v19 = vsel %vm3647_vm3, %v3800_v41, %v8366_v53  ;;  %v3865_v58 = vsel %vm3647_vm3, %v3801_v28, %v8367_v52 }
 0x2bb   :  { %v8370_v33 = vpop.permute.xlu1 %8369  ;;  %v3977_v8 = vpack.c.bf16 %v3865_v58, %v3864_v19  ;;  %v3713_v7 = vsel %vm562_vm1, %v11560_v57, %v8362_v9  ;;  %v3712_v35 = vsel %vm562_vm1, %v11558_v24, %v8361_v45  ;;  %v1897_v58 = vld [vmem:[#allocation2 + $0x259] sm:$0xff] }
 0x2bc   :  { %v8375_v56 = vpop.permute.xlu0 %8374  ;;  %v8372_v18 = vunpack.i.h.bf16 %v8370_v33  ;;  %v8371_v0 = vunpack.i.l.bf16 %v8370_v33  ;;  %v11853_v42 = vpack.i.bf16 %v1898_v59, %v1897_v58  ;;  %v1770_v45 = vld [vmem:[#allocation2 + $0x25a] sm:$0xff]  ;;  %v1771_v33 = vld [vmem:[#allocation2 + $0x262] sm:$0xff] }
 0x2bd   :  { %v8377_v11 = vunpack.i.h.bf16 %v8375_v56  ;;  %v8376_v30 = vunpack.i.l.bf16 %v8375_v56  ;;  %4368 = vmatprep.mubr.bf16.mxu1 %v3977_v8  ;;  %8664 = vrot.lane.b32.xlu1 %v11764_v13, %s9064_s19  ;;  %v1833_v13 = vld [vmem:[#allocation2 + $0x258] sm:$0xff] }
 0x2be   :  { %8659 = vrot.lane.b32.xlu0 %v11811_v15, %s9064_s19  ;;  %v3672_v6 = vsel %vm3647_vm3, %v3607_v16, %v8371_v0  ;;  %v3673_v5 = vsel %vm3647_vm3, %v3608_v54, %v8372_v18  ;;  %v11844_v48 = vpack.i.bf16 %v1834_v43, %v1833_v13  ;;  %v11860_v0 = vpack.i.bf16 %v1771_v33, %v1770_v45  ;;  %v1836_v16 = vld [vmem:[#allocation2 + $0x278] sm:$0xff]  ;;  %v1433_v13 = vld [vmem:[#allocation2 + $0x140] sm:$0xff] }
 0x2bf   :  { %v8385_v25 = vpop.permute.xlu1 %8384  ;;  %v3976_v27 = vpack.c.bf16 %v3673_v5, %v3672_v6  ;;  %v3776_v24 = vsel %vm174_vm0, %v3712_v35, %v8376_v30  ;;  %v3777_v57 = vsel %vm174_vm0, %v3713_v7, %v8377_v11  ;;  %v1835_v30 = vld [vmem:[#allocation2 + $0x270] sm:$0xff]  ;;  %v1773_v33 = vld [vmem:[#allocation2 + $0x27a] sm:$0xff] }
 0x2c0   :  { %v8380_v21 = vpop.permute.xlu0 %8379  ;;  %v8387_v52 = vunpack.i.h.bf16 %v8385_v25  ;;  %v8386_v53 = vunpack.i.l.bf16 %v8385_v25  ;;  %v1772_v45 = vld [vmem:[#allocation2 + $0x272] sm:$0xff] }
 0x2c1   :  { %v8382_v46 = vunpack.i.h.bf16 %v8380_v21  ;;  %v8381_v49 = vunpack.i.l.bf16 %v8380_v21  ;;  %4369 = vmatmul.mubr.bf16.gmra.mxu1 %v3976_v27  ;;  %8674 = vrot.lane.b32.xlu1 %v11782_v3, %s9062_s0 }
 0x2c2   :  { %8669 = vrot.lane.b32.xlu0 %v11829_v4, %s9062_s0  ;;  %v3649_v40 = vsel %vm3647_vm3, %v3584_v36, %v8387_v52  ;;  %v3648_v31 = vsel %vm3647_vm3, %v3583_v29, %v8386_v53  ;;  %v1900_v52 = vld [vmem:[#allocation2 + $0x279] sm:$0xff] }
 0x2c3   :  { %v3840_v41 = vsel %vm3647_vm3, %v3776_v24, %v8381_v49  ;;  %v3841_v1 = vsel %vm3647_vm3, %v3777_v57, %v8382_v46  ;;  %v3940_v37 = vpack.c.bf16 %v3649_v40, %v3648_v31  ;;  %v8395_v19 = vpop.permute.xlu1 %8394  ;;  %v11872_v46 = vpack.i.bf16 %v1836_v16, %v1835_v30  ;;  %v1899_v49 = vld [vmem:[#allocation2 + $0x271] sm:$0xff] }
 0x2c4   :  { %v8390_v28 = vpop.permute.xlu0 %8389  ;;  %v3941_v26 = vpack.c.bf16 %v3841_v1, %v3840_v41  ;;  %v8397_v62 = vunpack.i.h.bf16 %v8395_v19  ;;  %v8396_v17 = vunpack.i.l.bf16 %v8395_v19  ;;  %v1432_v53 = vld [vmem:[#allocation2 + $0x138] sm:$0xff]  ;;  %v11882_v1 = vpack.i.bf16 %v1900_v52, %v1899_v49 }
 0x2c5   :  { %8684 = vrot.lane.b32.xlu1 %v11788_v34, %s9063_s18  ;;  %v8392_v56 = vunpack.i.h.bf16 %v8390_v28  ;;  %v8391_v8 = vunpack.i.l.bf16 %v8390_v28  ;;  %v1688_v34 = vld [vmem:[#allocation2 + $0x151] sm:$0xff]  ;;  %v11892_v30 = vpack.i.bf16 %v1773_v33, %v1772_v45 }
 0x2c6   :  { %4272 = vmatprep.mubr.bf16.mxu0 %v3941_v26  ;;  %8679 = vrot.lane.b32.xlu0 %v11844_v48, %s9063_s18  ;;  %v3546_v24 = vsel %vm562_vm1, %v1433_v13, %v8397_v62  ;;  %v1408_v62 = vld [vmem:[#allocation2 + $0x18] sm:$0xff] }
 0x2c7   :  { %4273 = vmatmul.mubr.bf16.vlgmr.msra.gmra.mxu0 %v3940_v37  ;;  %v8405_v9 = vpop.permute.xlu1 %8404  ;;  %v3738_v20 = vsel %vm562_vm1, %v1688_v34, %v8391_v8  ;;  %v1664_v8 = vld [vmem:[#allocation2 + $0x31] sm:$0xff] }
 0x2c8   :  { %v8400_v3 = vpop.permute.xlu0 %8399  ;;  %7786 = vmatpush3.bf16.msra.mxu0 %v11644_v55  ;;  %v1689_v55 = vld [vmem:[#allocation2 + $0x159] sm:$0xff]  ;;  %v8406_v5 = vunpack.i.l.bf16 %v8405_v9 }
 0x2c9   :  { %7787 = vmatprep.subr.bf16.mxu0 %v9014_v60  ;;  %v8402_v50 = vunpack.i.h.bf16 %v8400_v3  ;;  %v8401_v14 = vunpack.i.l.bf16 %v8400_v3  ;;  %8694 = vrot.lane.b32.xlu1 %v11797_v38, %s9064_s19  ;;  %v3739_v54 = vsel %vm562_vm1, %v1689_v55, %v8392_v56  ;;  %v8407_v38 = vunpack.i.h.bf16 %v8405_v9 }
 0x2ca   :  { %8689 = vrot.lane.b32.xlu0 %v11853_v42, %s9064_s19 }
 0x2cb   :  { %v8415_v11 = vpop.permute.xlu1 %8414  ;;  %v3802_v7 = vsel %vm174_vm0, %v3738_v20, %v8401_v14  ;;  %v3803_v35 = vsel %vm174_vm0, %v3739_v54, %v8402_v50  ;;  %v3610_v41 = vsel %vm174_vm0, %v3546_v24, %v8407_v38  ;;  %v1665_v50 = vld [vmem:[#allocation2 + $0x39] sm:$0xff]  ;;  %v1837_v38 = vld [vmem:[#allocation2 + $0x288] sm:$0xff] }
 0x2cc   :  { %v8410_v18 = vpop.permute.xlu0 %8409  ;;  %7788 = vmatpush3.bf16.msra.mxu0 %v9014_v60  ;;  %v8417_v29 = vunpack.i.h.bf16 %v8415_v11  ;;  %v8416_v6 = vunpack.i.l.bf16 %v8415_v11 }
 0x2cd   :  { %8704 = vrot.lane.b32.xlu1 %v11811_v15, %s9062_s0  ;;  %v3545_v15 = vsel %vm562_vm1, %v1432_v53, %v8396_v17  ;;  %v8412_v37 = vunpack.i.h.bf16 %v8410_v18  ;;  %v8411_v28 = vunpack.i.l.bf16 %v8410_v18  ;;  %v1409_v17 = vld [vmem:[#allocation2 + $0x20] sm:$0xff] }
 0x2ce   :  { %8699 = vrot.lane.b32.xlu0 %v11860_v0, %s9062_s0  ;;  %v3866_v25 = vsel %vm3647_vm3, %v3802_v7, %v8416_v6  ;;  %v3867_v27 = vsel %vm3647_vm3, %v3803_v35, %v8417_v29  ;;  %v3609_v31 = vsel %vm174_vm0, %v3545_v15, %v8406_v5  ;;  %v1838_v5 = vld [vmem:[#allocation2 + $0x290] sm:$0xff] }
 0x2cf   :  { %v8425_v43 = vpop.permute.xlu1 %8424  ;;  %v3980_v36 = vpack.c.bf16 %v3867_v27, %v3866_v25  ;;  %v3715_v18 = vsel %vm562_vm1, %v1665_v50, %v8412_v37  ;;  %v3714_v55 = vsel %vm562_vm1, %v1664_v8, %v8411_v28  ;;  %v11906_v13 = vpack.i.bf16 %v1838_v5, %v1837_v38  ;;  %v1774_v28 = vld [vmem:[#allocation2 + $0x28a] sm:$0xff]  ;;  %v1839_v8 = vld [vmem:[#allocation2 + $0x2a0] sm:$0xff] }
 0x2d0   :  { %v8420_v21 = vpop.permute.xlu0 %8419  ;;  %v8427_v57 = vunpack.i.h.bf16 %v8425_v43  ;;  %v8426_v40 = vunpack.i.l.bf16 %v8425_v43  ;;  %v1840_v50 = vld [vmem:[#allocation2 + $0x2a8] sm:$0xff]  ;;  %v1434_v5 = vld [vmem:[#allocation2 + $0x150] sm:$0xff] }
 0x2d1   :  { %4376 = vmatprep.mubr.bf16.mxu1 %v3980_v36  ;;  %8714 = vrot.lane.b32.xlu1 %v11829_v4, %s9063_s18  ;;  %v8422_v59 = vunpack.i.h.bf16 %v8420_v21  ;;  %v8421_v60 = vunpack.i.l.bf16 %v8420_v21  ;;  %v1904_v38 = vld [vmem:[#allocation2 + $0x2a9] sm:$0xff] }
 0x2d2   :  { %8709 = vrot.lane.b32.xlu0 %v11872_v46, %s9063_s18  ;;  %v3674_v19 = vsel %vm3647_vm3, %v3609_v31, %v8426_v40  ;;  %v3675_v58 = vsel %vm3647_vm3, %v3610_v41, %v8427_v57  ;;  %v1901_v40 = vld [vmem:[#allocation2 + $0x289] sm:$0xff] }
 0x2d3   :  { %v8435_v3 = vpop.permute.xlu1 %8434  ;;  %v3979_v9 = vpack.c.bf16 %v3675_v58, %v3674_v19  ;;  %v3521_v16 = vsel %vm562_vm1, %v1408_v62, %v8421_v60  ;;  %v3522_v54 = vsel %vm562_vm1, %v1409_v17, %v8422_v59 }
 0x2d4   :  { %v8430_v26 = vpop.permute.xlu0 %8429  ;;  %v8437_v14 = vunpack.i.h.bf16 %v8435_v3  ;;  %v8436_v34 = vunpack.i.l.bf16 %v8435_v3  ;;  %v1690_v3 = vld [vmem:[#allocation2 + $0x169] sm:$0xff] }
 0x2d5   :  { %v8432_v4 = vunpack.i.h.bf16 %v8430_v26  ;;  %v8431_v56 = vunpack.i.l.bf16 %v8430_v26  ;;  %4377 = vmatmul.mubr.bf16.gmra.mxu1 %v3979_v9  ;;  %8724 = vrot.lane.b32.xlu1 %v11844_v48, %s9064_s19  ;;  %v1775_v26 = vld [vmem:[#allocation2 + $0x292] sm:$0xff] }
 0x2d6   :  { %8719 = vrot.lane.b32.xlu0 %v11882_v1, %s9064_s19  ;;  %v3585_v49 = vsel %vm174_vm0, %v3521_v16, %v8436_v34  ;;  %v3586_v52 = vsel %vm174_vm0, %v3522_v54, %v8437_v14  ;;  %v11930_v54 = vpack.i.bf16 %v1840_v50, %v1839_v8 }
 0x2d7   :  { %v8445_v20 = vpop.permute.xlu1 %8444  ;;  %v3778_v35 = vsel %vm174_vm0, %v3714_v55, %v8431_v56  ;;  %v3779_v21 = vsel %vm174_vm0, %v3715_v18, %v8432_v4  ;;  %v1691_v4 = vld [vmem:[#allocation2 + $0x171] sm:$0xff] }
 0x2d8   :  { %v8440_v11 = vpop.permute.xlu0 %8439  ;;  %v8447_v7 = vunpack.i.h.bf16 %v8445_v20  ;;  %v8446_v48 = vunpack.i.l.bf16 %v8445_v20 }
 0x2d9   :  { %v8442_v29 = vunpack.i.h.bf16 %v8440_v11  ;;  %v8441_v6 = vunpack.i.l.bf16 %v8440_v11  ;;  %8734 = vrot.lane.b32.xlu1 %v11853_v42, %s9062_s0  ;;  %v1902_v42 = vld [vmem:[#allocation2 + $0x291] sm:$0xff] }
 0x2da   :  { %8729 = vrot.lane.b32.xlu0 %v11892_v30, %s9062_s0  ;;  %v3650_v36 = vsel %vm3647_vm3, %v3585_v49, %v8446_v48  ;;  %v3651_v24 = vsel %vm3647_vm3, %v3586_v52, %v8447_v7  ;;  %v11914_v41 = vpack.i.bf16 %v1902_v42, %v1901_v40  ;;  %v1435_v7 = vld [vmem:[#allocation2 + $0x158] sm:$0xff] }
 0x2db   :  { %v3842_v25 = vsel %vm3647_vm3, %v3778_v35, %v8441_v6  ;;  %v3843_v27 = vsel %vm3647_vm3, %v3779_v21, %v8442_v29  ;;  %v8455_v15 = vpop.permute.xlu1 %8454  ;;  %v3943_v57 = vpack.c.bf16 %v3651_v24, %v3650_v36  ;;  %v1903_v6 = vld [vmem:[#allocation2 + $0x2a1] sm:$0xff] }
 0x2dc   :  { %v8450_v53 = vpop.permute.xlu0 %8449  ;;  %v3944_v43 = vpack.c.bf16 %v3843_v27, %v3842_v25  ;;  %v8457_v45 = vunpack.i.h.bf16 %v8455_v15  ;;  %v8456_v33 = vunpack.i.l.bf16 %v8455_v15  ;;  %v11940_v49 = vpack.i.bf16 %v1904_v38, %v1903_v6 }
 0x2dd   :  { %8744 = vrot.lane.b32.xlu1 %v11860_v0, %s9063_s18  ;;  %v8452_v19 = vunpack.i.h.bf16 %v8450_v53  ;;  %v8451_v58 = vunpack.i.l.bf16 %v8450_v53  ;;  %v11920_v0 = vpack.i.bf16 %v1775_v26, %v1774_v28  ;;  %v1776_v28 = vld [vmem:[#allocation2 + $0x2a2] sm:$0xff] }
 0x2de   :  { %8739 = vrot.lane.b32.xlu0 %v11906_v13, %s9063_s18  ;;  %4280 = vmatprep.mubr.bf16.mxu0 %v3944_v43  ;;  %v3548_v21 = vsel %vm562_vm1, %v1435_v7, %v8457_v45  ;;  %v1920_v7 = vld [vmem:[#allocation2 + $0x3a] sm:$0xff] }
 0x2df   :  { %4281 = vmatmul.mubr.bf16.gmra.mxu0 %v3943_v57  ;;  %v8465_v37 = vpop.permute.xlu1 %8464  ;;  %v3741_v14 = vsel %vm562_vm1, %v1691_v4, %v8452_v19  ;;  %v3740_v34 = vsel %vm562_vm1, %v1690_v3, %v8451_v58  ;;  %v1666_v58 = vld [vmem:[#allocation2 + $0x49] sm:$0xff]  ;;  %v1411_v4 = vld [vmem:[#allocation2 + $0x38] sm:$0xff] }
 0x2e0   :  { %v8460_v31 = vpop.permute.xlu0 %8459  ;;  %v8466_v62 = vunpack.i.l.bf16 %v8465_v37 }
 0x2e1   :  { %v8462_v59 = vunpack.i.h.bf16 %v8460_v31  ;;  %v8461_v60 = vunpack.i.l.bf16 %v8460_v31  ;;  %8754 = vrot.lane.b32.xlu1 %v11872_v46, %s9064_s19  ;;  %v8467_v46 = vunpack.i.h.bf16 %v8465_v37 }
 0x2e2   :  { %8749 = vrot.lane.b32.xlu0 %v11914_v41, %s9064_s19 }
 0x2e3   :  { %v8475_v56 = vpop.permute.xlu1 %8474  ;;  %v3804_v17 = vsel %vm174_vm0, %v3740_v34, %v8461_v60  ;;  %v3805_v11 = vsel %vm174_vm0, %v3741_v14, %v8462_v59  ;;  %v3612_v53 = vsel %vm174_vm0, %v3548_v21, %v8467_v46  ;;  %v1667_v59 = vld [vmem:[#allocation2 + $0x51] sm:$0xff] }
 0x2e4   :  { %v8470_v9 = vpop.permute.xlu0 %8469  ;;  %v8477_v18 = vunpack.i.h.bf16 %v8475_v56  ;;  %v8476_v55 = vunpack.i.l.bf16 %v8475_v56  ;;  %v1841_v46 = vld [vmem:[#allocation2 + $0x2b8] sm:$0xff] }
 0x2e5   :  { %8764 = vrot.lane.b32.xlu1 %v11882_v1, %s9062_s0  ;;  %v3547_v1 = vsel %vm562_vm1, %v1434_v5, %v8456_v33  ;;  %v8472_v43 = vunpack.i.h.bf16 %v8470_v9  ;;  %v8471_v36 = vunpack.i.l.bf16 %v8470_v9  ;;  %v1410_v33 = vld [vmem:[#allocation2 + $0x30] sm:$0xff] }
 0x2e6   :  { %8759 = vrot.lane.b32.xlu0 %v11920_v0, %s9062_s0  ;;  %v3868_v20 = vsel %vm3647_vm3, %v3804_v17, %v8476_v55  ;;  %v3869_v29 = vsel %vm3647_vm3, %v3805_v11, %v8477_v18  ;;  %v3611_v52 = vsel %vm174_vm0, %v3547_v1, %v8466_v62  ;;  %v1842_v62 = vld [vmem:[#allocation2 + $0x2c0] sm:$0xff]  ;;  %v1919_v5 = vld [vmem:[#allocation2 + $0x32] sm:$0xff] }
 0x2e7   :  { %v8485_v48 = vpop.permute.xlu1 %8484  ;;  %v3983_v35 = vpack.c.bf16 %v3869_v29, %v3868_v20  ;;  %v3717_v9 = vsel %vm562_vm1, %v1667_v59, %v8472_v43  ;;  %v3716_v45 = vsel %vm562_vm1, %v1666_v58, %v8471_v36  ;;  %v1905_v43 = vld [vmem:[#allocation2 + $0x2b9] sm:$0xff]  ;;  %v1906_v36 = vld [vmem:[#allocation2 + $0x2c1] sm:$0xff] }
 0x2e8   :  { %v8480_v16 = vpop.permute.xlu0 %8479  ;;  %v8487_v25 = vunpack.i.h.bf16 %v8485_v48  ;;  %v8486_v27 = vunpack.i.l.bf16 %v8485_v48  ;;  %v11982_v58 = vpack.i.bf16 %v1906_v36, %v1905_v43  ;;  %v8061_v36 = vunpack.i.l.bf16 %v11489_v12 }
 0x2e9   :  { %8774 = vrot.lane.b32.xlu1 %v11892_v30, %s9063_s18  ;;  %4384 = vmatprep.mubr.bf16.mxu1 %v3983_v35  ;;  %v8482_v40 = vunpack.i.h.bf16 %v8480_v16  ;;  %v8481_v42 = vunpack.i.l.bf16 %v8480_v16  ;;  %v1777_v30 = vld [vmem:[#allocation2 + $0x2aa] sm:$0xff]  ;;  %v11966_v35 = vpack.i.bf16 %v1842_v62, %v1841_v46  ;;  %v8062_v46 = vunpack.i.h.bf16 %v11489_v12 }
 0x2ea   :  { %8769 = vrot.lane.b32.xlu0 %v11930_v54, %s9063_s18  ;;  %v3676_v15 = vsel %vm3647_vm3, %v3611_v52, %v8486_v27  ;;  %v3677_v57 = vsel %vm3647_vm3, %v3612_v53, %v8487_v25  ;;  %v11952_v8 = vpack.i.bf16 %v1777_v30, %v1776_v28 }
 0x2eb   :  { %v8495_v31 = vpop.permute.xlu1 %8494  ;;  %v3982_v37 = vpack.c.bf16 %v3677_v57, %v3676_v15  ;;  %v3524_v50 = vsel %vm562_vm1, %v1411_v4, %v8482_v40  ;;  %v3523_v14 = vsel %vm562_vm1, %v1410_v33, %v8481_v42  ;;  %v8046_v15 = vunpack.i.l.bf16 %v11467_v39  ;;  %v1692_v57 = vld [vmem:[#allocation2 + $0x181] sm:$0xff]  ;;  %v1693_v40 = vld [vmem:[#allocation2 + $0x189] sm:$0xff] }
 0x2ec   :  { %v8490_v24 = vpop.permute.xlu0 %8489  ;;  %v8497_v60 = vunpack.i.h.bf16 %v8495_v31  ;;  %v8496_v3 = vunpack.i.l.bf16 %v8495_v31  ;;  %v3942_v42 = vpack.c.bf16 %v1920_v7, %v1919_v5  ;;  %v8052_v31 = vunpack.i.h.bf16 %v11475_v32  ;;  %v1779_v4 = vld [vmem:[#allocation2 + $0x2c2] sm:$0xff] }
 0x2ed   :  { %v8492_v26 = vunpack.i.h.bf16 %v8490_v24  ;;  %v8491_v19 = vunpack.i.l.bf16 %v8490_v24  ;;  %8784 = vrot.lane.b32.xlu1 %v11906_v13, %s9064_s19  ;;  %4385 = vmatmul.mubr.bf16.gmra.mxu1 %v3982_v37  ;;  %v8047_v24 = vunpack.i.h.bf16 %v11467_v39  ;;  %v8051_v37 = vunpack.i.l.bf16 %v11475_v32  ;;  %v1439_v39 = vld [vmem:[#allocation2 + $0x1b8] sm:$0xff] }
 0x2ee   :  { %8779 = vrot.lane.b32.xlu0 %v11940_v49, %s9064_s19  ;;  %v3587_v6 = vsel %vm174_vm0, %v3523_v14, %v8496_v3  ;;  %v3588_v38 = vsel %vm174_vm0, %v3524_v50, %v8497_v60  ;;  %v1778_v60 = vld [vmem:[#allocation2 + $0x2ba] sm:$0xff]  ;;  %v1922_v50 = vld [vmem:[#allocation2 + $0x52] sm:$0xff] }
 0x2ef   :  { %v8505_v34 = vpop.permute.xlu1 %8504  ;;  %v3780_v11 = vsel %vm174_vm0, %v3716_v45, %v8491_v19  ;;  %v3781_v16 = vsel %vm174_vm0, %v3717_v9, %v8492_v26  ;;  %v8057_v26 = vunpack.i.h.bf16 %v11477_v63 }
 0x2f0   :  { %v8500_v56 = vpop.permute.xlu0 %8499  ;;  %v8507_v13 = vunpack.i.h.bf16 %v8505_v34  ;;  %v8506_v17 = vunpack.i.l.bf16 %v8505_v34  ;;  %v1923_v34 = vld [vmem:[#allocation2 + $0x62] sm:$0xff] }
 0x2f1   :  { %v8502_v18 = vunpack.i.h.bf16 %v8500_v56  ;;  %v8501_v55 = vunpack.i.l.bf16 %v8500_v56  ;;  %8794 = vrot.lane.b32.xlu1 %v11914_v41, %s9062_s0  ;;  %v1921_v56 = vld [vmem:[#allocation2 + $0x4a] sm:$0xff] }
 0x2f2   :  { %8789 = vrot.lane.b32.xlu0 %v11952_v8, %s9062_s0  ;;  %v3652_v1 = vsel %vm3647_vm3, %v3587_v6, %v8506_v17  ;;  %v3653_v25 = vsel %vm3647_vm3, %v3588_v38, %v8507_v13  ;;  %v1438_v17 = vld [vmem:[#allocation2 + $0x1b0] sm:$0xff]  ;;  %v11995_v38 = vpack.i.bf16 %v1779_v4, %v1778_v60  ;;  %v3945_v5 = vpack.c.bf16 %v1922_v50, %v1921_v56  ;;  %v1908_v60 = vld [vmem:[#allocation2 + $0x2d9] sm:$0xff]  ;;  %v1926_v4 = vld [vmem:[#allocation2 + $0x82] sm:$0xff] }
 0x2f3   :  { %v3844_v20 = vsel %vm3647_vm3, %v3780_v11, %v8501_v55  ;;  %v3845_v29 = vsel %vm3647_vm3, %v3781_v16, %v8502_v18  ;;  %v8515_v27 = vpop.permute.xlu1 %8514  ;;  %v3946_v53 = vpack.c.bf16 %v3653_v25, %v3652_v1  ;;  %v1924_v18 = vld [vmem:[#allocation2 + $0x6a] sm:$0xff]  ;;  %v8056_v55 = vunpack.i.l.bf16 %v11477_v63 }
 0x2f4   :  { %v8510_v48 = vpop.permute.xlu0 %8509  ;;  %v3947_v21 = vpack.c.bf16 %v3845_v29, %v3844_v20  ;;  %v8517_v3 = vunpack.i.h.bf16 %v8515_v27  ;;  %v8516_v9 = vunpack.i.l.bf16 %v8515_v27  ;;  %v3552_v11 = vsel %vm562_vm1, %v1439_v39, %v8057_v26  ;;  %v1436_v16 = vld [vmem:[#allocation2 + $0x168] sm:$0xff]  ;;  %v1437_v20 = vld [vmem:[#allocation2 + $0x170] sm:$0xff] }
 0x2f5   :  { %v8512_v41 = vunpack.i.h.bf16 %v8510_v48  ;;  %v8511_v52 = vunpack.i.l.bf16 %v8510_v48  ;;  %8804 = vrot.lane.b32.xlu1 %v11920_v0, %s9063_s18  ;;  %v3948_v1 = vpack.c.bf16 %v1924_v18, %v1923_v34  ;;  %v1843_v25 = vld [vmem:[#allocation2 + $0x2d0] sm:$0xff]  ;;  %v3551_v43 = vsel %vm562_vm1, %v1438_v17, %v8056_v55  ;;  %v1928_v34 = vld [vmem:[#allocation2 + $0x9a] sm:$0xff] }
 0x2f6   :  { %8799 = vrot.lane.b32.xlu0 %v11966_v35, %s9063_s18  ;;  %4288 = vmatprep.mubr.bf16.mxu0 %v3947_v21  ;;  %v3550_v63 = vsel %vm562_vm1, %v1437_v20, %v8517_v3  ;;  %v3549_v7 = vsel %vm562_vm1, %v1436_v16, %v8516_v9  ;;  %v3615_v16 = vsel %vm174_vm0, %v3551_v43, %v8061_v36  ;;  %v1932_v43 = vld [vmem:[#allocation2 + $0xca] sm:$0xff] }
 0x2f7   :  { %v3743_v28 = vsel %vm562_vm1, %v1693_v40, %v8512_v41  ;;  %v3742_v30 = vsel %vm562_vm1, %v1692_v57, %v8511_v52  ;;  %4289 = vmatmul.mubr.bf16.gmra.mxu0 %v3946_v53  ;;  %v8520_v45 = vpop.permute.xlu1 %8519  ;;  %v1695_v57 = vld [vmem:[#allocation2 + $0x1d1] sm:$0xff]  ;;  %v1694_v40 = vld [vmem:[#allocation2 + $0x1c9] sm:$0xff]  ;;  %v3616_v20 = vsel %vm174_vm0, %v3552_v11, %v8062_v46  ;;  %v9030_v11 = vld [vmem:[#allocation2 + $0x2da] sm:$0xff] }
 0x2f8   :  { %v8530_v19 = vpop.permute.xlu0 %8529  ;;  %7789 = vmatprep.mubr.msk.bf16.mxu0 %vm562_vm1, %v3942_v42  ;;  %v3806_v59 = vsel %vm174_vm0, %v3742_v30, %v8046_v15  ;;  %v3807_v32 = vsel %vm174_vm0, %v3743_v28, %v8047_v24  ;;  %v8522_v62 = vunpack.i.h.bf16 %v8520_v45  ;;  %v8521_v13 = vunpack.i.l.bf16 %v8520_v45  ;;  %v9029_v46 = vld [vmem:[#allocation2 + $0x2d2] sm:$0xff] }
 0x2f9   :  { %v3870_v33 = vsel %vm3647_vm3, %v3806_v59, %v8051_v37  ;;  %v3871_v0 = vsel %vm3647_vm3, %v3807_v32, %v8052_v31  ;;  %8814 = vrot.lane.b32.xlu1 %v11930_v54, %s9064_s19  ;;  %v8532_v29 = vunpack.i.h.bf16 %v8530_v19  ;;  %v8531_v48 = vunpack.i.l.bf16 %v8530_v19  ;;  %v1844_v54 = vld [vmem:[#allocation2 + $0x2d8] sm:$0xff] }
 0x2fa   :  { %8809 = vrot.lane.b32.xlu0 %v11982_v58, %s9064_s19  ;;  %v3986_v14 = vpack.c.bf16 %v3871_v0, %v3870_v33  ;;  %v3613_v24 = vsel %vm174_vm0, %v3549_v7, %v8521_v13  ;;  %v3614_v15 = vsel %vm174_vm0, %v3550_v63, %v8522_v62  ;;  %v12010_v37 = vpack.i.bf16 %v1844_v54, %v1843_v25  ;;  %v1907_v32 = vld [vmem:[#allocation2 + $0x2d1] sm:$0xff]  ;;  %v1925_v0 = vld [vmem:[#allocation2 + $0x7a] sm:$0xff] }
 0x2fb   :  { %v8525_v21 = vpop.permute.xlu1 %8524  ;;  %v3745_v42 = vsel %vm562_vm1, %v1695_v57, %v8532_v29  ;;  %v3744_v39 = vsel %vm562_vm1, %v1694_v40, %v8531_v48  ;;  %v12023_v55 = vpack.i.bf16 %v1908_v60, %v1907_v32  ;;  %v3951_v17 = vpack.c.bf16 %v1926_v4, %v1925_v0  ;;  %v1929_v25 = vld [vmem:[#allocation2 + $0xaa] sm:$0xff]  ;;  %v1930_v54 = vld [vmem:[#allocation2 + $0xb2] sm:$0xff]  ;;  %v1696_v57 = vld [vmem:[#allocation2 + $0x1e1] sm:$0xff] }
 0x2fc   :  { %v8535_v6 = vpop.permute.xlu0 %8534  ;;  %4392 = vmatprep.mubr.bf16.mxu1 %v3986_v14  ;;  %v8527_v27 = vunpack.i.h.bf16 %v8525_v21  ;;  %v8526_v41 = vunpack.i.l.bf16 %v8525_v21  ;;  %v1927_v14 = vld [vmem:[#allocation2 + $0x92] sm:$0xff]  ;;  %v12037_v21 = vpack.i.bf16 %v9030_v11, %v9029_v46  ;;  %v1697_v40 = vld [vmem:[#allocation2 + $0x1e9] sm:$0xff] }
 0x2fd   :  { %v8537_v52 = vunpack.i.h.bf16 %v8535_v6  ;;  %v8536_v53 = vunpack.i.l.bf16 %v8535_v6  ;;  %8824 = vrot.lane.b32.xlu1 %v11940_v49, %s9062_s0  ;;  %v9031_v11 = vld [vmem:[#allocation2 + $0x2ea] sm:$0xff] }
 0x2fe   :  { %8819 = vrot.lane.b32.xlu0 %v11995_v38, %s9062_s0  ;;  %v3678_v28 = vsel %vm3647_vm3, %v3613_v24, %v8526_v41  ;;  %v3679_v30 = vsel %vm3647_vm3, %v3614_v15, %v8527_v27  ;;  %v1441_v15 = vld [vmem:[#allocation2 + $0x1d0] sm:$0xff] }
 0x2ff   :  { %7790 = vmatmul.mubr.msk.bf16.vlgmr.msra.gmra.mxu0 %vm562_vm1, %v3945_v5  ;;  %v8545_v26 = vpop.permute.xlu1 %8544  ;;  %v3985_v49 = vpack.c.bf16 %v3679_v30, %v3678_v28  ;;  %v3808_v3 = vsel %vm174_vm0, %v3744_v39, %v8536_v53  ;;  %v3809_v9 = vsel %vm174_vm0, %v3745_v42, %v8537_v52  ;;  %v1845_v5 = vld [vmem:[#allocation2 + $0x2e8] sm:$0xff]  ;;  %v3957_v28 = vpack.c.bf16 %v1930_v54, %v1929_v25 }
 0x300   :  { %v8540_v31 = vpop.permute.xlu0 %8539  ;;  %7793 = vmatprep.mubr.msk.bf16.mxu0 %vm562_vm1, %v3948_v1  ;;  %v8547_v45 = vunpack.i.h.bf16 %v8545_v26  ;;  %v8546_v33 = vunpack.i.l.bf16 %v8545_v26  ;;  %v1846_v1 = vld [vmem:[#allocation2 + $0x2f0] sm:$0xff]  ;;  %v1931_v53 = vld [vmem:[#allocation2 + $0xc2] sm:$0xff] }
 0x301   :  { %v8542_v19 = vunpack.i.h.bf16 %v8540_v31  ;;  %v8541_v59 = vunpack.i.l.bf16 %v8540_v31  ;;  %8834 = vrot.lane.b32.xlu1 %v11952_v8, %s9063_s18  ;;  %4393 = vmatmul.mubr.bf16.gmra.mxu1 %v3985_v49  ;;  %v3954_v8 = vpack.c.bf16 %v1928_v34, %v1927_v14  ;;  %v12043_v31 = vpack.i.bf16 %v1846_v1, %v1845_v5  ;;  %v1440_v30 = vld [vmem:[#allocation2 + $0x1c8] sm:$0xff]  ;;  %v1935_v5 = vld [vmem:[#allocation2 + $0xf2] sm:$0xff] }
 0x302   :  { %8829 = vrot.lane.b32.xlu0 %v12010_v37, %s9063_s18  ;;  %v3680_v29 = vsel %vm3647_vm3, %v3615_v16, %v8546_v33  ;;  %v3681_v6 = vsel %vm3647_vm3, %v3616_v20, %v8547_v45  ;;  %v3960_v49 = vpack.c.bf16 %v1932_v43, %v1931_v53  ;;  %v1909_v45 = vld [vmem:[#allocation2 + $0x2e9] sm:$0xff]  ;;  %v1910_v33 = vld [vmem:[#allocation2 + $0x2f1] sm:$0xff] }
 0x303   :  { %v3872_v56 = vsel %vm3647_vm3, %v3808_v3, %v8541_v59  ;;  %v3873_v50 = vsel %vm3647_vm3, %v3809_v9, %v8542_v19  ;;  %v8555_v13 = vpop.permute.xlu1 %8554  ;;  %v9032_v1 = vld [vmem:[#allocation2 + $0x2f2] sm:$0xff]  ;;  %v1848_v53 = vld [vmem:[#allocation2 + $0x308] sm:$0xff] }
 0x304   :  { %v8550_v18 = vpop.permute.xlu0 %8549  ;;  %v3989_v62 = vpack.c.bf16 %v3873_v50, %v3872_v56  ;;  %v8557_v63 = vunpack.i.h.bf16 %v8555_v13  ;;  %v8556_v27 = vunpack.i.l.bf16 %v8555_v13  ;;  %v12061_v13 = vpack.i.bf16 %v1910_v33, %v1909_v45  ;;  %v1912_v45 = vld [vmem:[#allocation2 + $0x309] sm:$0xff] }
 0x305   :  { %8844 = vrot.lane.b32.xlu1 %v11966_v35, %s9064_s19  ;;  %v8552_v7 = vunpack.i.h.bf16 %v8550_v18  ;;  %v8551_v12 = vunpack.i.l.bf16 %v8550_v18  ;;  %v3988_v35 = vpack.c.bf16 %v3681_v6, %v3680_v29  ;;  %v1934_v6 = vld [vmem:[#allocation2 + $0xe2] sm:$0xff]  ;;  %v12071_v25 = vpack.i.bf16 %v9032_v1, %v9031_v11 }
 0x306   :  { %8839 = vrot.lane.b32.xlu0 %v12023_v55, %s9064_s19  ;;  %4400 = vmatprep.mubr.bf16.mxu1 %v3989_v62  ;;  %v3554_v39 = vsel %vm562_vm1, %v1441_v15, %v8557_v63  ;;  %v3553_v32 = vsel %vm562_vm1, %v1440_v30, %v8556_v27  ;;  %v1936_v63 = vld [vmem:[#allocation2 + $0xfa] sm:$0xff]  ;;  %v1443_v30 = vld [vmem:[#allocation2 + $0x1e8] sm:$0xff] }
 0x307   :  { %7794 = vmatmul.mubr.msk.bf16.gmra.mxu0 %vm562_vm1, %v3951_v17  ;;  %v8565_v41 = vpop.permute.xlu1 %8564  ;;  %v3747_v26 = vsel %vm562_vm1, %v1697_v40, %v8552_v7  ;;  %v3746_v19 = vsel %vm562_vm1, %v1696_v57, %v8551_v12  ;;  %v1698_v15 = vld [vmem:[#allocation2 + $0x1f9] sm:$0xff]  ;;  %v1699_v57 = vld [vmem:[#allocation2 + $0x201] sm:$0xff] }
 0x308   :  { %v8560_v48 = vpop.permute.xlu0 %8559  ;;  %7797 = vmatprep.mubr.msk.bf16.mxu0 %vm562_vm1, %v3954_v8  ;;  %v8566_v36 = vunpack.i.l.bf16 %v8565_v41  ;;  %v8567_v42 = vunpack.i.h.bf16 %v8565_v41 }
 0x309   :  { %v8561_v52 = vunpack.i.l.bf16 %v8560_v48  ;;  %v8562_v24 = vunpack.i.h.bf16 %v8560_v48  ;;  %8854 = vrot.lane.b32.xlu1 %v11982_v58, %s9062_s0  ;;  %4401 = vmatmul.mubr.bf16.gmra.mxu1 %v3988_v35  ;;  %v1847_v35 = vld [vmem:[#allocation2 + $0x300] sm:$0xff] }
 0x30a   :  { %8849 = vrot.lane.b32.xlu0 %v12037_v21, %s9062_s0  ;;  %v3617_v0 = vsel %vm174_vm0, %v3553_v32, %v8566_v36  ;;  %v3618_v14 = vsel %vm174_vm0, %v3554_v39, %v8567_v42 }
 0x30b   :  { %v3810_v60 = vsel %vm174_vm0, %v3746_v19, %v8561_v52  ;;  %v8575_v3 = vpop.permute.xlu1 %8574  ;;  %v3811_v4 = vsel %vm174_vm0, %v3747_v26, %v8562_v24  ;;  %v3966_v24 = vpack.c.bf16 %v1936_v63, %v1935_v5  ;;  %v1939_v5 = vld [vmem:[#allocation2 + $0x122] sm:$0xff]  ;;  %v1940_v63 = vld [vmem:[#allocation2 + $0x12a] sm:$0xff] }
 0x30c   :  { %v8570_v59 = vpop.permute.xlu0 %8569  ;;  %v8577_v56 = vunpack.i.h.bf16 %v8575_v3  ;;  %v8576_v50 = vunpack.i.l.bf16 %v8575_v3 }
 0x30d   :  { %v8572_v9 = vunpack.i.h.bf16 %v8570_v59  ;;  %v8571_v58 = vunpack.i.l.bf16 %v8570_v59  ;;  %8864 = vrot.lane.b32.xlu1 %v11995_v38, %s9063_s18  ;;  %v1933_v38 = vld [vmem:[#allocation2 + $0xda] sm:$0xff] }
 0x30e   :  { %8859 = vrot.lane.b32.xlu0 %v12043_v31, %s9063_s18  ;;  %v3682_v16 = vsel %vm3647_vm3, %v3617_v0, %v8576_v50  ;;  %v3683_v20 = vsel %vm3647_vm3, %v3618_v14, %v8577_v56  ;;  %v3963_v52 = vpack.c.bf16 %v1934_v6, %v1933_v38 }
 0x30f   :  { %7798 = vmatmul.mubr.msk.bf16.gmra.mxu0 %vm562_vm1, %v3957_v28  ;;  %v3874_v34 = vsel %vm3647_vm3, %v3810_v60, %v8571_v58  ;;  %v3875_v18 = vsel %vm3647_vm3, %v3811_v4, %v8572_v9  ;;  %v8585_v8 = vpop.permute.xlu1 %8584  ;;  %v3991_v29 = vpack.c.bf16 %v3683_v20, %v3682_v16  ;;  %v1442_v28 = vld [vmem:[#allocation2 + $0x1e0] sm:$0xff]  ;;  %v1938_v16 = vld [vmem:[#allocation2 + $0x112] sm:$0xff] }
 0x310   :  { %v8580_v62 = vpop.permute.xlu0 %8579  ;;  %7801 = vmatprep.mubr.msk.bf16.mxu0 %vm562_vm1, %v3960_v49  ;;  %v3992_v17 = vpack.c.bf16 %v3875_v18, %v3874_v34  ;;  %v8587_v54 = vunpack.i.h.bf16 %v8585_v8  ;;  %v8586_v27 = vunpack.i.l.bf16 %v8585_v8  ;;  %v12083_v49 = vpack.i.bf16 %v1848_v53, %v1847_v35  ;;  %v1911_v58 = vld [vmem:[#allocation2 + $0x301] sm:$0xff]  ;;  %v1849_v53 = vld [vmem:[#allocation2 + $0x318] sm:$0xff] }
 0x311   :  { %8874 = vrot.lane.b32.xlu1 %v12010_v37, %s9064_s19  ;;  %v8582_v7 = vunpack.i.h.bf16 %v8580_v62  ;;  %v8581_v12 = vunpack.i.l.bf16 %v8580_v62  ;;  %v12097_v8 = vpack.i.bf16 %v1912_v45, %v1911_v58 }
 0x312   :  { %8869 = vrot.lane.b32.xlu0 %v12061_v13, %s9064_s19  ;;  %4408 = vmatprep.mubr.bf16.mxu1 %v3992_v17  ;;  %v3556_v32 = vsel %vm562_vm1, %v1443_v30, %v8587_v54  ;;  %v3555_v60 = vsel %vm562_vm1, %v1442_v28, %v8586_v27  ;;  %v1937_v17 = vld [vmem:[#allocation2 + $0x10a] sm:$0xff] }
 0x313   :  { %4409 = vmatmul.mubr.bf16.gmra.mxu1 %v3991_v29  ;;  %v12069_v48 = vpop.f32.mrf.mxu1  ;;  %v8595_v41 = vpop.permute.xlu1 %8594  ;;  %v3749_v39 = vsel %vm562_vm1, %v1699_v57, %v8582_v7  ;;  %v3748_v26 = vsel %vm562_vm1, %v1698_v15, %v8581_v12  ;;  %v1943_v57 = vld [vmem:[#allocation2 + $0x152] sm:$0xff] }
 0x314   :  { %v8590_v46 = vpop.permute.xlu0 %8589  ;;  %v8597_v40 = vunpack.i.h.bf16 %v8595_v41  ;;  %v8596_v42 = vunpack.i.l.bf16 %v8595_v41  ;;  %v9033_v41 = vld [vmem:[#allocation2 + $0x302] sm:$0xff] }
 0x315   :  { %v8592_v43 = vunpack.i.h.bf16 %v8590_v46  ;;  %v8591_v37 = vunpack.i.l.bf16 %v8590_v46  ;;  %v4300_v36 = vpop.f32.mrf.mxu1  ;;  %8884 = vrot.lane.b32.xlu1 %v12023_v55, %s9062_s0  ;;  %v3972_v46 = vpack.c.bf16 %v1940_v63, %v1939_v5 }
 0x316   :  { %8879 = vrot.lane.b32.xlu0 %v12071_v25, %s9062_s0  ;;  %v3619_v14 = vsel %vm174_vm0, %v3555_v60, %v8596_v42  ;;  %v3620_v34 = vsel %vm174_vm0, %v3556_v32, %v8597_v40  ;;  %v1944_v40 = vld [vmem:[#allocation2 + $0x15a] sm:$0xff] }
 0x317   :  { %7802 = vmatmul.mubr.msk.bf16.gmra.mxu0 %vm562_vm1, %v3963_v52  ;;  %v12080_v19 = vpop.f32.mrf.mxu1  ;;  %v8605_v55 = vpop.permute.xlu1 %8604  ;;  %v3812_v33 = vsel %vm174_vm0, %v3748_v26, %v8591_v37  ;;  %v3813_v0 = vsel %vm174_vm0, %v3749_v39, %v8592_v43  ;;  %v9034_v52 = vld [vmem:[#allocation2 + $0x30a] sm:$0xff]  ;;  %v1850_v43 = vld [vmem:[#allocation2 + $0x320] sm:$0xff] }
 0x318   :  { %v8600_v59 = vpop.permute.xlu0 %8599  ;;  %7805 = vmatprep.mubr.msk.bf16.mxu0 %vm562_vm1, %v3966_v24  ;;  %v8607_v4 = vunpack.i.h.bf16 %v8605_v55  ;;  %v8606_v56 = vunpack.i.l.bf16 %v8605_v55  ;;  %v12108_v35 = vpack.i.bf16 %v9034_v52, %v9033_v41  ;;  %v1941_v37 = vld [vmem:[#allocation2 + $0x13a] sm:$0xff]  ;;  %v1700_v39 = vld [vmem:[#allocation2 + $0x211] sm:$0xff]  ;;  %v12115_v60 = vpack.i.bf16 %v1850_v43, %v1849_v53 }
 0x319   :  { %v8602_v3 = vunpack.i.h.bf16 %v8600_v59  ;;  %v8601_v9 = vunpack.i.l.bf16 %v8600_v59  ;;  %v4303_v50 = vpop.f32.mrf.mxu1  ;;  %8894 = vrot.lane.b32.xlu1 %v12037_v21, %s9063_s18  ;;  %v3969_v21 = vpack.c.bf16 %v1938_v16, %v1937_v17  ;;  %v1701_v26 = vld [vmem:[#allocation2 + $0x219] sm:$0xff] }
 0x31a   :  { %8889 = vrot.lane.b32.xlu0 %v12083_v49, %s9063_s18  ;;  %v3684_v38 = vsel %vm3647_vm3, %v3619_v14, %v8606_v56  ;;  %v3685_v6 = vsel %vm3647_vm3, %v3620_v34, %v8607_v4  ;;  %v1444_v55 = vld [vmem:[#allocation2 + $0x1f8] sm:$0xff]  ;;  %v3978_v4 = vpack.c.bf16 %v1944_v40, %v1943_v57  ;;  %v1947_v57 = vld [vmem:[#allocation2 + $0x182] sm:$0xff]  ;;  %v1948_v40 = vld [vmem:[#allocation2 + $0x18a] sm:$0xff] }
 0x31b   :  { %v3876_v18 = vsel %vm3647_vm3, %v3812_v33, %v8601_v9  ;;  %v3877_v62 = vsel %vm3647_vm3, %v3813_v0, %v8602_v3  ;;  %v8615_v7 = vpop.permute.xlu1 %8614  ;;  %v3994_v12 = vpack.c.bf16 %v3685_v6, %v3684_v38  ;;  %v1445_v3 = vld [vmem:[#allocation2 + $0x200] sm:$0xff]  ;;  %v1946_v52 = vld [vmem:[#allocation2 + $0x172] sm:$0xff] }
 0x31c   :  { %v8610_v20 = vpop.permute.xlu0 %8609  ;;  %v3995_v29 = vpack.c.bf16 %v3877_v62, %v3876_v18  ;;  %v8617_v36 = vunpack.i.h.bf16 %v8615_v7  ;;  %v8616_v24 = vunpack.i.l.bf16 %v8615_v7  ;;  %v1913_v18 = vld [vmem:[#allocation2 + $0x319] sm:$0xff]  ;;  %v1914_v62 = vld [vmem:[#allocation2 + $0x321] sm:$0xff] }
 0x31d   :  { %8904 = vrot.lane.b32.xlu1 %v12043_v31, %s9064_s19  ;;  %v8612_v11 = vunpack.i.h.bf16 %v8610_v20  ;;  %v8611_v1 = vunpack.i.l.bf16 %v8610_v20  ;;  %v1942_v31 = vld [vmem:[#allocation2 + $0x142] sm:$0xff] }
 0x31e   :  { %8899 = vrot.lane.b32.xlu0 %v12097_v8, %s9064_s19  ;;  %4416 = vmatprep.mubr.bf16.mxu1 %v3995_v29  ;;  %v3975_v0 = vpack.c.bf16 %v1942_v31, %v1941_v37  ;;  %v3558_v56 = vsel %vm562_vm1, %v1445_v3, %v8617_v36  ;;  %v3557_v50 = vsel %vm562_vm1, %v1444_v55, %v8616_v24  ;;  %v9035_v24 = vld [vmem:[#allocation2 + $0x322] sm:$0xff] }
 0x31f   :  { %4417 = vmatmul.mubr.bf16.gmra.mxu1 %v3994_v12  ;;  %v12105_v54 = vpop.f32.mrf.mxu1  ;;  %7806 = vmatmul.mubr.msk.bf16.gmra.mxu0 %vm562_vm1, %v3969_v21  ;;  %v8625_v15 = vpop.permute.xlu1 %8624  ;;  %v3751_v9 = vsel %vm562_vm1, %v1701_v26, %v8612_v11  ;;  %v3750_v58 = vsel %vm562_vm1, %v1700_v39, %v8611_v1  ;;  %v12134_v21 = vpack.i.bf16 %v1914_v62, %v1913_v18  ;;  %v1852_v26 = vld [vmem:[#allocation2 + $0x338] sm:$0xff] }
 0x320   :  { %v8620_v27 = vpop.permute.xlu0 %8619  ;;  %7809 = vmatprep.mubr.msk.bf16.mxu0 %vm562_vm1, %v3972_v46  ;;  %v8627_v59 = vunpack.i.h.bf16 %v8625_v15  ;;  %v8626_v32 = vunpack.i.l.bf16 %v8625_v15  ;;  %v9036_v15 = vld [vmem:[#allocation2 + $0x31a] sm:$0xff] }
 0x321   :  { %v8622_v42 = vunpack.i.h.bf16 %v8620_v27  ;;  %v8621_v28 = vunpack.i.l.bf16 %v8620_v27  ;;  %v4308_v30 = vpop.f32.mrf.mxu1  ;;  %8914 = vrot.lane.b32.xlu1 %v12061_v13, %s9062_s0  ;;  %v12145_v31 = vpack.i.bf16 %v9035_v24, %v9036_v15 }
 0x322   :  { %8909 = vrot.lane.b32.xlu0 %v12108_v35, %s9062_s0  ;;  %v3621_v6 = vsel %vm174_vm0, %v3557_v50, %v8626_v32  ;;  %v3622_v5 = vsel %vm174_vm0, %v3558_v56, %v8627_v59  ;;  %v1916_v59 = vld [vmem:[#allocation2 + $0x339] sm:$0xff]  ;;  %v3984_v56 = vpack.c.bf16 %v1948_v40, %v1947_v57  ;;  %v1446_v50 = vld [vmem:[#allocation2 + $0x210] sm:$0xff]  ;;  %v1951_v57 = vld [vmem:[#allocation2 + $0x1e2] sm:$0xff] }
 0x323   :  { %v12119_v45 = vpop.f32.mrf.mxu1  ;;  %v8635_v14 = vpop.permute.xlu1 %8634  ;;  %v3814_v17 = vsel %vm174_vm0, %v3750_v58, %v8621_v28  ;;  %v3815_v16 = vsel %vm174_vm0, %v3751_v9, %v8622_v42  ;;  %v1851_v42 = vld [vmem:[#allocation2 + $0x330] sm:$0xff] }
 0x324   :  { %v8630_v33 = vpop.permute.xlu0 %8629  ;;  %v8637_v20 = vunpack.i.h.bf16 %v8635_v14  ;;  %v8636_v29 = vunpack.i.l.bf16 %v8635_v14  ;;  %v1702_v58 = vld [vmem:[#allocation2 + $0x229] sm:$0xff]  ;;  %v1447_v14 = vld [vmem:[#allocation2 + $0x218] sm:$0xff] }
 0x325   :  { %v8632_v34 = vunpack.i.h.bf16 %v8630_v33  ;;  %v8631_v13 = vunpack.i.l.bf16 %v8630_v33  ;;  %v4311_v38 = vpop.f32.mrf.mxu1  ;;  %8924 = vrot.lane.b32.xlu1 %v12071_v25, %s9063_s18  ;;  %v1945_v25 = vld [vmem:[#allocation2 + $0x16a] sm:$0xff] }
 0x326   :  { %8919 = vrot.lane.b32.xlu0 %v12115_v60, %s9063_s18  ;;  %v3686_v11 = vsel %vm3647_vm3, %v3621_v6, %v8636_v29  ;;  %v3687_v1 = vsel %vm3647_vm3, %v3622_v5, %v8637_v20  ;;  %v3981_v9 = vpack.c.bf16 %v1946_v52, %v1945_v25  ;;  %v1703_v33 = vld [vmem:[#allocation2 + $0x231] sm:$0xff]  ;;  %v1949_v5 = vld [vmem:[#allocation2 + $0x19a] sm:$0xff] }
 0x327   :  { %v3878_v63 = vsel %vm3647_vm3, %v3814_v17, %v8631_v13  ;;  %v3879_v7 = vsel %vm3647_vm3, %v3815_v16, %v8632_v34  ;;  %7810 = vmatmul.mubr.msk.bf16.gmra.mxu0 %vm562_vm1, %v3975_v0  ;;  %v8645_v27 = vpop.permute.xlu1 %8644  ;;  %v3997_v41 = vpack.c.bf16 %v3687_v1, %v3686_v11  ;;  %v12156_v17 = vpack.i.bf16 %v1852_v26, %v1851_v42  ;;  %v1952_v40 = vld [vmem:[#allocation2 + $0x1ea] sm:$0xff] }
 0x328   :  { %v8640_v12 = vpop.permute.xlu0 %8639  ;;  %v3998_v46 = vpack.c.bf16 %v3879_v7, %v3878_v63  ;;  %7813 = vmatprep.mubr.msk.bf16.mxu0 %vm562_vm1, %v3978_v4  ;;  %v8647_v28 = vunpack.i.h.bf16 %v8645_v27  ;;  %v8646_v30 = vunpack.i.l.bf16 %v8645_v27  ;;  %v1950_v63 = vld [vmem:[#allocation2 + $0x1a2] sm:$0xff] }
 0x329   :  { %8934 = vrot.lane.b32.xlu1 %v12083_v49, %s9064_s19  ;;  %v8642_v53 = vunpack.i.h.bf16 %v8640_v12  ;;  %v8641_v43 = vunpack.i.l.bf16 %v8640_v12  ;;  %v1915_v49 = vld [vmem:[#allocation2 + $0x331] sm:$0xff]  ;;  %v3987_v15 = vpack.c.bf16 %v1950_v63, %v1949_v5  ;;  %v1917_v26 = vld [vmem:[#allocation2 + $0x349] sm:$0xff] }
 0x32a   :  { %8929 = vrot.lane.b32.xlu0 %v12134_v21, %s9064_s19  ;;  %4424 = vmatprep.mubr.bf16.mxu1 %v3998_v46  ;;  %v8958_v16 = vpack.i.bf16 %v1916_v59, %v1915_v49  ;;  %v3560_v20 = vsel %vm562_vm1, %v1447_v14, %v8647_v28  ;;  %v3559_v29 = vsel %vm562_vm1, %v1446_v50, %v8646_v30  ;;  %v12173_v30 = vld [vmem:[#allocation2 + $0x332] sm:$0xff]  ;;  %v1956_v50 = vld [vmem:[#allocation2 + $0x21a] sm:$0xff] }
 0x32b   :  { %4425 = vmatmul.mubr.bf16.gmra.mxu1 %v3997_v41  ;;  %v12143_v37 = vpop.f32.mrf.mxu1  ;;  %v8655_v39 = vpop.permute.xlu1 %8654  ;;  %v3753_v34 = vsel %vm562_vm1, %v1703_v33, %v8642_v53  ;;  %v3752_v13 = vsel %vm562_vm1, %v1702_v58, %v8641_v43  ;;  %v1918_v49 = vld [vmem:[#allocation2 + $0x351] sm:$0xff]  ;;  %v1953_v58 = vld [vmem:[#allocation2 + $0x1fa] sm:$0xff] }
 0x32c   :  { %v8650_v36 = vpop.permute.xlu0 %8649  ;;  %v8657_v0 = vunpack.i.h.bf16 %v8655_v39  ;;  %v8656_v4 = vunpack.i.l.bf16 %v8655_v39  ;;  %v12175_v39 = vld [vmem:[#allocation2 + $0x33a] sm:$0xff] }
 0x32d   :  { %v8652_v32 = vunpack.i.h.bf16 %v8650_v36  ;;  %v8651_v55 = vunpack.i.l.bf16 %v8650_v36  ;;  %v4316_v3 = vpop.f32.mrf.mxu1  ;;  %8944 = vrot.lane.b32.xlu1 %v12097_v8, %s9062_s0 }
 0x32e   :  { %8939 = vrot.lane.b32.xlu0 %v12145_v31, %s9062_s0  ;;  %v3623_v27 = vsel %vm174_vm0, %v3559_v29, %v8656_v4  ;;  %v3624_v41 = vsel %vm174_vm0, %v3560_v20, %v8657_v0  ;;  %v1705_v20 = vld [vmem:[#allocation2 + $0x249] sm:$0xff] }
 0x32f   :  { %v12153_v18 = vpop.f32.mrf.mxu1  ;;  %7814 = vmatmul.mubr.msk.bf16.gmra.mxu0 %vm562_vm1, %v3981_v9  ;;  %v8665_v8 = vpop.permute.xlu1 %8664  ;;  %v3816_v7 = vsel %vm174_vm0, %v3752_v13, %v8651_v55  ;;  %v3817_v12 = vsel %vm174_vm0, %v3753_v34, %v8652_v32  ;;  %v8968_v9 = vpack.i.bf16 %v12175_v39, %v12173_v30 }
 0x330   :  { %v8660_v62 = vpop.permute.xlu0 %8659  ;;  %7817 = vmatprep.mubr.msk.bf16.mxu0 %vm562_vm1, %v3984_v56  ;;  %v8667_v46 = vunpack.i.h.bf16 %v8665_v8  ;;  %v8666_v11 = vunpack.i.l.bf16 %v8665_v8  ;;  %v1955_v56 = vld [vmem:[#allocation2 + $0x212] sm:$0xff] }
 0x331   :  { %v8662_v38 = vunpack.i.h.bf16 %v8660_v62  ;;  %v8661_v6 = vunpack.i.l.bf16 %v8660_v62  ;;  %v4319_v1 = vpop.f32.mrf.mxu1  ;;  %8954 = vrot.lane.b32.xlu1 %v12108_v35, %s9063_s18  ;;  %v3990_v35 = vpack.c.bf16 %v1952_v40, %v1951_v57  ;;  %v8983_v62 = vpack.i.bf16 %v1918_v49, %v1917_v26 }
 0x332   :  { %8949 = vrot.lane.b32.xlu0 %v12156_v17, %s9063_s18  ;;  %v3688_v36 = vsel %vm3647_vm3, %v3623_v27, %v8666_v11  ;;  %v3689_v24 = vsel %vm3647_vm3, %v3624_v41, %v8667_v46  ;;  %v3996_v11 = vpack.c.bf16 %v1956_v50, %v1955_v56 }
 0x333   :  { %v3880_v25 = vsel %vm3647_vm3, %v3816_v7, %v8661_v6  ;;  %v3881_v52 = vsel %vm3647_vm3, %v3817_v12, %v8662_v38  ;;  %v8675_v42 = vpop.permute.xlu1 %8674  ;;  %v4000_v28 = vpack.c.bf16 %v3689_v24, %v3688_v36  ;;  %v1448_v38 = vld [vmem:[#allocation2 + $0x228] sm:$0xff]  ;;  %v1449_v6 = vld [vmem:[#allocation2 + $0x230] sm:$0xff] }
 0x334   :  { %v8670_v53 = vpop.permute.xlu0 %8669  ;;  %v4001_v43 = vpack.c.bf16 %v3881_v52, %v3880_v25  ;;  %v8677_v33 = vunpack.i.h.bf16 %v8675_v42  ;;  %v8676_v0 = vunpack.i.l.bf16 %v8675_v42 }
 0x335   :  { %8964 = vrot.lane.b32.xlu1 %v12115_v60, %s9064_s19  ;;  %v8672_v59 = vunpack.i.h.bf16 %v8670_v53  ;;  %v8671_v32 = vunpack.i.l.bf16 %v8670_v53  ;;  %v1954_v60 = vld [vmem:[#allocation2 + $0x202] sm:$0xff] }
 0x336   :  { %8959 = vrot.lane.b32.xlu0 %v8958_v16, %s9064_s19  ;;  %4432 = vmatprep.mubr.bf16.mxu1 %v4001_v43  ;;  %v1704_v16 = vld [vmem:[#allocation2 + $0x241] sm:$0xff]  ;;  %v3993_v46 = vpack.c.bf16 %v1954_v60, %v1953_v58  ;;  %v3562_v1 = vsel %vm562_vm1, %v1449_v6, %v8677_v33  ;;  %v3561_v27 = vsel %vm562_vm1, %v1448_v38, %v8676_v0  ;;  %v1960_v60 = vld [vmem:[#allocation2 + $0x24a] sm:$0xff] }
 0x337   :  { %4433 = vmatmul.mubr.bf16.gmra.mxu1 %v4000_v28  ;;  %v12180_v55 = vpop.f32.mrf.mxu1  ;;  %7818 = vmatmul.mubr.msk.bf16.gmra.mxu0 %vm562_vm1, %v3987_v15  ;;  %v8685_v4 = vpop.permute.xlu1 %8684  ;;  %v3755_v5 = vsel %vm562_vm1, %v1705_v20, %v8672_v59  ;;  %v3754_v63 = vsel %vm562_vm1, %v1704_v16, %v8671_v32  ;;  %v1706_v20 = vld [vmem:[#allocation2 + $0x259] sm:$0xff] }
 0x338   :  { %v8680_v3 = vpop.permute.xlu0 %8679  ;;  %7821 = vmatprep.mubr.msk.bf16.mxu0 %vm562_vm1, %v3990_v35  ;;  %v8687_v29 = vunpack.i.h.bf16 %v8685_v4  ;;  %v8686_v8 = vunpack.i.l.bf16 %v8685_v4  ;;  %v1959_v4 = vld [vmem:[#allocation2 + $0x242] sm:$0xff] }
 0x339   :  { %v8682_v14 = vunpack.i.h.bf16 %v8680_v3  ;;  %v8681_v34 = vunpack.i.l.bf16 %v8680_v3  ;;  %v4324_v13 = vpop.f32.mrf.mxu1  ;;  %8974 = vrot.lane.b32.xlu1 %v12134_v21, %s9062_s0  ;;  %v1958_v3 = vld [vmem:[#allocation2 + $0x232] sm:$0xff]  ;;  %v4002_v38 = vpack.c.bf16 %v1960_v60, %v1959_v4  ;;  %v1450_v6 = vld [vmem:[#allocation2 + $0x240] sm:$0xff] }
 0x33a   :  { %8969 = vrot.lane.b32.xlu0 %v8968_v9, %s9062_s0  ;;  %v3625_v15 = vsel %vm174_vm0, %v3561_v27, %v8686_v8  ;;  %v3626_v57 = vsel %vm174_vm0, %v3562_v1, %v8687_v29  ;;  %v1707_v29 = vld [vmem:[#allocation2 + $0x261] sm:$0xff] }
 0x33b   :  { %v12191_v7 = vpop.f32.mrf.mxu1  ;;  %v8695_v41 = vpop.permute.xlu1 %8694  ;;  %v3818_v21 = vsel %vm174_vm0, %v3754_v63, %v8681_v34  ;;  %v3819_v53 = vsel %vm174_vm0, %v3755_v5, %v8682_v14  ;;  %v1451_v5 = vld [vmem:[#allocation2 + $0x248] sm:$0xff] }
 0x33c   :  { %v8690_v12 = vpop.permute.xlu0 %8689  ;;  %v8697_v43 = vunpack.i.h.bf16 %v8695_v41  ;;  %v8696_v36 = vunpack.i.l.bf16 %v8695_v41 }
 0x33d   :  { %v8692_v25 = vunpack.i.h.bf16 %v8690_v12  ;;  %v8691_v52 = vunpack.i.l.bf16 %v8690_v12  ;;  %v4327_v24 = vpop.f32.mrf.mxu1  ;;  %8979 = vrot.lane.b32.xlu1 %v12145_v31, %s9063_s18  ;;  %v1957_v31 = vld [vmem:[#allocation2 + $0x22a] sm:$0xff] }
 0x33e   :  { %8984 = vrot.lane.b32.xlu0 %v8983_v62, %s9064_s19  ;;  %v3690_v26 = vsel %vm3647_vm3, %v3625_v15, %v8696_v36  ;;  %v3691_v49 = vsel %vm3647_vm3, %v3626_v57, %v8697_v43  ;;  %v3999_v16 = vpack.c.bf16 %v1958_v3, %v1957_v31  ;;  %v1963_v31 = vld [vmem:[#allocation2 + $0x272] sm:$0xff]  ;;  %v1964_v3 = vld [vmem:[#allocation2 + $0x27a] sm:$0xff] }
 0x33f   :  { %v3882_v40 = vsel %vm3647_vm3, %v3818_v21, %v8691_v52  ;;  %v3883_v42 = vsel %vm3647_vm3, %v3819_v53, %v8692_v25  ;;  %7822 = vmatmul.mubr.msk.bf16.gmra.mxu0 %vm562_vm1, %v3993_v46  ;;  %v8705_v59 = vpop.permute.xlu1 %8704  ;;  %v4003_v32 = vpack.c.bf16 %v3691_v49, %v3690_v26  ;;  %v4008_v4 = vpack.c.bf16 %v1964_v3, %v1963_v31 }
 0x340   :  { %v8700_v28 = vpop.permute.xlu0 %8699  ;;  %v4004_v35 = vpack.c.bf16 %v3883_v42, %v3882_v40  ;;  %7825 = vmatprep.mubr.msk.bf16.mxu0 %vm562_vm1, %v3996_v11  ;;  %v8707_v56 = vunpack.i.h.bf16 %v8705_v59  ;;  %v8706_v50 = vunpack.i.l.bf16 %v8705_v59 }
 0x341   :  { %8989 = vrot.lane.b32.xlu1 %v12156_v17, %s9064_s19  ;;  %v8702_v9 = vunpack.i.h.bf16 %v8700_v28  ;;  %v8701_v58 = vunpack.i.l.bf16 %v8700_v28  ;;  %v1961_v28 = vld [vmem:[#allocation2 + $0x25a] sm:$0xff] }
 0x342   :  { %4440 = vmatprep.mubr.bf16.mxu1 %v4004_v35  ;;  %v3564_v1 = vsel %vm562_vm1, %v1451_v5, %v8707_v56  ;;  %v3563_v27 = vsel %vm562_vm1, %v1450_v6, %v8706_v50  ;;  %v1962_v35 = vld [vmem:[#allocation2 + $0x262] sm:$0xff] }
 0x343   :  { %4441 = vmatmul.mubr.bf16.gmra.mxu1 %v4003_v32  ;;  %v12210_v33 = vpop.f32.mrf.mxu1  ;;  %v8715_v14 = vpop.permute.xlu1 %8714  ;;  %v3757_v63 = vsel %vm562_vm1, %v1707_v29, %v8702_v9  ;;  %v3756_v12 = vsel %vm562_vm1, %v1706_v20, %v8701_v58  ;;  %v1967_v29 = vld [vmem:[#allocation2 + $0x2a2] sm:$0xff] }
 0x344   :  { %v8710_v0 = vpop.permute.xlu0 %8709  ;;  %v8717_v17 = vunpack.i.h.bf16 %v8715_v14  ;;  %v8716_v8 = vunpack.i.l.bf16 %v8715_v14 }
 0x345   :  { %v8712_v34 = vunpack.i.h.bf16 %v8710_v0  ;;  %v8711_v13 = vunpack.i.l.bf16 %v8710_v0  ;;  %v4332_v62 = vpop.f32.mrf.mxu1  ;;  %v4005_v0 = vpack.c.bf16 %v1962_v35, %v1961_v28 }
 0x346   :  { %v3627_v15 = vsel %vm174_vm0, %v3563_v27, %v8716_v8  ;;  %v3628_v57 = vsel %vm174_vm0, %v3564_v1, %v8717_v17  ;;  %v1968_v17 = vld [vmem:[#allocation2 + $0x2aa] sm:$0xff]  ;;  %v9015_v8 = vld [vmem:[%s16791_s10 + $0x18] sm:$0xff]  }
 0x347   :  { %v12214_v46 = vpop.f32.mrf.mxu1  ;;  %7826 = vmatmul.mubr.msk.bf16.gmra.mxu0 %vm562_vm1, %v3999_v16  ;;  %v8725_v41 = vpop.permute.xlu1 %8724  ;;  %v3820_v21 = vsel %vm174_vm0, %v3756_v12, %v8711_v13  ;;  %v3821_v53 = vsel %vm174_vm0, %v3757_v63, %v8712_v34  ;;  %v1965_v34 = vld [vmem:[#allocation2 + $0x28a] sm:$0xff]  ;;  %v1966_v13 = vld [vmem:[#allocation2 + $0x292] sm:$0xff]  ;;  %7921 = vmatprep.subr.bf16.mxu1 %v9015_v8 }
 0x348   :  { %v8720_v11 = vpop.permute.xlu0 %8719  ;;  %7829 = vmatprep.mubr.msk.bf16.mxu0 %vm562_vm1, %v4002_v38  ;;  %v8727_v43 = vunpack.i.h.bf16 %v8725_v41  ;;  %v8726_v36 = vunpack.i.l.bf16 %v8725_v41  ;;  %v1708_v63 = vld [vmem:[#allocation2 + $0x271] sm:$0xff]  ;;  %v1709_v12 = vld [vmem:[#allocation2 + $0x279] sm:$0xff]  ;;  %7922 = vmatpush3.bf16.msra.mxu1 %v9015_v8 }
 0x349   :  { %v8722_v25 = vunpack.i.h.bf16 %v8720_v11  ;;  %v8721_v52 = vunpack.i.l.bf16 %v8720_v11  ;;  %v4335_v24 = vpop.f32.mrf.mxu1  ;;  %v1452_v27 = vld [vmem:[#allocation2 + $0x258] sm:$0xff]  ;;  %v1453_v41 = vld [vmem:[#allocation2 + $0x260] sm:$0xff] }
 0x34a   :  { %v3692_v59 = vsel %vm3647_vm3, %v3627_v15, %v8726_v36  ;;  %v3693_v32 = vsel %vm3647_vm3, %v3628_v57, %v8727_v43  ;;  %v4011_v43 = vpack.c.bf16 %v1966_v13, %v1965_v34  ;;  %v4014_v36 = vpack.c.bf16 %v1968_v17, %v1967_v29  ;;  %v1969_v34 = vld [vmem:[#allocation2 + $0x2ba] sm:$0xff]  ;;  %v1970_v13 = vld [vmem:[#allocation2 + $0x2c2] sm:$0xff] }
 0x34b   :  { %v3884_v40 = vsel %vm3647_vm3, %v3820_v21, %v8721_v52  ;;  %v3885_v42 = vsel %vm3647_vm3, %v3821_v53, %v8722_v25  ;;  %v8735_v9 = vpop.permute.xlu1 %8734  ;;  %v4006_v58 = vpack.c.bf16 %v3693_v32, %v3692_v59 }
 0x34c   :  { %v8730_v26 = vpop.permute.xlu0 %8729  ;;  %v4007_v49 = vpack.c.bf16 %v3885_v42, %v3884_v40  ;;  %v8737_v62 = vunpack.i.h.bf16 %v8735_v9  ;;  %v8736_v16 = vunpack.i.l.bf16 %v8735_v9 }
 0x34d   :  { %v8732_v60 = vunpack.i.h.bf16 %v8730_v26  ;;  %v8731_v56 = vunpack.i.l.bf16 %v8730_v26 }
 0x34e   :  { %4448 = vmatprep.mubr.bf16.mxu1 %v4007_v49  ;;  %v3566_v24 = vsel %vm562_vm1, %v1453_v41, %v8737_v62  ;;  %v3565_v15 = vsel %vm562_vm1, %v1452_v27, %v8736_v16 }
 0x34f   :  { %4449 = vmatmul.mubr.bf16.gmra.mxu1 %v4006_v58  ;;  %v12228_v50 = vpop.f32.mrf.mxu1  ;;  %7830 = vmatmul.mubr.msk.bf16.gmra.mxu0 %vm562_vm1, %v4005_v0  ;;  %v8745_v20 = vpop.permute.xlu1 %8744  ;;  %v3759_v25 = vsel %vm562_vm1, %v1709_v12, %v8732_v60  ;;  %v3758_v52 = vsel %vm562_vm1, %v1708_v63, %v8731_v56  ;;  %v4017_v12 = vpack.c.bf16 %v1970_v13, %v1969_v34 }
 0x350   :  { %v8740_v14 = vpop.permute.xlu0 %8739  ;;  %7833 = vmatprep.mubr.msk.bf16.mxu0 %vm562_vm1, %v4008_v4  ;;  %v8747_v11 = vunpack.i.h.bf16 %v8745_v20  ;;  %v8746_v1 = vunpack.i.l.bf16 %v8745_v20 }
 0x351   :  { %v8742_v38 = vunpack.i.h.bf16 %v8740_v14  ;;  %v8741_v6 = vunpack.i.l.bf16 %v8740_v14  ;;  %v4340_v5 = vpop.f32.mrf.mxu1 }
 0x352   :  { %v3629_v32 = vsel %vm174_vm0, %v3565_v15, %v8746_v1  ;;  %v3630_v31 = vsel %vm174_vm0, %v3566_v24, %v8747_v11  ;;  %v1710_v11 = vld [vmem:[#allocation2 + $0x289] sm:$0xff]  ;;  %v1711_v1 = vld [vmem:[#allocation2 + $0x291] sm:$0xff] }
 0x353   :  { %v12237_v21 = vpop.f32.mrf.mxu1  ;;  %v8755_v57 = vpop.permute.xlu1 %8754  ;;  %v3822_v28 = vsel %vm174_vm0, %v3758_v52, %v8741_v6  ;;  %v3823_v35 = vsel %vm174_vm0, %v3759_v25, %v8742_v38  ;;  %v1454_v25 = vld [vmem:[#allocation2 + $0x270] sm:$0xff]  ;;  %v1455_v52 = vld [vmem:[#allocation2 + $0x278] sm:$0xff] }
 0x354   :  { %v8750_v53 = vpop.permute.xlu0 %8749  ;;  %v8757_v26 = vunpack.i.h.bf16 %v8755_v57  ;;  %v8756_v49 = vunpack.i.l.bf16 %v8755_v57 }
 0x355   :  { %v8752_v40 = vunpack.i.h.bf16 %v8750_v53  ;;  %v8751_v42 = vunpack.i.l.bf16 %v8750_v53  ;;  %v4343_v59 = vpop.f32.mrf.mxu1 }
 0x356   :  { %v3694_v4 = vsel %vm3647_vm3, %v3629_v32, %v8756_v49  ;;  %v3695_v60 = vsel %vm3647_vm3, %v3630_v31, %v8757_v26 }
 0x357   :  { %v3886_v3 = vsel %vm3647_vm3, %v3822_v28, %v8751_v42  ;;  %v3887_v9 = vsel %vm3647_vm3, %v3823_v35, %v8752_v40  ;;  %7834 = vmatmul.mubr.msk.bf16.gmra.mxu0 %vm562_vm1, %v4011_v43  ;;  %v8765_v56 = vpop.permute.xlu1 %8764  ;;  %v4009_v14 = vpack.c.bf16 %v3695_v60, %v3694_v4  ;;  %v17257_v35 = vpack.c.bf16 %v11429_v22, %v11427_v51 }
 0x358   :  { %v8760_v58 = vpop.permute.xlu0 %8759  ;;  %v4010_v0 = vpack.c.bf16 %v3887_v9, %v3886_v3  ;;  %7837 = vmatprep.mubr.msk.bf16.mxu0 %vm562_vm1, %v4014_v36  ;;  %v8767_v17 = vunpack.i.h.bf16 %v8765_v56  ;;  %v8766_v8 = vunpack.i.l.bf16 %v8765_v56 }
 0x359   :  { %v8762_v62 = vunpack.i.h.bf16 %v8760_v58  ;;  %v8761_v16 = vunpack.i.l.bf16 %v8760_v58 }
 0x35a   :  { %4456 = vmatprep.mubr.bf16.mxu1 %v4010_v0  ;;  %v3568_v15 = vsel %vm562_vm1, %v1455_v52, %v8767_v17  ;;  %v3567_v57 = vsel %vm562_vm1, %v1454_v25, %v8766_v8  ;;  %v1456_v25 = vld [vmem:[#allocation2 + $0x288] sm:$0xff] }
 0x35b   :  { %4457 = vmatmul.mubr.bf16.gmra.mxu1 %v4009_v14  ;;  %v12251_v20 = vpop.f32.mrf.mxu1  ;;  %v8775_v38 = vpop.permute.xlu1 %8774  ;;  %v3761_v53 = vsel %vm562_vm1, %v1711_v1, %v8762_v62  ;;  %v3760_v43 = vsel %vm562_vm1, %v1710_v11, %v8761_v16  ;;  %v17258_v16 = vpack.c.bf16 %v11437_v23, %v11435_v44  ;;  %v1712_v11 = vld [vmem:[#allocation2 + $0x2a1] sm:$0xff]  ;;  %v1713_v1 = vld [vmem:[#allocation2 + $0x2a9] sm:$0xff] }
 0x35c   :  { %v8770_v29 = vpop.permute.xlu0 %8769  ;;  %v8777_v27 = vunpack.i.h.bf16 %v8775_v38  ;;  %v8776_v41 = vunpack.i.l.bf16 %v8775_v38  ;;  %v1457_v44 = vld [vmem:[#allocation2 + $0x290] sm:$0xff] }
 0x35d   :  { %v8772_v6 = vunpack.i.h.bf16 %v8770_v29  ;;  %v8771_v5 = vunpack.i.l.bf16 %v8770_v29  ;;  %v4348_v63 = vpop.f32.mrf.mxu1 }
 0x35e   :  { %v3631_v3 = vsel %vm174_vm0, %v3567_v57, %v8776_v41  ;;  %v3632_v9 = vsel %vm174_vm0, %v3568_v15, %v8777_v27 }
 0x35f   :  { %v12255_v36 = vpop.f32.mrf.mxu1  ;;  %7838 = vmatmul.mubr.msk.bf16.gmra.mxu0 %vm562_vm1, %v4017_v12  ;;  %v8785_v40 = vpop.permute.xlu1 %8784  ;;  %v3824_v26 = vsel %vm174_vm0, %v3760_v43, %v8771_v5  ;;  %v3825_v49 = vsel %vm174_vm0, %v3761_v53, %v8772_v6  ;;  %v17259_v6 = vpack.c.bf16 %v11447_v61, %v11445_v10  ;;  %v4032_v10 = vpack.c.bf16 %v12175_v39, %v12173_v30 }
 0x360   :  { %v8780_v24 = vpop.permute.xlu0 %8779  ;;  %7841 = vmatprep.mubr.msk.bf16.mxu0 %vm562_vm1, %v17257_v35  ;;  %v8787_v59 = vunpack.i.h.bf16 %v8785_v40  ;;  %v8786_v32 = vunpack.i.l.bf16 %v8785_v40 }
 0x361   :  { %v8782_v42 = vunpack.i.h.bf16 %v8780_v24  ;;  %v8781_v28 = vunpack.i.l.bf16 %v8780_v24  ;;  %v4351_v31 = vpop.f32.mrf.mxu1 }
 0x362   :  { %v3696_v51 = vsel %vm3647_vm3, %v3631_v3, %v8786_v32  ;;  %v3697_v22 = vsel %vm3647_vm3, %v3632_v9, %v8787_v59  ;;  %v17260_v31 = vpack.c.bf16 %v11451_v2, %v11455_v47 }
 0x363   :  { %v3888_v58 = vsel %vm3647_vm3, %v3824_v26, %v8781_v28  ;;  %v3889_v0 = vsel %vm3647_vm3, %v3825_v49, %v8782_v42  ;;  %v8795_v56 = vpop.permute.xlu1 %8794  ;;  %v4012_v14 = vpack.c.bf16 %v3697_v22, %v3696_v51  ;;  %v1981_v51 = vld [vmem:[#allocation2 + $0x34a] sm:$0xff]  ;;  %v1982_v22 = vld [vmem:[#allocation2 + $0x352] sm:$0xff] }
 0x364   :  { %v8790_v4 = vpop.permute.xlu0 %8789  ;;  %v4013_v60 = vpack.c.bf16 %v3889_v0, %v3888_v58  ;;  %v8797_v17 = vunpack.i.h.bf16 %v8795_v56  ;;  %v8796_v8 = vunpack.i.l.bf16 %v8795_v56  ;;  %v4035_v47 = vpack.c.bf16 %v1982_v22, %v1981_v51 }
 0x365   :  { %v8792_v34 = vunpack.i.h.bf16 %v8790_v4  ;;  %v8791_v13 = vunpack.i.l.bf16 %v8790_v4 }
 0x366   :  { %4464 = vmatprep.mubr.bf16.mxu1 %v4013_v60  ;;  %v3570_v61 = vsel %vm562_vm1, %v1457_v44, %v8797_v17  ;;  %v3569_v24 = vsel %vm562_vm1, %v1456_v25, %v8796_v8 }
 0x367   :  { %4465 = vmatmul.mubr.bf16.gmra.mxu1 %v4012_v14  ;;  %v12272_v62 = vpop.f32.mrf.mxu1  ;;  %7842 = vmatmul.mubr.msk.bf16.gmra.mxu0 %vm562_vm1, %v17258_v16  ;;  %v8805_v38 = vpop.permute.xlu1 %8804  ;;  %v3763_v23 = vsel %vm562_vm1, %v1713_v1, %v8792_v34  ;;  %v3762_v52 = vsel %vm562_vm1, %v1712_v11, %v8791_v13  ;;  %v1458_v11 = vld [vmem:[#allocation2 + $0x2a0] sm:$0xff]  ;;  %v1459_v1 = vld [vmem:[#allocation2 + $0x2a8] sm:$0xff] }
 0x368   :  { %v8800_v29 = vpop.permute.xlu0 %8799  ;;  %7845 = vmatprep.mubr.msk.bf16.mxu0 %vm562_vm1, %v17259_v6  ;;  %v8807_v27 = vunpack.i.h.bf16 %v8805_v38  ;;  %v8806_v41 = vunpack.i.l.bf16 %v8805_v38  ;;  %v1714_v6 = vld [vmem:[#allocation2 + $0x2b9] sm:$0xff] }
 0x369   :  { %v8802_v5 = vunpack.i.h.bf16 %v8800_v29  ;;  %v8801_v63 = vunpack.i.l.bf16 %v8800_v29  ;;  %v4356_v12 = vpop.f32.mrf.mxu1 }
 0x36a   :  { %v3633_v59 = vsel %vm174_vm0, %v3569_v24, %v8806_v41  ;;  %v3634_v32 = vsel %vm174_vm0, %v3570_v61, %v8807_v27 }
 0x36b   :  { %v12284_v53 = vpop.f32.mrf.mxu1  ;;  %v8815_v15 = vpop.permute.xlu1 %8814  ;;  %v3826_v42 = vsel %vm174_vm0, %v3762_v52, %v8801_v63  ;;  %v3827_v28 = vsel %vm174_vm0, %v3763_v23, %v8802_v5  ;;  %v1715_v5 = vld [vmem:[#allocation2 + $0x2c1] sm:$0xff] }
 0x36c   :  { %v8810_v43 = vpop.permute.xlu0 %8809  ;;  %v8817_v35 = vunpack.i.h.bf16 %v8815_v15  ;;  %v8816_v26 = vunpack.i.l.bf16 %v8815_v15 }
 0x36d   :  { %v8812_v57 = vunpack.i.h.bf16 %v8810_v43  ;;  %v8811_v40 = vunpack.i.l.bf16 %v8810_v43  ;;  %v4359_v49 = vpop.f32.mrf.mxu1 }
 0x36e   :  { %v3698_v58 = vsel %vm3647_vm3, %v3633_v59, %v8816_v26  ;;  %v3699_v0 = vsel %vm3647_vm3, %v3634_v32, %v8817_v35 }
 0x36f   :  { %v3890_v30 = vsel %vm3647_vm3, %v3826_v42, %v8811_v40  ;;  %v3891_v39 = vsel %vm3647_vm3, %v3827_v28, %v8812_v57  ;;  %7846 = vmatmul.mubr.msk.bf16.gmra.mxu0 %vm562_vm1, %v17260_v31  ;;  %v8825_v4 = vpop.permute.xlu1 %8824  ;;  %v4015_v60 = vpack.c.bf16 %v3699_v0, %v3698_v58 }
 0x370   :  { %v8820_v3 = vpop.permute.xlu0 %8819  ;;  %v4016_v9 = vpack.c.bf16 %v3891_v39, %v3890_v30  ;;  %7849 = vmatprep.mubr.msk.bf16.mxu0 %vm562_vm1, %v4032_v10  ;;  %v8827_v13 = vunpack.i.h.bf16 %v8825_v4  ;;  %v8826_v16 = vunpack.i.l.bf16 %v8825_v4 }
 0x371   :  { %v8822_v56 = vunpack.i.h.bf16 %v8820_v3  ;;  %v8821_v14 = vunpack.i.l.bf16 %v8820_v3 }
 0x372   :  { %4472 = vmatprep.mubr.bf16.mxu1 %v4016_v9  ;;  %v3572_v23 = vsel %vm562_vm1, %v1459_v1, %v8827_v13  ;;  %v3571_v52 = vsel %vm562_vm1, %v1458_v11, %v8826_v16 }
 0x373   :  { %4473 = vmatmul.mubr.bf16.gmra.mxu1 %v4015_v60  ;;  %v12303_v34 = vpop.f32.mrf.mxu1  ;;  %v8835_v29 = vpop.permute.xlu1 %8834  ;;  %v3765_v27 = vsel %vm562_vm1, %v1715_v5, %v8822_v56  ;;  %v3764_v41 = vsel %vm562_vm1, %v1714_v6, %v8821_v14 }
 0x374   :  { %v8830_v2 = vpop.permute.xlu0 %8829  ;;  %v8837_v63 = vunpack.i.h.bf16 %v8835_v29  ;;  %v8836_v12 = vunpack.i.l.bf16 %v8835_v29  ;;  %v1460_v29 = vld [vmem:[#allocation2 + $0x2b8] sm:$0xff] }
 0x375   :  { %v8832_v17 = vunpack.i.h.bf16 %v8830_v2  ;;  %v8831_v8 = vunpack.i.l.bf16 %v8830_v2  ;;  %v4364_v38 = vpop.f32.mrf.mxu1  ;;  %v1716_v2 = vld [vmem:[#allocation2 + $0x2d1] sm:$0xff] }
 0x376   :  { %v3635_v28 = vsel %vm174_vm0, %v3571_v52, %v8836_v12  ;;  %v3636_v35 = vsel %vm174_vm0, %v3572_v23, %v8837_v63 }
 0x377   :  { %v12307_v25 = vpop.f32.mrf.mxu1  ;;  %7850 = vmatmul.mubr.msk.bf16.gmra.mxu0 %vm562_vm1, %v4035_v47  ;;  %v8845_v43 = vpop.permute.xlu1 %8844  ;;  %v3828_v24 = vsel %vm174_vm0, %v3764_v41, %v8831_v8  ;;  %v3829_v15 = vsel %vm174_vm0, %v3765_v27, %v8832_v17  ;;  %v1717_v47 = vld [vmem:[#allocation2 + $0x2d9] sm:$0xff] }
 0x378   :  { %v8840_v44 = vpop.permute.xlu0 %8839  ;;  %v8847_v57 = vunpack.i.h.bf16 %v8845_v43  ;;  %v8846_v40 = vunpack.i.l.bf16 %v8845_v43  ;;  %v1461_v17 = vld [vmem:[#allocation2 + $0x2c0] sm:$0xff] }
 0x379   :  { %v8842_v10 = vunpack.i.h.bf16 %v8840_v44  ;;  %v8841_v61 = vunpack.i.l.bf16 %v8840_v44  ;;  %v4367_v42 = vpop.f32.mrf.mxu1 }
 0x37a   :  { %v3700_v30 = vsel %vm3647_vm3, %v3635_v28, %v8846_v40  ;;  %v3701_v39 = vsel %vm3647_vm3, %v3636_v35, %v8847_v57 }
 0x37b   :  { %v3892_v26 = vsel %vm3647_vm3, %v3828_v24, %v8841_v61  ;;  %v3893_v49 = vsel %vm3647_vm3, %v3829_v15, %v8842_v10  ;;  %v8855_v31 = vpop.permute.xlu1 %8854  ;;  %v4018_v3 = vpack.c.bf16 %v3701_v39, %v3700_v30  ;;  %v9016_v39 = vld [vmem:[%s16791_s10 + $0x10] sm:$0xff]  }
 0x37c   :  { %v8850_v59 = vpop.permute.xlu0 %8849  ;;  %v4019_v32 = vpack.c.bf16 %v3893_v49, %v3892_v26  ;;  %v8857_v4 = vunpack.i.h.bf16 %v8855_v31  ;;  %v8856_v60 = vunpack.i.l.bf16 %v8855_v31  ;;  %7923 = vmatprep.subr.bf16.mxu1 %v9016_v39 }
 0x37d   :  { %v8852_v9 = vunpack.i.h.bf16 %v8850_v59  ;;  %v8851_v58 = vunpack.i.l.bf16 %v8850_v59  ;;  %7924 = vmatpush3.bf16.msra.mxu1 %v9016_v39 }
 0x37e   :  { %4480 = vmatprep.mubr.bf16.mxu1 %v4019_v32  ;;  %v3574_v63 = vsel %vm562_vm1, %v1461_v17, %v8857_v4  ;;  %v3573_v12 = vsel %vm562_vm1, %v1460_v29, %v8856_v60  ;;  %v1462_v29 = vld [vmem:[#allocation2 + $0x2d0] sm:$0xff]  ;;  %v1463_v17 = vld [vmem:[#allocation2 + $0x2d8] sm:$0xff] }
 0x37f   :  { %4481 = vmatmul.mubr.bf16.gmra.mxu1 %v4018_v3  ;;  %v8865_v51 = vpop.permute.xlu1 %8864  ;;  %v3767_v8 = vsel %vm562_vm1, %v1717_v47, %v8852_v9  ;;  %v3766_v38 = vsel %vm562_vm1, %v1716_v2, %v8851_v58  ;;  %v1719_v2 = vld [vmem:[#allocation2 + $0x2f1] sm:$0xff] }
 0x380   :  { %v8860_v0 = vpop.permute.xlu0 %8859  ;;  %v8867_v13 = vunpack.i.h.bf16 %v8865_v51  ;;  %v8866_v16 = vunpack.i.l.bf16 %v8865_v51 }
 0x381   :  { %v8862_v22 = vunpack.i.h.bf16 %v8860_v0  ;;  %v8861_v56 = vunpack.i.l.bf16 %v8860_v0  ;;  %v12320_v14 = vpop.f32.mrf.mxu1 }
 0x382   :  { %v3637_v10 = vsel %vm174_vm0, %v3573_v12, %v8866_v16  ;;  %v3638_v61 = vsel %vm174_vm0, %v3574_v63, %v8867_v13  ;;  %v9017_v16 = vld [vmem:[%s16791_s10 + $0x8] sm:$0xff]  }
 0x383   :  { %v4372_v6 = vpop.f32.mrf.mxu1  ;;  %v8875_v11 = vpop.permute.xlu1 %8874  ;;  %v3830_v41 = vsel %vm174_vm0, %v3766_v38, %v8861_v56  ;;  %v3831_v44 = vsel %vm174_vm0, %v3767_v8, %v8862_v22  ;;  %v1718_v56 = vld [vmem:[#allocation2 + $0x2e9] sm:$0xff]  ;;  %7925 = vmatprep.subr.bf16.mxu1 %v9017_v16 }
 0x384   :  { %v8870_v5 = vpop.permute.xlu0 %8869  ;;  %v8877_v23 = vunpack.i.h.bf16 %v8875_v11  ;;  %v8876_v52 = vunpack.i.l.bf16 %v8875_v11  ;;  %7926 = vmatpush3.bf16.msra.mxu1 %v9017_v16  ;;  %v1465_v16 = vld [vmem:[#allocation2 + $0x2f0] sm:$0xff] }
 0x385   :  { %v8872_v1 = vunpack.i.h.bf16 %v8870_v5  ;;  %v8871_v27 = vunpack.i.l.bf16 %v8870_v5  ;;  %v12328_v43 = vpop.f32.mrf.mxu1 }
 0x386   :  { %v3702_v35 = vsel %vm3647_vm3, %v3637_v10, %v8876_v52  ;;  %v3703_v26 = vsel %vm3647_vm3, %v3638_v61, %v8877_v23 }
 0x387   :  { %v12332_v24 = vpop.f32.mrf.mxu0  ;;  %v3894_v15 = vsel %vm3647_vm3, %v3830_v41, %v8871_v27  ;;  %v3895_v57 = vsel %vm3647_vm3, %v3831_v44, %v8872_v1  ;;  %v4375_v40 = vpop.f32.mrf.mxu1  ;;  %v4021_v32 = vpack.c.bf16 %v3703_v26, %v3702_v35 }
 0x388   :  { %v8880_v42 = vpop.permute.xlu0 %8879  ;;  %v4022_v28 = vpack.c.bf16 %v3895_v57, %v3894_v15  ;;  %v8885_v49 = vpop.permute.xlu1 %8884  ;;  %v9018_v57 = vld [vmem:[%s16791_s10] sm:$0xff]  }
 0x389   :  { %v4276_v59 = vpop.f32.mrf.mxu0  ;;  %v8882_v31 = vunpack.i.h.bf16 %v8880_v42  ;;  %v8881_v3 = vunpack.i.l.bf16 %v8880_v42  ;;  %v8887_v58 = vunpack.i.h.bf16 %v8885_v49  ;;  %v8886_v0 = vunpack.i.l.bf16 %v8885_v49  ;;  %7927 = vmatprep.subr.bf16.mxu1 %v9018_v57 }
 0x38a   :  { %4488 = vmatprep.mubr.bf16.mxu1 %v4022_v28  ;;  %7928 = vmatpush3.bf16.msra.mxu1 %v9018_v57 }
 0x38b   :  { %v12338_v30 = vpop.f32.mrf.mxu0  ;;  %4489 = vmatmul.mubr.bf16.gmra.mxu1 %v4021_v32  ;;  %v3769_v8 = vsel %vm562_vm1, %v1719_v2, %v8882_v31  ;;  %v3768_v38 = vsel %vm562_vm1, %v1718_v56, %v8881_v3  ;;  %v3576_v5 = vsel %vm562_vm1, %v1463_v17, %v8887_v58  ;;  %v3575_v63 = vsel %vm562_vm1, %v1462_v29, %v8886_v0 }
 0x38c   :  { %v8890_v9 = vpop.permute.xlu0 %8889  ;;  %v8895_v4 = vpop.permute.xlu1 %8894 }
 0x38d   :  { %v4279_v60 = vpop.f32.mrf.mxu0  ;;  %v8892_v51 = vunpack.i.h.bf16 %v8890_v9  ;;  %v8891_v22 = vunpack.i.l.bf16 %v8890_v9  ;;  %v8897_v47 = vunpack.i.h.bf16 %v8895_v4  ;;  %v8896_v13 = vunpack.i.l.bf16 %v8895_v4 }
 0x38f   :  { %v3832_v27 = vsel %vm174_vm0, %v3768_v38, %v8891_v22  ;;  %v3833_v41 = vsel %vm174_vm0, %v3769_v8, %v8892_v51  ;;  %v3639_v52 = vsel %vm174_vm0, %v3575_v63, %v8896_v13  ;;  %v3640_v10 = vsel %vm174_vm0, %v3576_v5, %v8897_v47  ;;  %v1720_v51 = vld [vmem:[#allocation2 + $0x301] sm:$0xff]  ;;  %v1721_v22 = vld [vmem:[#allocation2 + $0x309] sm:$0xff] }
 0x390   :  { %v8900_v6 = vpop.permute.xlu0 %8899  ;;  %v8905_v12 = vpop.permute.xlu1 %8904  ;;  %v1464_v13 = vld [vmem:[#allocation2 + $0x2e8] sm:$0xff] }
 0x391   :  { %v8902_v11 = vunpack.i.h.bf16 %v8900_v6  ;;  %v8901_v1 = vunpack.i.l.bf16 %v8900_v6  ;;  %v8907_v44 = vunpack.i.h.bf16 %v8905_v12  ;;  %v8906_v23 = vunpack.i.l.bf16 %v8905_v12 }
 0x393   :  { %v3896_v61 = vsel %vm3647_vm3, %v3832_v27, %v8901_v1  ;;  %v3897_v15 = vsel %vm3647_vm3, %v3833_v41, %v8902_v11  ;;  %v3704_v28 = vsel %vm3647_vm3, %v3639_v52, %v8906_v23  ;;  %v3705_v35 = vsel %vm3647_vm3, %v3640_v10, %v8907_v44 }
 0x394   :  { %v8910_v40 = vpop.permute.xlu0 %8909  ;;  %v4025_v42 = vpack.c.bf16 %v3897_v15, %v3896_v61  ;;  %v8915_v26 = vpop.permute.xlu1 %8914  ;;  %v4024_v49 = vpack.c.bf16 %v3705_v35, %v3704_v28 }
 0x395   :  { %v12361_v59 = vpop.f32.mrf.mxu1  ;;  %v8912_v32 = vunpack.i.h.bf16 %v8910_v40  ;;  %v8911_v39 = vunpack.i.l.bf16 %v8910_v40  ;;  %v8917_v3 = vunpack.i.h.bf16 %v8915_v26  ;;  %v8916_v9 = vunpack.i.l.bf16 %v8915_v26 }
 0x396   :  { %4496 = vmatprep.mubr.bf16.mxu1 %v4025_v42 }
 0x397   :  { %4497 = vmatmul.mubr.bf16.gmra.mxu1 %v4024_v49  ;;  %v4380_v58 = vpop.f32.mrf.mxu1  ;;  %v3771_v29 = vsel %vm562_vm1, %v1721_v22, %v8912_v32  ;;  %v3770_v17 = vsel %vm562_vm1, %v1720_v51, %v8911_v39  ;;  %v3578_v38 = vsel %vm562_vm1, %v1465_v16, %v8917_v3  ;;  %v3577_v6 = vsel %vm562_vm1, %v1464_v13, %v8916_v9  ;;  %v1722_v22 = vld [vmem:[#allocation2 + $0x319] sm:$0xff] }
 0x398   :  { %v8920_v31 = vpop.permute.xlu0 %8919  ;;  %v8925_v0 = vpop.permute.xlu1 %8924  ;;  %v1466_v16 = vld [vmem:[#allocation2 + $0x300] sm:$0xff] }
 0x399   :  { %v8922_v4 = vunpack.i.h.bf16 %v8920_v31  ;;  %v8921_v60 = vunpack.i.l.bf16 %v8920_v31  ;;  %v8927_v56 = vunpack.i.h.bf16 %v8925_v0  ;;  %v8926_v2 = vunpack.i.l.bf16 %v8925_v0  ;;  %v12363_v47 = vpop.f32.mrf.mxu1 }
 0x39b   :  { %v4383_v5 = vpop.f32.mrf.mxu1  ;;  %v3834_v1 = vsel %vm174_vm0, %v3770_v17, %v8921_v60  ;;  %v3835_v27 = vsel %vm174_vm0, %v3771_v29, %v8922_v4  ;;  %v3641_v23 = vsel %vm174_vm0, %v3577_v6, %v8926_v2  ;;  %v3642_v52 = vsel %vm174_vm0, %v3578_v38, %v8927_v56  ;;  %v1723_v56 = vld [vmem:[#allocation2 + $0x321] sm:$0xff] }
 0x39c   :  { %v8930_v8 = vpop.permute.xlu0 %8929  ;;  %v8935_v63 = vpop.permute.xlu1 %8934  ;;  %v1467_v29 = vld [vmem:[#allocation2 + $0x308] sm:$0xff] }
 0x39d   :  { %v8932_v12 = vunpack.i.h.bf16 %v8930_v8  ;;  %v8931_v11 = vunpack.i.l.bf16 %v8930_v8  ;;  %v8937_v41 = vunpack.i.h.bf16 %v8935_v63  ;;  %v8936_v44 = vunpack.i.l.bf16 %v8935_v63 }
 0x39f   :  { %v12373_v10 = vpop.f32.mrf.mxu0  ;;  %v3898_v61 = vsel %vm3647_vm3, %v3834_v1, %v8931_v11  ;;  %v3899_v15 = vsel %vm3647_vm3, %v3835_v27, %v8932_v12  ;;  %v3706_v42 = vsel %vm3647_vm3, %v3641_v23, %v8936_v44  ;;  %v3707_v28 = vsel %vm3647_vm3, %v3642_v52, %v8937_v41 }
 0x3a0   :  { %v8940_v57 = vpop.permute.xlu0 %8939  ;;  %v4028_v40 = vpack.c.bf16 %v3899_v15, %v3898_v61  ;;  %v8945_v35 = vpop.permute.xlu1 %8944  ;;  %v4027_v49 = vpack.c.bf16 %v3707_v28, %v3706_v42 }
 0x3a1   :  { %v4284_v26 = vpop.f32.mrf.mxu0  ;;  %v8942_v39 = vunpack.i.h.bf16 %v8940_v57  ;;  %v8941_v31 = vunpack.i.l.bf16 %v8940_v57  ;;  %v8947_v9 = vunpack.i.h.bf16 %v8945_v35  ;;  %v8946_v58 = vunpack.i.l.bf16 %v8945_v35 }
 0x3a2   :  { %4504 = vmatprep.mubr.bf16.mxu1 %v4028_v40 }
 0x3a3   :  { %v12379_v32 = vpop.f32.mrf.mxu0  ;;  %4505 = vmatmul.mubr.bf16.gmra.mxu1 %v4027_v49  ;;  %v3773_v17 = vsel %vm562_vm1, %v1723_v56, %v8942_v39  ;;  %v3772_v8 = vsel %vm562_vm1, %v1722_v22, %v8941_v31  ;;  %v3580_v6 = vsel %vm562_vm1, %v1467_v29, %v8947_v9  ;;  %v3579_v5 = vsel %vm562_vm1, %v1466_v16, %v8946_v58  ;;  %v9037_v31 = vld [vmem:[#allocation2 + $0x339] sm:$0xff]  ;;  %v9038_v9 = vld [vmem:[#allocation2 + $0x331] sm:$0xff] }
 0x3a4   :  { %v8950_v3 = vpop.permute.xlu0 %8949  ;;  %v8955_v0 = vpop.permute.xlu1 %8954 }
 0x3a5   :  { %v4287_v4 = vpop.f32.mrf.mxu0  ;;  %v8952_v60 = vunpack.i.h.bf16 %v8950_v3  ;;  %v8951_v51 = vunpack.i.l.bf16 %v8950_v3  ;;  %v8957_v2 = vunpack.i.h.bf16 %v8955_v0  ;;  %v8956_v13 = vunpack.i.l.bf16 %v8955_v0 }
 0x3a6   :  { %v17261_v4 = vld [vmem:[#allocation65_spill] sm:$0xff] }
 0x3a7   :  { %v3836_v1 = vsel %vm174_vm0, %v3772_v8, %v8951_v51  ;;  %v3837_v27 = vsel %vm174_vm0, %v3773_v17, %v8952_v60  ;;  %v3643_v23 = vsel %vm174_vm0, %v3579_v5, %v8956_v13  ;;  %v3644_v52 = vsel %vm174_vm0, %v3580_v6, %v8957_v2  ;;  %v9019_v6 = vld [vmem:[%s16788_s7 + $0x8] sm:$0xff]  }
 0x3a8   :  { %v8960_v38 = vpop.permute.xlu0 %8959  ;;  %v8965_v63 = vpop.permute.xlu1 %8964  ;;  %v8067_v60 = vunpack.i.h.bf16 %v17261_v4  ;;  %v8066_v51 = vunpack.i.l.bf16 %v17261_v4  ;;  %7853 = vmatprep.subr.bf16.mxu0 %v9019_v6 }
 0x3a9   :  { %v8962_v12 = vunpack.i.h.bf16 %v8960_v38  ;;  %v8961_v11 = vunpack.i.l.bf16 %v8960_v38  ;;  %v8967_v41 = vunpack.i.h.bf16 %v8965_v63  ;;  %v8966_v44 = vunpack.i.l.bf16 %v8965_v63  ;;  %7854 = vmatpush3.bf16.msra.mxu0 %v9019_v6 }
 0x3ab   :  { %v3900_v61 = vsel %vm3647_vm3, %v3836_v1, %v8961_v11  ;;  %v3901_v15 = vsel %vm3647_vm3, %v3837_v27, %v8962_v12  ;;  %v3708_v42 = vsel %vm3647_vm3, %v3643_v23, %v8966_v44  ;;  %v3709_v28 = vsel %vm3647_vm3, %v3644_v52, %v8967_v41  ;;  %v1468_v41 = vld [vmem:[#allocation2 + $0x318] sm:$0xff]  ;;  %v1469_v44 = vld [vmem:[#allocation2 + $0x320] sm:$0xff] }
 0x3ac   :  { %v8970_v57 = vpop.permute.xlu0 %8969  ;;  %v4031_v40 = vpack.c.bf16 %v3901_v15, %v3900_v61  ;;  %v8975_v35 = vpop.permute.xlu1 %8974  ;;  %v4030_v39 = vpack.c.bf16 %v3709_v28, %v3708_v42 }
 0x3ad   :  { %v8972_v26 = vunpack.i.h.bf16 %v8970_v57  ;;  %v8971_v49 = vunpack.i.l.bf16 %v8970_v57  ;;  %v12395_v0 = vpop.f32.mrf.mxu1  ;;  %v8977_v29 = vunpack.i.h.bf16 %v8975_v35  ;;  %v8976_v17 = vunpack.i.l.bf16 %v8975_v35 }
 0x3ae   :  { %4512 = vmatprep.mubr.bf16.mxu1 %v4031_v40 }
 0x3af   :  { %v3775_v3 = vsel %vm562_vm1, %v9037_v31, %v8972_v26  ;;  %v3774_v58 = vsel %vm562_vm1, %v9038_v9, %v8971_v49  ;;  %4513 = vmatmul.mubr.bf16.gmra.mxu1 %v4030_v39  ;;  %v4388_v16 = vpop.f32.mrf.mxu1  ;;  %v3582_v61 = vsel %vm562_vm1, %v1469_v44, %v8977_v29  ;;  %v3581_v15 = vsel %vm562_vm1, %v1468_v41, %v8976_v17  ;;  %v17262_v9 = vld [vmem:[#allocation6_spill] sm:$0xff] }
 0x3b0   :  { %v8985_v22 = vpop.permute.xlu0 %8984  ;;  %v8980_v56 = vpop.permute.xlu1 %8979  ;;  %v3838_v8 = vsel %vm174_vm0, %v3774_v58, %v8066_v51  ;;  %v3839_v38 = vsel %vm174_vm0, %v3775_v3, %v8067_v60  ;;  %v17264_v16 = vld [vmem:[#allocation8_spill] sm:$0xff] }
 0x3b1   :  { %v8987_v2 = vunpack.i.h.bf16 %v8985_v22  ;;  %v8986_v13 = vunpack.i.l.bf16 %v8985_v22  ;;  %v8982_v5 = vunpack.i.h.bf16 %v8980_v56  ;;  %v8981_v63 = vunpack.i.l.bf16 %v8980_v56  ;;  %v12404_v12 = vpop.f32.mrf.mxu1 }
 0x3b3   :  { %v3902_v11 = vsel %vm3647_vm3, %v3838_v8, %v8986_v13  ;;  %v3903_v1 = vsel %vm3647_vm3, %v3839_v38, %v8987_v2  ;;  %v4391_v52 = vpop.f32.mrf.mxu1  ;;  %v3645_v42 = vsel %vm174_vm0, %v3581_v15, %v8981_v63  ;;  %v3646_v28 = vsel %vm174_vm0, %v3582_v61, %v8982_v5  ;;  %v17263_v2 = vld [vmem:[#allocation7_spill] sm:$0xff] }
 0x3b4   :  { %v4034_v27 = vpack.c.bf16 %v3903_v1, %v3902_v11  ;;  %v8990_v23 = vpop.permute.xlu1 %8989 }
 0x3b5   :  { %v8992_v57 = vunpack.i.h.bf16 %v8990_v23  ;;  %v8991_v40 = vunpack.i.l.bf16 %v8990_v23 }
 0x3b6   :  { %4520 = vmatprep.mubr.bf16.mxu1 %v4034_v27 }
 0x3b7   :  { %v4290_v35 = vpop.f32.mrf.mxu0  ;;  %v3710_v26 = vsel %vm3647_vm3, %v3645_v42, %v8991_v40  ;;  %v3711_v49 = vsel %vm3647_vm3, %v3646_v28, %v8992_v57  ;;  %v17266_v28 = vld [vmem:[#allocation9_spill] sm:$0xff] }
 0x3b8   :  { %v4033_v39 = vpack.c.bf16 %v3711_v49, %v3710_v26 }
 0x3b9   :  { %v4292_v31 = vpop.f32.mrf.mxu0 }
 0x3ba   :  { %4521 = vmatmul.mubr.bf16.gmra.mxu1 %v4033_v39  ;;  %v17268_v31 = vld [vmem:[#allocation10_spill] sm:$0xff] }
 0x3bb   :  { %v4293_v3 = vpop.f32.mrf.mxu0  ;;  %7929 = vmatprep.mubr.msk.bf16.mxu1 %vm174_vm0, %v17262_v9 }
 0x3bd   :  { %v4295_v58 = vpop.f32.mrf.mxu0 }
 0x3bf   :  { %v7791_v4 = vpop.f32.mrf.mxu0 }
 0x3c0   :  { %v12424_v13 = vadd.f32 %v7791_v4, %v12373_v10 }
 0x3c1   :  { %v4563_v60 = vpop.f32.mrf.mxu0  ;;  %v12419_v22 = vpop.f32.mrf.mxu1 }
 0x3c2   :  { %v12417_v51 = vadd.f32 %v4563_v60, %v12332_v24  ;;  %7930 = vmatmul.mubr.msk.bf16.vlgmr.msra.gmra.mxu1 %vm174_vm0, %v17263_v2  ;;  %v4955_v10 = vmul.f32 %v12424_v13, %v12424_v13 }
 0x3c3   :  { %v7792_v56 = vpop.f32.mrf.mxu0  ;;  %7933 = vmatprep.mubr.msk.bf16.mxu1 %vm174_vm0, %v17264_v16  ;;  %v4396_v29 = vpop.f32.mrf.mxu1 }
 0x3c4   :  { %v4953_v8 = vmul.f32 %v12417_v51, %v12417_v51  ;;  %v12431_v24 = vadd.f32 %v7792_v56, %v12379_v32  ;;  %v4820_v63 = vsel %vm562_vm1, %v12417_v51, 0.0  ;;  %v4823_v32 = vsel %vm562_vm1, %v12424_v13, 0.0 }
 0x3c5   :  { %v4566_v17 = vpop.f32.mrf.mxu0  ;;  %v12436_v6 = vpop.f32.mrf.mxu1  ;;  %v5020_v26 = vsel %vm562_vm1, %v4955_v10, 0.0 }
 0x3c6   :  { %v12434_v38 = vadd.f32 %v4566_v17, %v12338_v30  ;;  %v5017_v44 = vsel %vm562_vm1, %v4953_v8, 0.0  ;;  %v4956_v23 = vmul.f32 %v12431_v24, %v12431_v24  ;;  %v4825_v49 = vsel %vm562_vm1, %v12431_v24, 0.0 }
 0x3c7   :  { %v7795_v5 = vpop.f32.mrf.mxu0  ;;  %v4399_v27 = vpop.f32.mrf.mxu1 }
 0x3c8   :  { %v4821_v11 = vsel %vm562_vm1, %v12434_v38, 0.0  ;;  %v4954_v1 = vmul.f32 %v12434_v38, %v12434_v38  ;;  %v12462_v39 = vadd.f32 %v7795_v5, %v12069_v48  ;;  %v5022_v56 = vsel %vm562_vm1, %v4956_v23, 0.0 }
 0x3c9   :  { %v4822_v30 = vadd.f32 %v4821_v11, %v4820_v63  ;;  %v4579_v41 = vpop.f32.mrf.mxu0  ;;  %v12454_v40 = vpop.f32.mrf.mxu1 }
 0x3ca   :  { %v5018_v52 = vsel %vm562_vm1, %v4954_v1, 0.0  ;;  %v12452_v61 = vadd.f32 %v4579_v41, %v4290_v35  ;;  %7934 = vmatmul.mubr.msk.bf16.gmra.mxu1 %vm174_vm0, %v17266_v28  ;;  %17267 = vst [vmem:[#allocation66_spill] sm:$0xff] %v12462_v39  ;;  %v4959_v10 = vmul.f32 %v12462_v39, %v12462_v39  ;;  %v4831_v27 = vsel %vm562_vm1, %v12462_v39, 0.0  ;;  %v17272_v28 = vld [vmem:[#allocation11_spill] sm:$0xff] }
 0x3cb   :  { %v4824_v15 = vadd.f32 %v4823_v32, %v4822_v30  ;;  %v5019_v57 = vadd.f32 %v5018_v52, %v5017_v44  ;;  %v7796_v42 = vpop.f32.mrf.mxu0  ;;  %7937 = vmatprep.mubr.msk.bf16.mxu1 %vm174_vm0, %v17268_v31  ;;  %v4404_v4 = vpop.f32.mrf.mxu1  ;;  %v17274_v31 = vld [vmem:[#allocation12_spill] sm:$0xff] }
 0x3cc   :  { %17265 = vst [vmem:[#allocation64_spill] sm:$0xff] %v12452_v61  ;;  %v4957_v35 = vmul.f32 %v12452_v61, %v12452_v61  ;;  %v4827_v2 = vsel %vm562_vm1, %v12452_v61, 0.0  ;;  %v12472_v16 = vadd.f32 %v7796_v42, %v12080_v19 }
 0x3cd   :  { %v4826_v9 = vadd.f32 %v4825_v49, %v4824_v15  ;;  %v5021_v58 = vadd.f32 %v5020_v26, %v5019_v57  ;;  %v4582_v60 = vpop.f32.mrf.mxu0  ;;  %v12476_v8 = vpop.f32.mrf.mxu1  ;;  %v5028_v26 = vsel %vm562_vm1, %v4959_v10, 0.0 }
 0x3ce   :  { %17269 = vst [vmem:[#allocation39_spill] sm:$0xff] %v12472_v16  ;;  %v12474_v48 = vadd.f32 %v4582_v60, %v4293_v3  ;;  %v5024_v63 = vsel %vm562_vm1, %v4957_v35, 0.0  ;;  %v4960_v41 = vmul.f32 %v12472_v16, %v12472_v16  ;;  %v4833_v49 = vsel %vm562_vm1, %v12472_v16, 0.0 }
 0x3cf   :  { %v5023_v29 = vadd.f32 %v5022_v56, %v5021_v58  ;;  %v4828_v17 = vadd.f32 %v4827_v2, %v4826_v9  ;;  %v7799_v5 = vpop.f32.mrf.mxu0  ;;  %v4407_v3 = vpop.f32.mrf.mxu1 }
 0x3d0   :  { %17270 = vst [vmem:[#allocation41_spill] sm:$0xff] %v12474_v48  ;;  %v4829_v11 = vsel %vm562_vm1, %v12474_v48, 0.0  ;;  %v4958_v1 = vmul.f32 %v12474_v48, %v12474_v48  ;;  %v12501_v35 = vadd.f32 %v7799_v5, %v12143_v37  ;;  %v5030_v56 = vsel %vm562_vm1, %v4960_v41, 0.0 }
 0x3d1   :  { %v5025_v19 = vadd.f32 %v5024_v63, %v5023_v29  ;;  %v4830_v32 = vadd.f32 %v4829_v11, %v4828_v17  ;;  %v4595_v30 = vpop.f32.mrf.mxu0 }
 0x3d2   :  { %v5026_v44 = vsel %vm562_vm1, %v4958_v1, 0.0  ;;  %v12491_v23 = vadd.f32 %v4595_v30, %v12105_v54  ;;  %7938 = vmatmul.mubr.msk.bf16.gmra.mxu1 %vm174_vm0, %v17272_v28  ;;  %17273 = vst [vmem:[#allocation40_spill] sm:$0xff] %v12501_v35  ;;  %v4963_v11 = vmul.f32 %v12501_v35, %v12501_v35 }
 0x3d3   :  { %v4832_v52 = vadd.f32 %v4831_v27, %v4830_v32  ;;  %v5027_v15 = vadd.f32 %v5026_v44, %v5025_v19  ;;  %v12493_v57 = vpop.f32.mrf.mxu1  ;;  %v7800_v42 = vpop.f32.mrf.mxu0  ;;  %7941 = vmatprep.mubr.msk.bf16.mxu1 %vm174_vm0, %v17274_v31  ;;  %v4839_v27 = vsel %vm562_vm1, %v12501_v35, 0.0 }
 0x3d4   :  { %17271 = vst [vmem:[#allocation43_spill] sm:$0xff] %v12491_v23  ;;  %v4961_v54 = vmul.f32 %v12491_v23, %v12491_v23  ;;  %v4835_v2 = vsel %vm562_vm1, %v12491_v23, 0.0  ;;  %v12511_v29 = vadd.f32 %v7800_v42, %v12153_v18 }
 0x3d5   :  { %v4834_v9 = vadd.f32 %v4833_v49, %v4832_v52  ;;  %v5029_v58 = vadd.f32 %v5028_v26, %v5027_v15  ;;  %v4412_v4 = vpop.f32.mrf.mxu1  ;;  %v4598_v60 = vpop.f32.mrf.mxu0  ;;  %v17278_v26 = vld [vmem:[#allocation13_spill] sm:$0xff]  ;;  %v5036_v49 = vsel %vm562_vm1, %v4963_v11, 0.0 }
 0x3d6   :  { %17275 = vst [vmem:[#allocation42_spill] sm:$0xff] %v12511_v29  ;;  %v12514_v37 = vadd.f32 %v4598_v60, %v12119_v45  ;;  %v5032_v1 = vsel %vm562_vm1, %v4961_v54, 0.0  ;;  %v4964_v41 = vmul.f32 %v12511_v29, %v12511_v29  ;;  %v4841_v54 = vsel %vm562_vm1, %v12511_v29, 0.0 }
 0x3d7   :  { %v5031_v17 = vadd.f32 %v5030_v56, %v5029_v58  ;;  %v4836_v5 = vadd.f32 %v4835_v2, %v4834_v9  ;;  %v12516_v10 = vpop.f32.mrf.mxu1  ;;  %v7803_v63 = vpop.f32.mrf.mxu0  ;;  %v17280_v58 = vld [vmem:[#allocation14_spill] sm:$0xff] }
 0x3d8   :  { %17276 = vst [vmem:[#allocation45_spill] sm:$0xff] %v12514_v37  ;;  %v4837_v19 = vsel %vm562_vm1, %v12514_v37, 0.0  ;;  %v4962_v18 = vmul.f32 %v12514_v37, %v12514_v37  ;;  %v12539_v31 = vadd.f32 %v7803_v63, %v12210_v33  ;;  %v5038_v56 = vsel %vm562_vm1, %v4964_v41, 0.0 }
 0x3d9   :  { %v5033_v32 = vadd.f32 %v5032_v1, %v5031_v17  ;;  %v4838_v3 = vadd.f32 %v4837_v19, %v4836_v5  ;;  %v4415_v45 = vpop.f32.mrf.mxu1  ;;  %v4611_v30 = vpop.f32.mrf.mxu0 }
 0x3da   :  { %v5034_v44 = vsel %vm562_vm1, %v4962_v18, 0.0  ;;  %v12531_v52 = vadd.f32 %v4611_v30, %v12180_v55  ;;  %7942 = vmatmul.mubr.msk.bf16.gmra.mxu1 %vm174_vm0, %v17278_v26  ;;  %17279 = vst [vmem:[#allocation44_spill] sm:$0xff] %v12539_v31  ;;  %v4967_v1 = vmul.f32 %v12539_v31, %v12539_v31  ;;  %v4847_v30 = vsel %vm562_vm1, %v12539_v31, 0.0  ;;  %v17283_v26 = vld [vmem:[#allocation15_spill] sm:$0xff] }
 0x3db   :  { %v4840_v15 = vadd.f32 %v4839_v27, %v4838_v3  ;;  %v5035_v42 = vadd.f32 %v5034_v44, %v5033_v32  ;;  %v7804_v28 = vpop.f32.mrf.mxu0  ;;  %7945 = vmatprep.mubr.msk.bf16.mxu1 %vm174_vm0, %v17280_v58 }
 0x3dc   :  { %17277 = vst [vmem:[#allocation47_spill] sm:$0xff] %v12531_v52  ;;  %v4965_v9 = vmul.f32 %v12531_v52, %v12531_v52  ;;  %v4843_v2 = vsel %vm562_vm1, %v12531_v52, 0.0  ;;  %v12549_v17 = vadd.f32 %v7804_v28, %v12214_v46 }
 0x3dd   :  { %v4842_v55 = vadd.f32 %v4841_v54, %v4840_v15  ;;  %v5037_v4 = vadd.f32 %v5036_v49, %v5035_v42  ;;  %v4614_v60 = vpop.f32.mrf.mxu0  ;;  %v5044_v49 = vsel %vm562_vm1, %v4967_v1, 0.0 }
 0x3de   :  { %17281 = vst [vmem:[#allocation46_spill] sm:$0xff] %v12549_v17  ;;  %v12552_v33 = vadd.f32 %v4614_v60, %v12191_v7  ;;  %v5040_v19 = vsel %vm562_vm1, %v4965_v9, 0.0  ;;  %v4968_v27 = vmul.f32 %v12549_v17, %v12549_v17  ;;  %v4849_v54 = vsel %vm562_vm1, %v12549_v17, 0.0 }
 0x3df   :  { %v5039_v5 = vadd.f32 %v5038_v56, %v5037_v4  ;;  %v4844_v63 = vadd.f32 %v4843_v2, %v4842_v55  ;;  %v12554_v11 = vpop.f32.mrf.mxu1  ;;  %v7807_v46 = vpop.f32.mrf.mxu0  ;;  %v17285_v55 = vld [vmem:[#allocation16_spill] sm:$0xff] }
 0x3e0   :  { %17282 = vst [vmem:[#allocation38_spill] sm:$0xff] %v12552_v33  ;;  %v4845_v18 = vsel %vm562_vm1, %v12552_v33, 0.0  ;;  %v4966_v32 = vmul.f32 %v12552_v33, %v12552_v33  ;;  %v5046_v2 = vsel %vm562_vm1, %v4968_v27, 0.0 }
 0x3e1   :  { %v5041_v3 = vadd.f32 %v5040_v19, %v5039_v5  ;;  %v4846_v45 = vadd.f32 %v4845_v18, %v4844_v63  ;;  %v4420_v7 = vpop.f32.mrf.mxu1  ;;  %v4627_v44 = vpop.f32.mrf.mxu0 }
 0x3e2   :  { %v5042_v41 = vsel %vm562_vm1, %v4966_v32, 0.0  ;;  %7946 = vmatmul.mubr.msk.bf16.gmra.mxu1 %vm174_vm0, %v17283_v26  ;;  %v12576_v9 = vadd.f32 %v4627_v44, %v12228_v50  ;;  %v12586_v50 = vadd.f32 %v7807_v46, %v12251_v20 }
 0x3e3   :  { %v4848_v15 = vadd.f32 %v4847_v30, %v4846_v45  ;;  %v5043_v42 = vadd.f32 %v5042_v41, %v5041_v3  ;;  %v12568_v28 = vpop.f32.mrf.mxu1  ;;  %v7808_v58 = vpop.f32.mrf.mxu0  ;;  %7949 = vmatprep.mubr.msk.bf16.mxu1 %vm174_vm0, %v17285_v55 }
 0x3e4   :  { %17284 = vst [vmem:[#allocation49_spill] sm:$0xff] %v12576_v9  ;;  %v4851_v5 = vsel %vm562_vm1, %v12576_v9, 0.0  ;;  %v4969_v63 = vmul.f32 %v12576_v9, %v12576_v9  ;;  %17286 = vst [vmem:[#allocation51_spill] sm:$0xff] %v12586_v50  ;;  %v4971_v20 = vmul.f32 %v12586_v50, %v12586_v50 }
 0x3e5   :  { %v4850_v4 = vadd.f32 %v4849_v54, %v4848_v15  ;;  %v5045_v60 = vadd.f32 %v5044_v49, %v5043_v42  ;;  %v4423_v56 = vpop.f32.mrf.mxu1  ;;  %v4630_v1 = vpop.f32.mrf.mxu0  ;;  %v17288_v42 = vld [vmem:[#allocation17_spill] sm:$0xff]  ;;  %v17290_v49 = vld [vmem:[#allocation18_spill] sm:$0xff] }
 0x3e6   :  { %v5048_v32 = vsel %vm562_vm1, %v4969_v63, 0.0  ;;  %v12590_v3 = vadd.f32 %v4630_v1, %v12237_v21  ;;  %v12603_v21 = vadd.f32 %v7808_v58, %v12255_v36 }
 0x3e7   :  { %v5047_v19 = vadd.f32 %v5046_v2, %v5045_v60  ;;  %v4852_v18 = vadd.f32 %v4851_v5, %v4850_v4  ;;  %v7811_v45 = vpop.f32.mrf.mxu0  ;;  %v4855_v4 = vsel %vm562_vm1, %v12586_v50, 0.0  ;;  %v5052_v5 = vsel %vm562_vm1, %v4971_v20, 0.0 }
 0x3e8   :  { %17287 = vst [vmem:[#allocation48_spill] sm:$0xff] %v12590_v3  ;;  %v4853_v30 = vsel %vm562_vm1, %v12590_v3, 0.0  ;;  %v4970_v27 = vmul.f32 %v12590_v3, %v12590_v3  ;;  %17289 = vst [vmem:[#allocation50_spill] sm:$0xff] %v12603_v21  ;;  %v4972_v36 = vmul.f32 %v12603_v21, %v12603_v21 }
 0x3e9   :  { %v5049_v7 = vadd.f32 %v5048_v32, %v5047_v19  ;;  %v4643_v41 = vpop.f32.mrf.mxu0  ;;  %v4854_v44 = vadd.f32 %v4853_v30, %v4852_v18  ;;  %v4857_v18 = vsel %vm562_vm1, %v12603_v21, 0.0 }
 0x3ea   :  { %7950 = vmatmul.mubr.msk.bf16.gmra.mxu1 %vm174_vm0, %v17288_v42  ;;  %v5050_v46 = vsel %vm562_vm1, %v4970_v27, 0.0  ;;  %v12616_v58 = vadd.f32 %v4643_v41, %v12272_v62  ;;  %v17293_v27 = vld [vmem:[#allocation19_spill] sm:$0xff]  ;;  %v17294_v42 = vld [vmem:[#allocation20_spill] sm:$0xff] }
 0x3eb   :  { %v12596_v15 = vpop.f32.mrf.mxu1  ;;  %v7812_v26 = vpop.f32.mrf.mxu0  ;;  %7953 = vmatprep.mubr.msk.bf16.mxu1 %vm174_vm0, %v17290_v49  ;;  %v5051_v54 = vadd.f32 %v5050_v46, %v5049_v7  ;;  %v4856_v56 = vadd.f32 %v4855_v4, %v4854_v44  ;;  %v5054_v44 = vsel %vm562_vm1, %v4972_v36, 0.0 }
 0x3ec   :  { %17291 = vst [vmem:[#allocation55_spill] sm:$0xff] %v12616_v58  ;;  %v4973_v62 = vmul.f32 %v12616_v58, %v12616_v58  ;;  %v4859_v46 = vsel %vm562_vm1, %v12616_v58, 0.0  ;;  %v17304_v58 = vld [vmem:[#allocation25_spill] sm:$0xff] }
 0x3ed   :  { %v4428_v55 = vpop.f32.mrf.mxu1  ;;  %v4646_v60 = vpop.f32.mrf.mxu0  ;;  %v5053_v1 = vadd.f32 %v5052_v5, %v5051_v54  ;;  %v4858_v30 = vadd.f32 %v4857_v18, %v4856_v56 }
 0x3ee   :  { %v12623_v32 = vadd.f32 %v4646_v60, %v12284_v53  ;;  %v9020_v53 = vld [vmem:[%s16788_s7] sm:$0xff]   ;;  %v12644_v60 = vadd.f32 %v7811_v45, %v12303_v34  ;;  %v5056_v56 = vsel %vm562_vm1, %v4973_v62, 0.0  ;;  %v12659_v45 = vadd.f32 %v7812_v26, %v12307_v25 }
 0x3ef   :  { %v12610_v2 = vpop.f32.mrf.mxu1  ;;  %v12618_v63 = vpop.f32.mrf.mxu0  ;;  %v5055_v20 = vadd.f32 %v5054_v44, %v5053_v1  ;;  %v4860_v55 = vadd.f32 %v4859_v46, %v4858_v30  ;;  %7855 = vmatprep.subr.bf16.mxu0 %v9020_v53 }
 0x3f0   :  { %17292 = vst [vmem:[#allocation52_spill] sm:$0xff] %v12623_v32  ;;  %v4974_v49 = vmul.f32 %v12623_v32, %v12623_v32  ;;  %17295 = vst [vmem:[#allocation59_spill] sm:$0xff] %v12644_v60  ;;  %v4861_v5 = vsel %vm562_vm1, %v12623_v32, 0.0  ;;  %7856 = vmatpush3.bf16.msra.mxu0 %v9020_v53  ;;  %v4975_v34 = vmul.f32 %v12644_v60, %v12644_v60  ;;  %v17298_v53 = vld [vmem:[#allocation22_spill] sm:$0xff] }
 0x3f1   :  { %v4431_v19 = vpop.f32.mrf.mxu1  ;;  %v4659_v7 = vpop.f32.mrf.mxu0  ;;  %v5057_v1 = vadd.f32 %v5056_v56, %v5055_v20  ;;  %v4862_v30 = vadd.f32 %v4861_v5, %v4860_v55  ;;  %17297 = vst [vmem:[#allocation63_spill] sm:$0xff] %v12659_v45 }
 0x3f2   :  { %7954 = vmatmul.mubr.msk.bf16.gmra.mxu1 %vm174_vm0, %v17293_v27  ;;  %v5058_v18 = vsel %vm562_vm1, %v4974_v49, 0.0  ;;  %v4863_v49 = vsel %vm562_vm1, %v12644_v60, 0.0  ;;  %v5060_v5 = vsel %vm562_vm1, %v4975_v34, 0.0  ;;  %v12671_v25 = vadd.f32 %v4659_v7, %v12320_v14  ;;  %v17301_v34 = vld [vmem:[#allocation23_spill] sm:$0xff] }
 0x3f3   :  { %v12630_v41 = vpop.f32.mrf.mxu0  ;;  %7957 = vmatprep.mubr.msk.bf16.mxu1 %vm174_vm0, %v17294_v42  ;;  %v17296_v42 = vld [vmem:[#allocation21_spill] sm:$0xff]  ;;  %v5059_v20 = vadd.f32 %v5058_v18, %v5057_v1  ;;  %v4864_v56 = vadd.f32 %v4863_v49, %v4862_v30  ;;  %v4865_v1 = vsel %vm562_vm1, %v12659_v45, 0.0  ;;  %v17302_v49 = vld [vmem:[#allocation24_spill] sm:$0xff] }
 0x3f4   :  { %17299 = vst [vmem:[#allocation53_spill] sm:$0xff] %v12671_v25  ;;  %v4977_v7 = vmul.f32 %v12671_v25, %v12671_v25 }
 0x3f5   :  { %v4662_v54 = vpop.f32.mrf.mxu0  ;;  %v4866_v30 = vadd.f32 %v4865_v1, %v4864_v56  ;;  %v4867_v56 = vsel %vm562_vm1, %v12671_v25, 0.0 }
 0x3f6   :  { %v12678_v18 = vadd.f32 %v4662_v54, %v12328_v43  ;;  %v5064_v60 = vsel %vm562_vm1, %v4977_v7, 0.0 }
 0x3f7   :  { %v12641_v4 = vpop.f32.mrf.mxu1  ;;  %v12649_v36 = vpop.f32.mrf.mxu0 }
 0x3f8   :  { %17300 = vst [vmem:[#allocation54_spill] sm:$0xff] %v12678_v18 }
 0x3f9   :  { %v4436_v19 = vpop.f32.mrf.mxu1  ;;  %v4675_v27 = vpop.f32.mrf.mxu0 }
 0x3fa   :  { %7958 = vmatmul.mubr.msk.bf16.gmra.mxu1 %vm174_vm0, %v17296_v42  ;;  %v4976_v19 = vmul.f32 %v12659_v45, %v12659_v45  ;;  %v5061_v42 = vadd.f32 %v5060_v5, %v5059_v20  ;;  %v4978_v5 = vmul.f32 %v12678_v18, %v12678_v18  ;;  %v12703_v45 = vadd.f32 %v12618_v63, %v12361_v59  ;;  %v17306_v63 = vld [vmem:[#allocation26_spill] sm:$0xff] }
 0x3fb   :  { %v12652_v44 = vpop.f32.mrf.mxu1  ;;  %v12661_v62 = vpop.f32.mrf.mxu0  ;;  %7961 = vmatprep.mubr.msk.bf16.mxu1 %vm174_vm0, %v17298_v53  ;;  %v12717_v59 = vadd.f32 %v12630_v41, %v12363_v47  ;;  %v12731_v47 = vadd.f32 %v4675_v27, %v12395_v0  ;;  %v17310_v27 = vld [vmem:[#allocation28_spill] sm:$0xff] }
 0x3fc   :  { %v5062_v14 = vsel %vm562_vm1, %v4976_v19, 0.0  ;;  %17303 = vst [vmem:[#allocation57_spill] sm:$0xff] %v12703_v45  ;;  %v5066_v25 = vsel %vm562_vm1, %v4978_v5, 0.0 }
 0x3fd   :  { %v4439_v46 = vpop.f32.mrf.mxu1  ;;  %v4678_v55 = vpop.f32.mrf.mxu0  ;;  %v5063_v43 = vadd.f32 %v5062_v14, %v5061_v42  ;;  %v4869_v42 = vsel %vm562_vm1, %v12678_v18, 0.0  ;;  %17305 = vst [vmem:[#allocation56_spill] sm:$0xff] %v12717_v59  ;;  %17307 = vst [vmem:[#allocation58_spill] sm:$0xff] %v12731_v47  ;;  %v4981_v0 = vmul.f32 %v12731_v47, %v12731_v47 }
 0x3ff   :  { %v12673_v26 = vpop.f32.mrf.mxu0  ;;  %v5065_v14 = vadd.f32 %v5064_v60, %v5063_v43  ;;  %v4871_v43 = vsel %vm562_vm1, %v12703_v45, 0.0 }
 0x401   :  { %v12680_v53 = vpop.f32.mrf.mxu0  ;;  %v5067_v60 = vadd.f32 %v5066_v25, %v5065_v14  ;;  %v4873_v14 = vsel %vm562_vm1, %v12717_v59, 0.0 }
 0x402   :  { %7962 = vmatmul.mubr.msk.bf16.gmra.mxu1 %vm174_vm0, %v17301_v34  ;;  %v4868_v34 = vadd.f32 %v4867_v56, %v4866_v30  ;;  %v4979_v30 = vmul.f32 %v12703_v45, %v12703_v45 }
 0x403   :  { %v12682_v46 = vpop.f32.mrf.mxu1  ;;  %v12689_v20 = vpop.f32.mrf.mxu0  ;;  %7965 = vmatprep.mubr.msk.bf16.mxu1 %vm174_vm0, %v17302_v49 }
 0x404   :  { %v4870_v32 = vadd.f32 %v4869_v42, %v4868_v34  ;;  %v4980_v34 = vmul.f32 %v12717_v59, %v12717_v59  ;;  %v17312_v59 = vld [vmem:[#allocation29_spill] sm:$0xff] }
 0x405   :  { %v4444_v54 = vpop.f32.mrf.mxu1  ;;  %v12697_v1 = vpop.f32.mrf.mxu0 }
 0x406   :  { %v4872_v56 = vadd.f32 %v4871_v43, %v4870_v32  ;;  %v5070_v43 = vsel %vm562_vm1, %v4980_v34, 0.0  ;;  %v12757_v34 = vadd.f32 %v12649_v36, %v12419_v22  ;;  %v12773_v36 = vadd.f32 %v12661_v62, %v12436_v6 }
 0x407   :  { %v12699_v19 = vpop.f32.mrf.mxu1  ;;  %v12708_v49 = vpop.f32.mrf.mxu0  ;;  %v12788_v6 = vadd.f32 %v12680_v53, %v12454_v40  ;;  %v17317_v53 = vld [vmem:[#allocation32_spill] sm:$0xff] }
 0x408   :  { %v4874_v32 = vadd.f32 %v4873_v14, %v4872_v56  ;;  %17311 = vst [vmem:[#allocation60_spill] sm:$0xff] %v12757_v34  ;;  %v5072_v14 = vsel %vm562_vm1, %v4981_v0, 0.0  ;;  %v4983_v22 = vmul.f32 %v12757_v34, %v12757_v34  ;;  %17313 = vst [vmem:[#allocation62_spill] sm:$0xff] %v12773_v36 }
 0x409   :  { %v4447_v54 = vpop.f32.mrf.mxu1  ;;  %v12721_v7 = vpop.f32.mrf.mxu0  ;;  %17315 = vst [vmem:[#allocation65_spill] sm:$0xff] %v12788_v6  ;;  %v4985_v40 = vmul.f32 %v12788_v6, %v12788_v6 }
 0x40a   :  { %7966 = vmatmul.mubr.msk.bf16.gmra.mxu1 %vm174_vm0, %v17304_v58  ;;  %v5068_v58 = vsel %vm562_vm1, %v4979_v30, 0.0  ;;  %v12738_v54 = vadd.f32 %v4678_v55, %v12404_v12  ;;  %v17309_v30 = vld [vmem:[#allocation27_spill] sm:$0xff]  ;;  %v4875_v12 = vsel %vm562_vm1, %v12731_v47, 0.0 }
 0x40b   :  { %7969 = vmatprep.mubr.msk.bf16.mxu1 %vm174_vm0, %v17306_v63  ;;  %v5069_v41 = vadd.f32 %v5068_v58, %v5067_v60  ;;  %v12733_v42 = vpop.f32.mrf.mxu0  ;;  %v4876_v56 = vadd.f32 %v4875_v12, %v4874_v32  ;;  %v17314_v32 = vld [vmem:[#allocation30_spill] sm:$0xff] }
 0x40c   :  { %17308 = vst [vmem:[#allocation61_spill] sm:$0xff] %v12738_v54  ;;  %v4982_v55 = vmul.f32 %v12738_v54, %v12738_v54 }
 0x40d   :  { %v5071_v60 = vadd.f32 %v5070_v43, %v5069_v41  ;;  %v12749_v58 = vpop.f32.mrf.mxu0 }
 0x40f   :  { %v12725_v5 = vpop.f32.mrf.mxu1  ;;  %v5073_v41 = vadd.f32 %v5072_v14, %v5071_v60  ;;  %v12762_v43 = vpop.f32.mrf.mxu0  ;;  %v17361_v50 = vld [vmem:[#allocation60_spill] sm:$0xff]  ;;  %v17362_v9 = vld [vmem:[#allocation62_spill] sm:$0xff] }
 0x410   :  { %v17363_v18 = vld [vmem:[#allocation65_spill] sm:$0xff] }
 0x411   :  { %v4452_v25 = vpop.f32.mrf.mxu1  ;;  %v12777_v60 = vpop.f32.mrf.mxu0 }
 0x412   :  { %7970 = vmatmul.mubr.msk.bf16.gmra.mxu1 %vm174_vm0, %v17309_v30  ;;  %v4877_v30 = vsel %vm562_vm1, %v12738_v54, 0.0 }
 0x413   :  { %v12740_v63 = vpop.f32.mrf.mxu1  ;;  %7973 = vmatprep.mubr.msk.bf16.mxu1 %vm174_vm0, %v17310_v27  ;;  %v5074_v27 = vsel %vm562_vm1, %v4982_v55, 0.0  ;;  %v4879_v55 = vsel %vm562_vm1, %v12757_v34, 0.0 }
 0x414   :  { %v5075_v0 = vadd.f32 %v5074_v27, %v5073_v41  ;;  %v12790_v41 = vpop.f32.mrf.mxu0 }
 0x415   :  { %v4455_v25 = vpop.f32.mrf.mxu1 }
 0x416   :  { %v4878_v25 = vadd.f32 %v4877_v30, %v4876_v56  ;;  %v4984_v30 = vmul.f32 %v12773_v36, %v12773_v36 }
 0x418   :  { %v4880_v56 = vadd.f32 %v4879_v55, %v4878_v25  ;;  %v12796_v25 = vadd.f32 %v12697_v1, %v12476_v8  ;;  %v5078_v55 = vsel %vm562_vm1, %v4984_v30, 0.0  ;;  %v12815_v30 = vadd.f32 %v12673_v26, %v12493_v57 }
 0x419   :  { %v12831_v26 = vadd.f32 %v12689_v20, %v12516_v10  ;;  %v12844_v10 = vadd.f32 %v12721_v7, %v12554_v11  ;;  %v17324_v7 = vld [vmem:[#allocation36_spill] sm:$0xff] }
 0x41a   :  { %7974 = vmatmul.mubr.msk.bf16.gmra.mxu1 %vm174_vm0, %v17312_v59  ;;  %v5076_v59 = vsel %vm562_vm1, %v4983_v22, 0.0  ;;  %v17316_v22 = vld [vmem:[#allocation31_spill] sm:$0xff]  ;;  %v4986_v8 = vmul.f32 %v12796_v25, %v12796_v25  ;;  %17318 = vst [vmem:[#allocation6_spill] sm:$0xff] %v12815_v30  ;;  %v4987_v57 = vmul.f32 %v12815_v30, %v12815_v30 }
 0x41b   :  { %v12765_v47 = vpop.f32.mrf.mxu1  ;;  %7977 = vmatprep.mubr.msk.bf16.mxu1 %vm174_vm0, %v17314_v32  ;;  %v5077_v62 = vadd.f32 %v5076_v59, %v5075_v0  ;;  %v4881_v32 = vsel %vm562_vm1, %v12773_v36, 0.0  ;;  %v12805_v59 = vpop.f32.mrf.mxu0  ;;  %17320 = vst [vmem:[#allocation7_spill] sm:$0xff] %v12831_v26  ;;  %17322 = vst [vmem:[#allocation8_spill] sm:$0xff] %v12844_v10  ;;  %v4989_v11 = vmul.f32 %v12844_v10, %v12844_v10 }
 0x41d   :  { %v4460_v12 = vpop.f32.mrf.mxu1  ;;  %v5079_v0 = vadd.f32 %v5078_v55, %v5077_v62  ;;  %v4885_v62 = vsel %vm562_vm1, %v12796_v25, 0.0  ;;  %v12820_v55 = vpop.f32.mrf.mxu0 }
 0x41e   :  { %v4882_v12 = vadd.f32 %v4881_v32, %v4880_v56  ;;  %v5080_v32 = vsel %vm562_vm1, %v4985_v40, 0.0  ;;  %v17321_v40 = vld [vmem:[#allocation34_spill] sm:$0xff] }
 0x41f   :  { %v12781_v14 = vpop.f32.mrf.mxu1 }
 0x421   :  { %v4463_v27 = vpop.f32.mrf.mxu1 }
 0x422   :  { %7978 = vmatmul.mubr.msk.bf16.gmra.mxu1 %vm174_vm0, %v17316_v22  ;;  %v4883_v27 = vsel %vm562_vm1, %v12788_v6, 0.0  ;;  %v5081_v22 = vadd.f32 %v5080_v32, %v5079_v0  ;;  %v5082_v6 = vsel %vm562_vm1, %v4986_v8, 0.0 }
 0x423   :  { %7981 = vmatprep.mubr.msk.bf16.mxu1 %vm174_vm0, %v17317_v53  ;;  %v4884_v1 = vadd.f32 %v4883_v27, %v4882_v12  ;;  %v17319_v12 = vld [vmem:[#allocation33_spill] sm:$0xff]  ;;  %v12835_v27 = vpop.f32.mrf.mxu0 }
 0x424   :  { %v5083_v0 = vadd.f32 %v5082_v6, %v5081_v22  ;;  %v4889_v6 = vsel %vm562_vm1, %v12831_v26, 0.0  ;;  %v12852_v22 = vadd.f32 %v12749_v58, %v12568_v28  ;;  %v4891_v28 = vsel %vm562_vm1, %v12844_v10, 0.0 }
 0x425   :  { %v4886_v36 = vadd.f32 %v4885_v62, %v4884_v1  ;;  %v4887_v1 = vsel %vm562_vm1, %v12815_v30, 0.0  ;;  %v5084_v62 = vsel %vm562_vm1, %v4987_v57, 0.0  ;;  %v17323_v57 = vld [vmem:[#allocation35_spill] sm:$0xff]  ;;  %v17325_v30 = vld [vmem:[#allocation37_spill] sm:$0xff] }
 0x426   :  { %v5085_v20 = vadd.f32 %v5084_v62, %v5083_v0  ;;  %v4990_v58 = vmul.f32 %v12852_v22, %v12852_v22 }
 0x427   :  { %v12811_v56 = vpop.f32.mrf.mxu1  ;;  %v4888_v32 = vadd.f32 %v4887_v1, %v4886_v36 }
 0x428   :  { %v5090_v10 = vsel %vm562_vm1, %v4990_v58, 0.0 }
 0x429   :  { %v4468_v53 = vpop.f32.mrf.mxu1  ;;  %v4890_v36 = vadd.f32 %v4889_v6, %v4888_v32 }
 0x42a   :  { %7982 = vmatmul.mubr.msk.bf16.gmra.mxu1 %vm174_vm0, %v17319_v12  ;;  %v4988_v53 = vmul.f32 %v12831_v26, %v12831_v26  ;;  %v12846_v12 = vpop.f32.mrf.mxu0 }
 0x42b   :  { %v12823_v34 = vpop.f32.mrf.mxu1  ;;  %7985 = vmatprep.mubr.msk.bf16.mxu1 %vm174_vm0, %v17321_v40  ;;  %v4892_v32 = vadd.f32 %v4891_v28, %v4890_v36 }
 0x42c   :  { %v12863_v1 = vpop.f32.mrf.mxu0 }
 0x42d   :  { %v4471_v8 = vpop.f32.mrf.mxu1 }
 0x42e   :  { %v5086_v8 = vsel %vm562_vm1, %v4988_v53, 0.0  ;;  %v12873_v53 = vadd.f32 %v12708_v49, %v12596_v15  ;;  %v12887_v15 = vadd.f32 %v12733_v42, %v12610_v2 }
 0x42f   :  { %v5087_v0 = vadd.f32 %v5086_v8, %v5085_v20  ;;  %v4893_v20 = vsel %vm562_vm1, %v12852_v22, 0.0 }
 0x430   :  { %v4894_v26 = vadd.f32 %v4893_v20, %v4892_v32  ;;  %v4991_v36 = vmul.f32 %v12873_v53, %v12873_v53  ;;  %17326 = vst [vmem:[#allocation9_spill] sm:$0xff] %v12887_v15  ;;  %v12900_v32 = vadd.f32 %v12777_v60, %v12641_v4  ;;  %v4897_v20 = vsel %vm562_vm1, %v12887_v15, 0.0 }
 0x432   :  { %7986 = vmatmul.mubr.msk.bf16.gmra.mxu1 %vm174_vm0, %v17323_v57  ;;  %v5088_v57 = vsel %vm562_vm1, %v4989_v11, 0.0  ;;  %v5092_v58 = vsel %vm562_vm1, %v4991_v36, 0.0  ;;  %v4993_v4 = vmul.f32 %v12900_v32, %v12900_v32 }
 0x433   :  { %v12854_v40 = vpop.f32.mrf.mxu1  ;;  %7989 = vmatprep.mubr.msk.bf16.mxu1 %vm174_vm0, %v17324_v7  ;;  %v5089_v8 = vadd.f32 %v5088_v57, %v5087_v0  ;;  %v12878_v7 = vpop.f32.mrf.mxu0  ;;  %v4895_v0 = vsel %vm562_vm1, %v12873_v53, 0.0 }
 0x434   :  { %v4896_v28 = vadd.f32 %v4895_v0, %v4894_v26  ;;  %v12908_v26 = vadd.f32 %v12805_v59, %v12652_v44  ;;  %v12921_v44 = vadd.f32 %v12762_v43, %v12682_v46  ;;  %v5096_v59 = vsel %vm562_vm1, %v4993_v4, 0.0 }
 0x435   :  { %v4476_v62 = vpop.f32.mrf.mxu1  ;;  %v5091_v49 = vadd.f32 %v5090_v10, %v5089_v8  ;;  %v12889_v11 = vpop.f32.mrf.mxu0  ;;  %v12935_v46 = vadd.f32 %v12790_v41, %v12699_v19 }
 0x436   :  { %17327 = vst [vmem:[#allocation10_spill] sm:$0xff] %v12908_v26  ;;  %v4898_v8 = vadd.f32 %v4897_v20, %v4896_v28  ;;  %17328 = vst [vmem:[#allocation11_spill] sm:$0xff] %v12921_v44  ;;  %v4901_v28 = vsel %vm562_vm1, %v12908_v26, 0.0 }
 0x437   :  { %v12869_v6 = vpop.f32.mrf.mxu1  ;;  %v5093_v2 = vadd.f32 %v5092_v58, %v5091_v49  ;;  %v12902_v42 = vpop.f32.mrf.mxu0  ;;  %v4899_v58 = vsel %vm562_vm1, %v12900_v32, 0.0  ;;  %v17370_v52 = vld [vmem:[#allocation9_spill] sm:$0xff] }
 0x439   :  { %v4479_v62 = vpop.f32.mrf.mxu1  ;;  %v4758_v49 = vpop.f32.mrf.mxu0 }
 0x43a   :  { %7990 = vmatmul.mubr.msk.bf16.gmra.mxu1 %vm174_vm0, %v17325_v30  ;;  %v4992_v30 = vmul.f32 %v12887_v15, %v12887_v15  ;;  %v4900_v15 = vadd.f32 %v4899_v58, %v4898_v8  ;;  %v4995_v8 = vmul.f32 %v12921_v44, %v12921_v44 }
 0x43c   :  { %v5094_v36 = vsel %vm562_vm1, %v4992_v30, 0.0 }
 0x43d   :  { %v5095_v60 = vadd.f32 %v5094_v36, %v5093_v2  ;;  %v12926_v2 = vpop.f32.mrf.mxu0  ;;  %v4902_v36 = vadd.f32 %v4901_v28, %v4900_v15  ;;  %v5100_v15 = vsel %vm562_vm1, %v4995_v8, 0.0  ;;  %v12946_v28 = vadd.f32 %v12835_v27, %v12725_v5 }
 0x43f   :  { %v12893_v57 = vpop.f32.mrf.mxu1  ;;  %v5097_v30 = vadd.f32 %v5096_v59, %v5095_v60  ;;  %v4771_v4 = vpop.f32.mrf.mxu0  ;;  %v4903_v60 = vsel %vm562_vm1, %v12921_v44, 0.0  ;;  %17329 = vst [vmem:[#allocation12_spill] sm:$0xff] %v12946_v28  ;;  %v4907_v27 = vsel %vm562_vm1, %v12946_v28, 0.0 }
 0x440   :  { %v4904_v59 = vadd.f32 %v4903_v60, %v4902_v36  ;;  %v12954_v36 = vadd.f32 %v12863_v1, %v12740_v63  ;;  %v4997_v60 = vmul.f32 %v12946_v28, %v12946_v28  ;;  %v12968_v1 = vadd.f32 %v12820_v55, %v12765_v47 }
 0x441   :  { %v4484_v10 = vpop.f32.mrf.mxu1  ;;  %v12948_v41 = vpop.f32.mrf.mxu0  ;;  %v12983_v47 = vadd.f32 %v12889_v11, %v12811_v56  ;;  %v12997_v56 = vadd.f32 %v12878_v7, %v12854_v40 }
 0x442   :  { %v4994_v10 = vmul.f32 %v12908_v26, %v12908_v26  ;;  %17330 = vst [vmem:[#allocation13_spill] sm:$0xff] %v12954_v36  ;;  %v5104_v63 = vsel %vm562_vm1, %v4997_v60, 0.0  ;;  %17331 = vst [vmem:[#allocation14_spill] sm:$0xff] %v12968_v1  ;;  %v4999_v60 = vmul.f32 %v12968_v1, %v12968_v1 }
 0x443   :  { %v12910_v62 = vpop.f32.mrf.mxu1  ;;  %v4774_v5 = vpop.f32.mrf.mxu0  ;;  %17333 = vst [vmem:[#allocation16_spill] sm:$0xff] %v12983_v47 }
 0x444   :  { %v5098_v20 = vsel %vm562_vm1, %v4994_v10, 0.0  ;;  %v4996_v10 = vmul.f32 %v12935_v46, %v12935_v46 }
 0x445   :  { %v4487_v0 = vpop.f32.mrf.mxu1  ;;  %v5099_v43 = vadd.f32 %v5098_v20, %v5097_v30  ;;  %v4905_v20 = vsel %vm562_vm1, %v12935_v46, 0.0 }
 0x446   :  { %v5102_v8 = vsel %vm562_vm1, %v4996_v10, 0.0 }
 0x447   :  { %v5101_v19 = vadd.f32 %v5100_v15, %v5099_v43  ;;  %v4998_v43 = vmul.f32 %v12954_v36, %v12954_v36 }
 0x449   :  { %v5103_v44 = vadd.f32 %v5102_v8, %v5101_v19  ;;  %v12972_v19 = vpop.f32.mrf.mxu0  ;;  %v5106_v8 = vsel %vm562_vm1, %v4998_v43, 0.0  ;;  %v12988_v43 = vadd.f32 %v4758_v49, %v12823_v34  ;;  %v4915_v34 = vsel %vm562_vm1, %v12983_v47, 0.0 }
 0x44b   :  { %v12929_v0 = vpop.f32.mrf.mxu1  ;;  %v5105_v10 = vadd.f32 %v5104_v63, %v5103_v44  ;;  %v4787_v44 = vpop.f32.mrf.mxu0  ;;  %17334 = vst [vmem:[#allocation17_spill] sm:$0xff] %v12988_v43  ;;  %v5002_v49 = vmul.f32 %v12988_v43, %v12988_v43 }
 0x44d   :  { %v4492_v58 = vpop.f32.mrf.mxu1  ;;  %v5107_v55 = vadd.f32 %v5106_v8, %v5105_v10  ;;  %v7848_v10 = vpop.f32.mrf.mxu0 }
 0x44e   :  { %v4906_v58 = vadd.f32 %v4905_v20, %v4904_v59  ;;  %v4909_v59 = vsel %vm562_vm1, %v12954_v36, 0.0 }
 0x44f   :  { %v12939_v26 = vpop.f32.mrf.mxu1 }
 0x450   :  { %v4908_v15 = vadd.f32 %v4907_v27, %v4906_v58  ;;  %v12977_v58 = vadd.f32 %v12846_v12, %v12781_v14  ;;  %v5108_v12 = vsel %vm562_vm1, %v4999_v60, 0.0 }
 0x451   :  { %v4495_v30 = vpop.f32.mrf.mxu1  ;;  %v5109_v11 = vadd.f32 %v5108_v12, %v5107_v55  ;;  %v4917_v55 = vsel %vm562_vm1, %v12988_v43, 0.0  ;;  %v13016_v12 = vadd.f32 %v4771_v4, %v12893_v57 }
 0x452   :  { %v4910_v28 = vadd.f32 %v4909_v59, %v4908_v15  ;;  %17332 = vst [vmem:[#allocation15_spill] sm:$0xff] %v12977_v58  ;;  %v5000_v14 = vmul.f32 %v12977_v58, %v12977_v58  ;;  %v5001_v59 = vmul.f32 %v12983_v47, %v12983_v47  ;;  %v4913_v8 = vsel %vm562_vm1, %v12977_v58, 0.0  ;;  %v17380_v61 = vld [vmem:[#allocation17_spill] sm:$0xff] }
 0x454   :  { %v5112_v7 = vsel %vm562_vm1, %v5001_v59, 0.0  ;;  %v13024_v59 = vadd.f32 %v4774_v5, %v12910_v62 }
 0x457   :  { %v12963_v30 = vpop.f32.mrf.mxu1 }
 0x459   :  { %v4500_v20 = vpop.f32.mrf.mxu1 }
 0x45a   :  { %v4911_v20 = vsel %vm562_vm1, %v12968_v1, 0.0  ;;  %v4790_v1 = vpop.f32.mrf.mxu0 }
 0x45b   :  { %v4501_v27 = vpop.f32.mrf.mxu1  ;;  %v4912_v15 = vadd.f32 %v4911_v20, %v4910_v28  ;;  %v13007_v28 = vadd.f32 %v12902_v42, %v12869_v6  ;;  %v5003_v20 = vmul.f32 %v12997_v56, %v12997_v56  ;;  %v5114_v42 = vsel %vm562_vm1, %v5002_v49, 0.0 }
 0x45c   :  { %v13026_v57 = vpop.f32.mrf.mxu0  ;;  %v13035_v49 = vadd.f32 %v12926_v2, %v12929_v0  ;;  %v4925_v0 = vsel %vm562_vm1, %v13024_v59, 0.0 }
 0x45d   :  { %v4503_v63 = vpop.f32.mrf.mxu1  ;;  %v4914_v60 = vadd.f32 %v4913_v8, %v4912_v15  ;;  %v4919_v15 = vsel %vm562_vm1, %v12997_v56, 0.0  ;;  %v5116_v4 = vsel %vm562_vm1, %v5003_v20, 0.0 }
 0x45e   :  { %v5110_v63 = vsel %vm562_vm1, %v5000_v14, 0.0  ;;  %v5004_v14 = vmul.f32 %v13007_v28, %v13007_v28 }
 0x45f   :  { %v5111_v47 = vadd.f32 %v5110_v63, %v5109_v11  ;;  %v4916_v58 = vadd.f32 %v4915_v34, %v4914_v60  ;;  %v4921_v11 = vsel %vm562_vm1, %v13007_v28, 0.0  ;;  %v5005_v34 = vmul.f32 %v13016_v12, %v13016_v12 }
 0x460   :  { %v5006_v63 = vmul.f32 %v13024_v59, %v13024_v59 }
 0x461   :  { %v5113_v8 = vadd.f32 %v5112_v7, %v5111_v47  ;;  %v4918_v43 = vadd.f32 %v4917_v55, %v4916_v58  ;;  %v5118_v58 = vsel %vm562_vm1, %v5004_v14, 0.0  ;;  %v4923_v47 = vsel %vm562_vm1, %v13016_v12, 0.0 }
 0x462   :  { %v13044_v7 = vadd.f32 %v12948_v41, %v12939_v26  ;;  %v5120_v2 = vsel %vm562_vm1, %v5005_v34, 0.0  ;;  %v4927_v26 = vsel %vm562_vm1, %v13035_v49, 0.0 }
 0x463   :  { %v4506_v40 = vpop.f32.mrf.mxu1  ;;  %v5115_v60 = vadd.f32 %v5114_v42, %v5113_v8  ;;  %v4920_v62 = vadd.f32 %v4919_v15, %v4918_v43  ;;  %v5007_v43 = vmul.f32 %v13035_v49, %v13035_v49  ;;  %v13052_v42 = vadd.f32 %v4787_v44, %v12963_v30 }
 0x464   :  { %v5122_v8 = vsel %vm562_vm1, %v5006_v63, 0.0  ;;  %v5008_v41 = vmul.f32 %v13044_v7, %v13044_v7  ;;  %v4929_v30 = vsel %vm562_vm1, %v13044_v7, 0.0 }
 0x465   :  { %v4508_v6 = vpop.f32.mrf.mxu1  ;;  %v5117_v55 = vadd.f32 %v5116_v4, %v5115_v60  ;;  %v4922_v20 = vadd.f32 %v4921_v11, %v4920_v62  ;;  %v13059_v4 = vadd.f32 %v4790_v1, %v4501_v27  ;;  %v5009_v44 = vmul.f32 %v13052_v42, %v13052_v42 }
 0x466   :  { %v4803_v6 = vpop.f32.mrf.mxu0  ;;  %v5126_v1 = vsel %vm562_vm1, %v5008_v41, 0.0  ;;  %v4931_v27 = vsel %vm562_vm1, %v13052_v42, 0.0 }
 0x467   :  { %v4509_v36 = vpop.f32.mrf.mxu1  ;;  %v5119_v15 = vadd.f32 %v5118_v58, %v5117_v55  ;;  %v4924_v14 = vadd.f32 %v4923_v47, %v4922_v20  ;;  %17335 = vst [vmem:[#allocation18_spill] sm:$0xff] %v13059_v4  ;;  %v13067_v58 = vadd.f32 %v12972_v19, %v4506_v40  ;;  %v5010_v20 = vmul.f32 %v13059_v4, %v13059_v4 }
 0x468   :  { %v7852_v62 = vpop.f32.mrf.mxu0  ;;  %v5128_v19 = vsel %vm562_vm1, %v5009_v44, 0.0  ;;  %v4933_v40 = vsel %vm562_vm1, %v13059_v4, 0.0 }
 0x469   :  { %v4511_v5 = vpop.f32.mrf.mxu1  ;;  %v5121_v11 = vadd.f32 %v5120_v2, %v5119_v15  ;;  %v4926_v34 = vadd.f32 %v4925_v0, %v4924_v14  ;;  %v13074_v2 = vadd.f32 %v7848_v10, %v4509_v36  ;;  %v5130_v36 = vsel %vm562_vm1, %v5010_v20, 0.0 }
 0x46a   :  { %v5124_v5 = vsel %vm562_vm1, %v5007_v43, 0.0  ;;  %v4806_v14 = vpop.f32.mrf.mxu0  ;;  %v4935_v10 = vsel %vm562_vm1, %v13067_v58, 0.0 }
 0x46b   :  { %v5123_v47 = vadd.f32 %v5122_v8, %v5121_v11  ;;  %v4928_v63 = vadd.f32 %v4927_v26, %v4926_v34  ;;  %v5011_v8 = vmul.f32 %v13067_v58, %v13067_v58 }
 0x46d   :  { %v5125_v0 = vadd.f32 %v5124_v5, %v5123_v47  ;;  %v4930_v43 = vadd.f32 %v4929_v30, %v4928_v63  ;;  %v5012_v5 = vmul.f32 %v13074_v2, %v13074_v2  ;;  %v5132_v63 = vsel %vm562_vm1, %v5011_v8, 0.0 }
 0x46f   :  { %v4514_v60 = vpop.f32.mrf.mxu1  ;;  %v5127_v41 = vadd.f32 %v5126_v1, %v5125_v0  ;;  %v4932_v11 = vadd.f32 %v4931_v27, %v4930_v43  ;;  %v5134_v27 = vsel %vm562_vm1, %v5012_v5, 0.0 }
 0x470   :  { %v13081_v26 = vadd.f32 %v4803_v6, %v4514_v60  ;;  %v4937_v6 = vsel %vm562_vm1, %v13074_v2, 0.0 }
 0x471   :  { %v4516_v55 = vpop.f32.mrf.mxu1  ;;  %v5129_v44 = vadd.f32 %v5128_v19, %v5127_v41  ;;  %v4934_v47 = vadd.f32 %v4933_v40, %v4932_v11 }
 0x472   :  { %v5013_v60 = vmul.f32 %v13081_v26, %v13081_v26  ;;  %v4939_v20 = vsel %vm562_vm1, %v13081_v26, 0.0 }
 0x473   :  { %v4517_v15 = vpop.f32.mrf.mxu1  ;;  %v5131_v55 = vadd.f32 %v5130_v36, %v5129_v44  ;;  %v4936_v1 = vadd.f32 %v4935_v10, %v4934_v47 }
 0x474   :  { %v13088_v30 = vadd.f32 %v4806_v14, %v4517_v15  ;;  %v5136_v19 = vsel %vm562_vm1, %v5013_v60, 0.0 }
 0x475   :  { %v4519_v34 = vpop.f32.mrf.mxu1  ;;  %v5133_v43 = vadd.f32 %v5132_v63, %v5131_v55  ;;  %v4938_v15 = vadd.f32 %v4937_v6, %v4936_v1 }
 0x476   :  { %v5014_v0 = vmul.f32 %v13088_v30, %v13088_v30  ;;  %v4941_v40 = vsel %vm562_vm1, %v13088_v30, 0.0 }
 0x477   :  { %v5135_v41 = vadd.f32 %v5134_v27, %v5133_v43  ;;  %v4940_v11 = vadd.f32 %v4939_v20, %v4938_v15 }
 0x478   :  { %v5138_v36 = vsel %vm562_vm1, %v5014_v0, 0.0 }
 0x479   :  { %v5137_v44 = vadd.f32 %v5136_v19, %v5135_v41  ;;  %v4942_v47 = vadd.f32 %v4941_v40, %v4940_v11 }
 0x47a   :  { %v4522_v14 = vpop.f32.mrf.mxu1 }
 0x47b   :  { %v13104_v8 = vadd.f32 %v13026_v57, %v4522_v14  ;;  %v5139_v57 = vadd.f32 %v5138_v36, %v5137_v44 }
 0x47c   :  { %v4524_v34 = vpop.f32.mrf.mxu1 }
 0x47d   :  { %v4943_v10 = vsel %vm562_vm1, %v13104_v8, 0.0  ;;  %v5015_v5 = vmul.f32 %v13104_v8, %v13104_v8 }
 0x47e   :  { %v4525_v63 = vpop.f32.mrf.mxu1  ;;  %v4944_v55 = vadd.f32 %v4943_v10, %v4942_v47 }
 0x47f   :  { %v5140_v6 = vsel %vm562_vm1, %v5015_v5, 0.0  ;;  %v13112_v60 = vadd.f32 %v7852_v62, %v4525_v63 }
 0x480   :  { %v4527_v1 = vpop.f32.mrf.mxu1  ;;  %v5141_v0 = vadd.f32 %v5140_v6, %v5139_v57 }
 0x481   :  { %v4945_v27 = vsel %vm562_vm1, %v13112_v60, 0.0  ;;  %v5016_v20 = vmul.f32 %v13112_v60, %v13112_v60 }
 0x482   :  { %v4946_v43 = vadd.f32 %v4945_v27, %v4944_v55  ;;  %v13118_v15 = vpop.f32.mrf.mxu1 }
 0x483   :  { %17336 = vst [vmem:[#allocation19_spill] sm:$0xff] %v13118_v15  ;;  %v5142_v14 = vsel %vm562_vm1, %v5016_v20, 0.0 }
 0x484   :  { %v4947_v19 = vrot.slane %v4946_v43, 4  ;;  %v5143_v40 = vadd.f32 %v5142_v14, %v5141_v0  ;;  %v13121_v41 = vpop.f32.mrf.mxu1 }
 0x485   :  { %17337 = vst [vmem:[#allocation20_spill] sm:$0xff] %v13121_v41  ;;  %v6793_v6 = vmul.f32 %v13121_v41, %v13121_v41 }
 0x486   :  { %v4948_v62 = vadd.f32 %v4947_v19, %v4946_v43  ;;  %v5144_v11 = vrot.slane %v5143_v40, 4  ;;  %v13123_v34 = vpop.f32.mrf.mxu1  ;;  %v6795_v19 = vmul.f32 %v13118_v15, %v13118_v15 }
 0x487   :  { %17338 = vst [vmem:[#allocation21_spill] sm:$0xff] %v13123_v34 }
 0x488   :  { %v4949_v36 = vrot.slane %v4948_v62, 2  ;;  %v5145_v10 = vadd.f32 %v5144_v11, %v5143_v40  ;;  %v13125_v5 = vpop.f32.mrf.mxu1 }
 0x489   :  { %17339 = vst [vmem:[#allocation22_spill] sm:$0xff] %v13125_v5  ;;  %v6724_v1 = vadd.f32 %v13125_v5, %v13121_v41  ;;  %v6794_v27 = vmul.f32 %v13125_v5, %v13125_v5 }
 0x48a   :  { %v4950_v44 = vadd.f32 %v4949_v36, %v4948_v62  ;;  %v5146_v47 = vrot.slane %v5145_v10, 2  ;;  %v13127_v63 = vpop.f32.mrf.mxu1 }
 0x48b   :  { %17340 = vst [vmem:[#allocation23_spill] sm:$0xff] %v13127_v63  ;;  %v6725_v11 = vadd.f32 %v13118_v15, %v6724_v1  ;;  %v6857_v36 = vadd.f32 %v6794_v27, %v6793_v6 }
 0x48c   :  { %v4951_v57 = vrot.slane %v4950_v44, 1  ;;  %v5147_v55 = vadd.f32 %v5146_v47, %v5145_v10  ;;  %v13135_v20 = vpop.f32.mrf.mxu1 }
 0x48d   :  { %17341 = vst [vmem:[#allocation24_spill] sm:$0xff] %v13135_v20 }
 0x48e   :  { %v4952_v0 = vadd.f32 %v4951_v57, %v4950_v44  ;;  %v5148_v43 = vrot.slane %v5147_v55, 1  ;;  %v13137_v14 = vpop.f32.mrf.mxu1  ;;  %v6797_v44 = vmul.f32 %v13135_v20, %v13135_v20 }
 0x48f   :  { %17342 = vst [vmem:[#allocation25_spill] sm:$0xff] %v13137_v14 }
 0x490   :  { %v5149_v40 = vadd.f32 %v5148_v43, %v5147_v55  ;;  %v13141_v62 = vmul.f32 0.001953125, %v4952_v0  ;;  %v13144_v10 = vpop.f32.mrf.mxu1  ;;  %v6796_v55 = vmul.f32 %v13123_v34, %v13123_v34  ;;  %v6858_v0 = vadd.f32 %v6857_v36, %v6795_v19 }
 0x491   :  { %17343 = vst [vmem:[#allocation26_spill] sm:$0xff] %v13144_v10  ;;  %v6726_v43 = vadd.f32 %v13123_v34, %v6725_v11  ;;  %v13168_v19 = vmul.f32 %v13127_v63, %v13127_v63 }
 0x492   :  { %v5151_v47 = vmul.f32 0.001953125, %v5149_v40  ;;  %v5152_v5 = vmul.f32 %v13141_v62, %v13141_v62  ;;  %v13150_v57 = vpop.f32.mrf.mxu1  ;;  %v6859_v4 = vadd.f32 %v6858_v0, %v6796_v55  ;;  %v5185_v17 = vsub.f32 %v17361_v50, %v13141_v62  ;;  %v17366_v50 = vld [vmem:[#allocation6_spill] sm:$0xff] }
 0x493   :  { %17344 = vst [vmem:[#allocation27_spill] sm:$0xff] %v13150_v57  ;;  %v6727_v15 = vadd.f32 %v6726_v43, %v13135_v20  ;;  %v5187_v21 = vsub.f32 %v17363_v18, %v13141_v62  ;;  %v5189_v55 = vsub.f32 %v17366_v50, %v13141_v62  ;;  %v17368_v18 = vld [vmem:[#allocation8_spill] sm:$0xff]  ;;  %v5193_v33 = vsub.f32 %v12873_v53, %v13141_v62 }
 0x494   :  { %v5153_v41 = vsub.f32 %v5151_v47, %v5152_v5  ;;  %v13155_v1 = vpop.f32.mrf.mxu1  ;;  %v13170_v11 = vadd.f32 %v6859_v4, %v6797_v44  ;;  %v13189_v4 = vmul.f32 %v13144_v10, %v13144_v10  ;;  %v13278_v44 = vld [vmem:[%s16786_s5] ss:$0 sm:$0xff]  ;;  %v5191_v3 = vsub.f32 %v17368_v18, %v13141_v62 }
 0x495   :  { %17345 = vst [vmem:[#allocation28_spill] sm:$0xff] %v13155_v1  ;;  %v13177_v36 = vadd.f32 %v6727_v15, %v13144_v10  ;;  %17365 = vst [vmem:[#allocation60_spill] sm:$0xff] %v13278_v44  ;;  %v17369_v10 = vsub.f32 %v13112_v60, %v13141_v62  ;;  %v5194_v50 = vsub.f32 %v17370_v52, %v13141_v62  ;;  %v17372_v18 = vld [vmem:[#allocation10_spill] sm:$0xff]  ;;  %v17375_v52 = vld [vmem:[#allocation13_spill] sm:$0xff] }
 0x496   :  { %v5154_v6 = vmax.f32 %v5153_v41, 0.0  ;;  %v13157_v27 = vpop.f32.mrf.mxu1  ;;  %v13174_v41 = vmul.f32 %v13137_v14, %v13137_v14  ;;  %v5196_v35 = vsub.f32 %v17372_v18, %v13141_v62  ;;  %v5198_v60 = vsub.f32 %v12935_v46, %v13141_v62  ;;  %v17377_v18 = vld [vmem:[#allocation15_spill] sm:$0xff] }
 0x497   :  { %17346 = vst [vmem:[#allocation29_spill] sm:$0xff] %v13157_v27  ;;  %v5202_v39 = vsub.f32 %v17377_v18, %v13141_v62  ;;  %v5206_v18 = vsub.f32 %v13007_v28, %v13141_v62 }
 0x498   :  { %v5219_v40 = vadd.f32 1e-05, %v5154_v6  ;;  %v13162_v57 = vpop.f32.mrf.mxu1  ;;  %v5186_v6 = vsub.f32 %v17362_v9, %v13141_v62  ;;  %v17367_v9 = vld [vmem:[#allocation7_spill] sm:$0xff] }
 0x499   :  { %17347 = vst [vmem:[#allocation30_spill] sm:$0xff] %v13162_v57  ;;  %v5190_v54 = vsub.f32 %v17367_v9, %v13141_v62  ;;  %v5195_v9 = vsub.f32 %v12900_v32, %v13141_v62  ;;  %v5200_v32 = vsub.f32 %v17375_v52, %v13141_v62  ;;  %v6861_v52 = vadd.f32 %v13170_v11, %v13189_v4 }
 0x49a   :  { %9023 = vrsqrt.f32 %v5219_v40  ;;  %v13164_v5 = vpop.f32.mrf.mxu1  ;;  %v5188_v40 = vsub.f32 %v12796_v25, %v13141_v62  ;;  %v5192_v25 = vsub.f32 %v12852_v22, %v13141_v62  ;;  %v17373_v22 = vld [vmem:[#allocation11_spill] sm:$0xff]  ;;  %v5210_v11 = vsub.f32 %v13044_v7, %v13141_v62 }
 0x49b   :  { %17348 = vst [vmem:[#allocation31_spill] sm:$0xff] %v13164_v5  ;;  %v5197_v37 = vsub.f32 %v17373_v22, %v13141_v62  ;;  %v17379_v22 = vld [vmem:[#allocation16_spill] sm:$0xff]  ;;  %v17383_v4 = vld [vmem:[#allocation27_spill] sm:$0xff]  ;;  %v13359_v7 = vmul.f32 %v13162_v57, %v13162_v57 }
 0x49c   :  { %v13179_v47 = vpop.f32.mrf.mxu1  ;;  %v5203_v46 = vsub.f32 %v17379_v22, %v13141_v62  ;;  %v5208_v22 = vsub.f32 %v13024_v59, %v13141_v62  ;;  %v13351_v59 = vmul.f32 %v13155_v1, %v13155_v1 }
 0x49d   :  { %17349 = vst [vmem:[#allocation32_spill] sm:$0xff] %v13179_v47  ;;  %17387 = vst [vmem:[#allocation10_spill] sm:$0xff] %v13359_v7 }
 0x49e   :  { %v13199_v0 = vpop.f32.mrf.mxu1  ;;  %17385 = vst [vmem:[#allocation8_spill] sm:$0xff] %v13351_v59  ;;  %v17450_v59 = vld [vmem:[#allocation50_spill] sm:$0xff] }
 0x49f   :  { %17350 = vst [vmem:[#allocation33_spill] sm:$0xff] %v13199_v0 }
 0x4a0   :  { %v13217_v20 = vpop.f32.mrf.mxu1 }
 0x4a1   :  { %17351 = vst [vmem:[#allocation34_spill] sm:$0xff] %v13217_v20 }
 0x4a2   :  { %v13235_v34 = vpop.f32.mrf.mxu1 }
 0x4a3   :  { %17352 = vst [vmem:[#allocation35_spill] sm:$0xff] %v13235_v34 }
 0x4a4   :  { %v13253_v15 = vpop.f32.mrf.mxu1 }
 0x4a5   :  { %17358 = vst [vmem:[#allocation36_spill] sm:$0xff] %v13253_v15 }
 0x4a6   :  { %v13271_v45 = vpop.f32.mrf.mxu1 }
 0x4a7   :  { %17364 = vst [vmem:[#allocation37_spill] sm:$0xff] %v13271_v45  ;;  %v13273_v43 = vpop.eup %9023 }
 0x4a8   :  { %v5284_v31 = vmul.f32 %v13273_v43, %v17369_v10  ;;  %v13298_v29 = vpop.f32.mrf.mxu1  ;;  %v17374_v10 = vld [vmem:[#allocation12_spill] sm:$0xff] }
 0x4a9   :  { %17371 = vst [vmem:[#allocation62_spill] sm:$0xff] %v13298_v29  ;;  %v5199_v53 = vsub.f32 %v17374_v10, %v13141_v62  ;;  %v17376_v29 = vld [vmem:[#allocation14_spill] sm:$0xff]  ;;  %v5204_v10 = vsub.f32 %v17380_v61, %v13141_v62  ;;  %v5209_v61 = vsub.f32 %v13035_v49, %v13141_v62  ;;  %v13355_v49 = vmul.f32 %v13157_v27, %v13157_v27 }
 0x4aa   :  { %v13309_v23 = vmul.f32 %v13278_v44, %v5284_v31  ;;  %v5201_v16 = vsub.f32 %v17376_v29, %v13141_v62  ;;  %v13317_v48 = vpop.f32.mrf.mxu1  ;;  %v6729_v31 = vadd.f32 %v13127_v63, %v13177_v36  ;;  %v5205_v29 = vsub.f32 %v12997_v56, %v13141_v62  ;;  %v17382_v36 = vld [vmem:[#allocation18_spill] sm:$0xff] }
 0x4ab   :  { %17378 = vst [vmem:[#allocation65_spill] sm:$0xff] %v13317_v48  ;;  %v5207_v48 = vsub.f32 %v13016_v12, %v13141_v62  ;;  %v5211_v56 = vsub.f32 %v13052_v42, %v13141_v62  ;;  %v5212_v28 = vsub.f32 %v17382_v36, %v13141_v62  ;;  %v13347_v12 = vmul.f32 %v17383_v4, %v17383_v4  ;;  %v17440_v4 = vld [vmem:[#allocation44_spill] sm:$0xff] }
 0x4ac   :  { %v13335_v44 = vpop.f32.mrf.mxu1  ;;  %17386 = vst [vmem:[#allocation9_spill] sm:$0xff] %v13355_v49  ;;  %v6862_v36 = vadd.f32 %v6861_v52, %v13168_v19  ;;  %v6730_v63 = vadd.f32 %v13137_v14, %v6729_v31  ;;  %v13374_v49 = vmul.f32 %v13273_v43, %v5185_v17  ;;  %v13377_v27 = vmul.f32 %v13273_v43, %v5186_v6 }
 0x4ad   :  { %17381 = vst [vmem:[#allocation6_spill] sm:$0xff] %v13335_v44  ;;  %17384 = vst [vmem:[#allocation7_spill] sm:$0xff] %v13347_v12  ;;  %v13367_v44 = vmul.f32 %v13164_v5, %v13164_v5  ;;  %v13371_v12 = vmul.f32 %v13179_v47, %v13179_v47  ;;  %v13385_v19 = vmul.f32 %v13217_v20, %v13217_v20  ;;  %v17434_v20 = vld [vmem:[#allocation42_spill] sm:$0xff] }
 0x4ae   :  { %v13361_v42 = vpop.f32.mrf.mxu1  ;;  %17391 = vst [vmem:[#allocation14_spill] sm:$0xff] %v13374_v49  ;;  %17392 = vst [vmem:[#allocation15_spill] sm:$0xff] %v13377_v27  ;;  %v13390_v52 = vmul.f32 %v13273_v43, %v5187_v21  ;;  %v13393_v14 = vmul.f32 %v13273_v43, %v5188_v40  ;;  %v13396_v17 = vmul.f32 %v13273_v43, %v5189_v55  ;;  %v17438_v47 = vld [vmem:[#allocation38_spill] sm:$0xff] }
 0x4af   :  { %17388 = vst [vmem:[#allocation11_spill] sm:$0xff] %v13361_v42  ;;  %17389 = vst [vmem:[#allocation12_spill] sm:$0xff] %v13367_v44  ;;  %v13381_v42 = vmul.f32 %v13199_v0, %v13199_v0  ;;  %v13399_v6 = vmul.f32 %v13273_v43, %v5190_v54  ;;  %v13405_v0 = vmul.f32 %v13273_v43, %v5192_v25 }
 0x4b0   :  { %17390 = vst [vmem:[#allocation13_spill] sm:$0xff] %v13371_v12  ;;  %17394 = vst [vmem:[#allocation17_spill] sm:$0xff] %v13385_v19  ;;  %v13387_v31 = vpop.f32.mrf.mxu1  ;;  %v13411_v21 = vmul.f32 %v13273_v43, %v5194_v50  ;;  %v13416_v55 = vmul.f32 %v13273_v43, %v5195_v9  ;;  %v13419_v54 = vmul.f32 %v13273_v43, %v5196_v35  ;;  %v17436_v12 = vld [vmem:[#allocation47_spill] sm:$0xff] }
 0x4b1   :  { %17393 = vst [vmem:[#allocation16_spill] sm:$0xff] %v13381_v42  ;;  %17395 = vst [vmem:[#allocation18_spill] sm:$0xff] %v13387_v31  ;;  %v13402_v42 = vmul.f32 %v13273_v43, %v5191_v3  ;;  %v13408_v31 = vmul.f32 %v13273_v43, %v5193_v33  ;;  %v13422_v3 = vmul.f32 %v13273_v43, %v5197_v37 }
 0x4b2   :  { %17396 = vst [vmem:[#allocation67_spill] sm:$0xff] %v13390_v52  ;;  %17397 = vst [vmem:[#allocation68_spill] sm:$0xff] %v13393_v14  ;;  %v13413_v40 = vpop.f32.mrf.mxu1  ;;  %v13425_v25 = vmul.f32 %v13273_v43, %v5198_v60  ;;  %v13428_v33 = vmul.f32 %v13273_v43, %v5199_v53  ;;  %v13431_v50 = vmul.f32 %v13273_v43, %v5200_v32  ;;  %v17453_v14 = vld [vmem:[#allocation55_spill] sm:$0xff]  ;;  %v17456_v52 = vld [vmem:[#allocation52_spill] sm:$0xff] }
 0x4b3   :  { %17398 = vst [vmem:[#allocation69_spill] sm:$0xff] %v13413_v40  ;;  %v13434_v40 = vmul.f32 %v13273_v43, %v5201_v16  ;;  %v13437_v9 = vmul.f32 %v13273_v43, %v5202_v39  ;;  %v13442_v37 = vmul.f32 %v13273_v43, %v5203_v46  ;;  %v13445_v60 = vmul.f32 %v13273_v43, %v5204_v10 }
 0x4b4   :  { %v13439_v35 = vpop.f32.mrf.mxu1  ;;  %v13448_v53 = vmul.f32 %v13273_v43, %v5205_v29  ;;  %v13451_v32 = vmul.f32 %v13273_v43, %v5206_v18  ;;  %v13454_v16 = vmul.f32 %v13273_v43, %v5207_v48  ;;  %v13457_v39 = vmul.f32 %v13273_v43, %v5208_v22 }
 0x4b5   :  { %17399 = vst [vmem:[#allocation70_spill] sm:$0xff] %v13439_v35  ;;  %v13460_v35 = vmul.f32 %v13273_v43, %v5209_v61  ;;  %v13463_v46 = vmul.f32 %v13273_v43, %v5210_v11  ;;  %v13468_v29 = vmul.f32 %v13273_v43, %v5211_v56  ;;  %v13471_v18 = vmul.f32 %v13273_v43, %v5212_v28  ;;  %v13488_v56 = vld [vmem:[%s16787_s6] ss:$0 sm:$0xff] }
 0x4b6   :  { %v13465_v10 = vpop.f32.mrf.mxu1  ;;  %v17401_v48 = vsub.f32 %v13067_v58, %v13141_v62  ;;  %v17402_v61 = vsub.f32 %v13074_v2, %v13141_v62  ;;  %17403 = vst [vmem:[#allocation72_spill] sm:$0xff] %v13488_v56  ;;  %v17404_v28 = vsub.f32 %v13081_v26, %v13141_v62  ;;  %v17405_v58 = vsub.f32 %v13088_v30, %v13141_v62 }
 0x4b7   :  { %17400 = vst [vmem:[#allocation71_spill] sm:$0xff] %v13465_v10  ;;  %v17406_v2 = vsub.f32 %v13104_v8, %v13141_v62  ;;  %v13510_v44 = vmul.f32 %v13235_v34, %v13235_v34  ;;  %v13518_v30 = vadd.f32 %v6862_v36, %v13174_v41  ;;  %v13526_v8 = vmul.f32 %v13271_v45, %v13271_v45 }
 0x4b8   :  { %v13477_v22 = vmul.f32 %v13273_v43, %v17401_v48  ;;  %v13483_v11 = vmul.f32 %v13273_v43, %v17402_v61  ;;  %v13494_v10 = vmul.f32 %v13273_v43, %v17404_v28  ;;  %v13500_v48 = vmul.f32 %v13273_v43, %v17405_v58  ;;  %v13512_v26 = vpop.f32.mrf.mxu1 }
 0x4b9   :  { %v13506_v61 = vmul.f32 %v13273_v43, %v17406_v2  ;;  %17407 = vst [vmem:[#allocation73_spill] sm:$0xff] %v13510_v44  ;;  %17408 = vst [vmem:[#allocation74_spill] sm:$0xff] %v13512_v26  ;;  %v13515_v28 = vadd.f32 %v6730_v63, %v13155_v1  ;;  %v13522_v58 = vmul.f32 %v13253_v15, %v13253_v15 }
 0x4ba   :  { %17410 = vst [vmem:[#allocation76_spill] sm:$0xff] %v13518_v30  ;;  %17412 = vst [vmem:[#allocation78_spill] sm:$0xff] %v13526_v8  ;;  %v17413_v2 = vsub.f32 %v12417_v51, %v13141_v62  ;;  %v17414_v63 = vsub.f32 %v12434_v38, %v13141_v62  ;;  %v17415_v36 = vsub.f32 %v12424_v13, %v13141_v62 }
 0x4bb   :  { %17409 = vst [vmem:[#allocation75_spill] sm:$0xff] %v13515_v28  ;;  %17411 = vst [vmem:[#allocation77_spill] sm:$0xff] %v13522_v58  ;;  %v17416_v26 = vsub.f32 %v12431_v24, %v13141_v62  ;;  %v13556_v38 = vadd.f32 %v13488_v56, %v13309_v23  ;;  %v17425_v23 = vld [vmem:[#allocation39_spill] sm:$0xff] }
 0x4bc   :  { %v13532_v44 = vmul.f32 %v13273_v43, %v17413_v2  ;;  %v13538_v41 = vmul.f32 %v13273_v43, %v17414_v63  ;;  %v13544_v1 = vmul.f32 %v13273_v43, %v17415_v36  ;;  %v13552_v2 = vpop.f32.mrf.mxu1  ;;  %v17419_v63 = vld [vmem:[#allocation64_spill] sm:$0xff]  ;;  %v17421_v36 = vld [vmem:[#allocation41_spill] sm:$0xff]  ;;  %v17426_v58 = vsub.f32 %v17425_v23, %v13141_v62 }
 0x4bd   :  { %v13550_v51 = vmul.f32 %v13273_v43, %v17416_v26  ;;  %17417 = vst [vmem:[#allocation79_spill] sm:$0xff] %v13552_v2  ;;  %17418 = vst [vmem:[#allocation80_spill] sm:$0xff] %v13556_v38  ;;  %v17420_v8 = vsub.f32 %v17419_v63, %v13141_v62  ;;  %v17422_v45 = vsub.f32 %v17421_v36, %v13141_v62  ;;  %v17423_v26 = vld [vmem:[#allocation66_spill] sm:$0xff]  ;;  %v17462_v38 = vld [vmem:[#allocation63_spill] sm:$0xff] }
 0x4be   :  { %v17424_v34 = vsub.f32 %v17423_v26, %v13141_v62  ;;  %v13580_v63 = vmul.f32 %v13273_v43, %v17426_v58  ;;  %v13600_v58 = vpop.f32.mrf.mxu1  ;;  %v17463_v27 = vsub.f32 %v17462_v38, %v13141_v62 }
 0x4bf   :  { %v13562_v13 = vmul.f32 %v13273_v43, %v17420_v8  ;;  %v13568_v24 = vmul.f32 %v13273_v43, %v17422_v45  ;;  %v17427_v8 = vld [vmem:[#allocation43_spill] sm:$0xff]  ;;  %v17429_v45 = vld [vmem:[#allocation45_spill] sm:$0xff]  ;;  %17433 = vst [vmem:[#allocation64_spill] sm:$0xff] %v13600_v58  ;;  %v17441_v58 = vsub.f32 %v17440_v4, %v13141_v62 }
 0x4c0   :  { %v13574_v2 = vmul.f32 %v13273_v43, %v17424_v34  ;;  %v17428_v15 = vsub.f32 %v17427_v8, %v13141_v62  ;;  %v17430_v5 = vsub.f32 %v17429_v45, %v13141_v62  ;;  %v17431_v34 = vld [vmem:[#allocation40_spill] sm:$0xff]  ;;  %v17435_v8 = vsub.f32 %v17434_v20, %v13141_v62  ;;  %v13669_v56 = vpop.f32.mrf.mxu1 }
 0x4c1   :  { %v17432_v19 = vsub.f32 %v17431_v34, %v13141_v62  ;;  %v17437_v45 = vsub.f32 %v17436_v12, %v13141_v62  ;;  %v17439_v34 = vsub.f32 %v17438_v47, %v13141_v62  ;;  %v13624_v20 = vmul.f32 %v13273_v43, %v17441_v58  ;;  %v17448_v58 = vld [vmem:[#allocation51_spill] sm:$0xff]  ;;  %17459 = vst [vmem:[#allocation43_spill] sm:$0xff] %v13669_v56 }
 0x4c2   :  { %v13586_v36 = vmul.f32 %v13273_v43, %v17428_v15  ;;  %v13592_v26 = vmul.f32 %v13273_v43, %v17430_v5  ;;  %v13606_v15 = vmul.f32 %v13273_v43, %v17435_v8  ;;  %v17442_v8 = vld [vmem:[#allocation46_spill] sm:$0xff]  ;;  %v17449_v30 = vsub.f32 %v17448_v58, %v13141_v62 }
 0x4c3   :  { %v13598_v23 = vmul.f32 %v13273_v43, %v17432_v19  ;;  %v13612_v5 = vmul.f32 %v13273_v43, %v17437_v45  ;;  %v13618_v19 = vmul.f32 %v13273_v43, %v17439_v34  ;;  %v17443_v7 = vsub.f32 %v17442_v8, %v13141_v62  ;;  %v17444_v45 = vld [vmem:[#allocation49_spill] sm:$0xff]  ;;  %v17446_v34 = vld [vmem:[#allocation48_spill] sm:$0xff] }
 0x4c4   :  { %v17445_v28 = vsub.f32 %v17444_v45, %v13141_v62  ;;  %v17447_v57 = vsub.f32 %v17446_v34, %v13141_v62  ;;  %v13648_v8 = vmul.f32 %v13273_v43, %v17449_v30  ;;  %v17451_v45 = vsub.f32 %v17450_v59, %v13141_v62 }
 0x4c5   :  { %v13630_v12 = vmul.f32 %v13273_v43, %v17443_v7  ;;  %v17454_v34 = vsub.f32 %v17453_v14, %v13141_v62  ;;  %v17457_v58 = vsub.f32 %v17456_v52, %v13141_v62  ;;  %v17460_v7 = vld [vmem:[#allocation59_spill] sm:$0xff]  ;;  %v5244_v14 = vmul.f32 %v13273_v43, %v17463_v27 }
 0x4c6   :  { %v13636_v47 = vmul.f32 %v13273_v43, %v17445_v28  ;;  %v13642_v4 = vmul.f32 %v13273_v43, %v17447_v57  ;;  %v13655_v28 = vmul.f32 %v13273_v43, %v17451_v45  ;;  %v17461_v59 = vsub.f32 %v17460_v7, %v13141_v62 }
 0x4c7   :  { %v13661_v57 = vmul.f32 %v13273_v43, %v17454_v34  ;;  %v13667_v30 = vmul.f32 %v13273_v43, %v17457_v58  ;;  %v17464_v34 = vld [vmem:[#allocation53_spill] sm:$0xff] }
 0x4c8   :  { %17452 = vst [vmem:[#allocation41_spill] sm:$0xff] %v13655_v28  ;;  %v5243_v45 = vmul.f32 %v13273_v43, %v17461_v59  ;;  %v17465_v49 = vsub.f32 %v17464_v34, %v13141_v62  ;;  %v17470_v28 = vld [vmem:[#allocation60_spill] sm:$0xff]  ;;  %v13735_v34 = vpop.f32.mrf.mxu1 }
 0x4c9   :  { %17455 = vst [vmem:[#allocation66_spill] sm:$0xff] %v13661_v57  ;;  %17458 = vst [vmem:[#allocation39_spill] sm:$0xff] %v13667_v30  ;;  %v17466_v57 = vld [vmem:[#allocation54_spill] sm:$0xff]  ;;  %v17468_v30 = vld [vmem:[#allocation57_spill] sm:$0xff]  ;;  %v13693_v38 = vmul.f32 %v17470_v28, %v13396_v17  ;;  %v13697_v27 = vmul.f32 %v17470_v28, %v13399_v6  ;;  %v13713_v17 = vmul.f32 %v17470_v28, %v13411_v21 }
 0x4ca   :  { %v5245_v52 = vmul.f32 %v13273_v43, %v17465_v49  ;;  %v17467_v58 = vsub.f32 %v17466_v57, %v13141_v62  ;;  %v17469_v7 = vsub.f32 %v17468_v30, %v13141_v62  ;;  %v13701_v49 = vmul.f32 %v17470_v28, %v13402_v42  ;;  %17471 = vst [vmem:[#allocation45_spill] sm:$0xff] %v13735_v34  ;;  %v17478_v34 = vld [vmem:[#allocation58_spill] sm:$0xff] }
 0x4cb   :  { %v13705_v57 = vmul.f32 %v17470_v28, %v13405_v0  ;;  %v13709_v30 = vmul.f32 %v17470_v28, %v13408_v31  ;;  %v13717_v6 = vmul.f32 %v17470_v28, %v13416_v55  ;;  %v13721_v42 = vmul.f32 %v17470_v28, %v13419_v54 }
 0x4cc   :  { %v5246_v56 = vmul.f32 %v13273_v43, %v17467_v58  ;;  %v5247_v59 = vmul.f32 %v13273_v43, %v17469_v7  ;;  %v13725_v0 = vmul.f32 %v17470_v28, %v13422_v3  ;;  %v13729_v31 = vmul.f32 %v17470_v28, %v13425_v25  ;;  %v13801_v58 = vpop.f32.mrf.mxu1 }
 0x4cd   :  { %v13733_v21 = vmul.f32 %v17470_v28, %v13428_v33  ;;  %v13739_v55 = vmul.f32 %v17470_v28, %v13431_v50  ;;  %v13743_v54 = vmul.f32 %v17470_v28, %v13434_v40  ;;  %v13747_v3 = vmul.f32 %v17470_v28, %v13437_v9  ;;  %17475 = vst [vmem:[#allocation38_spill] sm:$0xff] %v13801_v58 }
 0x4ce   :  { %v13751_v25 = vmul.f32 %v17470_v28, %v13442_v37  ;;  %v13755_v33 = vmul.f32 %v17470_v28, %v13445_v60  ;;  %v13759_v50 = vmul.f32 %v17470_v28, %v13448_v53  ;;  %v13763_v40 = vmul.f32 %v17470_v28, %v13451_v32 }
 0x4cf   :  { %v13767_v9 = vmul.f32 %v17470_v28, %v13454_v16  ;;  %v13771_v37 = vmul.f32 %v17470_v28, %v13457_v39  ;;  %v13775_v60 = vmul.f32 %v17470_v28, %v13460_v35  ;;  %v13779_v53 = vmul.f32 %v17470_v28, %v13463_v46 }
 0x4d0   :  { %v13783_v32 = vmul.f32 %v17470_v28, %v13468_v29  ;;  %v13787_v16 = vmul.f32 %v17470_v28, %v13471_v18  ;;  %v13791_v39 = vmul.f32 %v17470_v28, %v13477_v22  ;;  %v13795_v35 = vmul.f32 %v17470_v28, %v13483_v11  ;;  %v17476_v29 = vld [vmem:[#allocation56_spill] sm:$0xff] }
 0x4d1   :  { %v13799_v46 = vmul.f32 %v17470_v28, %v13494_v10  ;;  %v17477_v7 = vsub.f32 %v17476_v29, %v13141_v62  ;;  %v13813_v11 = vmul.f32 %v17470_v28, %v13500_v48  ;;  %v13817_v10 = vmul.f32 %v17470_v28, %v13506_v61 }
 0x4d2   :  { %17472 = vst [vmem:[#allocation40_spill] sm:$0xff] %v13783_v32  ;;  %17473 = vst [vmem:[#allocation42_spill] sm:$0xff] %v13787_v16  ;;  %v17479_v16 = vsub.f32 %v17478_v34, %v13141_v62  ;;  %v5292_v34 = vmul.f32 %v17470_v28, %v13538_v41  ;;  %v5293_v48 = vmul.f32 %v17470_v28, %v13544_v1  ;;  %v17495_v32 = vld [vmem:[#allocation15_spill] sm:$0xff] }
 0x4d3   :  { %17474 = vst [vmem:[#allocation47_spill] sm:$0xff] %v13799_v46  ;;  %v5248_v18 = vmul.f32 %v13273_v43, %v17477_v7  ;;  %17480 = vst [vmem:[#allocation44_spill] sm:$0xff] %v13813_v11  ;;  %v17481_v46 = vld [vmem:[#allocation61_spill] sm:$0xff]  ;;  %v5291_v7 = vmul.f32 %v17470_v28, %v13532_v44  ;;  %v13835_v61 = vmul.f32 %v17470_v28, %v13562_v13  ;;  %v13855_v13 = vpop.f32.mrf.mxu1 }
 0x4d4   :  { %v5249_v22 = vmul.f32 %v13273_v43, %v17479_v16  ;;  %v17482_v58 = vsub.f32 %v17481_v46, %v13141_v62  ;;  %v5294_v16 = vmul.f32 %v17470_v28, %v13550_v51  ;;  %v13839_v62 = vmul.f32 %v17470_v28, %v13568_v24  ;;  %17484 = vst [vmem:[#allocation49_spill] sm:$0xff] %v13855_v13  ;;  %v17485_v46 = vld [vmem:[#allocation41_spill] sm:$0xff]  ;;  %v17487_v13 = vld [vmem:[#allocation39_spill] sm:$0xff] }
 0x4d5   :  { %v5298_v44 = vmul.f32 %v17470_v28, %v13580_v63  ;;  %v13847_v1 = vmul.f32 %v17470_v28, %v13586_v36  ;;  %v13851_v41 = vmul.f32 %v17470_v28, %v13592_v26  ;;  %v5301_v51 = vmul.f32 %v17470_v28, %v13598_v23  ;;  %v13902_v11 = vpop.f32.mrf.mxu1 }
 0x4d6   :  { %v13823_v29 = vmul.f32 %v13273_v43, %v17482_v58  ;;  %v5297_v43 = vmul.f32 %v17470_v28, %v13574_v2  ;;  %v5302_v24 = vmul.f32 %v17470_v28, %v13606_v15  ;;  %v13861_v2 = vmul.f32 %v17470_v28, %v13612_v5  ;;  %v17486_v58 = vld [vmem:[#allocation66_spill] sm:$0xff]  ;;  %17491 = vst [vmem:[#allocation55_spill] sm:$0xff] %v13902_v11 }
 0x4d7   :  { %v13865_v63 = vmul.f32 %v17470_v28, %v13618_v19  ;;  %v5305_v36 = vmul.f32 %v17470_v28, %v13624_v20  ;;  %v5306_v26 = vmul.f32 %v17470_v28, %v13630_v12  ;;  %v13873_v23 = vmul.f32 %v17470_v28, %v13636_v47 }
 0x4d8   :  { %17483 = vst [vmem:[#allocation46_spill] sm:$0xff] %v13823_v29  ;;  %v13877_v15 = vmul.f32 %v17470_v28, %v13642_v4  ;;  %v5309_v5 = vmul.f32 %v17470_v28, %v13648_v8  ;;  %v5310_v19 = vmul.f32 %v17470_v28, %v17485_v46  ;;  %v13885_v20 = vmul.f32 %v17470_v28, %v17486_v58 }
 0x4d9   :  { %v13889_v12 = vmul.f32 %v17470_v28, %v17487_v13  ;;  %v5313_v47 = vmul.f32 %v17470_v28, %v5243_v45  ;;  %v5314_v29 = vmul.f32 %v17470_v28, %v5244_v14  ;;  %v13894_v4 = vmul.f32 %v17470_v28, %v5245_v52  ;;  %v17494_v45 = vld [vmem:[#allocation14_spill] sm:$0xff] }
 0x4da   :  { %v13897_v8 = vmul.f32 %v17470_v28, %v5246_v56  ;;  %v13900_v46 = vmul.f32 %v17470_v28, %v5247_v59  ;;  %v13905_v58 = vmul.f32 %v17470_v28, %v5248_v18  ;;  %v13908_v13 = vmul.f32 %v17470_v28, %v5249_v22  ;;  %v17498_v22 = vld [vmem:[#allocation68_spill] sm:$0xff] }
 0x4db   :  { %17488 = vst [vmem:[#allocation48_spill] sm:$0xff] %v13894_v4  ;;  %v5321_v14 = vmul.f32 %v17470_v28, %v17494_v45  ;;  %v5322_v52 = vmul.f32 %v17470_v28, %v17495_v32  ;;  %v17496_v4 = vld [vmem:[#allocation72_spill] sm:$0xff] }
 0x4dc   :  { %17489 = vst [vmem:[#allocation51_spill] sm:$0xff] %v13897_v8  ;;  %17490 = vst [vmem:[#allocation50_spill] sm:$0xff] %v13900_v46  ;;  %v5363_v56 = vadd.f32 %v17496_v4, %v5293_v48  ;;  %v5364_v8 = vadd.f32 %v17496_v4, %v5294_v16  ;;  %v5361_v59 = vadd.f32 %v17496_v4, %v5291_v7  ;;  %v17497_v46 = vld [vmem:[#allocation67_spill] sm:$0xff] }
 0x4dd   :  { %17492 = vst [vmem:[#allocation52_spill] sm:$0xff] %v13905_v58  ;;  %17493 = vst [vmem:[#allocation59_spill] sm:$0xff] %v13908_v13  ;;  %v5362_v11 = vadd.f32 %v17496_v4, %v5292_v34  ;;  %v13920_v18 = vmul.f32 %v17470_v28, %v17497_v46  ;;  %v13924_v13 = vmul.f32 %v17470_v28, %v17498_v22  ;;  %v13944_v46 = vpop.f32.mrf.mxu1 }
 0x4de   :  { %v13927_v45 = vadd.f32 %v17496_v4, %v5297_v43  ;;  %v13930_v32 = vadd.f32 %v17496_v4, %v5298_v44  ;;  %v13933_v48 = vadd.f32 %v17496_v4, %v5301_v51  ;;  %v13936_v7 = vadd.f32 %v17496_v4, %v5302_v24  ;;  %17499 = vst [vmem:[#allocation63_spill] sm:$0xff] %v13944_v46 }
 0x4df   :  { %v13939_v34 = vadd.f32 %v17496_v4, %v5305_v36  ;;  %v13942_v16 = vadd.f32 %v17496_v4, %v5306_v26  ;;  %v13947_v43 = vadd.f32 %v17496_v4, %v5309_v5  ;;  %v13950_v44 = vadd.f32 %v17496_v4, %v5310_v19 }
 0x4e0   :  { %v13953_v51 = vadd.f32 %v17496_v4, %v5313_v47  ;;  %v13956_v24 = vadd.f32 %v17496_v4, %v5314_v29  ;;  %v5425_v22 = vmax.f32 %v5361_v59, 0.0  ;;  %v5426_v36 = vmax.f32 %v5362_v11, 0.0 }
 0x4e1   :  { %v5427_v58 = vmax.f32 %v5363_v56, 0.0  ;;  %v5428_v28 = vmax.f32 %v5364_v8, 0.0  ;;  %v5391_v26 = vadd.f32 %v17496_v4, %v5321_v14  ;;  %v5392_v46 = vadd.f32 %v17496_v4, %v5322_v52  ;;  %v13984_v8 = vpop.f32.mrf.mxu1 }
 0x4e2   :  { %v13962_v5 = vadd.f32 %v17496_v4, %v13693_v38  ;;  %v13966_v19 = vadd.f32 %v17496_v4, %v13697_v27  ;;  %v13970_v29 = vadd.f32 %v17496_v4, %v13709_v30  ;;  %v13974_v11 = vadd.f32 %v17496_v4, %v13713_v17  ;;  %17500 = vst [vmem:[#allocation53_spill] sm:$0xff] %v13984_v8 }
 0x4e3   :  { %v13978_v47 = vadd.f32 %v17496_v4, %v13725_v0  ;;  %v13982_v38 = vadd.f32 %v17496_v4, %v13729_v31  ;;  %v13988_v27 = vadd.f32 %v17496_v4, %v13743_v54  ;;  %v13992_v30 = vadd.f32 %v17496_v4, %v13747_v3 }
 0x4e4   :  { %v13996_v17 = vadd.f32 %v17496_v4, %v13759_v50  ;;  %v14000_v0 = vadd.f32 %v17496_v4, %v13763_v40  ;;  %v5493_v31 = vpack.c.bf16 %v5426_v36, %v5425_v22  ;;  %v5494_v14 = vpack.c.bf16 %v5428_v28, %v5427_v58 }
 0x4e5   :  { %v5365_v52 = vadd.f32 %v17496_v4, %v13835_v61  ;;  %v5366_v54 = vadd.f32 %v17496_v4, %v13839_v62  ;;  %v14008_v3 = vadd.f32 %v17496_v4, %v13775_v60  ;;  %v14012_v50 = vadd.f32 %v17496_v4, %v13779_v53  ;;  %v14027_v53 = vpop.f32.mrf.mxu1 }
 0x4e6   :  { %v14016_v40 = vadd.f32 %v17496_v4, %v13791_v39  ;;  %v14020_v28 = vadd.f32 %v17496_v4, %v13795_v35  ;;  %7857 = vmatprep.mubr.msk.bf16.mxu0 %vm562_vm1, %v5493_v31  ;;  %v5369_v60 = vadd.f32 %v17496_v4, %v13847_v1  ;;  %v5370_v58 = vadd.f32 %v17496_v4, %v13851_v41  ;;  %v17502_v31 = vld [vmem:[#allocation8_spill] sm:$0xff] }
 0x4e7   :  { %v5429_v61 = vmax.f32 %v5365_v52, 0.0  ;;  %v5430_v62 = vmax.f32 %v5366_v54, 0.0  ;;  %v14031_v39 = vadd.f32 %v17496_v4, %v13817_v10  ;;  %v5431_v56 = vmax.f32 %v13927_v45, 0.0  ;;  %7858 = vmatmul.mubr.msk.bf16.vlgmr.msra.gmra.mxu0 %vm562_vm1, %v5494_v14  ;;  %v17503_v10 = vld [vmem:[#allocation76_spill] sm:$0xff] }
 0x4e8   :  { %v5432_v35 = vmax.f32 %v13930_v32, 0.0  ;;  %v5435_v59 = vmax.f32 %v13933_v48, 0.0  ;;  %v5436_v22 = vmax.f32 %v13936_v7, 0.0  ;;  %v5455_v52 = vmax.f32 %v5391_v26, 0.0  ;;  %v14045_v7 = vpop.f32.mrf.mxu1 }
 0x4e9   :  { %v5495_v36 = vpack.c.bf16 %v5430_v62, %v5429_v61  ;;  %v5456_v54 = vmax.f32 %v5392_v46, 0.0  ;;  %v5459_v45 = vmax.f32 %v13962_v5, 0.0  ;;  %v5460_v32 = vmax.f32 %v13966_v19, 0.0  ;;  %17501 = vst [vmem:[#allocation54_spill] sm:$0xff] %v14045_v7 }
 0x4ea   :  { %v5433_v48 = vmax.f32 %v5369_v60, 0.0  ;;  %v5434_v14 = vmax.f32 %v5370_v58, 0.0  ;;  %v5463_v1 = vmax.f32 %v13970_v29, 0.0  ;;  %v5464_v61 = vmax.f32 %v13974_v11, 0.0  ;;  %v17505_v60 = vld [vmem:[#allocation75_spill] sm:$0xff]  ;;  %v17506_v11 = vld [vmem:[#allocation10_spill] sm:$0xff]  ;;  %v14066_v19 = vpop.f32.mrf.mxu1 }
 0x4eb   :  { %7861 = vmatprep.mubr.msk.bf16.mxu0 %vm562_vm1, %v5495_v36  ;;  %v5467_v62 = vmax.f32 %v13978_v47, 0.0  ;;  %v6864_v26 = vadd.f32 %v17503_v10, %v17502_v31  ;;  %v5468_v46 = vmax.f32 %v13982_v38, 0.0  ;;  %v17504_v36 = vld [vmem:[#allocation30_spill] sm:$0xff]  ;;  %v5496_v7 = vpack.c.bf16 %v5432_v35, %v5431_v56  ;;  %v17507_v38 = vld [vmem:[#allocation27_spill] sm:$0xff] }
 0x4ec   :  { %v6732_v58 = vadd.f32 %v17505_v60, %v17504_v36  ;;  %v5373_v29 = vadd.f32 %v17496_v4, %v13861_v2  ;;  %v5497_v8 = vpack.c.bf16 %v5434_v14, %v5433_v48  ;;  %v5374_v31 = vadd.f32 %v17496_v4, %v13865_v63  ;;  %v17508_v56 = vld [vmem:[#allocation7_spill] sm:$0xff]  ;;  %v17509_v63 = vld [vmem:[#allocation29_spill] sm:$0xff] }
 0x4ed   :  { %v6865_v47 = vadd.f32 %v6864_v26, %v17506_v11  ;;  %v14064_v5 = vpack.c.bf16 %v5456_v54, %v5455_v52  ;;  %v5393_v35 = vadd.f32 %v17496_v4, %v13920_v18  ;;  %v5394_v54 = vadd.f32 %v17496_v4, %v13924_v13  ;;  %v17511_v18 = vld [vmem:[#allocation32_spill] sm:$0xff] }
 0x4ee   :  { %v6733_v10 = vadd.f32 %v17507_v38, %v6732_v58  ;;  %v14079_v14 = vpack.c.bf16 %v5460_v32, %v5459_v45  ;;  %v5437_v26 = vmax.f32 %v5373_v29, 0.0  ;;  %v17510_v58 = vld [vmem:[#allocation9_spill] sm:$0xff]  ;;  %v5483_v13 = vmax.f32 %v14016_v40, 0.0 }
 0x4ef   :  { %7862 = vmatmul.mubr.msk.bf16.gmra.mxu0 %vm562_vm1, %v5496_v7  ;;  %v6866_v2 = vadd.f32 %v6865_v47, %v17508_v56  ;;  %v5457_v7 = vmax.f32 %v5393_v35, 0.0  ;;  %v5397_v47 = vadd.f32 %v17496_v4, %v13701_v49  ;;  %v5438_v56 = vmax.f32 %v5374_v31, 0.0  ;;  %v17512_v32 = vld [vmem:[#allocation13_spill] sm:$0xff]  ;;  %v17513_v35 = vld [vmem:[#allocation34_spill] sm:$0xff] }
 0x4f0   :  { %7865 = vmatprep.mubr.msk.bf16.mxu0 %vm562_vm1, %v5497_v8  ;;  %v6734_v52 = vadd.f32 %v17509_v63, %v6733_v10  ;;  %v5458_v48 = vmax.f32 %v5394_v54, 0.0  ;;  %v5398_v8 = vadd.f32 %v17496_v4, %v13705_v57  ;;  %v14087_v10 = vpop.f32.mrf.mxu1  ;;  %v5498_v45 = vpack.c.bf16 %v5436_v22, %v5435_v59  ;;  %v17514_v57 = vld [vmem:[#allocation17_spill] sm:$0xff] }
 0x4f1   :  { %v6867_v11 = vadd.f32 %v6866_v2, %v17510_v58  ;;  %v5461_v60 = vmax.f32 %v5397_v47, 0.0  ;;  %v5377_v2 = vadd.f32 %v17496_v4, %v13873_v23  ;;  %v5378_v54 = vadd.f32 %v17496_v4, %v13877_v15 }
 0x4f2   :  { %v6735_v41 = vadd.f32 %v6734_v52, %v17511_v18  ;;  %v14094_v31 = vpack.c.bf16 %v5458_v48, %v5457_v7  ;;  %v5462_v52 = vmax.f32 %v5398_v8, 0.0  ;;  %v14099_v18 = vpack.c.bf16 %v5464_v61, %v5463_v1  ;;  %v17516_v1 = vld [vmem:[#allocation12_spill] sm:$0xff] }
 0x4f3   :  { %v6868_v29 = vadd.f32 %v6867_v11, %v17512_v32  ;;  %v5401_v59 = vadd.f32 %v17496_v4, %v13717_v6  ;;  %v5499_v22 = vpack.c.bf16 %v5438_v56, %v5437_v26  ;;  %v17515_v11 = vld [vmem:[#allocation31_spill] sm:$0xff]  ;;  %v5402_v23 = vadd.f32 %v17496_v4, %v13721_v42  ;;  %v17519_v56 = vld [vmem:[#allocation33_spill] sm:$0xff] }
 0x4f4   :  { %v6736_v49 = vadd.f32 %v6735_v41, %v17513_v35  ;;  %v14104_v32 = vpack.c.bf16 %v5462_v52, %v5461_v60  ;;  %v14108_v41 = vpop.f32.mrf.mxu1  ;;  %v17517_v6 = vmax.f32 %v13939_v34, 0.0  ;;  %v17518_v60 = vmax.f32 %v13942_v16, 0.0  ;;  %v17522_v16 = vld [vmem:[#allocation36_spill] sm:$0xff] }
 0x4f5   :  { %v6869_v58 = vadd.f32 %v6868_v29, %v17514_v57  ;;  %v5465_v7 = vmax.f32 %v5401_v59, 0.0  ;;  %v5466_v8 = vmax.f32 %v5402_v23, 0.0  ;;  %v14120_v29 = vpack.c.bf16 %v5468_v46, %v5467_v62  ;;  %v17521_v57 = vld [vmem:[#allocation62_spill] sm:$0xff]  ;;  %v17523_v62 = vld [vmem:[#allocation77_spill] sm:$0xff] }
 0x4f6   :  { %v6737_v47 = vadd.f32 %v17515_v11, %v6736_v49  ;;  %v5500_v26 = vpack.c.bf16 %v17518_v60, %v17517_v6  ;;  %v17520_v49 = vld [vmem:[#allocation16_spill] sm:$0xff]  ;;  %v5406_v59 = vadd.f32 %v17496_v4, %v13739_v55  ;;  %v5441_v34 = vmax.f32 %v5377_v2, 0.0 }
 0x4f7   :  { %7866 = vmatmul.mubr.msk.bf16.gmra.mxu0 %vm562_vm1, %v5498_v45  ;;  %v6870_v61 = vadd.f32 %v6869_v58, %v17516_v1  ;;  %v6810_v45 = vmul.f32 %v17521_v57, %v17521_v57  ;;  %v5405_v58 = vadd.f32 %v17496_v4, %v13733_v21  ;;  %v14130_v6 = vpack.c.bf16 %v5466_v8, %v5465_v7 }
 0x4f8   :  { %7869 = vmatprep.mubr.msk.bf16.mxu0 %vm562_vm1, %v5499_v22  ;;  %v6738_v42 = vadd.f32 %v17519_v56, %v6737_v47  ;;  %v5442_v22 = vmax.f32 %v5378_v54, 0.0  ;;  %v14132_v47 = vpop.f32.mrf.mxu1  ;;  %v17524_v60 = vmax.f32 %v13988_v27, 0.0  ;;  %v5381_v55 = vadd.f32 %v17496_v4, %v13885_v20 }
 0x4f9   :  { %v6871_v52 = vadd.f32 %v6870_v61, %v17520_v49  ;;  %v5469_v23 = vmax.f32 %v5405_v58, 0.0  ;;  %v5470_v61 = vmax.f32 %v5406_v59, 0.0  ;;  %v17525_v49 = vmax.f32 %v13992_v30, 0.0  ;;  %v17528_v59 = vld [vmem:[#allocation35_spill] sm:$0xff] }
 0x4fa   :  { %v6739_v1 = vadd.f32 %v6738_v42, %v17522_v16  ;;  %v5409_v54 = vadd.f32 %v17496_v4, %v13751_v25  ;;  %v5410_v7 = vadd.f32 %v17496_v4, %v13755_v33  ;;  %v17526_v42 = vmax.f32 %v13947_v43, 0.0  ;;  %v14157_v25 = vpop.f32.mrf.mxu1  ;;  %v17529_v33 = vld [vmem:[#allocation73_spill] sm:$0xff] }
 0x4fb   :  { %v6872_v46 = vadd.f32 %v6871_v52, %v17523_v62  ;;  %v14139_v21 = vpack.c.bf16 %v17525_v49, %v17524_v60  ;;  %v17527_v8 = vmax.f32 %v13950_v44, 0.0  ;;  %v5382_v30 = vadd.f32 %v17496_v4, %v13889_v12  ;;  %v17530_v49 = vld [vmem:[#allocation6_spill] sm:$0xff] }
 0x4fc   :  { %v6740_v2 = vadd.f32 %v6739_v1, %v17521_v57  ;;  %v14154_v58 = vpack.c.bf16 %v5470_v61, %v5469_v23  ;;  %v5501_v20 = vpack.c.bf16 %v5442_v22, %v5441_v34  ;;  %v5473_v62 = vmax.f32 %v5409_v54, 0.0  ;;  %v17535_v54 = vld [vmem:[#allocation78_spill] sm:$0xff] }
 0x4fd   :  { %v5502_v27 = vpack.c.bf16 %v17527_v8, %v17526_v42  ;;  %v6873_v52 = vadd.f32 %v6872_v46, %v6810_v45  ;;  %v5474_v60 = vmax.f32 %v5410_v7, 0.0  ;;  %v6813_v44 = vmul.f32 %v17530_v49, %v17530_v49  ;;  %v17533_v46 = vld [vmem:[#allocation37_spill] sm:$0xff]  ;;  %v17536_v7 = vld [vmem:[#allocation18_spill] sm:$0xff] }
 0x4fe   :  { %v6741_v1 = vadd.f32 %v17528_v59, %v6740_v2  ;;  %v17531_v42 = vmax.f32 %v13996_v17, 0.0  ;;  %v17532_v12 = vmax.f32 %v14000_v0, 0.0  ;;  %v5413_v34 = vadd.f32 %v17496_v4, %v13767_v9  ;;  %v17534_v2 = vld [vmem:[#allocation48_spill] sm:$0xff] }
 0x4ff   :  { %7870 = vmatmul.mubr.msk.bf16.gmra.mxu0 %vm562_vm1, %v5500_v26  ;;  %v6874_v43 = vadd.f32 %v6873_v52, %v17529_v33  ;;  %v5445_v22 = vmax.f32 %v5381_v55, 0.0  ;;  %v14173_v26 = vpack.c.bf16 %v5474_v60, %v5473_v62  ;;  %v5414_v61 = vadd.f32 %v17496_v4, %v13771_v37  ;;  %v14189_v37 = vpop.f32.mrf.mxu1  ;;  %v17539_v33 = vld [vmem:[#allocation65_spill] sm:$0xff] }
 0x500   :  { %v14167_v45 = vpack.c.bf16 %v17532_v12, %v17531_v42  ;;  %7873 = vmatprep.mubr.msk.bf16.mxu0 %vm562_vm1, %v5501_v20  ;;  %v6742_v23 = vadd.f32 %v17533_v46, %v6741_v1  ;;  %v5385_v17 = vadd.f32 %v17496_v4, %v17534_v2  ;;  %v6814_v8 = vmul.f32 %v17536_v7, %v17536_v7  ;;  %v17540_v12 = vld [vmem:[#allocation40_spill] sm:$0xff] }
 0x501   :  { %v6875_v0 = vadd.f32 %v6874_v43, %v17535_v54  ;;  %v5477_v52 = vmax.f32 %v5413_v34, 0.0  ;;  %v5446_v9 = vmax.f32 %v5382_v30, 0.0  ;;  %v5478_v55 = vmax.f32 %v5414_v61, 0.0  ;;  %v17541_v34 = vld [vmem:[#allocation42_spill] sm:$0xff]  ;;  %v17546_v46 = vld [vmem:[#allocation44_spill] sm:$0xff] }
 0x502   :  { %v6743_v20 = vadd.f32 %v6742_v23, %v17530_v49  ;;  %v17537_v1 = vmax.f32 %v14008_v3, 0.0  ;;  %v17538_v62 = vmax.f32 %v14012_v50, 0.0  ;;  %v6815_v42 = vmul.f32 %v17539_v33, %v17539_v33  ;;  %v17542_v23 = vld [vmem:[#allocation51_spill] sm:$0xff] }
 0x503   :  { %v6876_v43 = vadd.f32 %v6875_v0, %v6813_v44  ;;  %v5417_v2 = vadd.f32 %v17496_v4, %v17540_v12  ;;  %v5418_v30 = vadd.f32 %v17496_v4, %v17541_v34  ;;  %v5386_v61 = vadd.f32 %v17496_v4, %v17542_v23  ;;  %v17543_v3 = vld [vmem:[#allocation11_spill] sm:$0xff] }
 0x504   :  { %v14187_v60 = vpack.c.bf16 %v17538_v62, %v17537_v1  ;;  %v6816_v50 = vmul.f32 %v17543_v3, %v17543_v3  ;;  %v6744_v54 = vadd.f32 %v6743_v20, %v17536_v7  ;;  %v14202_v1 = vpack.c.bf16 %v5478_v55, %v5477_v52  ;;  %v17545_v23 = vld [vmem:[#allocation47_spill] sm:$0xff]  ;;  %v14215_v52 = vpop.f32.mrf.mxu1  ;;  %v17548_v55 = vld [vmem:[#allocation60_spill] sm:$0xff] }
 0x505   :  { %v6877_v62 = vadd.f32 %v6876_v43, %v6814_v8  ;;  %v5481_v15 = vmax.f32 %v5417_v2, 0.0  ;;  %v5482_v48 = vmax.f32 %v5418_v30, 0.0  ;;  %v17544_v44 = vmax.f32 %v14020_v28, 0.0  ;;  %v17547_v8 = vld [vmem:[#allocation46_spill] sm:$0xff] }
 0x506   :  { %v5503_v12 = vpack.c.bf16 %v5446_v9, %v5445_v22  ;;  %v6745_v34 = vadd.f32 %v17539_v33, %v6744_v54  ;;  %v5421_v49 = vadd.f32 %v17496_v4, %v17545_v23  ;;  %v5422_v20 = vadd.f32 %v17496_v4, %v17546_v46  ;;  %v17549_v28 = vld [vmem:[#allocation70_spill] sm:$0xff] }
 0x507   :  { %v14208_v0 = vpack.c.bf16 %v17544_v44, %v5483_v13  ;;  %v5320_v43 = vmul.f32 %v17548_v55, %v17547_v8  ;;  %7874 = vmatmul.mubr.msk.bf16.gmra.mxu0 %vm562_vm1, %v5502_v27  ;;  %v6878_v40 = vadd.f32 %v6877_v62, %v6815_v42  ;;  %v6817_v13 = vmul.f32 %v17549_v28, %v17549_v28  ;;  %v17550_v23 = vld [vmem:[#allocation74_spill] sm:$0xff]  ;;  %v17552_v62 = vld [vmem:[#allocation80_spill] sm:$0xff] }
 0x508   :  { %v14222_v22 = vpack.c.bf16 %v5482_v48, %v5481_v15  ;;  %v5447_v9 = vmax.f32 %v13953_v51, 0.0  ;;  %7877 = vmatprep.mubr.msk.bf16.mxu0 %vm562_vm1, %v5503_v12  ;;  %v6746_v2 = vadd.f32 %v17543_v3, %v6745_v34  ;;  %v5485_v46 = vmax.f32 %v5421_v49, 0.0  ;;  %v14239_v49 = vpop.f32.mrf.mxu1  ;;  %v17554_v34 = vld [vmem:[#allocation69_spill] sm:$0xff] }
 0x509   :  { %v5486_v30 = vmax.f32 %v5422_v20, 0.0  ;;  %v5448_v54 = vmax.f32 %v13956_v24, 0.0  ;;  %v6879_v44 = vadd.f32 %v6878_v40, %v6816_v50  ;;  %v6818_v27 = vmul.f32 %v17550_v23, %v17550_v23  ;;  %v17555_v20 = vld [vmem:[#allocation50_spill] sm:$0xff] }
 0x50a   :  { %v17551_v42 = vmax.f32 %v14031_v39, 0.0  ;;  %v17553_v8 = vmax.f32 %v17552_v62, 0.0  ;;  %v5449_v15 = vmax.f32 %v5385_v17, 0.0  ;;  %v5450_v51 = vmax.f32 %v5386_v61, 0.0  ;;  %v17556_v62 = vld [vmem:[#allocation52_spill] sm:$0xff]  ;;  %v17557_v61 = vld [vmem:[#allocation71_spill] sm:$0xff] }
 0x50b   :  { %v6747_v12 = vadd.f32 %v6746_v2, %v17549_v28  ;;  %v14237_v55 = vpack.c.bf16 %v5486_v30, %v5485_v46  ;;  %v6819_v24 = vmul.f32 %v17554_v34, %v17554_v34  ;;  %v6880_v50 = vadd.f32 %v6879_v44, %v6817_v13  ;;  %v14254_v44 = vpop.f32.mrf.mxu1 }
 0x50c   :  { %v14234_v48 = vpack.c.bf16 %v17553_v8, %v17551_v42  ;;  %v5387_v40 = vadd.f32 %v17496_v4, %v17555_v20  ;;  %v5388_v42 = vadd.f32 %v17496_v4, %v17556_v62  ;;  %v5504_v17 = vpack.c.bf16 %v5448_v54, %v5447_v9  ;;  %v17558_v8 = vld [vmem:[#allocation59_spill] sm:$0xff]  ;;  %v17559_v20 = vld [vmem:[#allocation64_spill] sm:$0xff] }
 0x50d   :  { %v6748_v39 = vadd.f32 %v6747_v12, %v17550_v23  ;;  %v6820_v2 = vmul.f32 %v17557_v61, %v17557_v61  ;;  %v6881_v46 = vadd.f32 %v6880_v50, %v6818_v27  ;;  %v5505_v30 = vpack.c.bf16 %v5450_v51, %v5449_v15  ;;  %v17560_v50 = vld [vmem:[#allocation45_spill] sm:$0xff] }
 0x50e   :  { %v5389_v28 = vadd.f32 %v17496_v4, %v17558_v8  ;;  %v5390_v3 = vadd.f32 %v17496_v4, %v5320_v43  ;;  %v6821_v9 = vmul.f32 %v17559_v20, %v17559_v20  ;;  %v5451_v27 = vmax.f32 %v5387_v40, 0.0  ;;  %v14264_v8 = vpop.f32.mrf.mxu1 }
 0x50f   :  { %v6749_v13 = vadd.f32 %v17554_v34, %v6748_v39  ;;  %7878 = vmatmul.mubr.msk.bf16.gmra.mxu0 %vm562_vm1, %v5504_v17  ;;  %v6882_v12 = vadd.f32 %v6881_v46, %v6819_v24  ;;  %v5452_v15 = vmax.f32 %v5388_v42, 0.0  ;;  %v6822_v4 = vmul.f32 %v17560_v50, %v17560_v50  ;;  %v17561_v24 = vld [vmem:[#allocation79_spill] sm:$0xff] }
 0x510   :  { %7881 = vmatprep.mubr.msk.bf16.mxu0 %vm562_vm1, %v5505_v30  ;;  %v5453_v43 = vmax.f32 %v5389_v28, 0.0  ;;  %v5454_v39 = vmax.f32 %v5390_v3, 0.0  ;;  %v6823_v17 = vmul.f32 %v17561_v24, %v17561_v24  ;;  %v14272_v28 = vpop.f32.mrf.mxu1 }
 0x511   :  { %v6750_v54 = vadd.f32 %v17557_v61, %v6749_v13  ;;  %v6883_v51 = vadd.f32 %v6882_v12, %v6820_v2  ;;  %v5506_v34 = vpack.c.bf16 %v5452_v15, %v5451_v27  ;;  %v17562_v13 = vld [vmem:[#allocation43_spill] sm:$0xff]  ;;  %17563 = vst [vmem:[#allocation57_spill] sm:$0xff] %v14272_v28 }
 0x512   :  { %v6824_v40 = vmul.f32 %v17562_v13, %v17562_v13  ;;  %v5507_v2 = vpack.c.bf16 %v5454_v39, %v5453_v43  ;;  %v17565_v15 = vld [vmem:[#allocation63_spill] sm:$0xff]  ;;  %v14282_v43 = vpop.f32.mrf.mxu1  ;;  %v17566_v39 = vld [vmem:[#allocation38_spill] sm:$0xff] }
 0x513   :  { %v6751_v62 = vadd.f32 %v6750_v54, %v17559_v20  ;;  %v6884_v46 = vadd.f32 %v6883_v51, %v6821_v9  ;;  %v17564_v54 = vld [vmem:[#allocation49_spill] sm:$0xff]  ;;  %v6826_v51 = vmul.f32 %v17565_v15, %v17565_v15 }
 0x514   :  { %v6825_v20 = vmul.f32 %v17564_v54, %v17564_v54 }
 0x515   :  { %v6752_v30 = vadd.f32 %v6751_v62, %v17560_v50  ;;  %v6885_v42 = vadd.f32 %v6884_v46, %v6822_v4  ;;  %v6827_v62 = vmul.f32 %v17566_v39, %v17566_v39  ;;  %v17567_v46 = vld [vmem:[#allocation55_spill] sm:$0xff] }
 0x517   :  { %v6753_v12 = vadd.f32 %v17561_v24, %v6752_v30  ;;  %7882 = vmatmul.mubr.msk.bf16.gmra.mxu0 %vm562_vm1, %v5506_v34  ;;  %v6886_v3 = vadd.f32 %v6885_v42, %v6823_v17  ;;  %v6828_v30 = vmul.f32 %v17567_v46, %v17567_v46 }
 0x518   :  { %7885 = vmatprep.mubr.msk.bf16.mxu0 %vm562_vm1, %v5507_v2 }
 0x519   :  { %v6754_v9 = vadd.f32 %v17562_v13, %v6753_v12  ;;  %v6887_v27 = vadd.f32 %v6886_v3, %v6824_v40  ;;  %v14290_v40 = vpop.f32.mrf.mxu1  ;;  %v6829_v3 = vmul.f32 %v14027_v53, %v14027_v53 }
 0x51b   :  { %v6755_v4 = vadd.f32 %v6754_v9, %v17564_v54  ;;  %v6888_v34 = vadd.f32 %v6887_v27, %v6825_v20  ;;  %v6830_v27 = vmul.f32 %v14066_v19, %v14066_v19 }
 0x51d   :  { %v6756_v17 = vadd.f32 %v6755_v4, %v17565_v15  ;;  %v6889_v42 = vadd.f32 %v6888_v34, %v6826_v51  ;;  %v14302_v4 = vpop.f32.mrf.mxu1  ;;  %v17568_v34 = vld [vmem:[#allocation53_spill] sm:$0xff] }
 0x51f   :  { %v6757_v2 = vadd.f32 %v17566_v39, %v6756_v17  ;;  %7886 = vmatmul.mubr.msk.bf16.gmra.mxu0 %vm562_vm1, %v14064_v5  ;;  %v6890_v12 = vadd.f32 %v6889_v42, %v6827_v62  ;;  %v6831_v5 = vmul.f32 %v17568_v34, %v17568_v34  ;;  %v17569_v42 = vld [vmem:[#allocation54_spill] sm:$0xff] }
 0x520   :  { %7889 = vmatprep.mubr.msk.bf16.mxu0 %vm562_vm1, %v14094_v31  ;;  %v6832_v39 = vmul.f32 %v17569_v42, %v17569_v42 }
 0x521   :  { %v6758_v20 = vadd.f32 %v17567_v46, %v6757_v2  ;;  %v6891_v9 = vadd.f32 %v6890_v12, %v6828_v30  ;;  %v14310_v30 = vpop.f32.mrf.mxu1 }
 0x523   :  { %v6759_v51 = vadd.f32 %v6758_v20, %v14027_v53  ;;  %v6892_v62 = vadd.f32 %v6891_v9, %v6829_v3  ;;  %v6833_v20 = vmul.f32 %v14108_v41, %v14108_v41 }
 0x525   :  { %v6760_v17 = vadd.f32 %v6759_v51, %v14066_v19  ;;  %v6893_v31 = vadd.f32 %v6892_v62, %v6830_v27  ;;  %v6834_v27 = vmul.f32 %v14157_v25, %v14157_v25  ;;  %v14322_v62 = vpop.f32.mrf.mxu1 }
 0x526   :  { %17570 = vst [vmem:[#allocation56_spill] sm:$0xff] %v14322_v62 }
 0x527   :  { %v6761_v2 = vadd.f32 %v17568_v34, %v6760_v17  ;;  %7890 = vmatmul.mubr.msk.bf16.gmra.mxu0 %vm562_vm1, %v14079_v14  ;;  %v6894_v12 = vadd.f32 %v6893_v31, %v6831_v5  ;;  %v6835_v14 = vmul.f32 %v14087_v10, %v14087_v10  ;;  %v6836_v31 = vmul.f32 %v14132_v47, %v14132_v47 }
 0x528   :  { %7893 = vmatprep.mubr.msk.bf16.mxu0 %vm562_vm1, %v14104_v32 }
 0x529   :  { %v6762_v3 = vadd.f32 %v17569_v42, %v6761_v2  ;;  %v6895_v9 = vadd.f32 %v6894_v12, %v6832_v39  ;;  %v14330_v39 = vpop.f32.mrf.mxu1 }
 0x52b   :  { %v6763_v51 = vadd.f32 %v6762_v3, %v14108_v41  ;;  %v6896_v5 = vadd.f32 %v6895_v9, %v6833_v20  ;;  %v6837_v3 = vmul.f32 %v14215_v52, %v14215_v52 }
 0x52d   :  { %v6764_v17 = vadd.f32 %v6763_v51, %v14157_v25  ;;  %v6897_v32 = vadd.f32 %v6896_v5, %v6834_v27  ;;  %v6838_v27 = vmul.f32 %v14254_v44, %v14254_v44  ;;  %v14342_v5 = vpop.f32.mrf.mxu1 }
 0x52f   :  { %v6765_v2 = vadd.f32 %v14087_v10, %v6764_v17  ;;  %7894 = vmatmul.mubr.msk.bf16.gmra.mxu0 %vm562_vm1, %v14099_v18  ;;  %v6898_v12 = vadd.f32 %v6897_v32, %v6835_v14  ;;  %v6839_v18 = vmul.f32 %v14189_v37, %v14189_v37  ;;  %v6840_v32 = vmul.f32 %v14239_v49, %v14239_v49 }
 0x530   :  { %7897 = vmatprep.mubr.msk.bf16.mxu0 %vm562_vm1, %v14130_v6 }
 0x531   :  { %v6766_v20 = vadd.f32 %v14132_v47, %v6765_v2  ;;  %v6899_v9 = vadd.f32 %v6898_v12, %v6836_v31  ;;  %v14350_v31 = vpop.f32.mrf.mxu1 }
 0x533   :  { %v6767_v51 = vadd.f32 %v6766_v20, %v14215_v52  ;;  %v6900_v14 = vadd.f32 %v6899_v9, %v6837_v3  ;;  %v6841_v20 = vmul.f32 %v14272_v28, %v14272_v28 }
 0x535   :  { %v6768_v17 = vadd.f32 %v6767_v51, %v14254_v44  ;;  %v6901_v6 = vadd.f32 %v6900_v14, %v6838_v27  ;;  %v6842_v27 = vmul.f32 %v14290_v40, %v14290_v40  ;;  %v14362_v14 = vpop.f32.mrf.mxu1 }
 0x537   :  { %v6769_v2 = vadd.f32 %v14189_v37, %v6768_v17  ;;  %7898 = vmatmul.mubr.msk.bf16.gmra.mxu0 %vm562_vm1, %v14120_v29  ;;  %v6902_v12 = vadd.f32 %v6901_v6, %v6839_v18  ;;  %v6843_v29 = vmul.f32 %v14264_v8, %v14264_v8  ;;  %v6844_v6 = vmul.f32 %v14282_v43, %v14282_v43 }
 0x538   :  { %7901 = vmatprep.mubr.msk.bf16.mxu0 %vm562_vm1, %v14154_v58 }
 0x539   :  { %v6770_v3 = vadd.f32 %v14239_v49, %v6769_v2  ;;  %v6903_v9 = vadd.f32 %v6902_v12, %v6840_v32  ;;  %v14370_v32 = vpop.f32.mrf.mxu1 }
 0x53b   :  { %v6771_v51 = vadd.f32 %v6770_v3, %v14272_v28  ;;  %v6904_v18 = vadd.f32 %v6903_v9, %v6841_v20  ;;  %v6845_v3 = vmul.f32 %v14310_v30, %v14310_v30 }
 0x53d   :  { %v6772_v17 = vadd.f32 %v6771_v51, %v14290_v40  ;;  %v6905_v58 = vadd.f32 %v6904_v18, %v6842_v27  ;;  %v6846_v27 = vmul.f32 %v14330_v39, %v14330_v39  ;;  %v14382_v18 = vpop.f32.mrf.mxu1 }
 0x53e   :  { %17571 = vst [vmem:[#allocation58_spill] sm:$0xff] %v14382_v18 }
 0x53f   :  { %v6773_v2 = vadd.f32 %v14264_v8, %v6772_v17  ;;  %7902 = vmatmul.mubr.msk.bf16.gmra.mxu0 %vm562_vm1, %v14139_v21  ;;  %v6906_v12 = vadd.f32 %v6905_v58, %v6843_v29  ;;  %v6847_v21 = vmul.f32 %v14302_v4, %v14302_v4  ;;  %v6848_v58 = vmul.f32 %v14322_v62, %v14322_v62 }
 0x540   :  { %7905 = vmatprep.mubr.msk.bf16.mxu0 %vm562_vm1, %v14173_v26 }
 0x541   :  { %v6774_v20 = vadd.f32 %v14282_v43, %v6773_v2  ;;  %v6907_v9 = vadd.f32 %v6906_v12, %v6844_v6  ;;  %v14390_v6 = vpop.f32.mrf.mxu1 }
 0x542   :  { %17572 = vst [vmem:[#allocation61_spill] sm:$0xff] %v14390_v6 }
 0x543   :  { %v6775_v51 = vadd.f32 %v6774_v20, %v14310_v30  ;;  %v6908_v29 = vadd.f32 %v6907_v9, %v6845_v3  ;;  %v6849_v20 = vmul.f32 %v14350_v31, %v14350_v31 }
 0x545   :  { %v6776_v17 = vadd.f32 %v6775_v51, %v14330_v39  ;;  %v6909_v26 = vadd.f32 %v6908_v29, %v6846_v27  ;;  %v6850_v27 = vmul.f32 %v14370_v32, %v14370_v32  ;;  %v14402_v29 = vpop.f32.mrf.mxu1 }
 0x547   :  { %v6777_v2 = vadd.f32 %v14302_v4, %v6776_v17  ;;  %7906 = vmatmul.mubr.msk.bf16.gmra.mxu0 %vm562_vm1, %v14167_v45  ;;  %v6910_v12 = vadd.f32 %v6909_v26, %v6847_v21  ;;  %v6851_v45 = vmul.f32 %v14342_v5, %v14342_v5  ;;  %v6852_v26 = vmul.f32 %v14362_v14, %v14362_v14 }
 0x548   :  { %7909 = vmatprep.mubr.msk.bf16.mxu0 %vm562_vm1, %v14202_v1 }
 0x549   :  { %v6778_v3 = vadd.f32 %v14322_v62, %v6777_v2  ;;  %v6911_v9 = vadd.f32 %v6910_v12, %v6848_v58  ;;  %v14410_v58 = vpop.f32.mrf.mxu1  ;;  %v17591_v7 = vld [vmem:[#allocation61_spill] sm:$0xff] }
 0x54a   :  { %17573 = vst [vmem:[#allocation41_spill] sm:$0xff] %v14410_v58 }
 0x54b   :  { %v6779_v51 = vadd.f32 %v6778_v3, %v14350_v31  ;;  %v6912_v21 = vadd.f32 %v6911_v9, %v6849_v20  ;;  %v6853_v3 = vmul.f32 %v14390_v6, %v14390_v6 }
 0x54d   :  { %v6780_v17 = vadd.f32 %v6779_v51, %v14370_v32  ;;  %v6913_v1 = vadd.f32 %v6912_v21, %v6850_v27  ;;  %v6854_v27 = vmul.f32 %v14410_v58, %v14410_v58  ;;  %v6855_v21 = vmul.f32 %v14382_v18, %v14382_v18 }
 0x54f   :  { %v6781_v2 = vadd.f32 %v14342_v5, %v6780_v17  ;;  %7910 = vmatmul.mubr.msk.bf16.gmra.mxu0 %vm562_vm1, %v14187_v60  ;;  %v6914_v12 = vadd.f32 %v6913_v1, %v6851_v45  ;;  %v6856_v45 = vmul.f32 %v14402_v29, %v14402_v29 }
 0x550   :  { %7913 = vmatprep.mubr.msk.bf16.mxu0 %vm562_vm1, %v14222_v22 }
 0x551   :  { %v6782_v20 = vadd.f32 %v14362_v14, %v6781_v2  ;;  %v6915_v9 = vadd.f32 %v6914_v12, %v6852_v26 }
 0x553   :  { %v6783_v51 = vadd.f32 %v6782_v20, %v14390_v6  ;;  %v6916_v17 = vadd.f32 %v6915_v9, %v6853_v3 }
 0x555   :  { %v6784_v60 = vadd.f32 %v6783_v51, %v14410_v58  ;;  %v6917_v1 = vadd.f32 %v6916_v17, %v6854_v27 }
 0x557   :  { %v6785_v22 = vadd.f32 %v14382_v18, %v6784_v60  ;;  %7914 = vmatmul.mubr.msk.bf16.gmra.mxu0 %vm562_vm1, %v14208_v0  ;;  %v6918_v26 = vadd.f32 %v6917_v1, %v6855_v21 }
 0x558   :  { %7917 = vmatprep.mubr.msk.bf16.mxu0 %vm562_vm1, %v14237_v55 }
 0x559   :  { %v6786_v2 = vadd.f32 %v14402_v29, %v6785_v22  ;;  %v6919_v12 = vadd.f32 %v6918_v26, %v6856_v45 }
 0x55b   :  { %v6787_v20 = vrot.slane %v6786_v2, 4  ;;  %v6920_v3 = vrot.slane %v6919_v12, 4 }
 0x55d   :  { %v6788_v9 = vadd.f32 %v6787_v20, %v6786_v2  ;;  %v6921_v51 = vadd.f32 %v6920_v3, %v6919_v12  ;;  %v17574_v12 = vld [vmem:[#allocation20_spill] sm:$0xff]  ;;  %v17576_v3 = vld [vmem:[#allocation19_spill] sm:$0xff]  ;;  %v17590_v20 = vld [vmem:[#allocation38_spill] sm:$0xff] }
 0x55f   :  { %v6789_v58 = vrot.slane %v6788_v9, 2  ;;  %7918 = vmatmul.mubr.msk.bf16.gmra.mxu0 %vm562_vm1, %v14234_v48  ;;  %v6922_v27 = vrot.slane %v6921_v51, 2  ;;  %v17575_v48 = vld [vmem:[#allocation22_spill] sm:$0xff] }
 0x561   :  { %v6790_v17 = vadd.f32 %v6789_v58, %v6788_v9  ;;  %v6923_v60 = vadd.f32 %v6922_v27, %v6921_v51  ;;  %v17578_v27 = vld [vmem:[#allocation24_spill] sm:$0xff]  ;;  %v17586_v9 = vld [vmem:[#allocation11_spill] sm:$0xff]  ;;  %v17587_v51 = vld [vmem:[#allocation70_spill] sm:$0xff] }
 0x562   :  { %v17588_v58 = vld [vmem:[#allocation69_spill] sm:$0xff] }
 0x563   :  { %v6791_v18 = vrot.slane %v6790_v17, 1  ;;  %v6924_v0 = vrot.slane %v6923_v60, 1 }
 0x565   :  { %v6792_v21 = vadd.f32 %v6791_v18, %v6790_v17  ;;  %v6925_v1 = vadd.f32 %v6924_v0, %v6923_v60  ;;  %v17577_v18 = vld [vmem:[#allocation21_spill] sm:$0xff]  ;;  %v17579_v60 = vld [vmem:[#allocation26_spill] sm:$0xff] }
 0x567   :  { %v14435_v6 = vmul.f32 0.001953125, %v6792_v21  ;;  %v6927_v55 = vmul.f32 0.001953125, %v6925_v1  ;;  %v17580_v21 = vld [vmem:[#allocation23_spill] sm:$0xff] }
 0x569   :  { %v6928_v45 = vmul.f32 %v14435_v6, %v14435_v6  ;;  %v6936_v0 = vsub.f32 %v17579_v60, %v14435_v6  ;;  %v6937_v1 = vsub.f32 %v17580_v21, %v14435_v6  ;;  %v17583_v60 = vld [vmem:[#allocation32_spill] sm:$0xff]  ;;  %v17585_v21 = vld [vmem:[#allocation6_spill] sm:$0xff]  ;;  %v17592_v61 = vsub.f32 %v17574_v12, %v14435_v6 }
 0x56a   :  { %v17594_v57 = vsub.f32 %v17576_v3, %v14435_v6  ;;  %v17596_v17 = vsub.f32 %v17577_v18, %v14435_v6 }
 0x56b   :  { %v6929_v22 = vsub.f32 %v6927_v55, %v6928_v45  ;;  %v17581_v55 = vld [vmem:[#allocation25_spill] sm:$0xff]  ;;  %v17589_v45 = vld [vmem:[#allocation64_spill] sm:$0xff] }
 0x56c   :  { %v17599_v18 = vsub.f32 %v17581_v55, %v14435_v6 }
 0x56d   :  { %v6930_v26 = vmax.f32 %v6929_v22, 0.0  ;;  %v17582_v22 = vld [vmem:[#allocation28_spill] sm:$0xff] }
 0x56f   :  { %v6995_v2 = vadd.f32 1e-05, %v6930_v26  ;;  %v17593_v26 = vsub.f32 %v17575_v48, %v14435_v6 }
 0x571   :  { %9025 = vrsqrt.f32 %v6995_v2 }
 0x57e   :  { %v14551_v28 = vpop.eup %9025 }
 0x57f   :  { %v14567_v62 = vmul.f32 %v14551_v28, %v17592_v61  ;;  %v14573_v16 = vmul.f32 %v14551_v28, %v17593_v26  ;;  %v14579_v2 = vmul.f32 %v14551_v28, %v17594_v57  ;;  %v14585_v12 = vmul.f32 %v14551_v28, %v17596_v17  ;;  %v17598_v57 = vld [vmem:[#allocation58_spill] sm:$0xff] }
 0x580   :  { %v17597_v61 = vsub.f32 %v17578_v27, %v14435_v6  ;;  %v14594_v26 = vmul.f32 %v14551_v28, %v6936_v0  ;;  %v14597_v3 = vmul.f32 %v14551_v28, %v6937_v1  ;;  %v14605_v17 = vmul.f32 %v14551_v28, %v17599_v18 }
 0x581   :  { %17595 = vst [vmem:[#allocation66_spill] sm:$0xff] %v14579_v2  ;;  %v6993_v2 = vsub.f32 %v17598_v57, %v14435_v6  ;;  %v17600_v27 = vsub.f32 %v17582_v22, %v14435_v6  ;;  %v17601_v0 = vsub.f32 %v17504_v36, %v14435_v6  ;;  %v17602_v57 = vsub.f32 %v17507_v38, %v14435_v6 }
 0x582   :  { %v14591_v48 = vmul.f32 %v14551_v28, %v17597_v61  ;;  %v17603_v18 = vsub.f32 %v17509_v63, %v14435_v6  ;;  %v17608_v63 = vsub.f32 %v17515_v11, %v14435_v6 }
 0x583   :  { %v14611_v61 = vmul.f32 %v14551_v28, %v17600_v27  ;;  %v14617_v1 = vmul.f32 %v14551_v28, %v17601_v0  ;;  %v14623_v55 = vmul.f32 %v14551_v28, %v17602_v57  ;;  %v17604_v27 = vsub.f32 %v17583_v60, %v14435_v6 }
 0x584   :  { %v14629_v22 = vmul.f32 %v14551_v28, %v17603_v18  ;;  %v17606_v0 = vsub.f32 %v17513_v35, %v14435_v6  ;;  %v6994_v57 = vsub.f32 %v14402_v29, %v14435_v6  ;;  %v14649_v18 = vmul.f32 %v14551_v28, %v17608_v63 }
 0x585   :  { %v14635_v36 = vmul.f32 %v14551_v28, %v17604_v27  ;;  %v17609_v60 = vsub.f32 %v17519_v56, %v14435_v6  ;;  %v17616_v63 = vsub.f32 %v17528_v59, %v14435_v6 }
 0x586   :  { %v14641_v38 = vmul.f32 %v14551_v28, %v17606_v0 }
 0x587   :  { %17605 = vst [vmem:[#allocation39_spill] sm:$0xff] %v14635_v36  ;;  %v14655_v27 = vmul.f32 %v14551_v28, %v17609_v60  ;;  %v17611_v36 = vld [vmem:[#allocation36_spill] sm:$0xff]  ;;  %v14673_v56 = vmul.f32 %v14551_v28, %v17616_v63  ;;  %v17617_v60 = vld [vmem:[#allocation37_spill] sm:$0xff]  ;;  %v17622_v63 = vsub.f32 %v17539_v33, %v14435_v6 }
 0x588   :  { %17607 = vst [vmem:[#allocation14_spill] sm:$0xff] %v14641_v38  ;;  %v17612_v35 = vsub.f32 %v17611_v36, %v14435_v6  ;;  %v17613_v38 = vld [vmem:[#allocation62_spill] sm:$0xff] }
 0x589   :  { %17610 = vst [vmem:[#allocation15_spill] sm:$0xff] %v14655_v27  ;;  %v17614_v29 = vsub.f32 %v17613_v38, %v14435_v6  ;;  %v17618_v27 = vsub.f32 %v17617_v60, %v14435_v6  ;;  %v14697_v60 = vmul.f32 %v14551_v28, %v17622_v63  ;;  %v17628_v63 = vsub.f32 %v17588_v58, %v14435_v6 }
 0x58a   :  { %v14661_v0 = vmul.f32 %v14551_v28, %v17612_v35  ;;  %v17619_v35 = vsub.f32 %v17585_v21, %v14435_v6 }
 0x58b   :  { %v14667_v11 = vmul.f32 %v14551_v28, %v17614_v29  ;;  %v14679_v36 = vmul.f32 %v14551_v28, %v17618_v27  ;;  %v17620_v29 = vld [vmem:[#allocation18_spill] sm:$0xff]  ;;  %v17623_v27 = vsub.f32 %v17586_v9, %v14435_v6  ;;  %v14721_v9 = vmul.f32 %v14551_v28, %v17628_v63 }
 0x58c   :  { %v14685_v38 = vmul.f32 %v14551_v28, %v17619_v35  ;;  %v17625_v35 = vsub.f32 %v17587_v51, %v14435_v6  ;;  %v17637_v63 = vsub.f32 %v17561_v24, %v14435_v6  ;;  %v17642_v24 = vsub.f32 %v17590_v20, %v14435_v6 }
 0x58d   :  { %17615 = vst [vmem:[#allocation72_spill] sm:$0xff] %v14667_v11  ;;  %v17621_v11 = vsub.f32 %v17620_v29, %v14435_v6  ;;  %v14703_v21 = vmul.f32 %v14551_v28, %v17623_v27  ;;  %17629 = vst [vmem:[#allocation8_spill] sm:$0xff] %v14721_v9  ;;  %v17630_v27 = vld [vmem:[#allocation71_spill] sm:$0xff]  ;;  %v17646_v20 = vsub.f32 %v17568_v34, %v14435_v6 }
 0x58e   :  { %v14709_v29 = vmul.f32 %v14551_v28, %v17625_v35  ;;  %v17633_v35 = vsub.f32 %v17589_v45, %v14435_v6  ;;  %v17650_v34 = vsub.f32 %v14087_v10, %v14435_v6  ;;  %v17654_v10 = vsub.f32 %v14189_v37, %v14435_v6 }
 0x58f   :  { %v14691_v59 = vmul.f32 %v14551_v28, %v17621_v11  ;;  %17624 = vst [vmem:[#allocation67_spill] sm:$0xff] %v14703_v21  ;;  %v17626_v11 = vsub.f32 %v17550_v23, %v14435_v6  ;;  %v17631_v21 = vsub.f32 %v17630_v27, %v14435_v6  ;;  %v14745_v27 = vmul.f32 %v14551_v28, %v17637_v63 }
 0x590   :  { %v14733_v23 = vmul.f32 %v14551_v28, %v17633_v35  ;;  %v17640_v35 = vsub.f32 %v17564_v54, %v14435_v6  ;;  %v7031_v63 = vmul.f32 %v14551_v28, %v17642_v24  ;;  %v17644_v54 = vsub.f32 %v14027_v53, %v14435_v6 }
 0x591   :  { %v14715_v33 = vmul.f32 %v14551_v28, %v17626_v11  ;;  %v14727_v51 = vmul.f32 %v14551_v28, %v17631_v21  ;;  %v17635_v11 = vsub.f32 %v17560_v50, %v14435_v6  ;;  %17638 = vst [vmem:[#allocation10_spill] sm:$0xff] %v14745_v27  ;;  %v17639_v21 = vsub.f32 %v17562_v13, %v14435_v6  ;;  %v17656_v27 = vld [vmem:[#allocation57_spill] sm:$0xff] }
 0x592   :  { %17634 = vst [vmem:[#allocation30_spill] sm:$0xff] %v14733_v23  ;;  %v7029_v23 = vmul.f32 %v14551_v28, %v17640_v35  ;;  %v17641_v50 = vsub.f32 %v17565_v15, %v14435_v6  ;;  %v17643_v13 = vsub.f32 %v17567_v46, %v14435_v6  ;;  %v7033_v35 = vmul.f32 %v14551_v28, %v17644_v54 }
 0x593   :  { %17627 = vst [vmem:[#allocation68_spill] sm:$0xff] %v14715_v33  ;;  %17632 = vst [vmem:[#allocation76_spill] sm:$0xff] %v14727_v51  ;;  %v14739_v58 = vmul.f32 %v14551_v28, %v17635_v11  ;;  %v7028_v45 = vmul.f32 %v14551_v28, %v17639_v21  ;;  %v17645_v15 = vsub.f32 %v14066_v19, %v14435_v6 }
 0x594   :  { %v7030_v11 = vmul.f32 %v14551_v28, %v17641_v50  ;;  %v7032_v21 = vmul.f32 %v14551_v28, %v17643_v13  ;;  %v7035_v24 = vmul.f32 %v14551_v28, %v17646_v20  ;;  %v17647_v46 = vsub.f32 %v17569_v42, %v14435_v6 }
 0x595   :  { %17636 = vst [vmem:[#allocation75_spill] sm:$0xff] %v14739_v58  ;;  %v7034_v50 = vmul.f32 %v14551_v28, %v17645_v15  ;;  %v17648_v53 = vsub.f32 %v14108_v41, %v14435_v6  ;;  %v17649_v19 = vsub.f32 %v14157_v25, %v14435_v6  ;;  %v7039_v20 = vmul.f32 %v14551_v28, %v17650_v34  ;;  %v17664_v58 = vld [vmem:[#allocation56_spill] sm:$0xff] }
 0x596   :  { %v7036_v13 = vmul.f32 %v14551_v28, %v17647_v46  ;;  %v17651_v42 = vsub.f32 %v14132_v47, %v14435_v6  ;;  %v17652_v41 = vsub.f32 %v14215_v52, %v14435_v6  ;;  %v17653_v25 = vsub.f32 %v14254_v44, %v14435_v6 }
 0x597   :  { %v7037_v54 = vmul.f32 %v14551_v28, %v17648_v53  ;;  %v7038_v15 = vmul.f32 %v14551_v28, %v17649_v19  ;;  %v7043_v34 = vmul.f32 %v14551_v28, %v17654_v10  ;;  %v17655_v47 = vsub.f32 %v14239_v49, %v14435_v6 }
 0x598   :  { %v7040_v46 = vmul.f32 %v14551_v28, %v17651_v42  ;;  %v7041_v53 = vmul.f32 %v14551_v28, %v17652_v41  ;;  %v7042_v19 = vmul.f32 %v14551_v28, %v17653_v25  ;;  %v17657_v52 = vsub.f32 %v17656_v27, %v14435_v6 }
 0x599   :  { %v7044_v42 = vmul.f32 %v14551_v28, %v17655_v47  ;;  %v17658_v44 = vsub.f32 %v14290_v40, %v14435_v6  ;;  %v17659_v37 = vsub.f32 %v14264_v8, %v14435_v6  ;;  %v17660_v49 = vsub.f32 %v14282_v43, %v14435_v6 }
 0x59a   :  { %v7045_v41 = vmul.f32 %v14551_v28, %v17657_v52  ;;  %v17661_v27 = vsub.f32 %v14310_v30, %v14435_v6  ;;  %v17662_v40 = vsub.f32 %v14330_v39, %v14435_v6  ;;  %v17663_v8 = vsub.f32 %v14302_v4, %v14435_v6 }
 0x59b   :  { %v7046_v25 = vmul.f32 %v14551_v28, %v17658_v44  ;;  %v7047_v10 = vmul.f32 %v14551_v28, %v17659_v37  ;;  %v7048_v47 = vmul.f32 %v14551_v28, %v17660_v49  ;;  %v17665_v43 = vsub.f32 %v17664_v58, %v14435_v6 }
 0x59c   :  { %v7049_v52 = vmul.f32 %v14551_v28, %v17661_v27  ;;  %v7050_v44 = vmul.f32 %v14551_v28, %v17662_v40  ;;  %v7051_v37 = vmul.f32 %v14551_v28, %v17663_v8  ;;  %v17666_v30 = vsub.f32 %v14350_v31, %v14435_v6 }
 0x59d   :  { %v7052_v49 = vmul.f32 %v14551_v28, %v17665_v43  ;;  %v17667_v39 = vsub.f32 %v14370_v32, %v14435_v6  ;;  %v17668_v4 = vsub.f32 %v14342_v5, %v14435_v6  ;;  %v17669_v58 = vsub.f32 %v14362_v14, %v14435_v6  ;;  %v14872_v5 = vld [vmem:[%s16792_s11] ss:$0 sm:$0xff] }
 0x59e   :  { %v7053_v27 = vmul.f32 %v14551_v28, %v17666_v30  ;;  %v17670_v31 = vsub.f32 %v17591_v7, %v14435_v6  ;;  %v7059_v51 = vmul.f32 %v14551_v28, %v6993_v2  ;;  %v7060_v32 = vmul.f32 %v14551_v28, %v6994_v57 }
 0x59f   :  { %v7054_v40 = vmul.f32 %v14551_v28, %v17667_v39  ;;  %v7055_v8 = vmul.f32 %v14551_v28, %v17668_v4  ;;  %v7056_v43 = vmul.f32 %v14551_v28, %v17669_v58  ;;  %v7098_v39 = vmul.f32 %v14872_v5, %v7028_v45 }
 0x5a0   :  { %v7057_v30 = vmul.f32 %v14551_v28, %v17670_v31  ;;  %v7099_v14 = vmul.f32 %v14872_v5, %v7029_v23  ;;  %v7100_v4 = vmul.f32 %v14872_v5, %v7030_v11  ;;  %v7101_v58 = vmul.f32 %v14872_v5, %v7031_v63 }
 0x5a1   :  { %v7102_v7 = vmul.f32 %v14872_v5, %v7032_v21  ;;  %v7103_v31 = vmul.f32 %v14872_v5, %v7033_v35  ;;  %v7104_v2 = vmul.f32 %v14872_v5, %v7034_v50  ;;  %v7105_v57 = vmul.f32 %v14872_v5, %v7035_v24 }
 0x5a2   :  { %v7106_v9 = vmul.f32 %v14872_v5, %v7036_v13  ;;  %v7107_v33 = vmul.f32 %v14872_v5, %v7037_v54  ;;  %v7108_v45 = vmul.f32 %v14872_v5, %v7038_v15  ;;  %v7109_v23 = vmul.f32 %v14872_v5, %v7039_v20 }
 0x5a3   :  { %v7110_v11 = vmul.f32 %v14872_v5, %v7040_v46  ;;  %v7111_v63 = vmul.f32 %v14872_v5, %v7041_v53  ;;  %v7112_v21 = vmul.f32 %v14872_v5, %v7042_v19  ;;  %v7113_v35 = vmul.f32 %v14872_v5, %v7043_v34 }
 0x5a4   :  { %v7114_v50 = vmul.f32 %v14872_v5, %v7044_v42  ;;  %v7115_v24 = vmul.f32 %v14872_v5, %v7045_v41  ;;  %v7116_v13 = vmul.f32 %v14872_v5, %v7046_v25  ;;  %v7117_v54 = vmul.f32 %v14872_v5, %v7047_v10 }
 0x5a5   :  { %v7118_v15 = vmul.f32 %v14872_v5, %v7048_v47  ;;  %v7119_v20 = vmul.f32 %v14872_v5, %v7049_v52  ;;  %v7120_v46 = vmul.f32 %v14872_v5, %v7050_v44  ;;  %v7121_v53 = vmul.f32 %v14872_v5, %v7051_v37  ;;  %v14909_v44 = vld [vmem:[%s16793_s12] ss:$0 sm:$0xff] }
 0x5a6   :  { %v7122_v19 = vmul.f32 %v14872_v5, %v7052_v49  ;;  %v7123_v34 = vmul.f32 %v14872_v5, %v7053_v27  ;;  %v7124_v42 = vmul.f32 %v14872_v5, %v7054_v40  ;;  %v7125_v41 = vmul.f32 %v14872_v5, %v7055_v8 }
 0x5a7   :  { %v7126_v25 = vmul.f32 %v14872_v5, %v7056_v43  ;;  %v7127_v10 = vmul.f32 %v14872_v5, %v7057_v30  ;;  %v7129_v47 = vmul.f32 %v14872_v5, %v7059_v51  ;;  %v7130_v52 = vmul.f32 %v14872_v5, %v7060_v32  ;;  %v14923_v51 = vpop.f32.mrf.mxu0 }
 0x5a8   :  { %v14912_v37 = vadd.f32 %v14909_v44, %v7098_v39  ;;  %v14915_v49 = vadd.f32 %v14909_v44, %v7099_v14  ;;  %v14918_v27 = vadd.f32 %v14909_v44, %v7100_v4  ;;  %v14921_v40 = vadd.f32 %v14909_v44, %v7101_v58 }
 0x5a9   :  { %v14926_v8 = vadd.f32 %v14909_v44, %v7102_v7  ;;  %v14929_v43 = vadd.f32 %v14909_v44, %v7103_v31  ;;  %v14932_v30 = vadd.f32 %v14909_v44, %v7104_v2  ;;  %v14935_v32 = vadd.f32 %v14909_v44, %v7105_v57  ;;  %v14946_v58 = vpop.f32.mrf.mxu0 }
 0x5aa   :  { %17671 = vst [vmem:[#allocation27_spill] sm:$0xff] %v14912_v37  ;;  %17672 = vst [vmem:[#allocation7_spill] sm:$0xff] %v14915_v49  ;;  %v14938_v39 = vadd.f32 %v14909_v44, %v7106_v9  ;;  %v14941_v14 = vadd.f32 %v14909_v44, %v7107_v33  ;;  %v14944_v4 = vadd.f32 %v14909_v44, %v7108_v45 }
 0x5ab   :  { %17673 = vst [vmem:[#allocation29_spill] sm:$0xff] %v14918_v27  ;;  %17674 = vst [vmem:[#allocation9_spill] sm:$0xff] %v14921_v40  ;;  %v14949_v7 = vadd.f32 %v14909_v44, %v7109_v23  ;;  %v14952_v31 = vadd.f32 %v14909_v44, %v7110_v11  ;;  %v14955_v2 = vadd.f32 %v14909_v44, %v7111_v63  ;;  %v14969_v23 = vpop.f32.mrf.mxu0 }
 0x5ac   :  { %17675 = vst [vmem:[#allocation13_spill] sm:$0xff] %v14926_v8  ;;  %17676 = vst [vmem:[#allocation34_spill] sm:$0xff] %v14929_v43  ;;  %v14958_v9 = vadd.f32 %v14909_v44, %v7112_v21  ;;  %v14961_v33 = vadd.f32 %v14909_v44, %v7113_v35  ;;  %v14964_v57 = vadd.f32 %v14909_v44, %v7114_v50 }
 0x5ad   :  { %17677 = vst [vmem:[#allocation17_spill] sm:$0xff] %v14932_v30  ;;  %17678 = vst [vmem:[#allocation31_spill] sm:$0xff] %v14935_v32  ;;  %v14967_v45 = vadd.f32 %v14909_v44, %v7115_v24  ;;  %v14972_v11 = vadd.f32 %v14909_v44, %v7116_v13  ;;  %v14975_v63 = vadd.f32 %v14909_v44, %v7117_v54 }
 0x5ae   :  { %17679 = vst [vmem:[#allocation12_spill] sm:$0xff] %v14938_v39  ;;  %17680 = vst [vmem:[#allocation33_spill] sm:$0xff] %v14941_v14  ;;  %v14978_v21 = vadd.f32 %v14909_v44, %v7118_v15  ;;  %v14981_v35 = vadd.f32 %v14909_v44, %v7119_v20  ;;  %v14984_v50 = vadd.f32 %v14909_v44, %v7120_v46  ;;  %v15004_v46 = vpop.f32.mrf.mxu0 }
 0x5af   :  { %17681 = vst [vmem:[#allocation16_spill] sm:$0xff] %v14944_v4  ;;  %17682 = vst [vmem:[#allocation77_spill] sm:$0xff] %v14949_v7  ;;  %v14987_v24 = vadd.f32 %v14909_v44, %v7121_v53  ;;  %v14993_v13 = vadd.f32 %v14909_v44, %v7123_v34  ;;  %v14996_v54 = vadd.f32 %v14909_v44, %v7124_v42 }
 0x5b0   :  { %17683 = vst [vmem:[#allocation35_spill] sm:$0xff] %v14952_v31  ;;  %17684 = vst [vmem:[#allocation73_spill] sm:$0xff] %v14955_v2  ;;  %v14999_v15 = vadd.f32 %v14909_v44, %v7125_v41  ;;  %v15002_v20 = vadd.f32 %v14909_v44, %v7126_v25  ;;  %v15007_v53 = vadd.f32 %v14909_v44, %v7127_v10 }
 0x5b1   :  { %17685 = vst [vmem:[#allocation48_spill] sm:$0xff] %v14958_v9  ;;  %17686 = vst [vmem:[#allocation78_spill] sm:$0xff] %v14961_v33  ;;  %v15013_v34 = vadd.f32 %v14909_v44, %v7130_v52  ;;  %v5924_v42 = vadd.f32 %v15004_v46, %v14946_v58  ;;  %v5993_v41 = vmul.f32 %v14946_v58, %v14946_v58 }
 0x5b2   :  { %17687 = vst [vmem:[#allocation65_spill] sm:$0xff] %v14964_v57  ;;  %17688 = vst [vmem:[#allocation40_spill] sm:$0xff] %v14967_v45  ;;  %v14990_v45 = vadd.f32 %v14909_v44, %v7122_v19  ;;  %v15010_v19 = vadd.f32 %v14909_v44, %v7129_v47  ;;  %v5994_v25 = vmul.f32 %v15004_v46, %v15004_v46 }
 0x5b3   :  { %17689 = vst [vmem:[#allocation42_spill] sm:$0xff] %v14972_v11  ;;  %17690 = vst [vmem:[#allocation51_spill] sm:$0xff] %v14975_v63  ;;  %v5925_v10 = vadd.f32 %v14923_v51, %v5924_v42  ;;  %v5995_v47 = vmul.f32 %v14923_v51, %v14923_v51 }
 0x5b4   :  { %17691 = vst [vmem:[#allocation47_spill] sm:$0xff] %v14978_v21  ;;  %17692 = vst [vmem:[#allocation44_spill] sm:$0xff] %v14981_v35 }
 0x5b5   :  { %17693 = vst [vmem:[#allocation46_spill] sm:$0xff] %v14984_v50  ;;  %17694 = vst [vmem:[#allocation60_spill] sm:$0xff] %v14987_v24  ;;  %v5926_v52 = vadd.f32 %v14969_v23, %v5925_v10 }
 0x5b6   :  { %17695 = vst [vmem:[#allocation74_spill] sm:$0xff] %v14990_v45  ;;  %17696 = vst [vmem:[#allocation80_spill] sm:$0xff] %v14993_v13 }
 0x5b7   :  { %17697 = vst [vmem:[#allocation50_spill] sm:$0xff] %v14996_v54  ;;  %17698 = vst [vmem:[#allocation52_spill] sm:$0xff] %v14999_v15 }
 0x5b8   :  { %17699 = vst [vmem:[#allocation59_spill] sm:$0xff] %v15002_v20  ;;  %17700 = vst [vmem:[#allocation45_spill] sm:$0xff] %v15007_v53  ;;  %v15021_v20 = vpop.f32.mrf.mxu0 }
 0x5b9   :  { %17701 = vst [vmem:[#allocation79_spill] sm:$0xff] %v15010_v19  ;;  %17702 = vst [vmem:[#allocation43_spill] sm:$0xff] %v15013_v34  ;;  %v6057_v19 = vadd.f32 %v5994_v25, %v5993_v41  ;;  %v5996_v34 = vmul.f32 %v14969_v23, %v14969_v23 }
 0x5ba   :  { %v15026_v53 = vpop.f32.mrf.mxu0 }
 0x5bb   :  { %v6058_v15 = vadd.f32 %v6057_v19, %v5995_v47  ;;  %v5927_v13 = vadd.f32 %v5926_v52, %v15026_v53  ;;  %v5997_v45 = vmul.f32 %v15026_v53, %v15026_v53  ;;  %v5999_v47 = vmul.f32 %v15021_v20, %v15021_v20 }
 0x5bc   :  { %v15031_v54 = vpop.f32.mrf.mxu0 }
 0x5bd   :  { %v6059_v42 = vadd.f32 %v6058_v15, %v5996_v34  ;;  %v6000_v34 = vmul.f32 %v15031_v54, %v15031_v54 }
 0x5be   :  { %v15036_v24 = vpop.f32.mrf.mxu0 }
 0x5bf   :  { %v5928_v41 = vadd.f32 %v5927_v13, %v15036_v24  ;;  %v5998_v25 = vmul.f32 %v15036_v24, %v15036_v24  ;;  %v6060_v10 = vadd.f32 %v6059_v42, %v5997_v45 }
 0x5c0   :  { %v15041_v50 = vpop.f32.mrf.mxu0 }
 0x5c1   :  { %v5929_v19 = vadd.f32 %v15021_v20, %v5928_v41  ;;  %v6061_v52 = vadd.f32 %v6060_v10, %v5998_v25 }
 0x5c2   :  { %v15046_v35 = vpop.f32.mrf.mxu0 }
 0x5c3   :  { %v5930_v15 = vadd.f32 %v15031_v54, %v5929_v19  ;;  %v6062_v13 = vadd.f32 %v6061_v52, %v5999_v47  ;;  %v6001_v42 = vmul.f32 %v15046_v35, %v15046_v35  ;;  %v6003_v52 = vmul.f32 %v15041_v50, %v15041_v50 }
 0x5c4   :  { %v15051_v21 = vpop.f32.mrf.mxu0 }
 0x5c5   :  { %v5931_v45 = vadd.f32 %v5930_v15, %v15046_v35  ;;  %v6063_v41 = vadd.f32 %v6062_v13, %v6000_v34  ;;  %v6004_v13 = vmul.f32 %v15051_v21, %v15051_v21 }
 0x5c6   :  { %v15056_v63 = vpop.f32.mrf.mxu0 }
 0x5c7   :  { %v5932_v25 = vadd.f32 %v5931_v45, %v15056_v63  ;;  %v6002_v10 = vmul.f32 %v15056_v63, %v15056_v63  ;;  %v6064_v19 = vadd.f32 %v6063_v41, %v6001_v42 }
 0x5c8   :  { %v15061_v11 = vpop.f32.mrf.mxu0 }
 0x5c9   :  { %v5933_v47 = vadd.f32 %v15041_v50, %v5932_v25  ;;  %v6065_v15 = vadd.f32 %v6064_v19, %v6002_v10 }
 0x5ca   :  { %v15066_v57 = vpop.f32.mrf.mxu0 }
 0x5cb   :  { %v5934_v34 = vadd.f32 %v15051_v21, %v5933_v47  ;;  %v6066_v45 = vadd.f32 %v6065_v15, %v6003_v52  ;;  %v6005_v41 = vmul.f32 %v15066_v57, %v15066_v57  ;;  %v6007_v15 = vmul.f32 %v15061_v11, %v15061_v11 }
 0x5cc   :  { %v15071_v33 = vpop.f32.mrf.mxu0 }
 0x5cd   :  { %v5935_v42 = vadd.f32 %v5934_v34, %v15066_v57  ;;  %v6067_v25 = vadd.f32 %v6066_v45, %v6004_v13  ;;  %v6008_v45 = vmul.f32 %v15071_v33, %v15071_v33 }
 0x5ce   :  { %v15076_v9 = vpop.f32.mrf.mxu0 }
 0x5cf   :  { %v5936_v10 = vadd.f32 %v5935_v42, %v15076_v9  ;;  %v6006_v19 = vmul.f32 %v15076_v9, %v15076_v9  ;;  %v6068_v47 = vadd.f32 %v6067_v25, %v6005_v41 }
 0x5d0   :  { %v15081_v2 = vpop.f32.mrf.mxu0 }
 0x5d1   :  { %17703 = vst [vmem:[#allocation49_spill] sm:$0xff] %v15081_v2  ;;  %v5937_v52 = vadd.f32 %v15061_v11, %v5936_v10  ;;  %v6069_v34 = vadd.f32 %v6068_v47, %v6006_v19 }
 0x5d2   :  { %v15086_v31 = vpop.f32.mrf.mxu0 }
 0x5d3   :  { %v5938_v13 = vadd.f32 %v15071_v33, %v5937_v52  ;;  %v6070_v42 = vadd.f32 %v6069_v34, %v6007_v15  ;;  %v6009_v25 = vmul.f32 %v15086_v31, %v15086_v31  ;;  %v6011_v34 = vmul.f32 %v15081_v2, %v15081_v2 }
 0x5d4   :  { %v15091_v7 = vpop.f32.mrf.mxu0 }
 0x5d5   :  { %17704 = vst [vmem:[#allocation63_spill] sm:$0xff] %v15091_v7  ;;  %v5939_v41 = vadd.f32 %v5938_v13, %v15086_v31  ;;  %v6071_v10 = vadd.f32 %v6070_v42, %v6008_v45  ;;  %v6012_v42 = vmul.f32 %v15091_v7, %v15091_v7 }
 0x5d6   :  { %v15096_v4 = vpop.f32.mrf.mxu0 }
 0x5d7   :  { %17705 = vst [vmem:[#allocation55_spill] sm:$0xff] %v15096_v4  ;;  %v5940_v19 = vadd.f32 %v5939_v41, %v15096_v4  ;;  %v6010_v47 = vmul.f32 %v15096_v4, %v15096_v4  ;;  %v6072_v52 = vadd.f32 %v6071_v10, %v6009_v25 }
 0x5d8   :  { %v15101_v14 = vpop.f32.mrf.mxu0 }
 0x5d9   :  { %17706 = vst [vmem:[#allocation53_spill] sm:$0xff] %v15101_v14  ;;  %v5941_v15 = vadd.f32 %v15081_v2, %v5940_v19  ;;  %v6073_v13 = vadd.f32 %v6072_v52, %v6010_v47 }
 0x5da   :  { %v15106_v39 = vpop.f32.mrf.mxu0 }
 0x5db   :  { %17707 = vst [vmem:[#allocation54_spill] sm:$0xff] %v15106_v39  ;;  %v5942_v45 = vadd.f32 %v15091_v7, %v5941_v15  ;;  %v6074_v41 = vadd.f32 %v6073_v13, %v6011_v34  ;;  %v6013_v10 = vmul.f32 %v15106_v39, %v15106_v39  ;;  %v6015_v13 = vmul.f32 %v15101_v14, %v15101_v14  ;;  %v17762_v7 = vld [vmem:[#allocation10_spill] sm:$0xff] }
 0x5dc   :  { %v15111_v32 = vpop.f32.mrf.mxu0 }
 0x5dd   :  { %17708 = vst [vmem:[#allocation20_spill] sm:$0xff] %v15111_v32  ;;  %v5943_v25 = vadd.f32 %v5942_v45, %v15106_v39  ;;  %v6075_v19 = vadd.f32 %v6074_v41, %v6012_v42  ;;  %v6016_v41 = vmul.f32 %v15111_v32, %v15111_v32  ;;  %v17761_v39 = vld [vmem:[#allocation75_spill] sm:$0xff] }
 0x5de   :  { %v15116_v30 = vpop.f32.mrf.mxu0 }
 0x5df   :  { %17709 = vst [vmem:[#allocation22_spill] sm:$0xff] %v15116_v30  ;;  %v5944_v47 = vadd.f32 %v5943_v25, %v15116_v30  ;;  %v6014_v52 = vmul.f32 %v15116_v30, %v15116_v30  ;;  %v6076_v15 = vadd.f32 %v6075_v19, %v6013_v10  ;;  %v17760_v30 = vld [vmem:[#allocation30_spill] sm:$0xff] }
 0x5e0   :  { %v15121_v43 = vpop.f32.mrf.mxu0 }
 0x5e1   :  { %17710 = vst [vmem:[#allocation19_spill] sm:$0xff] %v15121_v43  ;;  %v5945_v34 = vadd.f32 %v15101_v14, %v5944_v47  ;;  %v6077_v45 = vadd.f32 %v6076_v15, %v6014_v52 }
 0x5e2   :  { %v15126_v8 = vpop.f32.mrf.mxu0 }
 0x5e3   :  { %17711 = vst [vmem:[#allocation21_spill] sm:$0xff] %v15126_v8  ;;  %v5946_v42 = vadd.f32 %v15111_v32, %v5945_v34  ;;  %v6078_v25 = vadd.f32 %v6077_v45, %v6015_v13  ;;  %v6017_v19 = vmul.f32 %v15126_v8, %v15126_v8  ;;  %v6019_v45 = vmul.f32 %v15121_v43, %v15121_v43  ;;  %v17759_v32 = vld [vmem:[#allocation76_spill] sm:$0xff] }
 0x5e4   :  { %v15131_v40 = vpop.f32.mrf.mxu0 }
 0x5e5   :  { %17712 = vst [vmem:[#allocation24_spill] sm:$0xff] %v15131_v40  ;;  %v5947_v10 = vadd.f32 %v5946_v42, %v15126_v8  ;;  %v6079_v47 = vadd.f32 %v6078_v25, %v6016_v41  ;;  %v6020_v25 = vmul.f32 %v15131_v40, %v15131_v40 }
 0x5e6   :  { %v15136_v27 = vpop.f32.mrf.mxu0 }
 0x5e7   :  { %17713 = vst [vmem:[#allocation26_spill] sm:$0xff] %v15136_v27  ;;  %v5948_v52 = vadd.f32 %v5947_v10, %v15136_v27  ;;  %v6018_v15 = vmul.f32 %v15136_v27, %v15136_v27  ;;  %v6080_v34 = vadd.f32 %v6079_v47, %v6017_v19 }
 0x5e8   :  { %v15141_v49 = vpop.f32.mrf.mxu0 }
 0x5e9   :  { %17714 = vst [vmem:[#allocation23_spill] sm:$0xff] %v15141_v49  ;;  %v5949_v13 = vadd.f32 %v15121_v43, %v5948_v52  ;;  %v6081_v42 = vadd.f32 %v6080_v34, %v6018_v15 }
 0x5ea   :  { %v15146_v37 = vpop.f32.mrf.mxu0 }
 0x5eb   :  { %17715 = vst [vmem:[#allocation25_spill] sm:$0xff] %v15146_v37  ;;  %v5950_v41 = vadd.f32 %v15131_v40, %v5949_v13  ;;  %v6082_v10 = vadd.f32 %v6081_v42, %v6019_v45  ;;  %v6021_v47 = vmul.f32 %v15146_v37, %v15146_v37  ;;  %v6023_v42 = vmul.f32 %v15141_v49, %v15141_v49 }
 0x5ec   :  { %v15151_v8 = vpop.f32.mrf.mxu0 }
 0x5ed   :  { %17716 = vst [vmem:[#allocation28_spill] sm:$0xff] %v15151_v8  ;;  %v5951_v19 = vadd.f32 %v5950_v41, %v15146_v37  ;;  %v6083_v52 = vadd.f32 %v6082_v10, %v6020_v25  ;;  %v6024_v10 = vmul.f32 %v15151_v8, %v15151_v8 }
 0x5ee   :  { %v15156_v27 = vpop.f32.mrf.mxu0 }
 0x5ef   :  { %17717 = vst [vmem:[#allocation32_spill] sm:$0xff] %v15156_v27  ;;  %v5952_v15 = vadd.f32 %v5951_v19, %v15156_v27  ;;  %v6022_v34 = vmul.f32 %v15156_v27, %v15156_v27  ;;  %v6084_v13 = vadd.f32 %v6083_v52, %v6021_v47 }
 0x5f0   :  { %v15161_v43 = vpop.f32.mrf.mxu0 }
 0x5f1   :  { %17718 = vst [vmem:[#allocation6_spill] sm:$0xff] %v15161_v43  ;;  %v5953_v45 = vadd.f32 %v15141_v49, %v5952_v15  ;;  %v6085_v41 = vadd.f32 %v6084_v13, %v6022_v34 }
 0x5f2   :  { %v15166_v40 = vpop.f32.mrf.mxu0 }
 0x5f3   :  { %17719 = vst [vmem:[#allocation11_spill] sm:$0xff] %v15166_v40  ;;  %v5954_v25 = vadd.f32 %v15151_v8, %v5953_v45  ;;  %v6086_v19 = vadd.f32 %v6085_v41, %v6023_v42  ;;  %v6025_v52 = vmul.f32 %v15166_v40, %v15166_v40  ;;  %v6027_v41 = vmul.f32 %v15161_v43, %v15161_v43 }
 0x5f4   :  { %v15171_v37 = vpop.f32.mrf.mxu0 }
 0x5f5   :  { %17720 = vst [vmem:[#allocation70_spill] sm:$0xff] %v15171_v37  ;;  %v5955_v47 = vadd.f32 %v5954_v25, %v15166_v40  ;;  %v6087_v15 = vadd.f32 %v6086_v19, %v6024_v10  ;;  %v6028_v19 = vmul.f32 %v15171_v37, %v15171_v37 }
 0x5f6   :  { %v15176_v27 = vpop.f32.mrf.mxu0 }
 0x5f7   :  { %17721 = vst [vmem:[#allocation69_spill] sm:$0xff] %v15176_v27  ;;  %v5956_v34 = vadd.f32 %v5955_v47, %v15176_v27  ;;  %v6026_v13 = vmul.f32 %v15176_v27, %v15176_v27  ;;  %v6088_v45 = vadd.f32 %v6087_v15, %v6025_v52 }
 0x5f8   :  { %v15181_v49 = vpop.f32.mrf.mxu0 }
 0x5f9   :  { %17722 = vst [vmem:[#allocation64_spill] sm:$0xff] %v15181_v49  ;;  %v5957_v42 = vadd.f32 %v15161_v43, %v5956_v34  ;;  %v6089_v25 = vadd.f32 %v6088_v45, %v6026_v13 }
 0x5fa   :  { %v15186_v8 = vpop.f32.mrf.mxu0 }
 0x5fb   :  { %17723 = vst [vmem:[#allocation38_spill] sm:$0xff] %v15186_v8  ;;  %v5958_v10 = vadd.f32 %v15171_v37, %v5957_v42  ;;  %v6090_v47 = vadd.f32 %v6089_v25, %v6027_v41  ;;  %v6029_v15 = vmul.f32 %v15186_v8, %v15186_v8  ;;  %v6031_v25 = vmul.f32 %v15181_v49, %v15181_v49 }
 0x5fc   :  { %v15191_v40 = vpop.f32.mrf.mxu0 }
 0x5fd   :  { %17724 = vst [vmem:[#allocation61_spill] sm:$0xff] %v15191_v40  ;;  %v5959_v52 = vadd.f32 %v5958_v10, %v15186_v8  ;;  %v6091_v34 = vadd.f32 %v6090_v47, %v6028_v19  ;;  %v6032_v47 = vmul.f32 %v15191_v40, %v15191_v40 }
 0x5fe   :  { %v15196_v27 = vpop.f32.mrf.mxu0 }
 0x5ff   :  { %17725 = vst [vmem:[#allocation58_spill] sm:$0xff] %v15196_v27  ;;  %v5960_v13 = vadd.f32 %v5959_v52, %v15196_v27  ;;  %v6030_v45 = vmul.f32 %v15196_v27, %v15196_v27  ;;  %v6092_v42 = vadd.f32 %v6091_v34, %v6029_v15 }
 0x600   :  { %v15201_v43 = vpop.f32.mrf.mxu0 }
 0x601   :  { %17726 = vst [vmem:[#allocation36_spill] sm:$0xff] %v15201_v43  ;;  %v5961_v41 = vadd.f32 %v15181_v49, %v5960_v13  ;;  %v6093_v10 = vadd.f32 %v6092_v42, %v6030_v45 }
 0x602   :  { %v15206_v37 = vpop.f32.mrf.mxu0 }
 0x603   :  { %17727 = vst [vmem:[#allocation62_spill] sm:$0xff] %v15206_v37  ;;  %v5962_v19 = vadd.f32 %v15191_v40, %v5961_v41  ;;  %v6094_v52 = vadd.f32 %v6093_v10, %v6031_v25  ;;  %v6033_v34 = vmul.f32 %v15206_v37, %v15206_v37  ;;  %v6035_v10 = vmul.f32 %v15201_v43, %v15201_v43 }
 0x604   :  { %v15211_v8 = vpop.f32.mrf.mxu0 }
 0x605   :  { %17728 = vst [vmem:[#allocation37_spill] sm:$0xff] %v15211_v8  ;;  %v5963_v15 = vadd.f32 %v5962_v19, %v15206_v37  ;;  %v6095_v13 = vadd.f32 %v6094_v52, %v6032_v47  ;;  %v6036_v52 = vmul.f32 %v15211_v8, %v15211_v8 }
 0x606   :  { %v15216_v27 = vpop.f32.mrf.mxu0 }
 0x607   :  { %17729 = vst [vmem:[#allocation18_spill] sm:$0xff] %v15216_v27  ;;  %v5964_v45 = vadd.f32 %v5963_v15, %v15216_v27  ;;  %v6034_v42 = vmul.f32 %v15216_v27, %v15216_v27  ;;  %v6096_v41 = vadd.f32 %v6095_v13, %v6033_v34 }
 0x608   :  { %v15221_v49 = vpop.f32.mrf.mxu0 }
 0x609   :  { %17730 = vst [vmem:[#allocation71_spill] sm:$0xff] %v15221_v49  ;;  %v5965_v25 = vadd.f32 %v15201_v43, %v5964_v45  ;;  %v6097_v19 = vadd.f32 %v6096_v41, %v6034_v42 }
 0x60a   :  { %v15226_v40 = vpop.f32.mrf.mxu0 }
 0x60b   :  { %17731 = vst [vmem:[#allocation57_spill] sm:$0xff] %v15226_v40  ;;  %v5966_v47 = vadd.f32 %v15211_v8, %v5965_v25  ;;  %v6098_v15 = vadd.f32 %v6097_v19, %v6035_v10  ;;  %v6037_v13 = vmul.f32 %v15226_v40, %v15226_v40  ;;  %v6039_v19 = vmul.f32 %v15221_v49, %v15221_v49 }
 0x60c   :  { %v15231_v37 = vpop.f32.mrf.mxu0 }
 0x60d   :  { %17732 = vst [vmem:[#allocation56_spill] sm:$0xff] %v15231_v37  ;;  %v5967_v34 = vadd.f32 %v5966_v47, %v15226_v40  ;;  %v6099_v45 = vadd.f32 %v6098_v15, %v6036_v52  ;;  %v6040_v15 = vmul.f32 %v15231_v37, %v15231_v37 }
 0x60e   :  { %v15236_v27 = vpop.f32.mrf.mxu0 }
 0x60f   :  { %17733 = vst [vmem:[#allocation81_spill] sm:$0xff] %v15236_v27  ;;  %v5968_v42 = vadd.f32 %v5967_v34, %v15236_v27  ;;  %v6038_v41 = vmul.f32 %v15236_v27, %v15236_v27  ;;  %v6100_v25 = vadd.f32 %v6099_v45, %v6037_v13 }
 0x610   :  { %v15241_v43 = vpop.f32.mrf.mxu0 }
 0x611   :  { %17734 = vst [vmem:[#allocation82_spill] sm:$0xff] %v15241_v43  ;;  %v5969_v10 = vadd.f32 %v15221_v49, %v5968_v42  ;;  %v6101_v47 = vadd.f32 %v6100_v25, %v6038_v41 }
 0x612   :  { %v15246_v8 = vpop.f32.mrf.mxu0 }
 0x613   :  { %17735 = vst [vmem:[#allocation83_spill] sm:$0xff] %v15246_v8  ;;  %v5970_v52 = vadd.f32 %v15231_v37, %v5969_v10  ;;  %v6102_v34 = vadd.f32 %v6101_v47, %v6039_v19  ;;  %v6041_v45 = vmul.f32 %v15246_v8, %v15246_v8  ;;  %v6043_v47 = vmul.f32 %v15241_v43, %v15241_v43 }
 0x614   :  { %v15251_v40 = vpop.f32.mrf.mxu0 }
 0x615   :  { %17736 = vst [vmem:[#allocation84_spill] sm:$0xff] %v15251_v40  ;;  %v5971_v13 = vadd.f32 %v5970_v52, %v15246_v8  ;;  %v6103_v42 = vadd.f32 %v6102_v34, %v6040_v15  ;;  %v6044_v34 = vmul.f32 %v15251_v40, %v15251_v40 }
 0x616   :  { %v15256_v27 = vpop.f32.mrf.mxu0 }
 0x617   :  { %17737 = vst [vmem:[#allocation85_spill] sm:$0xff] %v15256_v27  ;;  %v5972_v41 = vadd.f32 %v5971_v13, %v15256_v27  ;;  %v6042_v25 = vmul.f32 %v15256_v27, %v15256_v27  ;;  %v6104_v10 = vadd.f32 %v6103_v42, %v6041_v45 }
 0x618   :  { %v15261_v49 = vpop.f32.mrf.mxu0 }
 0x619   :  { %17738 = vst [vmem:[#allocation86_spill] sm:$0xff] %v15261_v49  ;;  %v5973_v19 = vadd.f32 %v15241_v43, %v5972_v41  ;;  %v6105_v52 = vadd.f32 %v6104_v10, %v6042_v25 }
 0x61a   :  { %v15266_v37 = vpop.f32.mrf.mxu0 }
 0x61b   :  { %17739 = vst [vmem:[#allocation87_spill] sm:$0xff] %v15266_v37  ;;  %v5974_v15 = vadd.f32 %v15251_v40, %v5973_v19  ;;  %v6106_v13 = vadd.f32 %v6105_v52, %v6043_v47  ;;  %v6045_v42 = vmul.f32 %v15266_v37, %v15266_v37  ;;  %v6047_v52 = vmul.f32 %v15261_v49, %v15261_v49 }
 0x61c   :  { %v15271_v8 = vpop.f32.mrf.mxu0 }
 0x61d   :  { %17740 = vst [vmem:[#allocation88_spill] sm:$0xff] %v15271_v8  ;;  %v5975_v45 = vadd.f32 %v5974_v15, %v15266_v37  ;;  %v6107_v41 = vadd.f32 %v6106_v13, %v6044_v34  ;;  %v6048_v13 = vmul.f32 %v15271_v8, %v15271_v8 }
 0x61e   :  { %v15276_v27 = vpop.f32.mrf.mxu0 }
 0x61f   :  { %17741 = vst [vmem:[#allocation89_spill] sm:$0xff] %v15276_v27  ;;  %v5976_v25 = vadd.f32 %v5975_v45, %v15276_v27  ;;  %v6046_v10 = vmul.f32 %v15276_v27, %v15276_v27  ;;  %v6108_v19 = vadd.f32 %v6107_v41, %v6045_v42 }
 0x620   :  { %v15281_v43 = vpop.f32.mrf.mxu0 }
 0x621   :  { %17742 = vst [vmem:[#allocation90_spill] sm:$0xff] %v15281_v43  ;;  %v5977_v47 = vadd.f32 %v15261_v49, %v5976_v25  ;;  %v6109_v15 = vadd.f32 %v6108_v19, %v6046_v10 }
 0x622   :  { %v15286_v40 = vpop.f32.mrf.mxu0 }
 0x623   :  { %17743 = vst [vmem:[#allocation91_spill] sm:$0xff] %v15286_v40  ;;  %v5978_v34 = vadd.f32 %v15271_v8, %v5977_v47  ;;  %v6110_v45 = vadd.f32 %v6109_v15, %v6047_v52  ;;  %v6049_v41 = vmul.f32 %v15286_v40, %v15286_v40  ;;  %v17747_v52 = vld [vmem:[#allocation41_spill] sm:$0xff] }
 0x624   :  { %v15291_v37 = vpop.f32.mrf.mxu0  ;;  %v6992_v15 = vsub.f32 %v17747_v52, %v14435_v6 }
 0x625   :  { %17744 = vst [vmem:[#allocation92_spill] sm:$0xff] %v15291_v37  ;;  %v5979_v42 = vadd.f32 %v5978_v34, %v15286_v40  ;;  %v6111_v25 = vadd.f32 %v6110_v45, %v6048_v13  ;;  %v6051_v34 = vmul.f32 %v15281_v43, %v15281_v43 }
 0x626   :  { %v15296_v27 = vpop.f32.mrf.mxu0 }
 0x627   :  { %17745 = vst [vmem:[#allocation93_spill] sm:$0xff] %v15296_v27  ;;  %v5980_v10 = vadd.f32 %v5979_v42, %v15296_v27  ;;  %v6050_v19 = vmul.f32 %v15296_v27, %v15296_v27  ;;  %v6112_v47 = vadd.f32 %v6111_v25, %v6049_v41  ;;  %v6052_v42 = vmul.f32 %v15291_v37, %v15291_v37 }
 0x628   :  { %v15301_v49 = vpop.f32.mrf.mxu0  ;;  %v7058_v25 = vmul.f32 %v14551_v28, %v6992_v15 }
 0x629   :  { %17746 = vst [vmem:[#allocation94_spill] sm:$0xff] %v15301_v49  ;;  %v5981_v8 = vadd.f32 %v15281_v43, %v5980_v10  ;;  %v6113_v40 = vadd.f32 %v6112_v47, %v6050_v19  ;;  %v6055_v28 = vmul.f32 %v15301_v49, %v15301_v49 }
 0x62a   :  { %v15308_v13 = vpop.f32.mrf.mxu0 }
 0x62b   :  { %17748 = vst [vmem:[#allocation41_spill] sm:$0xff] %v15308_v13  ;;  %v5982_v45 = vadd.f32 %v15291_v37, %v5981_v8  ;;  %v6114_v27 = vadd.f32 %v6113_v40, %v6051_v34  ;;  %v6053_v10 = vmul.f32 %v15308_v13, %v15308_v13  ;;  %v7128_v40 = vmul.f32 %v14872_v5, %v7058_v25  ;;  %v17758_v37 = vld [vmem:[#allocation8_spill] sm:$0xff] }
 0x62c   :  { %v15313_v41 = vpop.f32.mrf.mxu0  ;;  %v7068_v25 = vmul.f32 %v14872_v5, %v14573_v16  ;;  %v7074_v16 = vmul.f32 %v14872_v5, %v14605_v17 }
 0x62d   :  { %17749 = vst [vmem:[#allocation95_spill] sm:$0xff] %v15313_v41  ;;  %v5983_v6 = vadd.f32 %v5982_v45, %v15308_v13  ;;  %v6115_v52 = vadd.f32 %v6114_v27, %v6052_v42  ;;  %v6056_v27 = vmul.f32 %v15313_v41, %v15313_v41 }
 0x62e   :  { %v15319_v43 = vpop.f32.mrf.mxu0 }
 0x62f   :  { %v5984_v19 = vadd.f32 %v5983_v6, %v15319_v43  ;;  %v6054_v8 = vmul.f32 %v15319_v43, %v15319_v43  ;;  %v6116_v47 = vadd.f32 %v6115_v52, %v6053_v10  ;;  %v15332_v6 = vadd.f32 %v14909_v44, %v7128_v40 }
 0x630   :  { %v7067_v10 = vmul.f32 %v14872_v5, %v14567_v62  ;;  %v7072_v40 = vmul.f32 %v14872_v5, %v14594_v26  ;;  %v7073_v62 = vmul.f32 %v14872_v5, %v14597_v3  ;;  %v7078_v26 = vmul.f32 %v14872_v5, %v14629_v22 }
 0x631   :  { %v5985_v34 = vadd.f32 %v15301_v49, %v5984_v19  ;;  %v6117_v15 = vadd.f32 %v6116_v47, %v6054_v8  ;;  %17750 = vst [vmem:[#allocation96_spill] sm:$0xff] %v15332_v6  ;;  %v17751_v19 = vld [vmem:[#allocation66_spill] sm:$0xff]  ;;  %v7070_v8 = vmul.f32 %v14872_v5, %v14585_v12  ;;  %v7076_v12 = vmul.f32 %v14872_v5, %v14617_v1 }
 0x632   :  { %v7069_v49 = vmul.f32 %v14872_v5, %v17751_v19  ;;  %v17754_v19 = vld [vmem:[#allocation15_spill] sm:$0xff]  ;;  %v15397_v4 = vadd.f32 %v14909_v44, %v7067_v10 }
 0x633   :  { %v5986_v45 = vadd.f32 %v15313_v41, %v5985_v34  ;;  %v6118_v42 = vadd.f32 %v6117_v15, %v6055_v28  ;;  %v7071_v34 = vmul.f32 %v14872_v5, %v14591_v48  ;;  %v7075_v15 = vmul.f32 %v14872_v5, %v14611_v61  ;;  %v17755_v41 = vld [vmem:[#allocation72_spill] sm:$0xff] }
 0x634   :  { %v7077_v48 = vmul.f32 %v14872_v5, %v14623_v55  ;;  %v7081_v61 = vmul.f32 %v14872_v5, %v14649_v18  ;;  %v7082_v1 = vmul.f32 %v14872_v5, %v17754_v19  ;;  %v7083_v55 = vmul.f32 %v14872_v5, %v14661_v0  ;;  %17763 = vst [vmem:[#allocation66_spill] sm:$0xff] %v15397_v4 }
 0x635   :  { %v5987_v52 = vrot.slane %v5986_v45, 4  ;;  %v6119_v47 = vadd.f32 %v6118_v42, %v6056_v27  ;;  %v17752_v42 = vld [vmem:[#allocation39_spill] sm:$0xff]  ;;  %v7084_v22 = vmul.f32 %v14872_v5, %v17755_v41  ;;  %v7087_v18 = vmul.f32 %v14872_v5, %v14685_v38 }
 0x636   :  { %v7079_v3 = vmul.f32 %v14872_v5, %v17752_v42  ;;  %v7085_v42 = vmul.f32 %v14872_v5, %v14673_v56  ;;  %v7088_v19 = vmul.f32 %v14872_v5, %v14691_v59  ;;  %v7089_v0 = vmul.f32 %v14872_v5, %v14697_v60 }
 0x637   :  { %v5988_v28 = vadd.f32 %v5987_v52, %v5986_v45  ;;  %v6120_v27 = vrot.slane %v6119_v47, 4  ;;  %v17753_v52 = vld [vmem:[#allocation14_spill] sm:$0xff]  ;;  %v7091_v56 = vmul.f32 %v14872_v5, %v14709_v29  ;;  %v7093_v38 = vmul.f32 %v14872_v5, %v17758_v37 }
 0x638   :  { %v7080_v17 = vmul.f32 %v14872_v5, %v17753_v52  ;;  %v7086_v52 = vmul.f32 %v14872_v5, %v14679_v36  ;;  %v7094_v59 = vmul.f32 %v14872_v5, %v17759_v32  ;;  %v7095_v60 = vmul.f32 %v14872_v5, %v17760_v30 }
 0x639   :  { %v5989_v45 = vrot.slane %v5988_v28, 2  ;;  %v6121_v6 = vadd.f32 %v6120_v27, %v6119_v47  ;;  %v17756_v27 = vld [vmem:[#allocation67_spill] sm:$0xff]  ;;  %v7097_v29 = vmul.f32 %v14872_v5, %v17762_v7  ;;  %v15403_v37 = vadd.f32 %v14909_v44, %v7069_v49 }
 0x63a   :  { %v7090_v41 = vmul.f32 %v14872_v5, %v17756_v27  ;;  %v7096_v27 = vmul.f32 %v14872_v5, %v17761_v39  ;;  %v15409_v30 = vadd.f32 %v14909_v44, %v7071_v34  ;;  %v15412_v39 = vadd.f32 %v14909_v44, %v7072_v40 }
 0x63b   :  { %v5990_v13 = vadd.f32 %v5989_v45, %v5988_v28  ;;  %v6122_v47 = vrot.slane %v6121_v6, 2  ;;  %v17757_v45 = vld [vmem:[#allocation68_spill] sm:$0xff]  ;;  %17765 = vst [vmem:[#allocation14_spill] sm:$0xff] %v15403_v37  ;;  %v15417_v7 = vadd.f32 %v14909_v44, %v7073_v62  ;;  %v15423_v49 = vadd.f32 %v14909_v44, %v7075_v15 }
 0x63c   :  { %v7092_v36 = vmul.f32 %v14872_v5, %v17757_v45  ;;  %v15400_v45 = vadd.f32 %v14909_v44, %v7068_v25  ;;  %17767 = vst [vmem:[#allocation72_spill] sm:$0xff] %v15409_v30  ;;  %17768 = vst [vmem:[#allocation67_spill] sm:$0xff] %v15412_v39  ;;  %v15426_v25 = vadd.f32 %v14909_v44, %v7076_v12 }
 0x63d   :  { %v5991_v28 = vrot.slane %v5990_v13, 1  ;;  %v6123_v14 = vadd.f32 %v6122_v47, %v6121_v6  ;;  %v15406_v6 = vadd.f32 %v14909_v44, %v7070_v8  ;;  %17769 = vst [vmem:[#allocation68_spill] sm:$0xff] %v15417_v7  ;;  %17771 = vst [vmem:[#allocation76_spill] sm:$0xff] %v15423_v49  ;;  %v15429_v8 = vadd.f32 %v14909_v44, %v7077_v48 }
 0x63e   :  { %17764 = vst [vmem:[#allocation39_spill] sm:$0xff] %v15400_v45  ;;  %17772 = vst [vmem:[#allocation30_spill] sm:$0xff] %v15426_v25  ;;  %v15432_v34 = vadd.f32 %v14909_v44, %v7078_v26  ;;  %v15437_v40 = vadd.f32 %v14909_v44, %v7079_v3  ;;  %v15440_v62 = vadd.f32 %v14909_v44, %v7080_v17 }
 0x63f   :  { %v5992_v2 = vadd.f32 %v5991_v28, %v5990_v13  ;;  %v6124_v32 = vrot.slane %v6123_v14, 1  ;;  %17766 = vst [vmem:[#allocation15_spill] sm:$0xff] %v15406_v6  ;;  %v15420_v13 = vadd.f32 %v14909_v44, %v7074_v16  ;;  %17773 = vst [vmem:[#allocation75_spill] sm:$0xff] %v15429_v8  ;;  %v15446_v15 = vadd.f32 %v14909_v44, %v7082_v1 }
 0x640   :  { %17774 = vst [vmem:[#allocation10_spill] sm:$0xff] %v15432_v34  ;;  %17775 = vst [vmem:[#allocation97_spill] sm:$0xff] %v15437_v40  ;;  %v15449_v12 = vadd.f32 %v14909_v44, %v7083_v55  ;;  %v15452_v48 = vadd.f32 %v14909_v44, %v7084_v22  ;;  %v15455_v26 = vadd.f32 %v14909_v44, %v7085_v42  ;;  %v17826_v40 = vld [vmem:[#allocation6_spill] sm:$0xff] }
 0x641   :  { %v15414_v5 = vmul.f32 0.001953125, %v5992_v2  ;;  %17770 = vst [vmem:[#allocation8_spill] sm:$0xff] %v15420_v13  ;;  %v6125_v10 = vadd.f32 %v6124_v32, %v6123_v14  ;;  %17776 = vst [vmem:[#allocation98_spill] sm:$0xff] %v15440_v62  ;;  %v15443_v14 = vadd.f32 %v14909_v44, %v7081_v61  ;;  %v15458_v3 = vadd.f32 %v14909_v44, %v7086_v52  ;;  %v17797_v32 = vld [vmem:[#allocation54_spill] sm:$0xff]  ;;  %v17825_v62 = vld [vmem:[#allocation69_spill] sm:$0xff] }
 0x642   :  { %17778 = vst [vmem:[#allocation100_spill] sm:$0xff] %v15446_v15  ;;  %17779 = vst [vmem:[#allocation101_spill] sm:$0xff] %v15449_v12  ;;  %v15461_v17 = vadd.f32 %v14909_v44, %v7087_v18  ;;  %v15464_v61 = vadd.f32 %v14909_v44, %v7088_v19  ;;  %v15467_v47 = vadd.f32 %v14909_v44, %v7089_v0  ;;  %v17822_v12 = vld [vmem:[#allocation23_spill] sm:$0xff] }
 0x643   :  { %v6128_v2 = vmul.f32 %v15414_v5, %v15414_v5  ;;  %17777 = vst [vmem:[#allocation99_spill] sm:$0xff] %v15443_v14  ;;  %v6127_v16 = vmul.f32 0.001953125, %v6125_v10  ;;  %17780 = vst [vmem:[#allocation102_spill] sm:$0xff] %v15452_v48  ;;  %v15470_v55 = vadd.f32 %v14909_v44, %v7090_v41  ;;  %v15473_v22 = vadd.f32 %v14909_v44, %v7091_v56  ;;  %v17801_v10 = vld [vmem:[#allocation21_spill] sm:$0xff]  ;;  %v17821_v48 = vld [vmem:[#allocation32_spill] sm:$0xff] }
 0x644   :  { %17781 = vst [vmem:[#allocation103_spill] sm:$0xff] %v15455_v26  ;;  %17782 = vst [vmem:[#allocation104_spill] sm:$0xff] %v15458_v3  ;;  %v15476_v42 = vadd.f32 %v14909_v44, %v7092_v36  ;;  %v15479_v52 = vadd.f32 %v14909_v44, %v7093_v38  ;;  %v15482_v18 = vadd.f32 %v14909_v44, %v7094_v59  ;;  %v17805_v59 = vld [vmem:[#allocation82_spill] sm:$0xff]  ;;  %v17806_v36 = vld [vmem:[#allocation84_spill] sm:$0xff] }
 0x645   :  { %17783 = vst [vmem:[#allocation105_spill] sm:$0xff] %v15461_v17  ;;  %17784 = vst [vmem:[#allocation106_spill] sm:$0xff] %v15464_v61  ;;  %v6129_v1 = vsub.f32 %v6127_v16, %v6128_v2  ;;  %v15485_v19 = vadd.f32 %v14909_v44, %v7095_v60  ;;  %v15488_v28 = vadd.f32 %v14909_v44, %v7096_v27  ;;  %v17799_v2 = vld [vmem:[#allocation53_spill] sm:$0xff]  ;;  %v17800_v16 = vld [vmem:[#allocation20_spill] sm:$0xff] }
 0x646   :  { %17785 = vst [vmem:[#allocation107_spill] sm:$0xff] %v15467_v47  ;;  %17786 = vst [vmem:[#allocation108_spill] sm:$0xff] %v15470_v55  ;;  %v15491_v41 = vadd.f32 %v14909_v44, %v7097_v29  ;;  %v17796_v29 = vld [vmem:[#allocation63_spill] sm:$0xff]  ;;  %v17802_v44 = vld [vmem:[#allocation26_spill] sm:$0xff]  ;;  %v6160_v8 = vsub.f32 %v17821_v48, %v15414_v5  ;;  %v6161_v25 = vsub.f32 %v17822_v12, %v15414_v5 }
 0x647   :  { %17787 = vst [vmem:[#allocation109_spill] sm:$0xff] %v15473_v22  ;;  %17788 = vst [vmem:[#allocation110_spill] sm:$0xff] %v15476_v42  ;;  %v6130_v0 = vmax.f32 %v6129_v1, 0.0  ;;  %v17794_v1 = vld [vmem:[#allocation55_spill] sm:$0xff]  ;;  %v17804_v60 = vld [vmem:[#allocation85_spill] sm:$0xff]  ;;  %v6164_v7 = vsub.f32 %v17825_v62, %v15414_v5  ;;  %v6165_v39 = vsub.f32 %v17826_v40, %v15414_v5 }
 0x648   :  { %17789 = vst [vmem:[#allocation111_spill] sm:$0xff] %v15479_v52  ;;  %17790 = vst [vmem:[#allocation112_spill] sm:$0xff] %v15482_v18  ;;  %v17803_v27 = vld [vmem:[#allocation83_spill] sm:$0xff]  ;;  %v17817_v61 = vld [vmem:[#allocation24_spill] sm:$0xff] }
 0x649   :  { %17791 = vst [vmem:[#allocation113_spill] sm:$0xff] %v15485_v19  ;;  %17792 = vst [vmem:[#allocation114_spill] sm:$0xff] %v15488_v28  ;;  %v6195_v38 = vadd.f32 1e-05, %v6130_v0  ;;  %v17795_v0 = vld [vmem:[#allocation49_spill] sm:$0xff]  ;;  %v17816_v47 = vld [vmem:[#allocation19_spill] sm:$0xff]  ;;  %v6158_v14 = vsub.f32 %v17817_v61, %v15414_v5 }
 0x64a   :  { %17793 = vst [vmem:[#allocation115_spill] sm:$0xff] %v15491_v41  ;;  %v6157_v15 = vsub.f32 %v17816_v47, %v15414_v5  ;;  %v17820_v26 = vld [vmem:[#allocation25_spill] sm:$0xff]  ;;  %v17823_v47 = vld [vmem:[#allocation28_spill] sm:$0xff]  ;;  %v17824_v61 = vld [vmem:[#allocation11_spill] sm:$0xff]  ;;  %v17841_v41 = vsub.f32 %v14946_v58, %v15414_v5  ;;  %v17845_v58 = vsub.f32 %v14969_v23, %v15414_v5 }
 0x64b   :  { %9027 = vrsqrt.f32 %v6195_v38  ;;  %v17798_v38 = vld [vmem:[#allocation22_spill] sm:$0xff]  ;;  %v6159_v34 = vsub.f32 %v17820_v26, %v15414_v5  ;;  %v6162_v49 = vsub.f32 %v17823_v47, %v15414_v5  ;;  %v6163_v13 = vsub.f32 %v17824_v61, %v15414_v5  ;;  %v17830_v47 = vld [vmem:[#allocation64_spill] sm:$0xff]  ;;  %v17831_v61 = vld [vmem:[#allocation61_spill] sm:$0xff] }
 0x64c   :  { %v17827_v26 = vld [vmem:[#allocation70_spill] sm:$0xff]  ;;  %v6169_v45 = vsub.f32 %v17830_v47, %v15414_v5  ;;  %v6170_v4 = vsub.f32 %v17831_v61, %v15414_v5  ;;  %v17836_v47 = vld [vmem:[#allocation57_spill] sm:$0xff] }
 0x64d   :  { %v6166_v30 = vsub.f32 %v17827_v26, %v15414_v5  ;;  %v17828_v48 = vld [vmem:[#allocation38_spill] sm:$0xff]  ;;  %v17834_v26 = vld [vmem:[#allocation36_spill] sm:$0xff]  ;;  %v6175_v61 = vsub.f32 %v17836_v47, %v15414_v5  ;;  %v17842_v47 = vsub.f32 %v15004_v46, %v15414_v5  ;;  %v17846_v46 = vsub.f32 %v15026_v53, %v15414_v5 }
 0x64e   :  { %v6167_v6 = vsub.f32 %v17828_v48, %v15414_v5  ;;  %v17829_v12 = vld [vmem:[#allocation58_spill] sm:$0xff]  ;;  %v6173_v55 = vsub.f32 %v17834_v26, %v15414_v5  ;;  %v17835_v48 = vld [vmem:[#allocation37_spill] sm:$0xff]  ;;  %v17839_v26 = vld [vmem:[#allocation56_spill] sm:$0xff]  ;;  %v17849_v53 = vsub.f32 %v15031_v54, %v15414_v5 }
 0x64f   :  { %v6168_v37 = vsub.f32 %v17829_v12, %v15414_v5  ;;  %v17832_v62 = vld [vmem:[#allocation62_spill] sm:$0xff]  ;;  %v6174_v22 = vsub.f32 %v17835_v48, %v15414_v5  ;;  %v6178_v19 = vsub.f32 %v17839_v26, %v15414_v5  ;;  %v17840_v48 = vsub.f32 %v15319_v43, %v15414_v5 }
 0x650   :  { %v6171_v3 = vsub.f32 %v17832_v62, %v15414_v5  ;;  %v17833_v40 = vld [vmem:[#allocation18_spill] sm:$0xff]  ;;  %v17837_v62 = vld [vmem:[#allocation81_spill] sm:$0xff] }
 0x651   :  { %v6172_v17 = vsub.f32 %v17833_v40, %v15414_v5  ;;  %v15618_v12 = vld [vmem:[%s16789_s8] ss:$0 sm:$0xff]  ;;  %v6176_v52 = vsub.f32 %v17837_v62, %v15414_v5  ;;  %v17838_v40 = vld [vmem:[#allocation71_spill] sm:$0xff] }
 0x652   :  { %v6177_v18 = vsub.f32 %v17838_v40, %v15414_v5  ;;  %v17843_v40 = vsub.f32 %v14923_v51, %v15414_v5  ;;  %v15653_v43 = vld [vmem:[%s16790_s9] ss:$0 sm:$0xff]  ;;  %v17847_v51 = vsub.f32 %v15036_v24, %v15414_v5  ;;  %v17850_v24 = vsub.f32 %v15046_v35, %v15414_v5  ;;  %s9066_s9 = smov [#allocation3]  }
 0x653   :  { %17844 = vst [vmem:[#allocation55_spill] sm:$0xff] %v15653_v43  ;;  %s7398_s17 = sshll.u32 %s9066_s9, 4  ;;  %s16767_s17 = int_to_ptr.vmem [resolvable:$true] %s7398_s17 }
 0x654   :  { %s9039_s20 = scalar_lea.vmem %s16767_s17, 8192  ;;  %p9044_p1 = scmp.lt.s32.totalorder %s16767_s17, %s16767_s17 }
 0x655   :  { %p9040_p0 = scmp.ne.s32.totalorder %s16767_s17, %s9039_s20  ;;  %p9045_p2 = scmp.lt.s32.totalorder %s9039_s20, %s9039_s20 }
 0x657   :  { %p9046_p3 = por %p9045_p2, %p9044_p1 }
 0x658   :  { %v15613_v42 = vpop.eup %9027 }
 0x659   :  { %v6258_v28 = vmul.f32 %v15613_v42, %v17840_v48  ;;  %v15636_v56 = vmul.f32 %v15613_v42, %v17841_v41  ;;  %v15642_v62 = vmul.f32 %v15613_v42, %v17842_v47  ;;  %v15648_v26 = vmul.f32 %v15613_v42, %v17843_v40  ;;  %p9047_p4 = pnand %p9046_p3, %p9040_p0 }
 0x65a   :  { %v15659_v41 = vmul.f32 %v15613_v42, %v17845_v58  ;;  %v15665_v48 = vmul.f32 %v15613_v42, %v17846_v46  ;;  %v15671_v47 = vmul.f32 %v15613_v42, %v17847_v51  ;;  %v17848_v40 = vsub.f32 %v15021_v20, %v15414_v5 }
 0x65b   :  { %v6328_v58 = vmul.f32 %v15618_v12, %v6258_v28  ;;  %v15684_v46 = vmul.f32 %v15613_v42, %v17849_v53  ;;  %v15690_v51 = vmul.f32 %v15613_v42, %v17850_v24  ;;  %v17851_v20 = vsub.f32 %v15056_v63, %v15414_v5 }
 0x65c   :  { %v15677_v23 = vmul.f32 %v15613_v42, %v17848_v40  ;;  %v17852_v28 = vsub.f32 %v15041_v50, %v15414_v5  ;;  %v17853_v53 = vsub.f32 %v15051_v21, %v15414_v5  ;;  %v17854_v24 = vsub.f32 %v15066_v57, %v15414_v5 }
 0x65d   :  { %v15696_v40 = vmul.f32 %v15613_v42, %v17851_v20  ;;  %v17855_v20 = vsub.f32 %v15076_v9, %v15414_v5  ;;  %v17856_v21 = vsub.f32 %v15061_v11, %v15414_v5  ;;  %v17857_v57 = vsub.f32 %v15071_v33, %v15414_v5 }
 0x65e   :  { %v15702_v54 = vmul.f32 %v15613_v42, %v17852_v28  ;;  %v15708_v35 = vmul.f32 %v15613_v42, %v17853_v53  ;;  %v15714_v63 = vmul.f32 %v15613_v42, %v17854_v24  ;;  %v6398_v28 = vadd.f32 %v15653_v43, %v6328_v58 }
 0x65f   :  { %v15720_v50 = vmul.f32 %v15613_v42, %v17855_v20  ;;  %v15727_v53 = vmul.f32 %v15613_v42, %v17856_v21  ;;  %v15733_v24 = vmul.f32 %v15613_v42, %v17857_v57  ;;  %v17858_v9 = vsub.f32 %v15086_v31, %v15414_v5 }
 0x660   :  { %v17859_v58 = vsub.f32 %v17794_v1, %v15414_v5  ;;  %v17860_v21 = vsub.f32 %v17795_v0, %v15414_v5  ;;  %v17861_v57 = vsub.f32 %v17796_v29, %v15414_v5  ;;  %v17864_v0 = vsub.f32 %v17798_v38, %v15414_v5 }
 0x661   :  { %v15739_v20 = vmul.f32 %v15613_v42, %v17858_v9  ;;  %v17862_v9 = vsub.f32 %v17797_v32, %v15414_v5  ;;  %v17865_v29 = vsub.f32 %v17799_v2, %v15414_v5  ;;  %v17866_v32 = vsub.f32 %v17800_v16, %v15414_v5 }
 0x662   :  { %v15745_v11 = vmul.f32 %v15613_v42, %v17859_v58  ;;  %v15751_v33 = vmul.f32 %v15613_v42, %v17860_v21  ;;  %v15757_v31 = vmul.f32 %v15613_v42, %v17861_v57  ;;  %v17863_v58 = vld [vmem:[#allocation96_spill] sm:$0xff]  ;;  %v15770_v21 = vmul.f32 %v15613_v42, %v17864_v0 }
 0x663   :  { %v15763_v1 = vmul.f32 %v15613_v42, %v17862_v9  ;;  %v7262_v43 = vadd.f32 %v17863_v58, %v6398_v28  ;;  %v15776_v57 = vmul.f32 %v15613_v42, %v17865_v29  ;;  %v15782_v9 = vmul.f32 %v15613_v42, %v17866_v32 }
 0x664   :  { %v17867_v28 = vsub.f32 %v17801_v10, %v15414_v5  ;;  %v17868_v58 = vsub.f32 %v17802_v44, %v15414_v5  ;;  %v15797_v0 = vmul.f32 %v15613_v42, %v6157_v15  ;;  %v15800_v16 = vmul.f32 %v15613_v42, %v6158_v14 }
 0x665   :  { %v7326_v29 = vmax.f32 %v7262_v43, 0.0  ;;  %v15803_v32 = vmul.f32 %v15613_v42, %v6159_v34  ;;  %v15806_v10 = vmul.f32 %v15613_v42, %v6160_v8  ;;  %v15812_v44 = vmul.f32 %v15613_v42, %v6162_v49  ;;  %v17875_v43 = vld [vmem:[#allocation87_spill] sm:$0xff] }
 0x666   :  { %v15788_v38 = vmul.f32 %v15613_v42, %v17867_v28  ;;  %v15794_v2 = vmul.f32 %v15613_v42, %v17868_v58  ;;  %v15809_v28 = vmul.f32 %v15613_v42, %v6161_v25  ;;  %v15815_v58 = vmul.f32 %v15613_v42, %v6163_v13 }
 0x667   :  { %v15818_v15 = vmul.f32 %v15613_v42, %v6164_v7  ;;  %v15821_v14 = vmul.f32 %v15613_v42, %v6165_v39  ;;  %7390 = vst [vmem:[#allocation3 + $0x1e8] sm:$0xff] %v7326_v29  ;;  %v15824_v34 = vmul.f32 %v15613_v42, %v6166_v30  ;;  %v15827_v8 = vmul.f32 %v15613_v42, %v6167_v6 }
 0x668   :  { %v15830_v25 = vmul.f32 %v15613_v42, %v6168_v37  ;;  %v15833_v49 = vmul.f32 %v15613_v42, %v6169_v45  ;;  %v15836_v13 = vmul.f32 %v15613_v42, %v6170_v4  ;;  %v15839_v7 = vmul.f32 %v15613_v42, %v6171_v3 }
 0x669   :  { %v15842_v39 = vmul.f32 %v15613_v42, %v6172_v17  ;;  %v15845_v30 = vmul.f32 %v15613_v42, %v6173_v55  ;;  %v15848_v6 = vmul.f32 %v15613_v42, %v6174_v22  ;;  %v15851_v37 = vmul.f32 %v15613_v42, %v6175_v61 }
 0x66a   :  { %v15854_v45 = vmul.f32 %v15613_v42, %v6176_v52  ;;  %v15857_v4 = vmul.f32 %v15613_v42, %v6177_v18  ;;  %v15860_v3 = vmul.f32 %v15613_v42, %v6178_v19  ;;  %v17869_v17 = vsub.f32 %v17803_v27, %v15414_v5 }
 0x66b   :  { %v17870_v22 = vsub.f32 %v17804_v60, %v15414_v5  ;;  %v17871_v52 = vsub.f32 %v17805_v59, %v15414_v5  ;;  %v17873_v19 = vsub.f32 %v17806_v36, %v15414_v5  ;;  %v17876_v29 = vsub.f32 %v17875_v43, %v15414_v5 }
 0x66c   :  { %v15866_v55 = vmul.f32 %v15613_v42, %v17869_v17  ;;  %v17878_v17 = vld [vmem:[#allocation89_spill] sm:$0xff] }
 0x66d   :  { %v15872_v61 = vmul.f32 %v15613_v42, %v17870_v22  ;;  %v15878_v18 = vmul.f32 %v15613_v42, %v17871_v52  ;;  %v15884_v27 = vmul.f32 %v15613_v42, %v17873_v19  ;;  %v15890_v60 = vmul.f32 %v15613_v42, %v17876_v29  ;;  %v17881_v52 = vld [vmem:[#allocation86_spill] sm:$0xff]  ;;  %v17884_v19 = vld [vmem:[#allocation88_spill] sm:$0xff]  ;;  %v17887_v29 = vld [vmem:[#allocation91_spill] sm:$0xff] }
 0x66e   :  { %v17879_v22 = vsub.f32 %v17878_v17, %v15414_v5 }
 0x66f   :  { %17872 = vst [vmem:[#allocation49_spill] sm:$0xff] %v15878_v18  ;;  %17874 = vst [vmem:[#allocation63_spill] sm:$0xff] %v15884_v27  ;;  %v17882_v18 = vsub.f32 %v17881_v52, %v15414_v5  ;;  %v17885_v27 = vsub.f32 %v17884_v19, %v15414_v5 }
 0x670   :  { %17877 = vst [vmem:[#allocation54_spill] sm:$0xff] %v15890_v60  ;;  %v15896_v59 = vmul.f32 %v15613_v42, %v17879_v22  ;;  %v17888_v60 = vsub.f32 %v17887_v29, %v15414_v5  ;;  %v17890_v22 = vld [vmem:[#allocation93_spill] sm:$0xff] }
 0x671   :  { %v15902_v36 = vmul.f32 %v15613_v42, %v17882_v18  ;;  %v15908_v43 = vmul.f32 %v15613_v42, %v17885_v27  ;;  %v17893_v18 = vld [vmem:[#allocation90_spill] sm:$0xff]  ;;  %v17896_v27 = vld [vmem:[#allocation92_spill] sm:$0xff] }
 0x672   :  { %17880 = vst [vmem:[#allocation22_spill] sm:$0xff] %v15896_v59  ;;  %v15914_v17 = vmul.f32 %v15613_v42, %v17888_v60  ;;  %v17891_v59 = vsub.f32 %v17890_v22, %v15414_v5  ;;  %v17898_v60 = vld [vmem:[#allocation41_spill] sm:$0xff] }
 0x673   :  { %17883 = vst [vmem:[#allocation53_spill] sm:$0xff] %v15902_v36  ;;  %17886 = vst [vmem:[#allocation20_spill] sm:$0xff] %v15908_v43  ;;  %v17894_v36 = vsub.f32 %v17893_v18, %v15414_v5  ;;  %v17897_v43 = vsub.f32 %v17896_v27, %v15414_v5 }
 0x674   :  { %17889 = vst [vmem:[#allocation21_spill] sm:$0xff] %v15914_v17  ;;  %v15920_v52 = vmul.f32 %v15613_v42, %v17891_v59  ;;  %v17899_v17 = vsub.f32 %v17898_v60, %v15414_v5  ;;  %v17900_v59 = vld [vmem:[#allocation94_spill] sm:$0xff]  ;;  %v15962_v60 = vmul.f32 %v15618_v12, %v15648_v26  ;;  %v15986_v26 = vmul.f32 %v15618_v12, %v15690_v51 }
 0x675   :  { %v15926_v19 = vmul.f32 %v15613_v42, %v17894_v36  ;;  %v15932_v29 = vmul.f32 %v15613_v42, %v17897_v43  ;;  %v17902_v36 = vld [vmem:[#allocation95_spill] sm:$0xff]  ;;  %v15954_v43 = vmul.f32 %v15618_v12, %v15636_v56  ;;  %v15978_v56 = vmul.f32 %v15618_v12, %v15677_v23 }
 0x676   :  { %17892 = vst [vmem:[#allocation26_spill] sm:$0xff] %v15920_v52  ;;  %v15938_v22 = vmul.f32 %v15613_v42, %v17899_v17  ;;  %v17901_v52 = vsub.f32 %v17900_v59, %v15414_v5  ;;  %v15958_v17 = vmul.f32 %v15618_v12, %v15642_v62  ;;  %v15982_v62 = vmul.f32 %v15618_v12, %v15684_v46 }
 0x677   :  { %17895 = vst [vmem:[#allocation83_spill] sm:$0xff] %v15926_v19  ;;  %v17903_v19 = vsub.f32 %v17902_v36, %v15414_v5  ;;  %v15970_v5 = vmul.f32 %v15618_v12, %v15665_v48  ;;  %v15994_v48 = vmul.f32 %v15618_v12, %v15702_v54  ;;  %v16002_v23 = vmul.f32 %v15618_v12, %v15714_v63  ;;  %v17910_v59 = vld [vmem:[#allocation54_spill] sm:$0xff] }
 0x678   :  { %v15944_v18 = vmul.f32 %v15613_v42, %v17901_v52  ;;  %v15966_v52 = vmul.f32 %v15618_v12, %v15659_v41  ;;  %v15990_v41 = vmul.f32 %v15618_v12, %v15696_v40  ;;  %v16006_v46 = vmul.f32 %v15618_v12, %v15720_v50 }
 0x679   :  { %v15950_v27 = vmul.f32 %v15613_v42, %v17903_v19  ;;  %v15974_v42 = vmul.f32 %v15618_v12, %v15671_v47  ;;  %v15998_v47 = vmul.f32 %v15618_v12, %v15708_v35  ;;  %v16010_v51 = vmul.f32 %v15618_v12, %v15727_v53  ;;  %v17908_v19 = vld [vmem:[#allocation63_spill] sm:$0xff]  ;;  %v17912_v36 = vld [vmem:[#allocation22_spill] sm:$0xff] }
 0x67a   :  { %v16014_v40 = vmul.f32 %v15618_v12, %v15733_v24  ;;  %v16018_v54 = vmul.f32 %v15618_v12, %v15739_v20  ;;  %v16022_v35 = vmul.f32 %v15618_v12, %v15745_v11  ;;  %v16026_v63 = vmul.f32 %v15618_v12, %v15751_v33 }
 0x67b   :  { %v16030_v50 = vmul.f32 %v15618_v12, %v15757_v31  ;;  %v16034_v53 = vmul.f32 %v15618_v12, %v15763_v1  ;;  %v16038_v24 = vmul.f32 %v15618_v12, %v15770_v21  ;;  %v16042_v20 = vmul.f32 %v15618_v12, %v15776_v57 }
 0x67c   :  { %v16046_v11 = vmul.f32 %v15618_v12, %v15782_v9  ;;  %v16050_v33 = vmul.f32 %v15618_v12, %v15788_v38  ;;  %v16054_v31 = vmul.f32 %v15618_v12, %v15794_v2  ;;  %v16058_v1 = vmul.f32 %v15618_v12, %v15797_v0 }
 0x67d   :  { %v16062_v21 = vmul.f32 %v15618_v12, %v15800_v16  ;;  %v16066_v57 = vmul.f32 %v15618_v12, %v15803_v32  ;;  %v16070_v9 = vmul.f32 %v15618_v12, %v15806_v10  ;;  %v16074_v38 = vmul.f32 %v15618_v12, %v15809_v28 }
 0x67e   :  { %v16078_v2 = vmul.f32 %v15618_v12, %v15812_v44  ;;  %v16082_v0 = vmul.f32 %v15618_v12, %v15815_v58  ;;  %v16086_v16 = vmul.f32 %v15618_v12, %v15818_v15  ;;  %v16090_v32 = vmul.f32 %v15618_v12, %v15821_v14 }
 0x67f   :  { %v16094_v10 = vmul.f32 %v15618_v12, %v15824_v34  ;;  %v16098_v28 = vmul.f32 %v15618_v12, %v15827_v8  ;;  %v16102_v44 = vmul.f32 %v15618_v12, %v15830_v25  ;;  %v16106_v58 = vmul.f32 %v15618_v12, %v15833_v49 }
 0x680   :  { %v16110_v15 = vmul.f32 %v15618_v12, %v15836_v13  ;;  %v16114_v14 = vmul.f32 %v15618_v12, %v15839_v7  ;;  %v16118_v34 = vmul.f32 %v15618_v12, %v15842_v39  ;;  %v16122_v8 = vmul.f32 %v15618_v12, %v15845_v30 }
 0x681   :  { %v16126_v25 = vmul.f32 %v15618_v12, %v15848_v6  ;;  %v16130_v49 = vmul.f32 %v15618_v12, %v15851_v37  ;;  %v16134_v13 = vmul.f32 %v15618_v12, %v15854_v45  ;;  %v16138_v7 = vmul.f32 %v15618_v12, %v15857_v4  ;;  %v17906_v37 = vld [vmem:[#allocation49_spill] sm:$0xff] }
 0x682   :  { %v16142_v39 = vmul.f32 %v15618_v12, %v15860_v3  ;;  %v16146_v30 = vmul.f32 %v15618_v12, %v15866_v55  ;;  %v16150_v6 = vmul.f32 %v15618_v12, %v15872_v61  ;;  %v16154_v45 = vmul.f32 %v15618_v12, %v17906_v37 }
 0x683   :  { %v16158_v4 = vmul.f32 %v15618_v12, %v17908_v19  ;;  %v16162_v3 = vmul.f32 %v15618_v12, %v17910_v59  ;;  %v16166_v55 = vmul.f32 %v15618_v12, %v17912_v36 }
 0x684   :  { %17904 = vst [vmem:[#allocation85_spill] sm:$0xff] %v16146_v30  ;;  %17905 = vst [vmem:[#allocation82_spill] sm:$0xff] %v16150_v6  ;;  %v17913_v30 = vld [vmem:[#allocation53_spill] sm:$0xff]  ;;  %v17914_v6 = vld [vmem:[#allocation20_spill] sm:$0xff] }
 0x685   :  { %17907 = vst [vmem:[#allocation84_spill] sm:$0xff] %v16154_v45  ;;  %17909 = vst [vmem:[#allocation19_spill] sm:$0xff] %v16158_v4  ;;  %v16170_v61 = vmul.f32 %v15618_v12, %v17913_v30  ;;  %v16174_v37 = vmul.f32 %v15618_v12, %v17914_v6  ;;  %v17915_v45 = vld [vmem:[#allocation21_spill] sm:$0xff]  ;;  %v17916_v4 = vld [vmem:[#allocation26_spill] sm:$0xff]  ;;  %v16190_v30 = vmul.f32 %v15618_v12, %v15932_v29 }
 0x686   :  { %17911 = vst [vmem:[#allocation24_spill] sm:$0xff] %v16162_v3  ;;  %v16178_v19 = vmul.f32 %v15618_v12, %v17915_v45  ;;  %v16182_v59 = vmul.f32 %v15618_v12, %v17916_v4  ;;  %v17918_v3 = vld [vmem:[#allocation83_spill] sm:$0xff]  ;;  %v16194_v6 = vmul.f32 %v15618_v12, %v15938_v22  ;;  %v16198_v45 = vmul.f32 %v15618_v12, %v15944_v18 }
 0x687   :  { %v16186_v36 = vmul.f32 %v15618_v12, %v17918_v3  ;;  %v16202_v4 = vmul.f32 %v15618_v12, %v15950_v27 }
 0x688   :  { %17917 = vst [vmem:[#allocation25_spill] sm:$0xff] %v16182_v59  ;;  %v17919_v59 = vld [vmem:[#allocation55_spill] sm:$0xff] }
 0x689   :  { %v16206_v3 = vadd.f32 %v17919_v59, %v15954_v43  ;;  %v16210_v29 = vadd.f32 %v17919_v59, %v15958_v17  ;;  %v16214_v22 = vadd.f32 %v17919_v59, %v15962_v60  ;;  %v16218_v18 = vadd.f32 %v17919_v59, %v15966_v52 }
 0x68a   :  { %v16222_v12 = vadd.f32 %v17919_v59, %v15970_v5  ;;  %v16226_v27 = vadd.f32 %v17919_v59, %v15974_v42  ;;  %v16230_v43 = vadd.f32 %v17919_v59, %v15978_v56  ;;  %v16234_v17 = vadd.f32 %v17919_v59, %v15982_v62 }
 0x68b   :  { %v16238_v60 = vadd.f32 %v17919_v59, %v15986_v26  ;;  %v16242_v52 = vadd.f32 %v17919_v59, %v15990_v41  ;;  %v16246_v5 = vadd.f32 %v17919_v59, %v15994_v48  ;;  %v16250_v42 = vadd.f32 %v17919_v59, %v15998_v47 }
 0x68c   :  { %v16254_v56 = vadd.f32 %v17919_v59, %v16002_v23  ;;  %v16258_v62 = vadd.f32 %v17919_v59, %v16006_v46  ;;  %v16262_v26 = vadd.f32 %v17919_v59, %v16010_v51  ;;  %v16266_v41 = vadd.f32 %v17919_v59, %v16014_v40 }
 0x68d   :  { %v16270_v48 = vadd.f32 %v17919_v59, %v16018_v54  ;;  %v16274_v47 = vadd.f32 %v17919_v59, %v16022_v35  ;;  %v16278_v23 = vadd.f32 %v17919_v59, %v16026_v63  ;;  %v16282_v46 = vadd.f32 %v17919_v59, %v16030_v50 }
 0x68e   :  { %v16286_v51 = vadd.f32 %v17919_v59, %v16034_v53  ;;  %v16290_v40 = vadd.f32 %v17919_v59, %v16038_v24  ;;  %v16294_v54 = vadd.f32 %v17919_v59, %v16042_v20  ;;  %v16298_v35 = vadd.f32 %v17919_v59, %v16046_v11 }
 0x68f   :  { %v16302_v63 = vadd.f32 %v17919_v59, %v16050_v33  ;;  %v16306_v50 = vadd.f32 %v17919_v59, %v16054_v31  ;;  %v16310_v53 = vadd.f32 %v17919_v59, %v16058_v1  ;;  %v16314_v24 = vadd.f32 %v17919_v59, %v16062_v21 }
 0x690   :  { %v16318_v20 = vadd.f32 %v17919_v59, %v16066_v57  ;;  %v16322_v11 = vadd.f32 %v17919_v59, %v16070_v9  ;;  %v16326_v33 = vadd.f32 %v17919_v59, %v16074_v38  ;;  %v16330_v31 = vadd.f32 %v17919_v59, %v16078_v2 }
 0x691   :  { %v16334_v1 = vadd.f32 %v17919_v59, %v16082_v0  ;;  %v16338_v21 = vadd.f32 %v17919_v59, %v16086_v16  ;;  %v16342_v57 = vadd.f32 %v17919_v59, %v16090_v32  ;;  %v16346_v9 = vadd.f32 %v17919_v59, %v16094_v10 }
 0x692   :  { %v16350_v38 = vadd.f32 %v17919_v59, %v16098_v28  ;;  %v16354_v2 = vadd.f32 %v17919_v59, %v16102_v44  ;;  %v16358_v0 = vadd.f32 %v17919_v59, %v16106_v58  ;;  %v16362_v16 = vadd.f32 %v17919_v59, %v16110_v15 }
 0x693   :  { %v16366_v32 = vadd.f32 %v17919_v59, %v16114_v14  ;;  %v16370_v10 = vadd.f32 %v17919_v59, %v16118_v34  ;;  %v16374_v28 = vadd.f32 %v17919_v59, %v16122_v8  ;;  %v16378_v44 = vadd.f32 %v17919_v59, %v16126_v25  ;;  %v17924_v8 = vld [vmem:[#allocation85_spill] sm:$0xff] }
 0x694   :  { %v16382_v58 = vadd.f32 %v17919_v59, %v16130_v49  ;;  %v16386_v15 = vadd.f32 %v17919_v59, %v16134_v13  ;;  %v16390_v14 = vadd.f32 %v17919_v59, %v16138_v7  ;;  %v16394_v34 = vadd.f32 %v17919_v59, %v16142_v39 }
 0x695   :  { %17920 = vst [vmem:[#allocation32_spill] sm:$0xff] %v16378_v44  ;;  %v16398_v25 = vadd.f32 %v17919_v59, %v17924_v8  ;;  %v17925_v44 = vld [vmem:[#allocation82_spill] sm:$0xff]  ;;  %v16418_v8 = vadd.f32 %v17919_v59, %v16166_v55  ;;  %v16438_v55 = vadd.f32 %v17919_v59, %v16186_v36 }
 0x696   :  { %17921 = vst [vmem:[#allocation23_spill] sm:$0xff] %v16382_v58  ;;  %17922 = vst [vmem:[#allocation28_spill] sm:$0xff] %v16386_v15  ;;  %v16402_v49 = vadd.f32 %v17919_v59, %v17925_v44  ;;  %v17926_v58 = vld [vmem:[#allocation84_spill] sm:$0xff]  ;;  %v17927_v15 = vld [vmem:[#allocation19_spill] sm:$0xff]  ;;  %v16422_v44 = vadd.f32 %v17919_v59, %v16170_v61  ;;  %v16442_v61 = vadd.f32 %v17919_v59, %v16190_v30 }
 0x697   :  { %17923 = vst [vmem:[#allocation11_spill] sm:$0xff] %v16390_v14  ;;  %v16406_v13 = vadd.f32 %v17919_v59, %v17926_v58  ;;  %v16410_v7 = vadd.f32 %v17919_v59, %v17927_v15  ;;  %v17929_v14 = vld [vmem:[#allocation24_spill] sm:$0xff]  ;;  %v16426_v58 = vadd.f32 %v17919_v59, %v16174_v37  ;;  %v16430_v15 = vadd.f32 %v17919_v59, %v16178_v19 }
 0x698   :  { %v16414_v39 = vadd.f32 %v17919_v59, %v17929_v14  ;;  %17932 = vst [vmem:[#allocation70_spill] sm:$0xff] %v16438_v55  ;;  %17933 = vst [vmem:[#allocation38_spill] sm:$0xff] %v16442_v61  ;;  %v16446_v37 = vadd.f32 %v17919_v59, %v16194_v6  ;;  %v16450_v19 = vadd.f32 %v17919_v59, %v16198_v45  ;;  %v17937_v55 = vld [vmem:[#allocation39_spill] sm:$0xff]  ;;  %v17938_v61 = vld [vmem:[#allocation14_spill] sm:$0xff] }
 0x699   :  { %17928 = vst [vmem:[#allocation69_spill] sm:$0xff] %v16410_v7  ;;  %v17930_v7 = vld [vmem:[#allocation25_spill] sm:$0xff]  ;;  %v16462_v30 = vadd.f32 %v17937_v55, %v16210_v29  ;;  %v16466_v6 = vadd.f32 %v17938_v61, %v16214_v22  ;;  %v17943_v55 = vld [vmem:[#allocation8_spill] sm:$0xff] }
 0x69a   :  { %v16434_v14 = vadd.f32 %v17919_v59, %v17930_v7  ;;  %17934 = vst [vmem:[#allocation58_spill] sm:$0xff] %v16446_v37  ;;  %17935 = vst [vmem:[#allocation64_spill] sm:$0xff] %v16450_v19  ;;  %v16454_v7 = vadd.f32 %v17919_v59, %v16202_v4  ;;  %v17939_v37 = vld [vmem:[#allocation15_spill] sm:$0xff]  ;;  %v17940_v19 = vld [vmem:[#allocation72_spill] sm:$0xff]  ;;  %v16486_v22 = vadd.f32 %v17943_v55, %v16234_v17 }
 0x69b   :  { %v16470_v45 = vadd.f32 %v17939_v37, %v16218_v18  ;;  %v16474_v59 = vadd.f32 %v17940_v19, %v16222_v12  ;;  %v17941_v4 = vld [vmem:[#allocation67_spill] sm:$0xff]  ;;  %v17944_v61 = vld [vmem:[#allocation76_spill] sm:$0xff]  ;;  %v17945_v37 = vld [vmem:[#allocation30_spill] sm:$0xff] }
 0x69c   :  { %17931 = vst [vmem:[#allocation6_spill] sm:$0xff] %v16434_v14  ;;  %v17936_v14 = vld [vmem:[#allocation66_spill] sm:$0xff]  ;;  %v16490_v18 = vadd.f32 %v17944_v61, %v16238_v60  ;;  %v16494_v12 = vadd.f32 %v17945_v37, %v16242_v52  ;;  %v17946_v19 = vld [vmem:[#allocation75_spill] sm:$0xff]  ;;  %v17951_v37 = vld [vmem:[#allocation100_spill] sm:$0xff] }
 0x69d   :  { %v16458_v36 = vadd.f32 %v17936_v14, %v16206_v3  ;;  %v16478_v3 = vadd.f32 %v17941_v4, %v16226_v27  ;;  %v17942_v14 = vld [vmem:[#allocation68_spill] sm:$0xff]  ;;  %v16498_v27 = vadd.f32 %v17946_v19, %v16246_v5  ;;  %v17947_v4 = vld [vmem:[#allocation10_spill] sm:$0xff]  ;;  %v17950_v61 = vld [vmem:[#allocation99_spill] sm:$0xff]  ;;  %v16518_v5 = vadd.f32 %v17951_v37, %v16266_v41 }
 0x69e   :  { %v16482_v29 = vadd.f32 %v17942_v14, %v16230_v43  ;;  %v16502_v43 = vadd.f32 %v17947_v4, %v16250_v42  ;;  %v17948_v14 = vld [vmem:[#allocation97_spill] sm:$0xff]  ;;  %v17949_v55 = vld [vmem:[#allocation98_spill] sm:$0xff]  ;;  %v16514_v52 = vadd.f32 %v17950_v61, %v16262_v26 }
 0x69f   :  { %v16506_v17 = vadd.f32 %v17948_v14, %v16254_v56  ;;  %v16510_v60 = vadd.f32 %v17949_v55, %v16258_v62  ;;  %v17952_v19 = vld [vmem:[#allocation101_spill] sm:$0xff]  ;;  %v17953_v4 = vld [vmem:[#allocation102_spill] sm:$0xff]  ;;  %v17954_v14 = vld [vmem:[#allocation103_spill] sm:$0xff] }
 0x6a0   :  { %v16522_v42 = vadd.f32 %v17952_v19, %v16270_v48  ;;  %v16526_v56 = vadd.f32 %v17953_v4, %v16274_v47  ;;  %v16530_v62 = vadd.f32 %v17954_v14, %v16278_v23  ;;  %v17955_v55 = vld [vmem:[#allocation104_spill] sm:$0xff]  ;;  %v17956_v61 = vld [vmem:[#allocation105_spill] sm:$0xff]  ;;  %v17957_v37 = vld [vmem:[#allocation106_spill] sm:$0xff] }
 0x6a1   :  { %v16534_v26 = vadd.f32 %v17955_v55, %v16282_v46  ;;  %v16538_v41 = vadd.f32 %v17956_v61, %v16286_v51  ;;  %v16542_v48 = vadd.f32 %v17957_v37, %v16290_v40  ;;  %v17958_v19 = vld [vmem:[#allocation107_spill] sm:$0xff]  ;;  %v17959_v4 = vld [vmem:[#allocation108_spill] sm:$0xff]  ;;  %v17960_v14 = vld [vmem:[#allocation109_spill] sm:$0xff] }
 0x6a2   :  { %v16546_v47 = vadd.f32 %v17958_v19, %v16294_v54  ;;  %v16550_v23 = vadd.f32 %v17959_v4, %v16298_v35  ;;  %v16554_v46 = vadd.f32 %v17960_v14, %v16302_v63  ;;  %v17961_v55 = vld [vmem:[#allocation110_spill] sm:$0xff]  ;;  %v17962_v61 = vld [vmem:[#allocation111_spill] sm:$0xff]  ;;  %v17963_v37 = vld [vmem:[#allocation112_spill] sm:$0xff] }
 0x6a3   :  { %v16558_v51 = vadd.f32 %v17961_v55, %v16306_v50  ;;  %v16562_v40 = vadd.f32 %v17962_v61, %v16310_v53  ;;  %v16566_v54 = vadd.f32 %v17963_v37, %v16314_v24  ;;  %v17964_v19 = vld [vmem:[#allocation113_spill] sm:$0xff]  ;;  %v17965_v4 = vld [vmem:[#allocation114_spill] sm:$0xff]  ;;  %v17966_v14 = vld [vmem:[#allocation115_spill] sm:$0xff] }
 0x6a4   :  { %v16570_v35 = vadd.f32 %v17964_v19, %v16318_v20  ;;  %v16574_v63 = vadd.f32 %v17965_v4, %v16322_v11  ;;  %v16578_v50 = vadd.f32 %v17966_v14, %v16326_v33  ;;  %v17967_v55 = vld [vmem:[#allocation27_spill] sm:$0xff]  ;;  %v17969_v37 = vld [vmem:[#allocation29_spill] sm:$0xff]  ;;  %v17972_v14 = vld [vmem:[#allocation34_spill] sm:$0xff] }
 0x6a5   :  { %v16582_v53 = vadd.f32 %v17967_v55, %v16330_v31  ;;  %v17968_v61 = vld [vmem:[#allocation7_spill] sm:$0xff]  ;;  %v16590_v20 = vadd.f32 %v17969_v37, %v16338_v21  ;;  %v17970_v19 = vld [vmem:[#allocation9_spill] sm:$0xff]  ;;  %v16602_v31 = vadd.f32 %v17972_v14, %v16350_v38  ;;  %v17977_v37 = vld [vmem:[#allocation12_spill] sm:$0xff] }
 0x6a6   :  { %v16586_v24 = vadd.f32 %v17968_v61, %v16334_v1  ;;  %v16594_v11 = vadd.f32 %v17970_v19, %v16342_v57  ;;  %v17971_v4 = vld [vmem:[#allocation13_spill] sm:$0xff]  ;;  %v17975_v61 = vld [vmem:[#allocation31_spill] sm:$0xff]  ;;  %v16614_v57 = vadd.f32 %v17977_v37, %v16362_v16  ;;  %v17987_v37 = vld [vmem:[#allocation28_spill] sm:$0xff] }
 0x6a7   :  { %v16598_v33 = vadd.f32 %v17971_v4, %v16346_v9  ;;  %v17973_v55 = vld [vmem:[#allocation17_spill] sm:$0xff]  ;;  %v16610_v21 = vadd.f32 %v17975_v61, %v16358_v0  ;;  %v17981_v4 = vld [vmem:[#allocation16_spill] sm:$0xff]  ;;  %v17985_v61 = vld [vmem:[#allocation23_spill] sm:$0xff] }
 0x6a8   :  { %v16606_v1 = vadd.f32 %v17973_v55, %v16354_v2  ;;  %17978 = vst [vmem:[#allocation18_spill] sm:$0xff] %v16614_v57  ;;  %v17979_v19 = vld [vmem:[#allocation33_spill] sm:$0xff]  ;;  %v16622_v38 = vadd.f32 %v17981_v4, %v16370_v10  ;;  %v17983_v55 = vld [vmem:[#allocation32_spill] sm:$0xff] }
 0x6a9   :  { %17976 = vst [vmem:[#allocation62_spill] sm:$0xff] %v16610_v21  ;;  %v16618_v9 = vadd.f32 %v17979_v19, %v16366_v32  ;;  %v17982_v14 = vld [vmem:[#allocation77_spill] sm:$0xff]  ;;  %v17988_v57 = vld [vmem:[#allocation48_spill] sm:$0xff]  ;;  %v17990_v19 = vld [vmem:[#allocation11_spill] sm:$0xff] }
 0x6aa   :  { %17974 = vst [vmem:[#allocation61_spill] sm:$0xff] %v16606_v1  ;;  %v16626_v2 = vadd.f32 %v17982_v14, %v16374_v28  ;;  %v17984_v1 = vld [vmem:[#allocation35_spill] sm:$0xff]  ;;  %v17986_v21 = vld [vmem:[#allocation73_spill] sm:$0xff]  ;;  %v16638_v32 = vadd.f32 %v17988_v57, %v17987_v37  ;;  %v17993_v14 = vld [vmem:[#allocation40_spill] sm:$0xff] }
 0x6ab   :  { %17980 = vst [vmem:[#allocation36_spill] sm:$0xff] %v16618_v9  ;;  %v16630_v0 = vadd.f32 %v17984_v1, %v17983_v55  ;;  %v16634_v16 = vadd.f32 %v17986_v21, %v17985_v61  ;;  %v17991_v9 = vld [vmem:[#allocation78_spill] sm:$0xff]  ;;  %v17992_v4 = vld [vmem:[#allocation65_spill] sm:$0xff]  ;;  %v16650_v1 = vadd.f32 %v17993_v14, %v16398_v25  ;;  %v17995_v61 = vld [vmem:[#allocation51_spill] sm:$0xff] }
 0x6ac   :  { %17989 = vst [vmem:[#allocation37_spill] sm:$0xff] %v16638_v32  ;;  %v16642_v10 = vadd.f32 %v17991_v9, %v17990_v19  ;;  %v16646_v28 = vadd.f32 %v17992_v4, %v16394_v34  ;;  %v17994_v55 = vld [vmem:[#allocation42_spill] sm:$0xff]  ;;  %v16658_v57 = vadd.f32 %v17995_v61, %v16406_v13  ;;  %v17996_v37 = vld [vmem:[#allocation69_spill] sm:$0xff]  ;;  %v17997_v32 = vld [vmem:[#allocation47_spill] sm:$0xff] }
 0x6ad   :  { %v16654_v21 = vadd.f32 %v17994_v55, %v16402_v49  ;;  %v16662_v9 = vadd.f32 %v17997_v32, %v17996_v37  ;;  %v17999_v19 = vld [vmem:[#allocation44_spill] sm:$0xff]  ;;  %v18001_v4 = vld [vmem:[#allocation46_spill] sm:$0xff] }
 0x6ae   :  { %v16666_v34 = vadd.f32 %v17999_v19, %v16414_v39  ;;  %v16670_v25 = vadd.f32 %v18001_v4, %v16418_v8  ;;  %v18003_v14 = vld [vmem:[#allocation60_spill] sm:$0xff]  ;;  %v18005_v55 = vld [vmem:[#allocation74_spill] sm:$0xff] }
 0x6af   :  { %17998 = vst [vmem:[#allocation57_spill] sm:$0xff] %v16662_v9  ;;  %v16674_v49 = vadd.f32 %v18003_v14, %v16422_v44  ;;  %v16678_v13 = vadd.f32 %v18005_v55, %v16426_v58  ;;  %v18007_v61 = vld [vmem:[#allocation80_spill] sm:$0xff]  ;;  %v18008_v37 = vld [vmem:[#allocation6_spill] sm:$0xff] }
 0x6b0   :  { %18000 = vst [vmem:[#allocation81_spill] sm:$0xff] %v16666_v34  ;;  %18002 = vst [vmem:[#allocation71_spill] sm:$0xff] %v16670_v25  ;;  %v16682_v32 = vadd.f32 %v18007_v61, %v16430_v15  ;;  %v18009_v9 = vld [vmem:[#allocation50_spill] sm:$0xff]  ;;  %v18011_v34 = vld [vmem:[#allocation52_spill] sm:$0xff] }
 0x6b1   :  { %18004 = vst [vmem:[#allocation56_spill] sm:$0xff] %v16674_v49  ;;  %18006 = vst [vmem:[#allocation96_spill] sm:$0xff] %v16678_v13  ;;  %v16686_v39 = vadd.f32 %v18009_v9, %v18008_v37  ;;  %v18010_v19 = vld [vmem:[#allocation70_spill] sm:$0xff]  ;;  %v18013_v25 = vld [vmem:[#allocation59_spill] sm:$0xff]  ;;  %v7265_v37 = vmax.f32 %v16458_v36, 0.0  ;;  %v7275_v36 = vmax.f32 %v16498_v27, 0.0 }
 0x6b2   :  { %v16690_v8 = vadd.f32 %v18011_v34, %v18010_v19  ;;  %v18012_v4 = vld [vmem:[#allocation38_spill] sm:$0xff]  ;;  %v18015_v49 = vld [vmem:[#allocation45_spill] sm:$0xff]  ;;  %v18016_v55 = vld [vmem:[#allocation64_spill] sm:$0xff]  ;;  %v7266_v34 = vmax.f32 %v16462_v30, 0.0  ;;  %v7267_v19 = vmax.f32 %v16466_v6, 0.0  ;;  %v7276_v30 = vmax.f32 %v16502_v43, 0.0 }
 0x6b3   :  { %v16694_v44 = vadd.f32 %v18013_v25, %v18012_v4  ;;  %v18014_v14 = vld [vmem:[#allocation58_spill] sm:$0xff]  ;;  %v18017_v13 = vld [vmem:[#allocation79_spill] sm:$0xff]  ;;  %v7268_v25 = vmax.f32 %v16470_v45, 0.0  ;;  %v7269_v4 = vmax.f32 %v16474_v59, 0.0  ;;  %7329 = vst [vmem:[#allocation3] sm:$0xff] %v7265_v37  ;;  %v7277_v6 = vmax.f32 %v16506_v17, 0.0 }
 0x6b4   :  { %v16698_v58 = vadd.f32 %v18015_v49, %v18014_v14  ;;  %v16702_v15 = vadd.f32 %v18017_v13, %v18016_v55  ;;  %v18018_v61 = vld [vmem:[#allocation43_spill] sm:$0xff]  ;;  %v7270_v49 = vmax.f32 %v16478_v3, 0.0  ;;  %v7271_v14 = vmax.f32 %v16482_v29, 0.0  ;;  %7330 = vst [vmem:[#allocation3 + $0x8] sm:$0xff] %v7266_v34  ;;  %7331 = vst [vmem:[#allocation3 + $0x10] sm:$0xff] %v7267_v19  ;;  %v18023_v34 = vld [vmem:[#allocation37_spill] sm:$0xff] }
 0x6b5   :  { %v16706_v9 = vadd.f32 %v18018_v61, %v16454_v7  ;;  %v7272_v13 = vmax.f32 %v16486_v22, 0.0  ;;  %v7273_v55 = vmax.f32 %v16490_v18, 0.0  ;;  %v7274_v7 = vmax.f32 %v16494_v12, 0.0  ;;  %7332 = vst [vmem:[#allocation3 + $0x18] sm:$0xff] %v7268_v25  ;;  %7333 = vst [vmem:[#allocation3 + $0x20] sm:$0xff] %v7269_v4 }
 0x6b6   :  { %v7278_v45 = vmax.f32 %v16510_v60, 0.0  ;;  %v7279_v59 = vmax.f32 %v16514_v52, 0.0  ;;  %7334 = vst [vmem:[#allocation3 + $0x28] sm:$0xff] %v7270_v49  ;;  %7335 = vst [vmem:[#allocation3 + $0x30] sm:$0xff] %v7271_v14  ;;  %v7280_v3 = vmax.f32 %v16518_v5, 0.0  ;;  %v7281_v29 = vmax.f32 %v16522_v42, 0.0 }
 0x6b7   :  { %v7282_v22 = vmax.f32 %v16526_v56, 0.0  ;;  %v7283_v18 = vmax.f32 %v16530_v62, 0.0  ;;  %7336 = vst [vmem:[#allocation3 + $0x38] sm:$0xff] %v7272_v13  ;;  %7337 = vst [vmem:[#allocation3 + $0x40] sm:$0xff] %v7273_v55  ;;  %v7284_v12 = vmax.f32 %v16534_v26, 0.0  ;;  %v7285_v27 = vmax.f32 %v16538_v41, 0.0 }
 0x6b8   :  { %7338 = vst [vmem:[#allocation3 + $0x48] sm:$0xff] %v7274_v7  ;;  %7339 = vst [vmem:[#allocation3 + $0x50] sm:$0xff] %v7275_v36  ;;  %v7286_v43 = vmax.f32 %v16542_v48, 0.0  ;;  %v7287_v17 = vmax.f32 %v16546_v47, 0.0  ;;  %v7288_v60 = vmax.f32 %v16550_v23, 0.0  ;;  %v7289_v52 = vmax.f32 %v16554_v46, 0.0 }
 0x6b9   :  { %7340 = vst [vmem:[#allocation3 + $0x58] sm:$0xff] %v7276_v30  ;;  %7341 = vst [vmem:[#allocation3 + $0x60] sm:$0xff] %v7277_v6  ;;  %v7290_v5 = vmax.f32 %v16558_v51, 0.0  ;;  %v7291_v42 = vmax.f32 %v16562_v40, 0.0  ;;  %v7292_v56 = vmax.f32 %v16566_v54, 0.0  ;;  %v7293_v62 = vmax.f32 %v16570_v35, 0.0 }
 0x6ba   :  { %7342 = vst [vmem:[#allocation3 + $0x68] sm:$0xff] %v7278_v45  ;;  %7343 = vst [vmem:[#allocation3 + $0x70] sm:$0xff] %v7279_v59  ;;  %v7294_v26 = vmax.f32 %v16574_v63, 0.0  ;;  %v7295_v41 = vmax.f32 %v16578_v50, 0.0  ;;  %v7296_v48 = vmax.f32 %v16582_v53, 0.0  ;;  %v7297_v47 = vmax.f32 %v16586_v24, 0.0 }
 0x6bb   :  { %7344 = vst [vmem:[#allocation3 + $0x78] sm:$0xff] %v7280_v3  ;;  %7345 = vst [vmem:[#allocation3 + $0x80] sm:$0xff] %v7281_v29  ;;  %v7298_v23 = vmax.f32 %v16590_v20, 0.0  ;;  %v7299_v46 = vmax.f32 %v16594_v11, 0.0  ;;  %v7300_v51 = vmax.f32 %v16598_v33, 0.0  ;;  %v7301_v40 = vmax.f32 %v16602_v31, 0.0 }
 0x6bc   :  { %7346 = vst [vmem:[#allocation3 + $0x88] sm:$0xff] %v7282_v22  ;;  %7347 = vst [vmem:[#allocation3 + $0x90] sm:$0xff] %v7283_v18  ;;  %v18019_v54 = vld [vmem:[#allocation61_spill] sm:$0xff]  ;;  %v18020_v63 = vld [vmem:[#allocation62_spill] sm:$0xff]  ;;  %v7306_v61 = vmax.f32 %v16622_v38, 0.0  ;;  %v7307_v37 = vmax.f32 %v16626_v2, 0.0 }
 0x6bd   :  { %7348 = vst [vmem:[#allocation3 + $0x98] sm:$0xff] %v7284_v12  ;;  %7349 = vst [vmem:[#allocation3 + $0xa0] sm:$0xff] %v7285_v27  ;;  %v7302_v35 = vmax.f32 %v18019_v54, 0.0  ;;  %v7303_v50 = vmax.f32 %v18020_v63, 0.0  ;;  %v18021_v53 = vld [vmem:[#allocation18_spill] sm:$0xff]  ;;  %v18022_v20 = vld [vmem:[#allocation36_spill] sm:$0xff] }
 0x6be   :  { %7350 = vst [vmem:[#allocation3 + $0xa8] sm:$0xff] %v7286_v43  ;;  %7351 = vst [vmem:[#allocation3 + $0xb0] sm:$0xff] %v7287_v17  ;;  %v7304_v24 = vmax.f32 %v18021_v53, 0.0  ;;  %v7305_v11 = vmax.f32 %v18022_v20, 0.0  ;;  %v7308_v33 = vmax.f32 %v16630_v0, 0.0  ;;  %v7309_v31 = vmax.f32 %v16634_v16, 0.0 }
 0x6bf   :  { %7352 = vst [vmem:[#allocation3 + $0xb8] sm:$0xff] %v7288_v60  ;;  %7353 = vst [vmem:[#allocation3 + $0xc0] sm:$0xff] %v7289_v52  ;;  %v7310_v19 = vmax.f32 %v18023_v34, 0.0  ;;  %v7311_v25 = vmax.f32 %v16642_v10, 0.0  ;;  %v7312_v38 = vmax.f32 %v16646_v28, 0.0  ;;  %v7313_v2 = vmax.f32 %v16650_v1, 0.0 }
 0x6c0   :  { %7354 = vst [vmem:[#allocation3 + $0xc8] sm:$0xff] %v7290_v5  ;;  %7355 = vst [vmem:[#allocation3 + $0xd0] sm:$0xff] %v7291_v42  ;;  %v7314_v4 = vmax.f32 %v16654_v21, 0.0  ;;  %v7315_v0 = vmax.f32 %v16658_v57, 0.0  ;;  %v18024_v16 = vld [vmem:[#allocation57_spill] sm:$0xff]  ;;  %v18026_v13 = vld [vmem:[#allocation71_spill] sm:$0xff] }
 0x6c1   :  { %7356 = vst [vmem:[#allocation3 + $0xd8] sm:$0xff] %v7292_v56  ;;  %7357 = vst [vmem:[#allocation3 + $0xe0] sm:$0xff] %v7293_v62  ;;  %v7316_v10 = vmax.f32 %v18024_v16, 0.0  ;;  %v18025_v49 = vld [vmem:[#allocation81_spill] sm:$0xff]  ;;  %v7318_v55 = vmax.f32 %v18026_v13, 0.0  ;;  %v18027_v7 = vld [vmem:[#allocation56_spill] sm:$0xff] }
 0x6c2   :  { %7358 = vst [vmem:[#allocation3 + $0xe8] sm:$0xff] %v7294_v26  ;;  %7359 = vst [vmem:[#allocation3 + $0xf0] sm:$0xff] %v7295_v41  ;;  %v7317_v14 = vmax.f32 %v18025_v49, 0.0  ;;  %v7319_v36 = vmax.f32 %v18027_v7, 0.0  ;;  %v18028_v28 = vld [vmem:[#allocation96_spill] sm:$0xff]  ;;  %v7321_v21 = vmax.f32 %v16682_v32, 0.0 }
 0x6c3   :  { %7360 = vst [vmem:[#allocation3 + $0xf8] sm:$0xff] %v7296_v48  ;;  %7361 = vst [vmem:[#allocation3 + $0x100] sm:$0xff] %v7297_v47  ;;  %v7320_v1 = vmax.f32 %v18028_v28, 0.0  ;;  %v7322_v57 = vmax.f32 %v16686_v39, 0.0  ;;  %v7323_v30 = vmax.f32 %v16690_v8, 0.0  ;;  %v7324_v6 = vmax.f32 %v16694_v44, 0.0 }
 0x6c4   :  { %7362 = vst [vmem:[#allocation3 + $0x108] sm:$0xff] %v7298_v23  ;;  %7363 = vst [vmem:[#allocation3 + $0x110] sm:$0xff] %v7299_v46  ;;  %v7325_v45 = vmax.f32 %v16698_v58, 0.0  ;;  %v7327_v59 = vmax.f32 %v16702_v15, 0.0  ;;  %v7328_v32 = vmax.f32 %v16706_v9, 0.0 }
 0x6c5   :  { %7364 = vst [vmem:[#allocation3 + $0x118] sm:$0xff] %v7300_v51  ;;  %7365 = vst [vmem:[#allocation3 + $0x120] sm:$0xff] %v7301_v40 }
 0x6c6   :  { %7366 = vst [vmem:[#allocation3 + $0x128] sm:$0xff] %v7302_v35  ;;  %7367 = vst [vmem:[#allocation3 + $0x130] sm:$0xff] %v7303_v50 }
 0x6c7   :  { %7368 = vst [vmem:[#allocation3 + $0x138] sm:$0xff] %v7304_v24  ;;  %7369 = vst [vmem:[#allocation3 + $0x140] sm:$0xff] %v7305_v11 }
 0x6c8   :  { %7370 = vst [vmem:[#allocation3 + $0x148] sm:$0xff] %v7306_v61  ;;  %7371 = vst [vmem:[#allocation3 + $0x150] sm:$0xff] %v7307_v37 }
 0x6c9   :  { %7372 = vst [vmem:[#allocation3 + $0x158] sm:$0xff] %v7308_v33  ;;  %7373 = vst [vmem:[#allocation3 + $0x160] sm:$0xff] %v7309_v31 }
 0x6ca   :  { %7374 = vst [vmem:[#allocation3 + $0x168] sm:$0xff] %v7310_v19  ;;  %7375 = vst [vmem:[#allocation3 + $0x170] sm:$0xff] %v7311_v25 }
 0x6cb   :  { %7376 = vst [vmem:[#allocation3 + $0x178] sm:$0xff] %v7312_v38  ;;  %7377 = vst [vmem:[#allocation3 + $0x180] sm:$0xff] %v7313_v2 }
 0x6cc   :  { %7378 = vst [vmem:[#allocation3 + $0x188] sm:$0xff] %v7314_v4  ;;  %7379 = vst [vmem:[#allocation3 + $0x190] sm:$0xff] %v7315_v0 }
 0x6cd   :  { %7380 = vst [vmem:[#allocation3 + $0x198] sm:$0xff] %v7316_v10  ;;  %7381 = vst [vmem:[#allocation3 + $0x1a0] sm:$0xff] %v7317_v14 }
 0x6ce   :  { %7382 = vst [vmem:[#allocation3 + $0x1a8] sm:$0xff] %v7318_v55  ;;  %7383 = vst [vmem:[#allocation3 + $0x1b0] sm:$0xff] %v7319_v36 }
 0x6cf   :  { %7384 = vst [vmem:[#allocation3 + $0x1b8] sm:$0xff] %v7320_v1  ;;  %7385 = vst [vmem:[#allocation3 + $0x1c0] sm:$0xff] %v7321_v21 }
 0x6d0   :  { %7386 = vst [vmem:[#allocation3 + $0x1c8] sm:$0xff] %v7322_v57  ;;  %7387 = vst [vmem:[#allocation3 + $0x1d0] sm:$0xff] %v7323_v30 }
 0x6d1   :  { %7388 = vst [vmem:[#allocation3 + $0x1d8] sm:$0xff] %v7324_v6  ;;  %7389 = vst [vmem:[#allocation3 + $0x1e0] sm:$0xff] %v7325_v45 }
 0x6d2   :  { %7391 = vst [vmem:[#allocation3 + $0x1f0] sm:$0xff] %v7327_v59  ;;  %7392 = vst [vmem:[#allocation3 + $0x1f8] sm:$0xff] %v7328_v32 }
 0x6d3   :  { %9050 = shalt.err (!%p9047_p4)
}
 0x6d4   :  { %s9067_s21 = smov 128   ;;  %s9068_s2 = smov 8  }
 0x6d5   :  { %7404 = dma.vmem_to_hbm [thread:$0]  %s16767_s17, 8192, %s16794_s13, [#allocation4], %s9067_s21, %s9067_s21, %s9068_s2  }
 0x6d6   :  { %9059 = dma.done.wait [#allocation4], 8192  }
 0x6d7   :  { %9060 = vsyncadd [#allocation4], 4294959104 }
 0x6d8   :  { %7408 = vsyncpa [#allocation4], 1 }

</bundles_post_ra>
